<compile_context>
chip_gen: v7x
topology: tpu7x:2x2x1
jax: 0.10.0
libtpu: 0.0.40
codegen_flags: <defaults>
</compile_context>

<pallas_src>
import functools

import jax
import jax.numpy as jnp
from jax.experimental import pallas as pl
from jax.experimental.pallas import tpu as pltpu


# ----------------------------------------------------------------------------
# Pallas kernel: fused matmul + bias + activation (the hot path for the linear
# layer and every convolution after im2col).
# ----------------------------------------------------------------------------
def _matmul_bias_act_kernel(x_ref, w_ref, b_ref, o_ref, *, act):
    acc = jnp.dot(x_ref[...], w_ref[...], preferred_element_type=jnp.float32)
    acc = acc + b_ref[...]                       # (1, N) f32 broadcast over rows
    if act == "leaky_relu":
        acc = jnp.where(acc >= 0.0, acc, 0.2 * acc)
    elif act == "sigmoid":
        acc = 1.0 / (1.0 + jnp.exp(-acc))        # exact; exp runs on the EUP slot
    o_ref[...] = acc.astype(o_ref.dtype)


def matmul_bias_act(x, w, b, act="none", out_dtype=jnp.float32, tm=256):
    """y = act(x @ w + b).

    x: (M, K) activations / im2col patches (cast to bf16 at the boundary)
    w: (K, N) pre-transposed weights (ideally already bf16)
    b: (1, N) f32 bias
    The grid tiles M only ("parallel"); K and N use full-extent blocks (every
    layer's K/N operand fits comfortably in VMEM, so no K accumulator needed).
    """
    M, K = x.shape
    K2, N = w.shape
    assert K == K2, (K, K2)

    x = x.astype(jnp.bfloat16)
    w = w.astype(jnp.bfloat16)
    b = b.astype(jnp.float32).reshape(1, N)

    if M <= tm:
        tm = M                                   # full-extent row block: any M legal
    elif M % 8 != 0:
        # Rare ragged case: make the row block sublane-legal; extra rows dropped below.
        x = jnp.pad(x, ((0, (-M) % 8), (0, 0)))
    Mp = x.shape[0]
    grid_m = pl.cdiv(Mp, tm)

    out = pl.pallas_call(
        functools.partial(_matmul_bias_act_kernel, act=act),
        out_shape=jax.ShapeDtypeStruct((Mp, N), out_dtype),
        grid_spec=pl.GridSpec(
            grid=(grid_m,),
            in_specs=[
                pl.BlockSpec((tm, K), lambda i: (i, 0)),
                pl.BlockSpec((K, N), lambda i: (0, 0)),
                pl.BlockSpec((1, N), lambda i: (0, 0)),
            ],
            out_specs=pl.BlockSpec((tm, N), lambda i: (i, 0)),
        ),
        compiler_params=pltpu.CompilerParams(
            dimension_semantics=("parallel",),
        ),
    )(x, w, b)
    return out[:M] if Mp != M else out


# ----------------------------------------------------------------------------
# Convolution = im2col (cheap XLA data movement) + Pallas fused GEMM.
# TODO(synk): for large batches, fuse im2col into the Pallas kernel (grid over
# batch x output-row tiles) to avoid the k*k-inflated HBM patch matrix.
# ----------------------------------------------------------------------------
def _im2col_nhwc(x, k, stride, pad):
    """(N,H,W,C) -> (N*Ho*Wo, k*k*C) patches ordered (kh, kw, Cin)."""
    N, H, W, C = x.shape
    Ho = (H + 2 * pad - k) // stride + 1
    Wo = (W + 2 * pad - k) // stride + 1
    if pad == 0 and stride == k and Ho == 1 and Wo == 1:
        # Non-overlapping full-window conv (conv4): pure reshape, no inflation.
        return x.reshape(N, k * k * C), Ho, Wo
    xp = jnp.pad(x, ((0, 0), (pad, pad), (pad, pad), (0, 0)))
    cols = []
    for ki in range(k):
        for kj in range(k):
            cols.append(
                jax.lax.slice(
                    xp,
                    (0, ki, kj, 0),
                    (N, ki + (Ho - 1) * stride + 1, kj + (Wo - 1) * stride + 1, C),
                    (1, stride, stride, 1),
                )
            )
    patches = jnp.stack(cols, axis=3)            # (N, Ho, Wo, k*k, C)
    return patches.reshape(N * Ho * Wo, k * k * C), Ho, Wo


def conv2d_nhwc(x_nhwc, w_mat, b, k, stride, pad, act, out_dtype):
    """w_mat: (k*k*Cin, Cout) pre-transposed bf16 weights; b: (1, Cout) f32."""
    N = x_nhwc.shape[0]
    Cout = w_mat.shape[1]
    patches, Ho, Wo = _im2col_nhwc(x_nhwc, k, stride, pad)
    y = matmul_bias_act(patches, w_mat, b, act=act, out_dtype=out_dtype)
    return y.reshape(N, Ho, Wo, Cout)


# ----------------------------------------------------------------------------
# Parameters (deterministic synthetic init; shapes follow the PyTorch module)
# and one-time GEMM-layout preparation (done once, outside the hot path).
# ----------------------------------------------------------------------------
def init_params(key):
    keys = jax.random.split(key, 10)
    scale = 0.05

    def w(k, shape):
        return scale * jax.random.normal(k, shape, dtype=jnp.float32)

    return {
        # nn.Linear(10, 256): stored as (in, out) so y = x @ w + b
        "lin1_w": w(keys[0], (10, 256)),
        "lin1_b": w(keys[1], (256,)),
        # nn.Conv2d weights in PyTorch OIHW layout
        "conv1_w": w(keys[2], (128, 3, 4, 4)),
        "conv1_b": w(keys[3], (128,)),
        "conv2_w": w(keys[4], (256, 129, 4, 4)),
        "conv2_b": w(keys[5], (256,)),
        "conv3_w": w(keys[6], (512, 256, 4, 4)),
        "conv3_b": w(keys[7], (512,)),
        "conv4_w": w(keys[8], (1, 512, 4, 4)),
        "conv4_b": w(keys[9], (1,)),
    }


def prepare_params(params):
    """OIHW -> (kh*kw*Cin, Cout) bf16 GEMM layout, biases -> (1, N) f32."""

    def conv_mat(w_oihw):
        Cout, Cin, kh, kw = w_oihw.shape
        # (kh, kw, Cin, Cout) matches the im2col patch ordering (kh, kw, Cin).
        return (
            jnp.transpose(w_oihw, (2, 3, 1, 0))
            .reshape(kh * kw * Cin, Cout)
            .astype(jnp.bfloat16)
        )

    p = {
        "lin1_w": params["lin1_w"].astype(jnp.bfloat16),
        "lin1_b": params["lin1_b"].reshape(1, -1).astype(jnp.float32),
    }
    for name in ("conv1", "conv2", "conv3", "conv4"):
        p[name + "_w"] = conv_mat(params[name + "_w"])
        p[name + "_b"] = params[name + "_b"].reshape(1, -1).astype(jnp.float32)
    return p


# ----------------------------------------------------------------------------
# Full forward pass (matches ConditionalDCGANDiscriminator.forward).
# ----------------------------------------------------------------------------
def discriminator_forward(p, x_nchw, labels):
    N = x_nchw.shape[0]

    # y = leaky_relu(lin1(one_hot(labels))) -> (N, 16, 16, 1) label plane
    y = jax.nn.one_hot(labels, 10, dtype=jnp.bfloat16)             # (N, 10)
    y = matmul_bias_act(y, p["lin1_w"], p["lin1_b"],
                        act="leaky_relu", out_dtype=jnp.bfloat16)
    y = y.reshape(N, 16, 16, 1)

    # NCHW -> NHWC for the kernel path (bf16 activations throughout)
    x = jnp.transpose(x_nchw, (0, 2, 3, 1)).astype(jnp.bfloat16)   # (N, 32, 32, 3)

    x = conv2d_nhwc(x, p["conv1_w"], p["conv1_b"], 4, 2, 1,
                    "leaky_relu", jnp.bfloat16)                    # (N,16,16,128)
    x = jnp.concatenate([x, y], axis=-1)                           # (N,16,16,129)
    x = conv2d_nhwc(x, p["conv2_w"], p["conv2_b"], 4, 2, 1,
                    "leaky_relu", jnp.bfloat16)                    # (N,8,8,256)
    x = conv2d_nhwc(x, p["conv3_w"], p["conv3_b"], 4, 2, 1,
                    "leaky_relu", jnp.bfloat16)                    # (N,4,4,512)
    x = conv2d_nhwc(x, p["conv4_w"], p["conv4_b"], 4, 4, 0,
                    "sigmoid", jnp.float32)                        # (N,1,1,1)

    # Back to PyTorch NCHW output: (N, 1, 1, 1)
    return jnp.transpose(x, (0, 3, 1, 2))


if __name__ == "__main__":
    key = jax.random.PRNGKey(0)
    k_x, k_l, k_p = jax.random.split(key, 3)

    # Shapes implied by the module: x must be (N, 3, 32, 32) so that after
    # conv1 (s=2) the spatial size matches the 16x16 label plane.
    batch = 2
    x = jax.random.normal(k_x, (batch, 3, 32, 32), dtype=jnp.float32)
    labels = jax.random.randint(k_l, (batch,), 0, 10, dtype=jnp.int32)

    params = prepare_params(init_params(k_p))    # one-time weight prep

    out = jax.jit(discriminator_forward)(params, x, labels)
    out = jax.block_until_ready(out)

    assert out.shape == (batch, 1, 1, 1), out.shape
    assert bool(jnp.all(jnp.isfinite(out)))
    assert bool(jnp.all((out >= 0.0) & (out <= 1.0)))
    print("KERNEL_OK")
</pallas_src>

<mosaic_0001>
module attributes {stable_mosaic.version = 11 : i64} {
  func.func @_matmul_bias_act_kernel(%arg0: i32, %arg1: memref<256x48xbf16, #tpu.memory_space<vmem>>, %arg2: memref<48x128xbf16, #tpu.memory_space<vmem>>, %arg3: memref<1x128xf32, #tpu.memory_space<vmem>>, %arg4: memref<256x128xbf16, #tpu.memory_space<vmem>>) attributes {dimension_semantics = [#tpu.dimension_semantics<parallel>], iteration_bounds = array<i64: 2>, scalar_prefetch = 0 : i64, scratch_operands = 0 : i64, tpu.core_type = #tpu.core_type<tc>, window_params = [{transform_indices = @transform_0, window_bounds = array<i64: 256, 48>}, {pipeline_mode = #tpu.pipeline_mode<synchronous>, transform_indices = @transform_1, window_bounds = array<i64: 48, 128>}, {pipeline_mode = #tpu.pipeline_mode<synchronous>, transform_indices = @transform_2, window_bounds = array<i64: 1, 128>}, {transform_indices = @transform_3, window_bounds = array<i64: 256, 128>}]} {
    %c0 = arith.constant 0 : index
    %c0_0 = arith.constant 0 : index
    %0 = vector.load %arg1[%c0, %c0_0] : memref<256x48xbf16, #tpu.memory_space<vmem>>, vector<256x48xbf16>
    %c0_1 = arith.constant 0 : index
    %c0_2 = arith.constant 0 : index
    %1 = vector.load %arg2[%c0_1, %c0_2] : memref<48x128xbf16, #tpu.memory_space<vmem>>, vector<48x128xbf16>
    %cst = arith.constant dense<0.000000e+00> : vector<256x128xf32>
    %2 = tpu.matmul %0, %1, %cst {dimension_numbers = #tpu.dot_dimension_numbers<[1], [0], [0], [1], [0, 0, 1, 1], [], []>} : vector<256x48xbf16>, vector<48x128xbf16>, vector<256x128xf32> -> vector<256x128xf32>
    %c0_3 = arith.constant 0 : index
    %c0_4 = arith.constant 0 : index
    %3 = vector.load %arg3[%c0_3, %c0_4] : memref<1x128xf32, #tpu.memory_space<vmem>>, vector<1x128xf32>
    %4 = vector.broadcast %3 : vector<1x128xf32> to vector<256x128xf32>
    %5 = arith.addf %2, %4 : vector<256x128xf32>
    %cst_5 = arith.constant 0.000000e+00 : f32
    %6 = vector.broadcast %cst_5 : f32 to vector<256x128xf32>
    %7 = arith.cmpf oge, %5, %6 : vector<256x128xf32>
    %cst_6 = arith.constant 2.000000e-01 : f32
    %8 = vector.broadcast %cst_6 : f32 to vector<256x128xf32>
    %9 = arith.mulf %8, %5 : vector<256x128xf32>
    %10 = arith.select %7, %5, %9 : vector<256x128xi1>, vector<256x128xf32>
    %11 = arith.truncf %10 : vector<256x128xf32> to vector<256x128xbf16>
    %c0_7 = arith.constant 0 : index
    %c0_8 = arith.constant 0 : index
    %12 = vector.load %arg4[%c0_7, %c0_8] : memref<256x128xbf16, #tpu.memory_space<vmem>>, vector<256x128xbf16>
    tpu.vector_store %arg4[%c0_7, %c0_8], %11 {strides = array<i32>} : memref<256x128xbf16, #tpu.memory_space<vmem>>, vector<256x128xbf16>,
    return
  }
  func.func @transform_0(%arg0: i32) -> (i32, i32) {
    %c0_i32 = arith.constant 0 : i32
    %c0_i32_0 = arith.constant 0 : i32
    return %arg0, %c0_i32 : i32, i32
  }
  func.func @transform_1(%arg0: i32) -> (i32, i32) {
    %c0_i32 = arith.constant 0 : i32
    %c0_i32_0 = arith.constant 0 : i32
    %c0_i32_1 = arith.constant 0 : i32
    return %c0_i32, %c0_i32_0 : i32, i32
  }
  func.func @transform_2(%arg0: i32) -> (i32, i32) {
    %c0_i32 = arith.constant 0 : i32
    %c0_i32_0 = arith.constant 0 : i32
    %c0_i32_1 = arith.constant 0 : i32
    return %c0_i32, %c0_i32_0 : i32, i32
  }
  func.func @transform_3(%arg0: i32) -> (i32, i32) {
    %c0_i32 = arith.constant 0 : i32
    %c0_i32_0 = arith.constant 0 : i32
    return %arg0, %c0_i32 : i32, i32
  }
}

module attributes {stable_mosaic.version = 11 : i64} {
  func.func @_matmul_bias_act_kernel(%arg0: i32, %arg1: memref<2x10xbf16, #tpu.memory_space<vmem>>, %arg2: memref<10x256xbf16, #tpu.memory_space<vmem>>, %arg3: memref<1x256xf32, #tpu.memory_space<vmem>>, %arg4: memref<2x256xbf16, #tpu.memory_space<vmem>>) attributes {dimension_semantics = [#tpu.dimension_semantics<parallel>], iteration_bounds = array<i64: 1>, scalar_prefetch = 0 : i64, scratch_operands = 0 : i64, tpu.core_type = #tpu.core_type<tc>, window_params = [{transform_indices = @transform_0, window_bounds = array<i64: 2, 10>}, {pipeline_mode = #tpu.pipeline_mode<synchronous>, transform_indices = @transform_1, window_bounds = array<i64: 10, 256>}, {pipeline_mode = #tpu.pipeline_mode<synchronous>, transform_indices = @transform_2, window_bounds = array<i64: 1, 256>}, {transform_indices = @transform_3, window_bounds = array<i64: 2, 256>}]} {
    %c0 = arith.constant 0 : index
    %c0_0 = arith.constant 0 : index
    %0 = vector.load %arg1[%c0, %c0_0] : memref<2x10xbf16, #tpu.memory_space<vmem>>, vector<2x10xbf16>
    %c0_1 = arith.constant 0 : index
    %c0_2 = arith.constant 0 : index
    %1 = vector.load %arg2[%c0_1, %c0_2] : memref<10x256xbf16, #tpu.memory_space<vmem>>, vector<10x256xbf16>
    %cst = arith.constant dense<0.000000e+00> : vector<2x256xf32>
    %2 = tpu.matmul %0, %1, %cst {dimension_numbers = #tpu.dot_dimension_numbers<[1], [0], [0], [1], [0, 0, 1, 1], [], []>} : vector<2x10xbf16>, vector<10x256xbf16>, vector<2x256xf32> -> vector<2x256xf32>
    %c0_3 = arith.constant 0 : index
    %c0_4 = arith.constant 0 : index
    %3 = vector.load %arg3[%c0_3, %c0_4] : memref<1x256xf32, #tpu.memory_space<vmem>>, vector<1x256xf32>
    %4 = vector.broadcast %3 : vector<1x256xf32> to vector<2x256xf32>
    %5 = arith.addf %2, %4 : vector<2x256xf32>
    %cst_5 = arith.constant 0.000000e+00 : f32
    %6 = vector.broadcast %cst_5 : f32 to vector<2x256xf32>
    %7 = arith.cmpf oge, %5, %6 : vector<2x256xf32>
    %cst_6 = arith.constant 2.000000e-01 : f32
    %8 = vector.broadcast %cst_6 : f32 to vector<2x256xf32>
    %9 = arith.mulf %8, %5 : vector<2x256xf32>
    %10 = arith.select %7, %5, %9 : vector<2x256xi1>, vector<2x256xf32>
    %11 = arith.truncf %10 : vector<2x256xf32> to vector<2x256xbf16>
    %c0_7 = arith.constant 0 : index
    %c0_8 = arith.constant 0 : index
    %12 = vector.load %arg4[%c0_7, %c0_8] : memref<2x256xbf16, #tpu.memory_space<vmem>>, vector<2x256xbf16>
    tpu.vector_store %arg4[%c0_7, %c0_8], %11 {strides = array<i32>} : memref<2x256xbf16, #tpu.memory_space<vmem>>, vector<2x256xbf16>,
    return
  }
  func.func @transform_0(%arg0: i32) -> (i32, i32) {
    %c0_i32 = arith.constant 0 : i32
    %c0_i32_0 = arith.constant 0 : i32
    return %arg0, %c0_i32 : i32, i32
  }
  func.func @transform_1(%arg0: i32) -> (i32, i32) {
    %c0_i32 = arith.constant 0 : i32
    %c0_i32_0 = arith.constant 0 : i32
    %c0_i32_1 = arith.constant 0 : i32
    return %c0_i32, %c0_i32_0 : i32, i32
  }
  func.func @transform_2(%arg0: i32) -> (i32, i32) {
    %c0_i32 = arith.constant 0 : i32
    %c0_i32_0 = arith.constant 0 : i32
    %c0_i32_1 = arith.constant 0 : i32
    return %c0_i32, %c0_i32_0 : i32, i32
  }
  func.func @transform_3(%arg0: i32) -> (i32, i32) {
    %c0_i32 = arith.constant 0 : i32
    %c0_i32_0 = arith.constant 0 : i32
    return %arg0, %c0_i32 : i32, i32
  }
}

module attributes {stable_mosaic.version = 11 : i64} {
  func.func @_matmul_bias_act_kernel(%arg0: i32, %arg1: memref<128x2064xbf16, #tpu.memory_space<vmem>>, %arg2: memref<2064x256xbf16, #tpu.memory_space<vmem>>, %arg3: memref<1x256xf32, #tpu.memory_space<vmem>>, %arg4: memref<128x256xbf16, #tpu.memory_space<vmem>>) attributes {dimension_semantics = [#tpu.dimension_semantics<parallel>], iteration_bounds = array<i64: 1>, scalar_prefetch = 0 : i64, scratch_operands = 0 : i64, tpu.core_type = #tpu.core_type<tc>, window_params = [{transform_indices = @transform_0, window_bounds = array<i64: 128, 2064>}, {pipeline_mode = #tpu.pipeline_mode<synchronous>, transform_indices = @transform_1, window_bounds = array<i64: 2064, 256>}, {pipeline_mode = #tpu.pipeline_mode<synchronous>, transform_indices = @transform_2, window_bounds = array<i64: 1, 256>}, {transform_indices = @transform_3, window_bounds = array<i64: 128, 256>}]} {
    %c0 = arith.constant 0 : index
    %c0_0 = arith.constant 0 : index
    %0 = vector.load %arg1[%c0, %c0_0] : memref<128x2064xbf16, #tpu.memory_space<vmem>>, vector<128x2064xbf16>
    %c0_1 = arith.constant 0 : index
    %c0_2 = arith.constant 0 : index
    %1 = vector.load %arg2[%c0_1, %c0_2] : memref<2064x256xbf16, #tpu.memory_space<vmem>>, vector<2064x256xbf16>
    %cst = arith.constant dense<0.000000e+00> : vector<128x256xf32>
    %2 = tpu.matmul %0, %1, %cst {dimension_numbers = #tpu.dot_dimension_numbers<[1], [0], [0], [1], [0, 0, 1, 1], [], []>} : vector<128x2064xbf16>, vector<2064x256xbf16>, vector<128x256xf32> -> vector<128x256xf32>
    %c0_3 = arith.constant 0 : index
    %c0_4 = arith.constant 0 : index
    %3 = vector.load %arg3[%c0_3, %c0_4] : memref<1x256xf32, #tpu.memory_space<vmem>>, vector<1x256xf32>
    %4 = vector.broadcast %3 : vector<1x256xf32> to vector<128x256xf32>
    %5 = arith.addf %2, %4 : vector<128x256xf32>
    %cst_5 = arith.constant 0.000000e+00 : f32
    %6 = vector.broadcast %cst_5 : f32 to vector<128x256xf32>
    %7 = arith.cmpf oge, %5, %6 : vector<128x256xf32>
    %cst_6 = arith.constant 2.000000e-01 : f32
    %8 = vector.broadcast %cst_6 : f32 to vector<128x256xf32>
    %9 = arith.mulf %8, %5 : vector<128x256xf32>
    %10 = arith.select %7, %5, %9 : vector<128x256xi1>, vector<128x256xf32>
    %11 = arith.truncf %10 : vector<128x256xf32> to vector<128x256xbf16>
    %c0_7 = arith.constant 0 : index
    %c0_8 = arith.constant 0 : index
    %12 = vector.load %arg4[%c0_7, %c0_8] : memref<128x256xbf16, #tpu.memory_space<vmem>>, vector<128x256xbf16>
    tpu.vector_store %arg4[%c0_7, %c0_8], %11 {strides = array<i32>} : memref<128x256xbf16, #tpu.memory_space<vmem>>, vector<128x256xbf16>,
    return
  }
  func.func @transform_0(%arg0: i32) -> (i32, i32) {
    %c0_i32 = arith.constant 0 : i32
    %c0_i32_0 = arith.constant 0 : i32
    return %arg0, %c0_i32 : i32, i32
  }
  func.func @transform_1(%arg0: i32) -> (i32, i32) {
    %c0_i32 = arith.constant 0 : i32
    %c0_i32_0 = arith.constant 0 : i32
    %c0_i32_1 = arith.constant 0 : i32
    return %c0_i32, %c0_i32_0 : i32, i32
  }
  func.func @transform_2(%arg0: i32) -> (i32, i32) {
    %c0_i32 = arith.constant 0 : i32
    %c0_i32_0 = arith.constant 0 : i32
    %c0_i32_1 = arith.constant 0 : i32
    return %c0_i32, %c0_i32_0 : i32, i32
  }
  func.func @transform_3(%arg0: i32) -> (i32, i32) {
    %c0_i32 = arith.constant 0 : i32
    %c0_i32_0 = arith.constant 0 : i32
    return %arg0, %c0_i32 : i32, i32
  }
}

module attributes {stable_mosaic.version = 11 : i64} {
  func.func @_matmul_bias_act_kernel(%arg0: i32, %arg1: memref<32x4096xbf16, #tpu.memory_space<vmem>>, %arg2: memref<4096x512xbf16, #tpu.memory_space<vmem>>, %arg3: memref<1x512xf32, #tpu.memory_space<vmem>>, %arg4: memref<32x512xbf16, #tpu.memory_space<vmem>>) attributes {dimension_semantics = [#tpu.dimension_semantics<parallel>], iteration_bounds = array<i64: 1>, scalar_prefetch = 0 : i64, scratch_operands = 0 : i64, tpu.core_type = #tpu.core_type<tc>, window_params = [{transform_indices = @transform_0, window_bounds = array<i64: 32, 4096>}, {pipeline_mode = #tpu.pipeline_mode<synchronous>, transform_indices = @transform_1, window_bounds = array<i64: 4096, 512>}, {pipeline_mode = #tpu.pipeline_mode<synchronous>, transform_indices = @transform_2, window_bounds = array<i64: 1, 512>}, {transform_indices = @transform_3, window_bounds = array<i64: 32, 512>}]} {
    %c0 = arith.constant 0 : index
    %c0_0 = arith.constant 0 : index
    %0 = vector.load %arg1[%c0, %c0_0] : memref<32x4096xbf16, #tpu.memory_space<vmem>>, vector<32x4096xbf16>
    %c0_1 = arith.constant 0 : index
    %c0_2 = arith.constant 0 : index
    %1 = vector.load %arg2[%c0_1, %c0_2] : memref<4096x512xbf16, #tpu.memory_space<vmem>>, vector<4096x512xbf16>
    %cst = arith.constant dense<0.000000e+00> : vector<32x512xf32>
    %2 = tpu.matmul %0, %1, %cst {dimension_numbers = #tpu.dot_dimension_numbers<[1], [0], [0], [1], [0, 0, 1, 1], [], []>} : vector<32x4096xbf16>, vector<4096x512xbf16>, vector<32x512xf32> -> vector<32x512xf32>
    %c0_3 = arith.constant 0 : index
    %c0_4 = arith.constant 0 : index
    %3 = vector.load %arg3[%c0_3, %c0_4] : memref<1x512xf32, #tpu.memory_space<vmem>>, vector<1x512xf32>
    %4 = vector.broadcast %3 : vector<1x512xf32> to vector<32x512xf32>
    %5 = arith.addf %2, %4 : vector<32x512xf32>
    %cst_5 = arith.constant 0.000000e+00 : f32
    %6 = vector.broadcast %cst_5 : f32 to vector<32x512xf32>
    %7 = arith.cmpf oge, %5, %6 : vector<32x512xf32>
    %cst_6 = arith.constant 2.000000e-01 : f32
    %8 = vector.broadcast %cst_6 : f32 to vector<32x512xf32>
    %9 = arith.mulf %8, %5 : vector<32x512xf32>
    %10 = arith.select %7, %5, %9 : vector<32x512xi1>, vector<32x512xf32>
    %11 = arith.truncf %10 : vector<32x512xf32> to vector<32x512xbf16>
    %c0_7 = arith.constant 0 : index
    %c0_8 = arith.constant 0 : index
    %12 = vector.load %arg4[%c0_7, %c0_8] : memref<32x512xbf16, #tpu.memory_space<vmem>>, vector<32x512xbf16>
    tpu.vector_store %arg4[%c0_7, %c0_8], %11 {strides = array<i32>} : memref<32x512xbf16, #tpu.memory_space<vmem>>, vector<32x512xbf16>,
    return
  }
  func.func @transform_0(%arg0: i32) -> (i32, i32) {
    %c0_i32 = arith.constant 0 : i32
    %c0_i32_0 = arith.constant 0 : i32
    return %arg0, %c0_i32 : i32, i32
  }
  func.func @transform_1(%arg0: i32) -> (i32, i32) {
    %c0_i32 = arith.constant 0 : i32
    %c0_i32_0 = arith.constant 0 : i32
    %c0_i32_1 = arith.constant 0 : i32
    return %c0_i32, %c0_i32_0 : i32, i32
  }
  func.func @transform_2(%arg0: i32) -> (i32, i32) {
    %c0_i32 = arith.constant 0 : i32
    %c0_i32_0 = arith.constant 0 : i32
    %c0_i32_1 = arith.constant 0 : i32
    return %c0_i32, %c0_i32_0 : i32, i32
  }
  func.func @transform_3(%arg0: i32) -> (i32, i32) {
    %c0_i32 = arith.constant 0 : i32
    %c0_i32_0 = arith.constant 0 : i32
    return %arg0, %c0_i32 : i32, i32
  }
}

module attributes {stable_mosaic.version = 11 : i64} {
  func.func @_matmul_bias_act_kernel(%arg0: i32, %arg1: memref<2x8192xbf16, #tpu.memory_space<vmem>>, %arg2: memref<8192x1xbf16, #tpu.memory_space<vmem>>, %arg3: memref<1x1xf32, #tpu.memory_space<vmem>>, %arg4: memref<2x1xf32, #tpu.memory_space<vmem>>) attributes {dimension_semantics = [#tpu.dimension_semantics<parallel>], iteration_bounds = array<i64: 1>, scalar_prefetch = 0 : i64, scratch_operands = 0 : i64, tpu.core_type = #tpu.core_type<tc>, window_params = [{transform_indices = @transform_0, window_bounds = array<i64: 2, 8192>}, {pipeline_mode = #tpu.pipeline_mode<synchronous>, transform_indices = @transform_1, window_bounds = array<i64: 8192, 1>}, {pipeline_mode = #tpu.pipeline_mode<synchronous>, transform_indices = @transform_2, window_bounds = array<i64: 1, 1>}, {transform_indices = @transform_3, window_bounds = array<i64: 2, 1>}]} {
    %c0 = arith.constant 0 : index
    %c0_0 = arith.constant 0 : index
    %0 = vector.load %arg1[%c0, %c0_0] : memref<2x8192xbf16, #tpu.memory_space<vmem>>, vector<2x8192xbf16>
    %c0_1 = arith.constant 0 : index
    %c0_2 = arith.constant 0 : index
    %1 = vector.load %arg2[%c0_1, %c0_2] : memref<8192x1xbf16, #tpu.memory_space<vmem>>, vector<8192x1xbf16>
    %cst = arith.constant dense<0.000000e+00> : vector<2x1xf32>
    %2 = tpu.matmul %0, %1, %cst {dimension_numbers = #tpu.dot_dimension_numbers<[1], [0], [0], [1], [0, 0, 1, 1], [], []>} : vector<2x8192xbf16>, vector<8192x1xbf16>, vector<2x1xf32> -> vector<2x1xf32>
    %c0_3 = arith.constant 0 : index
    %c0_4 = arith.constant 0 : index
    %3 = vector.load %arg3[%c0_3, %c0_4] : memref<1x1xf32, #tpu.memory_space<vmem>>, vector<1x1xf32>
    %4 = vector.broadcast %3 : vector<1x1xf32> to vector<2x1xf32>
    %5 = arith.addf %2, %4 : vector<2x1xf32>
    %cst_5 = arith.constant 0.000000e+00 : f32
    %6 = vector.broadcast %cst_5 : f32 to vector<2x1xf32>
    %7 = arith.subf %6, %5 : vector<2x1xf32>
    %8 = math.exp %7 : vector<2x1xf32>
    %cst_6 = arith.constant 1.000000e+00 : f32
    %9 = vector.broadcast %cst_6 : f32 to vector<2x1xf32>
    %10 = arith.addf %9, %8 : vector<2x1xf32>
    %cst_7 = arith.constant 1.000000e+00 : f32
    %11 = vector.broadcast %cst_7 : f32 to vector<2x1xf32>
    %12 = arith.divf %11, %10 : vector<2x1xf32>
    %c0_8 = arith.constant 0 : index
    %c0_9 = arith.constant 0 : index
    %13 = vector.load %arg4[%c0_8, %c0_9] : memref<2x1xf32, #tpu.memory_space<vmem>>, vector<2x1xf32>
    tpu.vector_store %arg4[%c0_8, %c0_9], %12 {strides = array<i32>} : memref<2x1xf32, #tpu.memory_space<vmem>>, vector<2x1xf32>,
    return
  }
  func.func @transform_0(%arg0: i32) -> (i32, i32) {
    %c0_i32 = arith.constant 0 : i32
    %c0_i32_0 = arith.constant 0 : i32
    return %arg0, %c0_i32 : i32, i32
  }
  func.func @transform_1(%arg0: i32) -> (i32, i32) {
    %c0_i32 = arith.constant 0 : i32
    %c0_i32_0 = arith.constant 0 : i32
    %c0_i32_1 = arith.constant 0 : i32
    return %c0_i32, %c0_i32_0 : i32, i32
  }
  func.func @transform_2(%arg0: i32) -> (i32, i32) {
    %c0_i32 = arith.constant 0 : i32
    %c0_i32_0 = arith.constant 0 : i32
    %c0_i32_1 = arith.constant 0 : i32
    return %c0_i32, %c0_i32_0 : i32, i32
  }
  func.func @transform_3(%arg0: i32) -> (i32, i32) {
    %c0_i32 = arith.constant 0 : i32
    %c0_i32_0 = arith.constant 0 : i32
    return %arg0, %c0_i32 : i32, i32
  }
}

</mosaic_0001>

<bundles_post_ra>
// kernel: discriminator_forward.5
= control target key start
LH: loop header
LB: loop body
LE: loop exit
PB: predicated region body
PF: predicated region fallthrough
CT: control target
= control target key end

     0   :  { %vm42_vm0 = vcmask 1044480   ;;  %v132_v1 = vmov 0   ;;  %vm38_vm1 = vcmask 80896   ;;  %v20_v5 = vlaneseq  ;;  %s169_s1 = inlined_call_operand.vmem [shape: bf16[10,256], index: 1, kind: input, shape index: {}]   ;;  %s170_s0 = inlined_call_operand.vmem [shape: bf16[2,10], index: 0, kind: input, shape index: {}]   ;;  %s171_s2 = inlined_call_operand.vmem [shape: f32[1,256], index: 2, kind: input, shape index: {}]   ;;  %s172_s3 = inlined_call_operand.vmem [shape: bf16[2,256], index: 3, kind: output, shape index: {}]  }
   0x1   :  { %v129_v0 = vld [vmem:[%s169_s1 + $0x4] ss:$8 sps:$4 sm:$0x1f]   ;;  %81 = vmatprep.mubr.bf16.mxu0 %v132_v1  ;;  %v131_v2 = vld [vmem:[%s169_s1] ss:$8 sps:$4 sm:$0x1f]  }
   0x2   :  { %123 = vmatprep.subr.msk.bf16.mxu0 %vm42_vm0, %v129_v0  ;;  %v44_v3 = vsel %vm42_vm0, %v131_v2, 0  ;;  %v15_v4 = vld [vmem:[%s170_s0] sm:$0x1]  ;;  %v21_v6 = vshrl.u32 %v20_v5, 7  ;;  %v133_v11 = vmov 1966171168  }
   0x3   :  { %50 = vmatpush1.bf16.msra.mxu0 %v44_v3  ;;  %v18_v8 = vld [vmem:[%s171_s2] sm:$0x3]  ;;  %v102_v12 = vunpack.c.l.s4 %v133_v11 }
   0x4   :  { %v22_v7 = vsub.s32 0, %v21_v6  ;;  %v26_v9 = vsub.s32 1, %v21_v6 }
   0x5   :  { %v103_v17 = vunpack.c.0.s8 %v102_v12 }
   0x6   :  { %124 = vmatmul.mubr.msk.bf16.vlgmr.msra.gmra.mrb[0].mxu0 %vm38_vm1, %v15_v4  ;;  %v23_v10 = vrot.slane %v18_v8, %v22_v7  ;;  %v27_v13 = vrot.slane %v18_v8, %v26_v9 }
   0x7   :  { %v106_v24 = vsub.s32 %v103_v17, %v21_v6 }
  0xd9   :  { %v83_v14 = vpop.f32.mrb[0].mxu0 }
  0xda   :  { %v84_v15 = vadd.f32 %v83_v14, %v23_v10  ;;  %v85_v16 = vpop.f32.mrb[1].mxu0 }
  0xdb   :  { %v86_v18 = vadd.f32 %v85_v16, %v27_v13  ;;  %v87_v19 = vpop.f32.mrb[2].mxu0 }
  0xdc   :  { %vm90_vm2 = vcmp.ge.f32.partialorder %v84_v15, 0.0  ;;  %v92_v20 = vmul.f32 0.2, %v84_v15  ;;  %v88_v21 = vpop.f32.mrb[3].mxu0 }
  0xdd   :  { %vm91_vm3 = vcmp.ge.f32.partialorder %v86_v18, 0.0  ;;  %v93_v22 = vmul.f32 0.2, %v86_v18 }
  0xde   :  { %v94_v23 = vsel %vm90_vm2, %v84_v15, %v92_v20 }
  0xdf   :  { %v95_v25 = vsel %vm91_vm3, %v86_v18, %v93_v22 }
  0xe0   :  { %v125_v26 = vpack.c.bf16 %v95_v25, %v94_v23 }
  0xe2   :  { %v107_v27 = vrot.slane %v125_v26, %v106_v24 }
  0xe4   :  { %126 = vst.sshfl [vmem:[%s172_s3] sm:$0x5 pattern:$0x73625140] %v107_v27 }

// kernel: discriminator_forward.6
= control target key start
LH: loop header
LB: loop body
LE: loop exit
PB: predicated region body
PF: predicated region fallthrough
CT: control target
= control target key end

     0   :  { %s1164_s12 = smov 0   ;;  %s1292_s0 = inlined_call_operand.vmem [shape: bf16[512,48], index: 0, kind: input, shape index: {}]   ;;  %s1293_s1 = inlined_call_operand.vmem [shape: bf16[48,128], index: 1, kind: input, shape index: {}]   ;;  %s1294_s2 = inlined_call_operand.vmem [shape: f32[1,128], index: 2, kind: input, shape index: {}]   ;;  %s1295_s3 = inlined_call_operand.vmem [shape: bf16[512,128], index: 3, kind: output, shape index: {}]  }
   0x1 LB: > { %s840_s13 = sadd.s32 4294967295, %s1142_s12   ;;  %p844_p0 = scmp.ge.s32.totalorder %s1142_s12, 1  ;;  %s1142_s12 = sphi %s1164_s12, %s13_s12  }
   0x2   : > { %p138_p1 = scmp.lt.s32.totalorder %s1142_s12, 3 }
   0x4   : > { %p139_p2 = pnand %p844_p0, %p138_p1 }
   0x5   : > { %v1117_v0 = vld [vmem:[%s1293_s1] sm:$0xff] (!%p139_p2)   ;;  %s845_s16 = sshll.u32 (!%p139_p2), %s840_s13, 5  ;;  %v1118_v1 = vld [vmem:[%s1293_s1 + $0x8] sm:$0xff] (!%p139_p2)   ;;  %v1119_v2 = vld [vmem:[%s1293_s1 + $0x10] sm:$0xff] (!%p139_p2)   ;;  %vm318_vm0 = vcmask (!%p139_p2), 392192  }
   0x6   : > { %142 = sbr.rel (%p139_p2) target bundleno = 273 (0x111), region = 32  ;;  %p163_p3 = scmp.lt.s32.totalorder (!%p139_p2), %s845_s16, 63  ;;  %1065 = vmatprep.subr.bf16.mxu0 (!%p139_p2), %v1117_v0  ;;  %1103 = vmatprep.subr.bf16.mxu1 (!%p139_p2), %v1117_v0  ;;  %v1226_v19 = vld [vmem:[%s1294_s2] ss:$0 sm:$0xff] (!%p139_p2) }
   0x7   : > { %1066 = vmatpush3.bf16.msra.mxu0 (!%p139_p2), %v1117_v0  ;;  %1106 = vmatpush3.bf16.msra.mxu1 (!%p139_p2), %v1117_v0 }
   0x8   : > { %1067 = vmatprep.subr.bf16.mxu0 (!%p139_p2), %v1118_v1  ;;  %1104 = vmatprep.subr.bf16.mxu1 (!%p139_p2), %v1118_v1 }
   0xb   : > { %1068 = vmatpush3.bf16.msra.mxu0 (!%p139_p2), %v1118_v1  ;;  %1107 = vmatpush3.bf16.msra.mxu1 (!%p139_p2), %v1118_v1 }
   0xc   : > { %1069 = vmatprep.subr.bf16.mxu0 (!%p139_p2), %v1119_v2  ;;  %1105 = vmatprep.subr.bf16.mxu1 (!%p139_p2), %v1119_v2 }
   0xd   : > { %s1297_s16 = smov (!%p163_p3, %s845_s16), 63 }
   0xe   : > { %s846_s21 = sshll.u32 %s1297_s16, 2 }
   0xf   : > { %s1189_s24 = scalar_lea.vmem %s1292_s0, %s846_s21  ;;  %1070 = vmatpush3.bf16.msra.mxu0 %v1119_v2  ;;  %1108 = vmatpush3.bf16.msra.mxu1 %v1119_v2  ;;  %s1243_s29 = scalar_lea.vmem %s1295_s3, %s846_s21 }
  0x10   : > { %v1120_v3 = vld [vmem:[%s1189_s24] sm:$0xff]   ;;  %v1122_v5 = vld [vmem:[%s1189_s24 + $0x8] sm:$0xff]   ;;  %v1124_v7 = vld [vmem:[%s1189_s24 + $0x10] sm:$0xff]  }
  0x11   : > { %v1121_v4 = vld [vmem:[%s1189_s24 + $0x40] sm:$0xff]   ;;  %1071 = vmatprep.mubr.msk.bf16.mxu0 %vm318_vm0, %v1120_v3  ;;  %v1123_v6 = vld [vmem:[%s1189_s24 + $0x48] sm:$0xff]   ;;  %v1125_v8 = vld [vmem:[%s1189_s24 + $0x50] sm:$0xff]  }
  0x12   : > { %1087 = vmatprep.mubr.msk.bf16.mxu1 %vm318_vm0, %v1121_v4  ;;  %1072 = vmatmul.mubr.msk.bf16.vlgmr.msra.gmra.mrb[0].mxu0 %vm318_vm0, %v1122_v5  ;;  %v1126_v9 = vld [vmem:[%s1189_s24 + $0x18] sm:$0xff]   ;;  %v1128_v11 = vld [vmem:[%s1189_s24 + $0x20] sm:$0xff]   ;;  %v1130_v13 = vld [vmem:[%s1189_s24 + $0x28] sm:$0xff]  }
  0x13   : > { %1088 = vmatmul.mubr.msk.bf16.vlgmr.msra.gmra.mrb[0].mxu1 %vm318_vm0, %v1123_v6  ;;  %1075 = vmatprep.mubr.msk.bf16.mxu0 %vm318_vm0, %v1124_v7  ;;  %v1127_v10 = vld [vmem:[%s1189_s24 + $0x58] sm:$0xff]   ;;  %v1129_v12 = vld [vmem:[%s1189_s24 + $0x60] sm:$0xff]   ;;  %v1131_v14 = vld [vmem:[%s1189_s24 + $0x68] sm:$0xff]  }
  0x14   : > { %1091 = vmatprep.mubr.msk.bf16.mxu1 %vm318_vm0, %v1125_v8  ;;  %v1132_v15 = vld [vmem:[%s1189_s24 + $0x30] sm:$0xff]   ;;  %v1134_v17 = vld [vmem:[%s1189_s24 + $0x38] sm:$0xff]  }
  0x15   : > { %v1133_v16 = vld [vmem:[%s1189_s24 + $0x70] sm:$0xff]   ;;  %v1135_v18 = vld [vmem:[%s1189_s24 + $0x78] sm:$0xff]  }
  0x1a   : > { %1076 = vmatmul.mubr.msk.bf16.gmra.mrb[4].mxu0 %vm318_vm0, %v1126_v9 }
  0x1b   : > { %1092 = vmatmul.mubr.msk.bf16.gmra.mrb[4].mxu1 %vm318_vm0, %v1127_v10  ;;  %1079 = vmatprep.mubr.msk.bf16.mxu0 %vm318_vm0, %v1128_v11 }
  0x1c   : > { %1095 = vmatprep.mubr.msk.bf16.mxu1 %vm318_vm0, %v1129_v12 }
  0x22   : > { %1080 = vmatmul.mubr.msk.bf16.gmra.mrb[8].mxu0 %vm318_vm0, %v1130_v13 }
  0x23   : > { %1096 = vmatmul.mubr.msk.bf16.gmra.mrb[8].mxu1 %vm318_vm0, %v1131_v14  ;;  %1083 = vmatprep.mubr.msk.bf16.mxu0 %vm318_vm0, %v1132_v15 }
  0x24   : > { %1099 = vmatprep.mubr.msk.bf16.mxu1 %vm318_vm0, %v1133_v16 }
  0x2a   : > { %1084 = vmatmul.mubr.msk.bf16.gmra.mrb[12].mxu0 %vm318_vm0, %v1134_v17 }
  0x2b   : > { %1100 = vmatmul.mubr.msk.bf16.gmra.mrb[12].mxu1 %vm318_vm0, %v1135_v18 }
  0xe5   : > { %v1073_v20 = vpop.f32.mrb[0].mxu0 }
  0xe6   : > { %v1089_v21 = vpop.f32.mrb[0].mxu1  ;;  %v410_v22 = vadd.f32 %v1073_v20, %v1226_v19  ;;  %v401_v24 = vpop.f32.mrb[1].mxu0 }
  0xe7   : > { %v474_v23 = vadd.f32 %v1089_v21, %v1226_v19  ;;  %v465_v25 = vpop.f32.mrb[1].mxu1  ;;  %v402_v26 = vadd.f32 %v1226_v19, %v401_v24  ;;  %v1074_v28 = vpop.f32.mrb[2].mxu0 }
  0xe8   : > { %v466_v27 = vadd.f32 %v1226_v19, %v465_v25  ;;  %v1090_v29 = vpop.f32.mrb[2].mxu1  ;;  %vm530_vm1 = vcmp.ge.f32.partialorder %v410_v22, 0.0  ;;  %v562_v30 = vmul.f32 0.2, %v410_v22  ;;  %v413_v34 = vadd.f32 %v1074_v28, %v1226_v19  ;;  %v404_v36 = vpop.f32.mrb[3].mxu0 }
  0xe9   : > { %vm546_vm2 = vcmp.ge.f32.partialorder %v474_v23, 0.0  ;;  %v578_v31 = vmul.f32 0.2, %v474_v23  ;;  %vm528_vm3 = vcmp.ge.f32.partialorder %v402_v26, 0.0  ;;  %v560_v32 = vmul.f32 0.2, %v402_v26 }
  0xea   : > { %vm544_vm4 = vcmp.ge.f32.partialorder %v466_v27, 0.0  ;;  %v576_v33 = vmul.f32 0.2, %v466_v27  ;;  %v477_v35 = vadd.f32 %v1090_v29, %v1226_v19  ;;  %v468_v37 = vpop.f32.mrb[3].mxu1  ;;  %v594_v38 = vsel %vm530_vm1, %v410_v22, %v562_v30 }
  0xeb   : > { %v610_v39 = vsel %vm546_vm2, %v474_v23, %v578_v31  ;;  %v405_v40 = vadd.f32 %v1226_v19, %v404_v36  ;;  %v469_v41 = vadd.f32 %v1226_v19, %v468_v37  ;;  %vm531_vm5 = vcmp.ge.f32.partialorder %v413_v34, 0.0 }
  0xec   : > { %v563_v42 = vmul.f32 0.2, %v413_v34  ;;  %vm547_vm6 = vcmp.ge.f32.partialorder %v477_v35, 0.0  ;;  %v579_v43 = vmul.f32 0.2, %v477_v35  ;;  %v592_v46 = vsel %vm528_vm3, %v402_v26, %v560_v32 }
  0xed   : > { %vm529_vm7 = vcmp.ge.f32.partialorder %v405_v40, 0.0  ;;  %v561_v44 = vmul.f32 0.2, %v405_v40  ;;  %vm545_vm8 = vcmp.ge.f32.partialorder %v469_v41, 0.0  ;;  %v577_v45 = vmul.f32 0.2, %v469_v41 }
  0xee   : > { %v608_v47 = vsel %vm544_vm4, %v466_v27, %v576_v33  ;;  %v595_v48 = vsel %vm531_vm5, %v413_v34, %v563_v42  ;;  %v611_v49 = vsel %vm547_vm6, %v477_v35, %v579_v43  ;;  %v1077_v50 = vpop.f32.mrb[4].mxu0  ;;  %v1093_v51 = vpop.f32.mrb[4].mxu1 }
  0xef   : > { %v959_v52 = vpack.c.bf16 %v595_v48, %v594_v38  ;;  %v999_v53 = vpack.c.bf16 %v611_v49, %v610_v39  ;;  %v593_v54 = vsel %vm529_vm7, %v405_v40, %v561_v44  ;;  %v609_v55 = vsel %vm545_vm8, %v469_v41, %v577_v45  ;;  %v417_v56 = vpop.f32.mrb[5].mxu0  ;;  %v481_v57 = vpop.f32.mrb[5].mxu1 }
  0xf0   : > { %v954_v58 = vpack.c.bf16 %v593_v54, %v592_v46  ;;  %v994_v59 = vpack.c.bf16 %v609_v55, %v608_v47  ;;  %v426_v60 = vadd.f32 %v1077_v50, %v1226_v19  ;;  %v490_v61 = vadd.f32 %v1093_v51, %v1226_v19  ;;  %v1078_v62 = vpop.f32.mrb[6].mxu0  ;;  %v1094_v63 = vpop.f32.mrb[6].mxu1 }
  0xf1   : > { %1031 = vst [vmem:[%s1243_s29 + $0x8] sm:$0xff] %v959_v52   ;;  %1039 = vst [vmem:[%s1243_s29 + $0x48] sm:$0xff] %v999_v53   ;;  %v418_v0 = vadd.f32 %v1226_v19, %v417_v56  ;;  %v482_v1 = vadd.f32 %v1226_v19, %v481_v57  ;;  %v429_v2 = vadd.f32 %v1078_v62, %v1226_v19  ;;  %v420_v4 = vpop.f32.mrb[7].mxu0  ;;  %v484_v5 = vpop.f32.mrb[7].mxu1 }
  0xf2   : > { %v493_v3 = vadd.f32 %v1094_v63, %v1226_v19  ;;  %955 = vst [vmem:[%s1243_s29] sm:$0xff] %v954_v58   ;;  %1038 = vst [vmem:[%s1243_s29 + $0x40] sm:$0xff] %v994_v59   ;;  %vm534_vm9 = vcmp.ge.f32.partialorder %v426_v60, 0.0  ;;  %v566_v6 = vmul.f32 0.2, %v426_v60  ;;  %vm550_vm10 = vcmp.ge.f32.partialorder %v490_v61, 0.0 }
  0xf3   : > { %v582_v7 = vmul.f32 0.2, %v490_v61  ;;  %vm532_vm11 = vcmp.ge.f32.partialorder %v418_v0, 0.0  ;;  %v564_v8 = vmul.f32 0.2, %v418_v0  ;;  %vm548_vm12 = vcmp.ge.f32.partialorder %v482_v1, 0.0 }
  0xf4   : > { %v598_v9 = vsel %vm534_vm9, %v426_v60, %v566_v6  ;;  %v580_v10 = vmul.f32 0.2, %v482_v1  ;;  %vm535_vm13 = vcmp.ge.f32.partialorder %v429_v2, 0.0  ;;  %v567_v11 = vmul.f32 0.2, %v429_v2 }
  0xf5   : > { %v614_v12 = vsel %vm550_vm10, %v490_v61, %v582_v7  ;;  %v596_v13 = vsel %vm532_vm11, %v418_v0, %v564_v8  ;;  %vm551_vm14 = vcmp.ge.f32.partialorder %v493_v3, 0.0  ;;  %v583_v14 = vmul.f32 0.2, %v493_v3  ;;  %v1081_v15 = vpop.f32.mrb[8].mxu0 }
  0xf6   : > { %v1097_v16 = vpop.f32.mrb[8].mxu1  ;;  %v599_v17 = vsel %vm535_vm13, %v429_v2, %v567_v11  ;;  %v421_v18 = vadd.f32 %v1226_v19, %v420_v4  ;;  %v485_v20 = vadd.f32 %v1226_v19, %v484_v5  ;;  %v442_v21 = vadd.f32 %v1081_v15, %v1226_v19  ;;  %v433_v22 = vpop.f32.mrb[9].mxu0 }
  0xf7   : > { %v497_v23 = vpop.f32.mrb[9].mxu1  ;;  %v969_v24 = vpack.c.bf16 %v599_v17, %v598_v9  ;;  %v615_v25 = vsel %vm551_vm14, %v493_v3, %v583_v14  ;;  %v506_v26 = vadd.f32 %v1097_v16, %v1226_v19  ;;  %v434_v27 = vadd.f32 %v1226_v19, %v433_v22  ;;  %v1082_v28 = vpop.f32.mrb[10].mxu0 }
  0xf8   : > { %v1098_v29 = vpop.f32.mrb[10].mxu1  ;;  %v1009_v30 = vpack.c.bf16 %v615_v25, %v614_v12  ;;  %vm533_vm15 = vcmp.ge.f32.partialorder %v421_v18, 0.0  ;;  %v565_v31 = vmul.f32 0.2, %v421_v18  ;;  %vm549_vm0 = vcmp.ge.f32.partialorder %v485_v20, 0.0  ;;  %v436_v32 = vpop.f32.mrb[11].mxu0 }
  0xf9   : > { %v500_v33 = vpop.f32.mrb[11].mxu1  ;;  %1033 = vst [vmem:[%s1243_s29 + $0x18] sm:$0xff] %v969_v24   ;;  %v581_v34 = vmul.f32 0.2, %v485_v20  ;;  %vm538_vm1 = vcmp.ge.f32.partialorder %v442_v21, 0.0  ;;  %vm554_vm2 = vcmp.ge.f32.partialorder %v506_v26, 0.0  ;;  %v612_v36 = vsel %vm548_vm12, %v482_v1, %v580_v10 }
  0xfa   : > { %v570_v35 = vmul.f32 0.2, %v442_v21  ;;  %1041 = vst [vmem:[%s1243_s29 + $0x58] sm:$0xff] %v1009_v30   ;;  %v597_v37 = vsel %vm533_vm15, %v421_v18, %v565_v31  ;;  %v586_v38 = vmul.f32 0.2, %v506_v26  ;;  %vm536_vm3 = vcmp.ge.f32.partialorder %v434_v27, 0.0 }
  0xfb   : > { %v964_v39 = vpack.c.bf16 %v597_v37, %v596_v13  ;;  %v613_v40 = vsel %vm549_vm0, %v485_v20, %v581_v34  ;;  %v568_v41 = vmul.f32 0.2, %v434_v27  ;;  %v498_v42 = vadd.f32 %v1226_v19, %v497_v23 }
  0xfc   : > { %v1004_v43 = vpack.c.bf16 %v613_v40, %v612_v36  ;;  %v602_v44 = vsel %vm538_vm1, %v442_v21, %v570_v35  ;;  %v618_v45 = vsel %vm554_vm2, %v506_v26, %v586_v38  ;;  %v445_v46 = vadd.f32 %v1082_v28, %v1226_v19 }
  0xfd   : > { %1032 = vst [vmem:[%s1243_s29 + $0x10] sm:$0xff] %v964_v39   ;;  %vm552_vm4 = vcmp.ge.f32.partialorder %v498_v42, 0.0  ;;  %v584_v47 = vmul.f32 0.2, %v498_v42  ;;  %v509_v48 = vadd.f32 %v1098_v29, %v1226_v19  ;;  %v437_v49 = vadd.f32 %v1226_v19, %v436_v32  ;;  %v1085_v50 = vpop.f32.mrb[12].mxu0 }
  0xfe   : > { %v1101_v51 = vpop.f32.mrb[12].mxu1  ;;  %1040 = vst [vmem:[%s1243_s29 + $0x50] sm:$0xff] %v1004_v43   ;;  %vm539_vm5 = vcmp.ge.f32.partialorder %v445_v46, 0.0  ;;  %v571_v52 = vmul.f32 0.2, %v445_v46  ;;  %v501_v53 = vadd.f32 %v1226_v19, %v500_v33  ;;  %v458_v54 = vadd.f32 %v1085_v50, %v1226_v19  ;;  %v449_v55 = vpop.f32.mrb[13].mxu0 }
  0xff   : > { %v513_v56 = vpop.f32.mrb[13].mxu1  ;;  %v600_v57 = vsel %vm536_vm3, %v434_v27, %v568_v41  ;;  %vm555_vm6 = vcmp.ge.f32.partialorder %v509_v48, 0.0  ;;  %v587_v58 = vmul.f32 0.2, %v509_v48  ;;  %vm537_vm7 = vcmp.ge.f32.partialorder %v437_v49, 0.0  ;;  %v1086_v59 = vpop.f32.mrb[14].mxu0 }
 0x100   : > { %v1102_v60 = vpop.f32.mrb[14].mxu1  ;;  %v603_v61 = vsel %vm539_vm5, %v445_v46, %v571_v52  ;;  %v569_v62 = vmul.f32 0.2, %v437_v49  ;;  %vm553_vm8 = vcmp.ge.f32.partialorder %v501_v53, 0.0  ;;  %v585_v63 = vmul.f32 0.2, %v501_v53 }
 0x101   : > { %v452_v0 = vpop.f32.mrb[15].mxu0  ;;  %v616_v1 = vsel %vm552_vm4, %v498_v42, %v584_v47  ;;  %v979_v2 = vpack.c.bf16 %v603_v61, %v602_v44  ;;  %v619_v3 = vsel %vm555_vm6, %v509_v48, %v587_v58  ;;  %v574_v4 = vmul.f32 0.2, %v458_v54  ;;  %v516_v5 = vpop.f32.mrb[15].mxu1 }
 0x102   : > { %v1019_v6 = vpack.c.bf16 %v619_v3, %v618_v45  ;;  %v601_v7 = vsel %vm537_vm7, %v437_v49, %v569_v62  ;;  %v617_v8 = vsel %vm553_vm8, %v501_v53, %v585_v63  ;;  %v522_v9 = vadd.f32 %v1101_v51, %v1226_v19 }
 0x103   : > { %1035 = vst [vmem:[%s1243_s29 + $0x28] sm:$0xff] %v979_v2   ;;  %v974_v10 = vpack.c.bf16 %v601_v7, %v600_v57  ;;  %v1014_v11 = vpack.c.bf16 %v617_v8, %v616_v1  ;;  %vm542_vm9 = vcmp.ge.f32.partialorder %v458_v54, 0.0  ;;  %v450_v12 = vadd.f32 %v1226_v19, %v449_v55 }
 0x104   : > { %1043 = vst [vmem:[%s1243_s29 + $0x68] sm:$0xff] %v1019_v6   ;;  %vm558_vm10 = vcmp.ge.f32.partialorder %v522_v9, 0.0  ;;  %v590_v13 = vmul.f32 0.2, %v522_v9  ;;  %v514_v14 = vadd.f32 %v1226_v19, %v513_v56  ;;  %v461_v15 = vadd.f32 %v1086_v59, %v1226_v19 }
 0x105   : > { %1034 = vst [vmem:[%s1243_s29 + $0x20] sm:$0xff] %v974_v10   ;;  %1042 = vst [vmem:[%s1243_s29 + $0x60] sm:$0xff] %v1014_v11   ;;  %v572_v16 = vmul.f32 0.2, %v450_v12  ;;  %v525_v17 = vadd.f32 %v1102_v60, %v1226_v19  ;;  %v453_v18 = vadd.f32 %v1226_v19, %v452_v0  ;;  %v606_v20 = vsel %vm542_vm9, %v458_v54, %v574_v4 }
 0x106   : > { %vm540_vm11 = vcmp.ge.f32.partialorder %v450_v12, 0.0  ;;  %vm543_vm12 = vcmp.ge.f32.partialorder %v461_v15, 0.0  ;;  %v622_v21 = vsel %vm558_vm10, %v522_v9, %v590_v13  ;;  %v575_v22 = vmul.f32 0.2, %v461_v15 }
 0x107   : > { %vm559_vm13 = vcmp.ge.f32.partialorder %v525_v17, 0.0  ;;  %v591_v23 = vmul.f32 0.2, %v525_v17  ;;  %vm556_vm14 = vcmp.ge.f32.partialorder %v514_v14, 0.0  ;;  %vm541_vm15 = vcmp.ge.f32.partialorder %v453_v18, 0.0 }
 0x108   : > { %v573_v24 = vmul.f32 0.2, %v453_v18  ;;  %v517_v25 = vadd.f32 %v1226_v19, %v516_v5  ;;  %v604_v26 = vsel %vm540_vm11, %v450_v12, %v572_v16  ;;  %v588_v27 = vmul.f32 0.2, %v514_v14 }
 0x109   : > { %v607_v28 = vsel %vm543_vm12, %v461_v15, %v575_v22  ;;  %v623_v29 = vsel %vm559_vm13, %v525_v17, %v591_v23 }
 0x10a   : > { %v989_v30 = vpack.c.bf16 %v607_v28, %v606_v20  ;;  %v1029_v31 = vpack.c.bf16 %v623_v29, %v622_v21  ;;  %v605_v32 = vsel %vm541_vm15, %v453_v18, %v573_v24  ;;  %vm557_vm0 = vcmp.ge.f32.partialorder %v517_v25, 0.0 }
 0x10b   : > { %v984_v33 = vpack.c.bf16 %v605_v32, %v604_v26  ;;  %v589_v34 = vmul.f32 0.2, %v517_v25  ;;  %v620_v35 = vsel %vm556_vm14, %v514_v14, %v588_v27 }
 0x10c   : > { %1037 = vst [vmem:[%s1243_s29 + $0x38] sm:$0xff] %v989_v30   ;;  %1045 = vst [vmem:[%s1243_s29 + $0x78] sm:$0xff] %v1029_v31  }
 0x10d   : > { %1036 = vst [vmem:[%s1243_s29 + $0x30] sm:$0xff] %v984_v33   ;;  %v621_v36 = vsel %vm557_vm0, %v517_v25, %v589_v34 }
 0x10e   : > { %v1024_v37 = vpack.c.bf16 %v621_v36, %v620_v35 }
 0x110   : > { %1044 = vst [vmem:[%s1243_s29 + $0x70] sm:$0xff] %v1024_v37  }
 0x111 PF: > { %s13_s12 = sadd.s32 1, %s1142_s12  }
 0x112   : > { %p10_p4 = scmp.ge.s32.totalorder %s13_s12, 4  }
 0x114   :  { %12 = sbr.rel (!%p10_p4) target bundleno = 1 (0x1), region = 62 }

// kernel: discriminator_forward.7
= control target key start
LH: loop header
LB: loop body
LE: loop exit
PB: predicated region body
PF: predicated region fallthrough
CT: control target
= control target key end

     0   :  { %vm2399_vm0 = vcmask 130048   ;;  %s6552_s1 = inlined_call_operand.vmem [shape: bf16[2064,256], index: 1, kind: input, shape index: {}]   ;;  %s6553_s0 = inlined_call_operand.vmem [shape: bf16[128,2064], index: 0, kind: input, shape index: {}]   ;;  %s6554_s2 = inlined_call_operand.vmem [shape: f32[1,256], index: 2, kind: input, shape index: {}]   ;;  %s6555_s3 = inlined_call_operand.vmem [shape: bf16[128,256], index: 3, kind: output, shape index: {}]  }
   0x1   :  { %v4408_v0 = vld [vmem:[%s6552_s1 + $0x4] ss:$8 sps:$4 sm:$0xff]   ;;  %v4412_v2 = vld [vmem:[%s6552_s1] ss:$8 sps:$4 sm:$0xff]   ;;  %v4414_v4 = vld [vmem:[%s6552_s1 + $0x14] ss:$8 sps:$4 sm:$0xff]  }
   0x2   :  { %v4410_v1 = vld [vmem:[%s6552_s1 + $0x404] ss:$8 sps:$4 sm:$0xff]   ;;  %2424 = vmatprep.subr.bf16.mxu1 %v4408_v0  ;;  %v4413_v3 = vld [vmem:[%s6552_s1 + $0x400] ss:$8 sps:$4 sm:$0xff]   ;;  %v4416_v5 = vld [vmem:[%s6552_s1 + $0x414] ss:$8 sps:$4 sm:$0xff]  }
   0x3   :  { %2876 = vmatprep.subr.bf16.mxu0 %v4410_v1  ;;  %2425 = vmatpush1.bf16.msra.mxu1 %v4412_v2  ;;  %v4418_v6 = vld [vmem:[%s6552_s1 + $0x10] ss:$8 sps:$4 sm:$0xff]   ;;  %v4420_v8 = vld [vmem:[%s6552_s1 + $0x24] ss:$8 sps:$4 sm:$0xff]   ;;  %v4424_v10 = vld [vmem:[%s6552_s1 + $0x20] ss:$8 sps:$4 sm:$0xff]  }
   0x4   :  { %2877 = vmatpush1.bf16.msra.mxu0 %v4413_v3  ;;  %2426 = vmatprep.subr.bf16.mxu1 %v4414_v4  ;;  %v4419_v7 = vld [vmem:[%s6552_s1 + $0x410] ss:$8 sps:$4 sm:$0xff]   ;;  %v4422_v9 = vld [vmem:[%s6552_s1 + $0x424] ss:$8 sps:$4 sm:$0xff]   ;;  %v4425_v11 = vld [vmem:[%s6552_s1 + $0x420] ss:$8 sps:$4 sm:$0xff]  }
   0x5   :  { %2878 = vmatprep.subr.bf16.mxu0 %v4416_v5  ;;  %v4426_v12 = vld [vmem:[%s6552_s1 + $0x34] ss:$8 sps:$4 sm:$0xff]   ;;  %v4430_v14 = vld [vmem:[%s6552_s1 + $0x30] ss:$8 sps:$4 sm:$0xff]   ;;  %v4432_v16 = vld [vmem:[%s6552_s1 + $0x44] ss:$8 sps:$4 sm:$0xff]  }
   0x6   :  { %v4428_v13 = vld [vmem:[%s6552_s1 + $0x434] ss:$8 sps:$4 sm:$0xff]   ;;  %v4431_v15 = vld [vmem:[%s6552_s1 + $0x430] ss:$8 sps:$4 sm:$0xff]   ;;  %v4434_v17 = vld [vmem:[%s6552_s1 + $0x444] ss:$8 sps:$4 sm:$0xff]  }
   0x7   :  { %2427 = vmatpush1.bf16.msra.mxu1 %v4418_v6  ;;  %v4436_v18 = vld [vmem:[%s6552_s1 + $0x40] ss:$8 sps:$4 sm:$0xff]   ;;  %v4438_v20 = vld [vmem:[%s6552_s1 + $0x54] ss:$8 sps:$4 sm:$0xff]   ;;  %v4442_v22 = vld [vmem:[%s6552_s1 + $0x50] ss:$8 sps:$4 sm:$0xff]  }
   0x8   :  { %2879 = vmatpush1.bf16.msra.mxu0 %v4419_v7  ;;  %2428 = vmatprep.subr.bf16.mxu1 %v4420_v8  ;;  %v4437_v19 = vld [vmem:[%s6552_s1 + $0x440] ss:$8 sps:$4 sm:$0xff]   ;;  %v4440_v21 = vld [vmem:[%s6552_s1 + $0x454] ss:$8 sps:$4 sm:$0xff]   ;;  %v4443_v23 = vld [vmem:[%s6552_s1 + $0x450] ss:$8 sps:$4 sm:$0xff]  }
   0x9   :  { %2880 = vmatprep.subr.bf16.mxu0 %v4422_v9  ;;  %v4444_v24 = vld [vmem:[%s6552_s1 + $0x64] ss:$8 sps:$4 sm:$0xff]   ;;  %v4448_v26 = vld [vmem:[%s6552_s1 + $0x60] ss:$8 sps:$4 sm:$0xff]   ;;  %v4450_v28 = vld [vmem:[%s6552_s1 + $0x74] ss:$8 sps:$4 sm:$0xff]  }
   0xa   :  { %v4446_v25 = vld [vmem:[%s6552_s1 + $0x464] ss:$8 sps:$4 sm:$0xff]   ;;  %v4449_v27 = vld [vmem:[%s6552_s1 + $0x460] ss:$8 sps:$4 sm:$0xff]   ;;  %v4452_v29 = vld [vmem:[%s6552_s1 + $0x474] ss:$8 sps:$4 sm:$0xff]  }
   0xb   :  { %2429 = vmatpush1.bf16.msra.mxu1 %v4424_v10  ;;  %v4454_v30 = vld [vmem:[%s6552_s1 + $0x70] ss:$8 sps:$4 sm:$0xff]   ;;  %v4456_v32 = vld [vmem:[%s6552_s1 + $0x84] ss:$8 sps:$4 sm:$0xff]   ;;  %v4460_v34 = vld [vmem:[%s6552_s1 + $0x80] ss:$8 sps:$4 sm:$0xff]  }
   0xc   :  { %2881 = vmatpush1.bf16.msra.mxu0 %v4425_v11  ;;  %2430 = vmatprep.subr.bf16.mxu1 %v4426_v12  ;;  %v4455_v31 = vld [vmem:[%s6552_s1 + $0x470] ss:$8 sps:$4 sm:$0xff]   ;;  %v4458_v33 = vld [vmem:[%s6552_s1 + $0x484] ss:$8 sps:$4 sm:$0xff]   ;;  %v4461_v35 = vld [vmem:[%s6552_s1 + $0x480] ss:$8 sps:$4 sm:$0xff]  }
   0xd   :  { %2882 = vmatprep.subr.bf16.mxu0 %v4428_v13  ;;  %v4462_v36 = vld [vmem:[%s6552_s1 + $0x94] ss:$8 sps:$4 sm:$0xff]   ;;  %v4466_v38 = vld [vmem:[%s6552_s1 + $0x90] ss:$8 sps:$4 sm:$0xff]   ;;  %v4468_v40 = vld [vmem:[%s6552_s1 + $0xa4] ss:$8 sps:$4 sm:$0xff]  }
   0xe   :  { %v4464_v37 = vld [vmem:[%s6552_s1 + $0x494] ss:$8 sps:$4 sm:$0xff]   ;;  %v4467_v39 = vld [vmem:[%s6552_s1 + $0x490] ss:$8 sps:$4 sm:$0xff]   ;;  %v4470_v41 = vld [vmem:[%s6552_s1 + $0x4a4] ss:$8 sps:$4 sm:$0xff]  }
   0xf   :  { %2431 = vmatpush1.bf16.msra.mxu1 %v4430_v14  ;;  %v4472_v42 = vld [vmem:[%s6552_s1 + $0xa0] ss:$8 sps:$4 sm:$0xff]   ;;  %v4474_v44 = vld [vmem:[%s6552_s1 + $0xb4] ss:$8 sps:$4 sm:$0xff]   ;;  %v4478_v46 = vld [vmem:[%s6552_s1 + $0xb0] ss:$8 sps:$4 sm:$0xff]  }
  0x10   :  { %2883 = vmatpush1.bf16.msra.mxu0 %v4431_v15  ;;  %2432 = vmatprep.subr.bf16.mxu1 %v4432_v16  ;;  %v4473_v43 = vld [vmem:[%s6552_s1 + $0x4a0] ss:$8 sps:$4 sm:$0xff]   ;;  %v4476_v45 = vld [vmem:[%s6552_s1 + $0x4b4] ss:$8 sps:$4 sm:$0xff]   ;;  %v4479_v47 = vld [vmem:[%s6552_s1 + $0x4b0] ss:$8 sps:$4 sm:$0xff]  }
  0x11   :  { %2884 = vmatprep.subr.bf16.mxu0 %v4434_v17  ;;  %v4480_v48 = vld [vmem:[%s6552_s1 + $0xc4] ss:$8 sps:$4 sm:$0xff]   ;;  %v4484_v52 = vld [vmem:[%s6552_s1 + $0xc0] ss:$8 sps:$4 sm:$0xff]   ;;  %v4486_v54 = vld [vmem:[%s6552_s1 + $0xd4] ss:$8 sps:$4 sm:$0xff]  }
  0x12   :  { %v4506_v49 = vld [vmem:[%s6553_s0 + $0x4] ss:$68 sps:$4 sm:$0xff]   ;;  %v4488_v55 = vld [vmem:[%s6552_s1 + $0x4d4] ss:$8 sps:$4 sm:$0xff]   ;;  %v4490_v56 = vld [vmem:[%s6552_s1 + $0xd0] ss:$8 sps:$4 sm:$0xff]  }
  0x13   :  { %2433 = vmatpush1.bf16.msra.mxu1 %v4436_v18  ;;  %v4482_v50 = vld [vmem:[%s6552_s1 + $0x4c4] ss:$8 sps:$4 sm:$0xff]   ;;  %2456 = vmatprep.mubr.bf16.mxu1 %v4506_v49  ;;  %v4485_v53 = vld [vmem:[%s6552_s1 + $0x4c0] ss:$8 sps:$4 sm:$0xff]   ;;  %v4491_v57 = vld [vmem:[%s6552_s1 + $0x4d0] ss:$8 sps:$4 sm:$0xff]  }
  0x14   :  { %2885 = vmatpush1.bf16.msra.mxu0 %v4437_v19  ;;  %2434 = vmatprep.subr.bf16.mxu1 %v4438_v20  ;;  %v4509_v51 = vld [vmem:[%s6553_s0 + $0x24] ss:$68 sps:$4 sm:$0xff]   ;;  %v4498_v62 = vld [vmem:[%s6552_s1 + $0xf4] ss:$8 sps:$4 sm:$0xff]   ;;  %v4502_v0 = vld [vmem:[%s6552_s1 + $0xf0] ss:$8 sps:$4 sm:$0xff]  }
  0x15   :  { %2886 = vmatprep.subr.bf16.mxu0 %v4440_v21  ;;  %2908 = vmatprep.mubr.bf16.mxu0 %v4509_v51  ;;  %v4492_v58 = vld [vmem:[%s6552_s1 + $0xe4] ss:$8 sps:$4 sm:$0xff]   ;;  %v4496_v60 = vld [vmem:[%s6552_s1 + $0xe0] ss:$8 sps:$4 sm:$0xff]   ;;  %v4500_v63 = vld [vmem:[%s6552_s1 + $0x4f4] ss:$8 sps:$4 sm:$0xff]  }
  0x16   :  { %v4494_v59 = vld [vmem:[%s6552_s1 + $0x4e4] ss:$8 sps:$4 sm:$0xff]   ;;  %v4497_v61 = vld [vmem:[%s6552_s1 + $0x4e0] ss:$8 sps:$4 sm:$0xff]   ;;  %v4503_v1 = vld [vmem:[%s6552_s1 + $0x4f0] ss:$8 sps:$4 sm:$0xff]  }
  0x17   :  { %2435 = vmatpush1.bf16.msra.mxu1 %v4442_v22  ;;  %v4512_v2 = vld [vmem:[%s6552_s1 + $0x104] ss:$8 sps:$4 sm:$0xff]   ;;  %v4510_v6 = vld [vmem:[%s6552_s1 + $0x100] ss:$8 sps:$4 sm:$0xff]   ;;  %v4518_v8 = vld [vmem:[%s6552_s1 + $0x114] ss:$8 sps:$4 sm:$0xff]  }
  0x18   :  { %2887 = vmatpush1.bf16.msra.mxu0 %v4443_v23  ;;  %2436 = vmatprep.subr.bf16.mxu1 %v4444_v24  ;;  %v4515_v3 = vld [vmem:[%s6552_s1 + $0x504] ss:$8 sps:$4 sm:$0xff]   ;;  %v4513_v7 = vld [vmem:[%s6552_s1 + $0x500] ss:$8 sps:$4 sm:$0xff]   ;;  %v4521_v9 = vld [vmem:[%s6552_s1 + $0x514] ss:$8 sps:$4 sm:$0xff]  }
  0x19   :  { %2888 = vmatprep.subr.bf16.mxu0 %v4446_v25  ;;  %v4504_v4 = vld [vmem:[%s6553_s0] ss:$68 sps:$4 sm:$0xff]   ;;  %v4522_v10 = vld [vmem:[%s6553_s0 + $0x8c] ss:$68 sps:$4 sm:$0xff]   ;;  %v4536_v20 = vld [vmem:[%s6552_s1 + $0x134] ss:$8 sps:$4 sm:$0xff]  }
  0x1a   :  { %v4507_v5 = vld [vmem:[%s6553_s0 + $0x20] ss:$68 sps:$4 sm:$0xff]   ;;  %v4524_v11 = vld [vmem:[%s6553_s0 + $0xac] ss:$68 sps:$4 sm:$0xff]   ;;  %v4539_v21 = vld [vmem:[%s6552_s1 + $0x534] ss:$8 sps:$4 sm:$0xff]  }
  0x1b   :  { %2437 = vmatpush1.bf16.msra.mxu1 %v4448_v26  ;;  %v4516_v12 = vld [vmem:[%s6552_s1 + $0x110] ss:$8 sps:$4 sm:$0xff]   ;;  %v4529_v14 = vld [vmem:[%s6552_s1 + $0x124] ss:$8 sps:$4 sm:$0xff]   ;;  %v4527_v17 = vld [vmem:[%s6552_s1 + $0x120] ss:$8 sps:$4 sm:$0xff]  }
  0x1c   :  { %2889 = vmatpush1.bf16.msra.mxu0 %v4449_v27  ;;  %2438 = vmatprep.subr.bf16.mxu1 %v4450_v28  ;;  %v4519_v13 = vld [vmem:[%s6552_s1 + $0x510] ss:$8 sps:$4 sm:$0xff]   ;;  %v4533_v15 = vld [vmem:[%s6552_s1 + $0x524] ss:$8 sps:$4 sm:$0xff]   ;;  %v4531_v19 = vld [vmem:[%s6552_s1 + $0x520] ss:$8 sps:$4 sm:$0xff]  }
  0x1d   :  { %2890 = vmatprep.subr.bf16.mxu0 %v4452_v29  ;;  %v4526_v16 = vld [vmem:[%s6553_s0 + $0x88] ss:$68 sps:$4 sm:$0xff]   ;;  %v4540_v22 = vld [vmem:[%s6553_s0 + $0x114] ss:$68 sps:$4 sm:$0xff]  }
  0x1e   :  { %v4530_v18 = vld [vmem:[%s6553_s0 + $0xa8] ss:$68 sps:$4 sm:$0xff]   ;;  %v4542_v23 = vld [vmem:[%s6553_s0 + $0x134] ss:$68 sps:$4 sm:$0xff]  }
  0x1f   :  { %2439 = vmatpush1.bf16.msra.mxu1 %v4454_v30  ;;  %v4534_v24 = vld [vmem:[%s6552_s1 + $0x130] ss:$8 sps:$4 sm:$0xff]   ;;  %v4547_v26 = vld [vmem:[%s6552_s1 + $0x144] ss:$8 sps:$4 sm:$0xff]   ;;  %v4545_v29 = vld [vmem:[%s6552_s1 + $0x140] ss:$8 sps:$4 sm:$0xff]  }
  0x20   :  { %2891 = vmatpush1.bf16.msra.mxu0 %v4455_v31  ;;  %2440 = vmatprep.subr.bf16.mxu1 %v4456_v32  ;;  %v4537_v25 = vld [vmem:[%s6552_s1 + $0x530] ss:$8 sps:$4 sm:$0xff]   ;;  %v4551_v27 = vld [vmem:[%s6552_s1 + $0x544] ss:$8 sps:$4 sm:$0xff]   ;;  %v4549_v31 = vld [vmem:[%s6552_s1 + $0x540] ss:$8 sps:$4 sm:$0xff]  }
  0x21   :  { %2892 = vmatprep.subr.bf16.mxu0 %v4458_v33  ;;  %v4544_v28 = vld [vmem:[%s6553_s0 + $0x110] ss:$68 sps:$4 sm:$0xff]   ;;  %v4587_v51 = vld [vmem:[%s6552_s1 + $0x584] ss:$8 sps:$4 sm:$0xff]  }
  0x22   :  { %v4548_v30 = vld [vmem:[%s6553_s0 + $0x130] ss:$68 sps:$4 sm:$0xff]  }
  0x23   :  { %2441 = vmatpush1.bf16.msra.mxu1 %v4460_v34  ;;  %v4554_v32 = vld [vmem:[%s6552_s1 + $0x154] ss:$8 sps:$4 sm:$0xff]   ;;  %v4573_v49 = vld [vmem:[%s6552_s1 + $0x570] ss:$8 sps:$4 sm:$0xff]  }
  0x24   :  { %2893 = vmatpush1.bf16.msra.mxu0 %v4461_v35  ;;  %2442 = vmatprep.subr.bf16.mxu1 %v4462_v36  ;;  %v4557_v33 = vld [vmem:[%s6552_s1 + $0x554] ss:$8 sps:$4 sm:$0xff]   ;;  %v4552_v36 = vld [vmem:[%s6552_s1 + $0x150] ss:$8 sps:$4 sm:$0xff]  }
  0x25   :  { %2894 = vmatprep.subr.bf16.mxu0 %v4464_v37  ;;  %v4558_v34 = vld [vmem:[%s6553_s0 + $0x19c] ss:$68 sps:$4 sm:$0xff]   ;;  %v4555_v37 = vld [vmem:[%s6552_s1 + $0x550] ss:$8 sps:$4 sm:$0xff]  }
  0x26   :  { %v4560_v35 = vld [vmem:[%s6553_s0 + $0x1bc] ss:$68 sps:$4 sm:$0xff]  }
  0x27   :  { %2443 = vmatpush1.bf16.msra.mxu1 %v4466_v38  ;;  %v4565_v38 = vld [vmem:[%s6552_s1 + $0x164] ss:$8 sps:$4 sm:$0xff]  }
  0x28   :  { %2895 = vmatpush1.bf16.msra.mxu0 %v4467_v39  ;;  %2444 = vmatprep.subr.bf16.mxu1 %v4468_v40  ;;  %v4569_v39 = vld [vmem:[%s6552_s1 + $0x564] ss:$8 sps:$4 sm:$0xff]   ;;  %v4562_v40 = vld [vmem:[%s6553_s0 + $0x198] ss:$68 sps:$4 sm:$0xff]  }
  0x29   :  { %2896 = vmatprep.subr.bf16.mxu0 %v4470_v41  ;;  %v4563_v41 = vld [vmem:[%s6552_s1 + $0x160] ss:$8 sps:$4 sm:$0xff]  }
  0x2b   :  { %2445 = vmatpush1.bf16.msra.mxu1 %v4472_v42  ;;  %v4566_v42 = vld [vmem:[%s6553_s0 + $0x1b8] ss:$68 sps:$4 sm:$0xff]  }
  0x2c   :  { %2897 = vmatpush1.bf16.msra.mxu0 %v4473_v43  ;;  %2446 = vmatprep.subr.bf16.mxu1 %v4474_v44  ;;  %v4567_v43 = vld [vmem:[%s6552_s1 + $0x560] ss:$8 sps:$4 sm:$0xff]   ;;  %v4572_v44 = vld [vmem:[%s6552_s1 + $0x174] ss:$8 sps:$4 sm:$0xff]  }
  0x2d   :  { %2898 = vmatprep.subr.bf16.mxu0 %v4476_v45  ;;  %v4575_v45 = vld [vmem:[%s6552_s1 + $0x574] ss:$8 sps:$4 sm:$0xff]  }
  0x2f   :  { %2447 = vmatpush1.bf16.msra.mxu1 %v4478_v46  ;;  %v4576_v46 = vld [vmem:[%s6553_s0 + $0x224] ss:$68 sps:$4 sm:$0xff]  }
  0x30   :  { %2899 = vmatpush1.bf16.msra.mxu0 %v4479_v47  ;;  %2448 = vmatprep.subr.bf16.mxu1 %v4480_v48  ;;  %v4578_v47 = vld [vmem:[%s6553_s0 + $0x244] ss:$68 sps:$4 sm:$0xff]   ;;  %v4570_v48 = vld [vmem:[%s6552_s1 + $0x170] ss:$8 sps:$4 sm:$0xff]  }
  0x31   :  { %2900 = vmatprep.subr.bf16.mxu0 %v4482_v50  ;;  %v4583_v50 = vld [vmem:[%s6552_s1 + $0x184] ss:$8 sps:$4 sm:$0xff]  }
  0x33   :  { %2449 = vmatpush1.bf16.msra.mxu1 %v4484_v52  ;;  %v4580_v52 = vld [vmem:[%s6553_s0 + $0x220] ss:$68 sps:$4 sm:$0xff]  }
  0x34   :  { %2901 = vmatpush1.bf16.msra.mxu0 %v4485_v53  ;;  %2450 = vmatprep.subr.bf16.mxu1 %v4486_v54  ;;  %v4581_v53 = vld [vmem:[%s6552_s1 + $0x180] ss:$8 sps:$4 sm:$0xff]  }
  0x35   :  { %2902 = vmatprep.subr.bf16.mxu0 %v4488_v55  ;;  %v4584_v54 = vld [vmem:[%s6553_s0 + $0x240] ss:$68 sps:$4 sm:$0xff]  }
  0x36   :  { %v4585_v55 = vld [vmem:[%s6552_s1 + $0x580] ss:$8 sps:$4 sm:$0xff]  }
  0x37   :  { %2451 = vmatpush1.bf16.msra.mxu1 %v4490_v56  ;;  %v4590_v56 = vld [vmem:[%s6552_s1 + $0x194] ss:$8 sps:$4 sm:$0xff]  }
  0x38   :  { %2903 = vmatpush1.bf16.msra.mxu0 %v4491_v57  ;;  %2452 = vmatprep.subr.bf16.mxu1 %v4492_v58  ;;  %v4593_v57 = vld [vmem:[%s6552_s1 + $0x594] ss:$8 sps:$4 sm:$0xff]   ;;  %v4594_v58 = vld [vmem:[%s6553_s0 + $0x2ac] ss:$68 sps:$4 sm:$0xff]  }
  0x39   :  { %2904 = vmatprep.subr.bf16.mxu0 %v4494_v59  ;;  %v4596_v59 = vld [vmem:[%s6553_s0 + $0x2cc] ss:$68 sps:$4 sm:$0xff]  }
  0x3b   :  { %2453 = vmatpush1.bf16.msra.mxu1 %v4496_v60  ;;  %v4588_v60 = vld [vmem:[%s6552_s1 + $0x190] ss:$8 sps:$4 sm:$0xff]  }
  0x3c   :  { %2905 = vmatpush1.bf16.msra.mxu0 %v4497_v61  ;;  %2454 = vmatprep.subr.bf16.mxu1 %v4498_v62  ;;  %v4591_v61 = vld [vmem:[%s6552_s1 + $0x590] ss:$8 sps:$4 sm:$0xff]   ;;  %v4601_v62 = vld [vmem:[%s6552_s1 + $0x1a4] ss:$8 sps:$4 sm:$0xff]  }
  0x3d   :  { %2906 = vmatprep.subr.bf16.mxu0 %v4500_v63  ;;  %v4605_v63 = vld [vmem:[%s6552_s1 + $0x5a4] ss:$8 sps:$4 sm:$0xff]  }
  0x3f   :  { %2455 = vmatpush1.bf16.msra.mxu1 %v4502_v0  ;;  %v4598_v0 = vld [vmem:[%s6553_s0 + $0x2a8] ss:$68 sps:$4 sm:$0xff]  }
  0x40   :  { %2907 = vmatpush1.bf16.msra.mxu0 %v4503_v1  ;;  %2537 = vmatprep.subr.bf16.mxu1 %v4512_v2  ;;  %v4599_v1 = vld [vmem:[%s6552_s1 + $0x1a0] ss:$8 sps:$4 sm:$0xff]  }
  0x41   :  { %2989 = vmatprep.subr.bf16.mxu0 %v4515_v3  ;;  %v4602_v2 = vld [vmem:[%s6553_s0 + $0x2c8] ss:$68 sps:$4 sm:$0xff]  }
  0x42   :  { %2457 = vmatmul.mubr.bf16.vlgmr.msra.gmra.mrb[0].mxu1 %v4504_v4  ;;  %v4603_v3 = vld [vmem:[%s6552_s1 + $0x5a0] ss:$8 sps:$4 sm:$0xff]   ;;  %v4608_v4 = vld [vmem:[%s6552_s1 + $0x1b4] ss:$8 sps:$4 sm:$0xff]  }
  0x43   :  { %2909 = vmatmul.mubr.bf16.vlgmr.msra.gmra.mrb[0].mxu0 %v4507_v5  ;;  %2538 = vmatpush1.bf16.msra.mxu1 %v4510_v6  ;;  %v4611_v5 = vld [vmem:[%s6552_s1 + $0x5b4] ss:$8 sps:$4 sm:$0xff]  }
  0x44   :  { %2990 = vmatpush1.bf16.msra.mxu0 %v4513_v7  ;;  %2539 = vmatprep.subr.bf16.mxu1 %v4518_v8  ;;  %v4612_v6 = vld [vmem:[%s6553_s0 + $0x334] ss:$68 sps:$4 sm:$0xff]  }
  0x45   :  { %2991 = vmatprep.subr.bf16.mxu0 %v4521_v9  ;;  %2466 = vmatprep.mubr.bf16.mxu1 %v4522_v10  ;;  %v4614_v7 = vld [vmem:[%s6553_s0 + $0x354] ss:$68 sps:$4 sm:$0xff]   ;;  %v4619_v10 = vld [vmem:[%s6552_s1 + $0x1c4] ss:$8 sps:$4 sm:$0xff]  }
  0x46   :  { %2918 = vmatprep.mubr.bf16.mxu0 %v4524_v11  ;;  %v4606_v8 = vld [vmem:[%s6552_s1 + $0x1b0] ss:$8 sps:$4 sm:$0xff]   ;;  %v4623_v11 = vld [vmem:[%s6552_s1 + $0x5c4] ss:$8 sps:$4 sm:$0xff]  }
  0x47   :  { %2540 = vmatpush1.bf16.msra.mxu1 %v4516_v12  ;;  %v4609_v9 = vld [vmem:[%s6552_s1 + $0x5b0] ss:$8 sps:$4 sm:$0xff]  }
  0x48   :  { %2992 = vmatpush1.bf16.msra.mxu0 %v4519_v13  ;;  %2541 = vmatprep.subr.bf16.mxu1 %v4529_v14  ;;  %v4616_v12 = vld [vmem:[%s6553_s0 + $0x330] ss:$68 sps:$4 sm:$0xff]   ;;  %v4617_v13 = vld [vmem:[%s6552_s1 + $0x1c0] ss:$8 sps:$4 sm:$0xff]  }
  0x49   :  { %2993 = vmatprep.subr.bf16.mxu0 %v4533_v15  ;;  %v4620_v14 = vld [vmem:[%s6553_s0 + $0x350] ss:$68 sps:$4 sm:$0xff]   ;;  %v4621_v15 = vld [vmem:[%s6552_s1 + $0x5c0] ss:$8 sps:$4 sm:$0xff]  }
  0x4a   :  { %2467 = vmatmul.mubr.bf16.gmra.mrb[4].mxu1 %v4526_v16  ;;  %v4626_v16 = vld [vmem:[%s6552_s1 + $0x1d4] ss:$8 sps:$4 sm:$0xff]  }
  0x4b   :  { %2919 = vmatmul.mubr.bf16.gmra.mrb[4].mxu0 %v4530_v18  ;;  %2542 = vmatpush1.bf16.msra.mxu1 %v4527_v17  ;;  %v4629_v17 = vld [vmem:[%s6552_s1 + $0x5d4] ss:$8 sps:$4 sm:$0xff]  }
  0x4c   :  { %2994 = vmatpush1.bf16.msra.mxu0 %v4531_v19  ;;  %2543 = vmatprep.subr.bf16.mxu1 %v4536_v20  ;;  %v4630_v18 = vld [vmem:[%s6553_s0 + $0x3bc] ss:$68 sps:$4 sm:$0xff]   ;;  %v4624_v20 = vld [vmem:[%s6552_s1 + $0x1d0] ss:$8 sps:$4 sm:$0xff]  }
  0x4d   :  { %2995 = vmatprep.subr.bf16.mxu0 %v4539_v21  ;;  %2476 = vmatprep.mubr.bf16.mxu1 %v4540_v22  ;;  %v4632_v19 = vld [vmem:[%s6553_s0 + $0x3dc] ss:$68 sps:$4 sm:$0xff]   ;;  %v4627_v21 = vld [vmem:[%s6552_s1 + $0x5d0] ss:$8 sps:$4 sm:$0xff]   ;;  %v4637_v22 = vld [vmem:[%s6552_s1 + $0x1e4] ss:$8 sps:$4 sm:$0xff]  }
  0x4e   :  { %2928 = vmatprep.mubr.bf16.mxu0 %v4542_v23  ;;  %v4641_v23 = vld [vmem:[%s6552_s1 + $0x5e4] ss:$8 sps:$4 sm:$0xff]  }
  0x4f   :  { %2544 = vmatpush1.bf16.msra.mxu1 %v4534_v24  ;;  %v4634_v24 = vld [vmem:[%s6553_s0 + $0x3b8] ss:$68 sps:$4 sm:$0xff]  }
  0x50   :  { %2996 = vmatpush1.bf16.msra.mxu0 %v4537_v25  ;;  %2545 = vmatprep.subr.bf16.mxu1 %v4547_v26  ;;  %v4635_v25 = vld [vmem:[%s6552_s1 + $0x1e0] ss:$8 sps:$4 sm:$0xff]   ;;  %v4638_v26 = vld [vmem:[%s6553_s0 + $0x3d8] ss:$68 sps:$4 sm:$0xff]  }
  0x51   :  { %2997 = vmatprep.subr.bf16.mxu0 %v4551_v27  ;;  %v4639_v27 = vld [vmem:[%s6552_s1 + $0x5e0] ss:$8 sps:$4 sm:$0xff]  }
  0x52   :  { %2477 = vmatmul.mubr.bf16.gmra.mrb[8].mxu1 %v4544_v28  ;;  %v4644_v28 = vld [vmem:[%s6552_s1 + $0x1f4] ss:$8 sps:$4 sm:$0xff]  }
  0x53   :  { %2929 = vmatmul.mubr.bf16.gmra.mrb[8].mxu0 %v4548_v30  ;;  %2546 = vmatpush1.bf16.msra.mxu1 %v4545_v29  ;;  %v4647_v29 = vld [vmem:[%s6552_s1 + $0x5f4] ss:$8 sps:$4 sm:$0xff]   ;;  %v4650_v30 = vld [vmem:[%s6553_s0 + $0xc] ss:$68 sps:$4 sm:$0xff]  }
  0x54   :  { %2998 = vmatpush1.bf16.msra.mxu0 %v4549_v31  ;;  %2547 = vmatprep.subr.bf16.mxu1 %v4554_v32  ;;  %v4653_v31 = vld [vmem:[%s6553_s0 + $0x2c] ss:$68 sps:$4 sm:$0xff]  }
  0x55   :  { %2999 = vmatprep.subr.bf16.mxu0 %v4557_v33  ;;  %2486 = vmatprep.mubr.bf16.mxu1 %v4558_v34  ;;  %v4642_v32 = vld [vmem:[%s6552_s1 + $0x1f0] ss:$8 sps:$4 sm:$0xff]   ;;  %v4656_v34 = vld [vmem:[%s6552_s1 + $0x204] ss:$8 sps:$4 sm:$0xff]  }
  0x56   :  { %2938 = vmatprep.mubr.bf16.mxu0 %v4560_v35  ;;  %v4645_v33 = vld [vmem:[%s6552_s1 + $0x5f0] ss:$8 sps:$4 sm:$0xff]   ;;  %v4659_v35 = vld [vmem:[%s6552_s1 + $0x604] ss:$8 sps:$4 sm:$0xff]  }
  0x57   :  { %2548 = vmatpush1.bf16.msra.mxu1 %v4552_v36  ;;  %v4648_v36 = vld [vmem:[%s6553_s0 + $0x8] ss:$68 sps:$4 sm:$0xff]  }
  0x58   :  { %3000 = vmatpush1.bf16.msra.mxu0 %v4555_v37  ;;  %2549 = vmatprep.subr.bf16.mxu1 %v4565_v38  ;;  %v4651_v37 = vld [vmem:[%s6553_s0 + $0x28] ss:$68 sps:$4 sm:$0xff]  }
  0x59   :  { %3001 = vmatprep.subr.bf16.mxu0 %v4569_v39  ;;  %v4654_v38 = vld [vmem:[%s6552_s1 + $0x200] ss:$8 sps:$4 sm:$0xff]  }
  0x5a   :  { %2487 = vmatmul.mubr.bf16.gmra.mrb[12].mxu1 %v4562_v40  ;;  %v4657_v39 = vld [vmem:[%s6552_s1 + $0x600] ss:$8 sps:$4 sm:$0xff]   ;;  %v4662_v40 = vld [vmem:[%s6552_s1 + $0x214] ss:$8 sps:$4 sm:$0xff]  }
  0x5b   :  { %2939 = vmatmul.mubr.bf16.gmra.mrb[12].mxu0 %v4566_v42  ;;  %2550 = vmatpush1.bf16.msra.mxu1 %v4563_v41  ;;  %v4665_v41 = vld [vmem:[%s6552_s1 + $0x614] ss:$8 sps:$4 sm:$0xff]  }
  0x5c   :  { %3002 = vmatpush1.bf16.msra.mxu0 %v4567_v43  ;;  %2551 = vmatprep.subr.bf16.mxu1 %v4572_v44  ;;  %v4666_v42 = vld [vmem:[%s6553_s0 + $0x94] ss:$68 sps:$4 sm:$0xff]  }
  0x5d   :  { %3003 = vmatprep.subr.bf16.mxu0 %v4575_v45  ;;  %2496 = vmatprep.mubr.bf16.mxu1 %v4576_v46  ;;  %v4668_v43 = vld [vmem:[%s6553_s0 + $0xb4] ss:$68 sps:$4 sm:$0xff]   ;;  %v4673_v46 = vld [vmem:[%s6552_s1 + $0x224] ss:$8 sps:$4 sm:$0xff]  }
  0x5e   :  { %2948 = vmatprep.mubr.bf16.mxu0 %v4578_v47  ;;  %v4660_v44 = vld [vmem:[%s6552_s1 + $0x210] ss:$8 sps:$4 sm:$0xff]   ;;  %v4677_v47 = vld [vmem:[%s6552_s1 + $0x624] ss:$8 sps:$4 sm:$0xff]  }
  0x5f   :  { %2552 = vmatpush1.bf16.msra.mxu1 %v4570_v48  ;;  %v4663_v45 = vld [vmem:[%s6552_s1 + $0x610] ss:$8 sps:$4 sm:$0xff]  }
  0x60   :  { %3004 = vmatpush1.bf16.msra.mxu0 %v4573_v49  ;;  %2553 = vmatprep.subr.bf16.mxu1 %v4583_v50  ;;  %v4670_v48 = vld [vmem:[%s6553_s0 + $0x90] ss:$68 sps:$4 sm:$0xff]   ;;  %v4671_v49 = vld [vmem:[%s6552_s1 + $0x220] ss:$8 sps:$4 sm:$0xff]  }
  0x61   :  { %3005 = vmatprep.subr.bf16.mxu0 %v4587_v51  ;;  %v4674_v50 = vld [vmem:[%s6553_s0 + $0xb0] ss:$68 sps:$4 sm:$0xff]   ;;  %v4675_v51 = vld [vmem:[%s6552_s1 + $0x620] ss:$8 sps:$4 sm:$0xff]  }
  0x62   :  { %2497 = vmatmul.mubr.bf16.gmra.mrb[16].mxu1 %v4580_v52  ;;  %v4680_v52 = vld [vmem:[%s6552_s1 + $0x234] ss:$8 sps:$4 sm:$0xff]  }
  0x63   :  { %2949 = vmatmul.mubr.bf16.gmra.mrb[16].mxu0 %v4584_v54  ;;  %2554 = vmatpush1.bf16.msra.mxu1 %v4581_v53  ;;  %v4683_v53 = vld [vmem:[%s6552_s1 + $0x634] ss:$8 sps:$4 sm:$0xff]  }
  0x64   :  { %3006 = vmatpush1.bf16.msra.mxu0 %v4585_v55  ;;  %2555 = vmatprep.subr.bf16.mxu1 %v4590_v56  ;;  %v4684_v54 = vld [vmem:[%s6553_s0 + $0x11c] ss:$68 sps:$4 sm:$0xff]   ;;  %v4678_v56 = vld [vmem:[%s6552_s1 + $0x230] ss:$8 sps:$4 sm:$0xff]  }
  0x65   :  { %3007 = vmatprep.subr.bf16.mxu0 %v4593_v57  ;;  %2506 = vmatprep.mubr.bf16.mxu1 %v4594_v58  ;;  %v4686_v55 = vld [vmem:[%s6553_s0 + $0x13c] ss:$68 sps:$4 sm:$0xff]   ;;  %v4681_v57 = vld [vmem:[%s6552_s1 + $0x630] ss:$8 sps:$4 sm:$0xff]   ;;  %v4691_v58 = vld [vmem:[%s6552_s1 + $0x244] ss:$8 sps:$4 sm:$0xff]  }
  0x66   :  { %2958 = vmatprep.mubr.bf16.mxu0 %v4596_v59  ;;  %v4695_v59 = vld [vmem:[%s6552_s1 + $0x644] ss:$8 sps:$4 sm:$0xff]  }
  0x67   :  { %2556 = vmatpush1.bf16.msra.mxu1 %v4588_v60  ;;  %v4688_v60 = vld [vmem:[%s6553_s0 + $0x118] ss:$68 sps:$4 sm:$0xff]  }
  0x68   :  { %3008 = vmatpush1.bf16.msra.mxu0 %v4591_v61  ;;  %2557 = vmatprep.subr.bf16.mxu1 %v4601_v62  ;;  %v4689_v61 = vld [vmem:[%s6552_s1 + $0x240] ss:$8 sps:$4 sm:$0xff]   ;;  %v4692_v62 = vld [vmem:[%s6553_s0 + $0x138] ss:$68 sps:$4 sm:$0xff]  }
  0x69   :  { %3009 = vmatprep.subr.bf16.mxu0 %v4605_v63  ;;  %v4693_v63 = vld [vmem:[%s6552_s1 + $0x640] ss:$8 sps:$4 sm:$0xff]  }
  0x6a   :  { %2507 = vmatmul.mubr.bf16.gmra.mrb[20].mxu1 %v4598_v0  ;;  %v4698_v0 = vld [vmem:[%s6552_s1 + $0x254] ss:$8 sps:$4 sm:$0xff]  }
  0x6b   :  { %2959 = vmatmul.mubr.bf16.gmra.mrb[20].mxu0 %v4602_v2  ;;  %2558 = vmatpush1.bf16.msra.mxu1 %v4599_v1  ;;  %v4701_v1 = vld [vmem:[%s6552_s1 + $0x654] ss:$8 sps:$4 sm:$0xff]   ;;  %v4702_v2 = vld [vmem:[%s6553_s0 + $0x1a4] ss:$68 sps:$4 sm:$0xff]  }
  0x6c   :  { %3010 = vmatpush1.bf16.msra.mxu0 %v4603_v3  ;;  %2559 = vmatprep.subr.bf16.mxu1 %v4608_v4  ;;  %v4704_v3 = vld [vmem:[%s6553_s0 + $0x1c4] ss:$68 sps:$4 sm:$0xff]   ;;  %v4696_v4 = vld [vmem:[%s6552_s1 + $0x250] ss:$8 sps:$4 sm:$0xff]  }
  0x6d   :  { %3011 = vmatprep.subr.bf16.mxu0 %v4611_v5  ;;  %2516 = vmatprep.mubr.bf16.mxu1 %v4612_v6  ;;  %v4699_v5 = vld [vmem:[%s6552_s1 + $0x650] ss:$8 sps:$4 sm:$0xff]   ;;  %v4709_v6 = vld [vmem:[%s6552_s1 + $0x264] ss:$8 sps:$4 sm:$0xff]  }
  0x6e   :  { %2968 = vmatprep.mubr.bf16.mxu0 %v4614_v7  ;;  %v4713_v7 = vld [vmem:[%s6552_s1 + $0x664] ss:$8 sps:$4 sm:$0xff]  }
  0x6f   :  { %2560 = vmatpush1.bf16.msra.mxu1 %v4606_v8  ;;  %v4706_v8 = vld [vmem:[%s6553_s0 + $0x1a0] ss:$68 sps:$4 sm:$0xff]  }
  0x70   :  { %3012 = vmatpush1.bf16.msra.mxu0 %v4609_v9  ;;  %2561 = vmatprep.subr.bf16.mxu1 %v4619_v10  ;;  %v4707_v9 = vld [vmem:[%s6552_s1 + $0x260] ss:$8 sps:$4 sm:$0xff]  }
  0x71   :  { %3013 = vmatprep.subr.bf16.mxu0 %v4623_v11  ;;  %v4710_v10 = vld [vmem:[%s6553_s0 + $0x1c0] ss:$68 sps:$4 sm:$0xff]  }
  0x72   :  { %2517 = vmatmul.mubr.bf16.gmra.mrb[24].mxu1 %v4616_v12  ;;  %v4711_v11 = vld [vmem:[%s6552_s1 + $0x660] ss:$8 sps:$4 sm:$0xff]   ;;  %v4716_v12 = vld [vmem:[%s6552_s1 + $0x274] ss:$8 sps:$4 sm:$0xff]  }
  0x73   :  { %2969 = vmatmul.mubr.bf16.gmra.mrb[24].mxu0 %v4620_v14  ;;  %2562 = vmatpush1.bf16.msra.mxu1 %v4617_v13  ;;  %v4719_v13 = vld [vmem:[%s6552_s1 + $0x674] ss:$8 sps:$4 sm:$0xff]   ;;  %v4720_v14 = vld [vmem:[%s6553_s0 + $0x22c] ss:$68 sps:$4 sm:$0xff]  }
  0x74   :  { %3014 = vmatpush1.bf16.msra.mxu0 %v4621_v15  ;;  %2563 = vmatprep.subr.bf16.mxu1 %v4626_v16  ;;  %v4722_v15 = vld [vmem:[%s6553_s0 + $0x24c] ss:$68 sps:$4 sm:$0xff]  }
  0x75   :  { %3015 = vmatprep.subr.bf16.mxu0 %v4629_v17  ;;  %2526 = vmatprep.mubr.bf16.mxu1 %v4630_v18  ;;  %v4714_v16 = vld [vmem:[%s6552_s1 + $0x270] ss:$8 sps:$4 sm:$0xff]   ;;  %v4727_v18 = vld [vmem:[%s6552_s1 + $0x284] ss:$8 sps:$4 sm:$0xff]  }
  0x76   :  { %2978 = vmatprep.mubr.bf16.mxu0 %v4632_v19  ;;  %v4717_v17 = vld [vmem:[%s6552_s1 + $0x670] ss:$8 sps:$4 sm:$0xff]   ;;  %v4731_v19 = vld [vmem:[%s6552_s1 + $0x684] ss:$8 sps:$4 sm:$0xff]  }
  0x77   :  { %2564 = vmatpush1.bf16.msra.mxu1 %v4624_v20  ;;  %v4724_v20 = vld [vmem:[%s6553_s0 + $0x228] ss:$68 sps:$4 sm:$0xff]  }
  0x78   :  { %3016 = vmatpush1.bf16.msra.mxu0 %v4627_v21  ;;  %2565 = vmatprep.subr.bf16.mxu1 %v4637_v22  ;;  %v4725_v21 = vld [vmem:[%s6552_s1 + $0x280] ss:$8 sps:$4 sm:$0xff]  }
  0x79   :  { %3017 = vmatprep.subr.bf16.mxu0 %v4641_v23  ;;  %v4728_v22 = vld [vmem:[%s6553_s0 + $0x248] ss:$68 sps:$4 sm:$0xff]  }
  0x7a   :  { %2527 = vmatmul.mubr.bf16.gmra.mrb[28].mxu1 %v4634_v24  ;;  %v4729_v23 = vld [vmem:[%s6552_s1 + $0x680] ss:$8 sps:$4 sm:$0xff]   ;;  %v4734_v24 = vld [vmem:[%s6552_s1 + $0x294] ss:$8 sps:$4 sm:$0xff]  }
  0x7b   :  { %2979 = vmatmul.mubr.bf16.gmra.mrb[28].mxu0 %v4638_v26  ;;  %2566 = vmatpush1.bf16.msra.mxu1 %v4635_v25  ;;  %v4737_v25 = vld [vmem:[%s6552_s1 + $0x694] ss:$8 sps:$4 sm:$0xff]  }
  0x7c   :  { %3018 = vmatpush1.bf16.msra.mxu0 %v4639_v27  ;;  %2567 = vmatprep.subr.bf16.mxu1 %v4644_v28  ;;  %v4738_v26 = vld [vmem:[%s6553_s0 + $0x2b4] ss:$68 sps:$4 sm:$0xff]  }
  0x7d   :  { %3019 = vmatprep.subr.bf16.mxu0 %v4647_v29  ;;  %2569 = vmatprep.mubr.bf16.mxu1 %v4650_v30  ;;  %v4740_v27 = vld [vmem:[%s6553_s0 + $0x2d4] ss:$68 sps:$4 sm:$0xff]   ;;  %v4745_v30 = vld [vmem:[%s6552_s1 + $0x2a4] ss:$8 sps:$4 sm:$0xff]  }
  0x7e   :  { %3021 = vmatprep.mubr.bf16.mxu0 %v4653_v31  ;;  %v4732_v28 = vld [vmem:[%s6552_s1 + $0x290] ss:$8 sps:$4 sm:$0xff]   ;;  %v4749_v31 = vld [vmem:[%s6552_s1 + $0x6a4] ss:$8 sps:$4 sm:$0xff]  }
  0x7f   :  { %2568 = vmatpush1.bf16.msra.mxu1 %v4642_v32  ;;  %v4735_v29 = vld [vmem:[%s6552_s1 + $0x690] ss:$8 sps:$4 sm:$0xff]  }
  0x80   :  { %3020 = vmatpush1.bf16.msra.mxu0 %v4645_v33  ;;  %2650 = vmatprep.subr.bf16.mxu1 %v4656_v34  ;;  %v4742_v32 = vld [vmem:[%s6553_s0 + $0x2b0] ss:$68 sps:$4 sm:$0xff]   ;;  %v4743_v33 = vld [vmem:[%s6552_s1 + $0x2a0] ss:$8 sps:$4 sm:$0xff]  }
  0x81   :  { %3102 = vmatprep.subr.bf16.mxu0 %v4659_v35  ;;  %v4746_v34 = vld [vmem:[%s6553_s0 + $0x2d0] ss:$68 sps:$4 sm:$0xff]   ;;  %v4747_v35 = vld [vmem:[%s6552_s1 + $0x6a0] ss:$8 sps:$4 sm:$0xff]  }
  0x82   :  { %2570 = vmatmul.mubr.bf16.vlgmr.msra.gmra.mrb[0].mxu1 %v4648_v36  ;;  %v4752_v36 = vld [vmem:[%s6552_s1 + $0x2b4] ss:$8 sps:$4 sm:$0xff]  }
  0x83   :  { %3022 = vmatmul.mubr.bf16.vlgmr.msra.gmra.mrb[0].mxu0 %v4651_v37  ;;  %2651 = vmatpush1.bf16.msra.mxu1 %v4654_v38  ;;  %v4755_v37 = vld [vmem:[%s6552_s1 + $0x6b4] ss:$8 sps:$4 sm:$0xff]  }
  0x84   :  { %3103 = vmatpush1.bf16.msra.mxu0 %v4657_v39  ;;  %2652 = vmatprep.subr.bf16.mxu1 %v4662_v40  ;;  %v4756_v38 = vld [vmem:[%s6553_s0 + $0x33c] ss:$68 sps:$4 sm:$0xff]   ;;  %v4750_v40 = vld [vmem:[%s6552_s1 + $0x2b0] ss:$8 sps:$4 sm:$0xff]  }
  0x85   :  { %3104 = vmatprep.subr.bf16.mxu0 %v4665_v41  ;;  %2579 = vmatprep.mubr.bf16.mxu1 %v4666_v42  ;;  %v4758_v39 = vld [vmem:[%s6553_s0 + $0x35c] ss:$68 sps:$4 sm:$0xff]   ;;  %v4753_v41 = vld [vmem:[%s6552_s1 + $0x6b0] ss:$8 sps:$4 sm:$0xff]   ;;  %v4763_v42 = vld [vmem:[%s6552_s1 + $0x2c4] ss:$8 sps:$4 sm:$0xff]  }
  0x86   :  { %3031 = vmatprep.mubr.bf16.mxu0 %v4668_v43  ;;  %v4767_v43 = vld [vmem:[%s6552_s1 + $0x6c4] ss:$8 sps:$4 sm:$0xff]  }
  0x87   :  { %2653 = vmatpush1.bf16.msra.mxu1 %v4660_v44  ;;  %v4760_v44 = vld [vmem:[%s6553_s0 + $0x338] ss:$68 sps:$4 sm:$0xff]  }
  0x88   :  { %3105 = vmatpush1.bf16.msra.mxu0 %v4663_v45  ;;  %2654 = vmatprep.subr.bf16.mxu1 %v4673_v46  ;;  %v4761_v45 = vld [vmem:[%s6552_s1 + $0x2c0] ss:$8 sps:$4 sm:$0xff]   ;;  %v4764_v46 = vld [vmem:[%s6553_s0 + $0x358] ss:$68 sps:$4 sm:$0xff]  }
  0x89   :  { %3106 = vmatprep.subr.bf16.mxu0 %v4677_v47  ;;  %v4765_v47 = vld [vmem:[%s6552_s1 + $0x6c0] ss:$8 sps:$4 sm:$0xff]  }
  0x8a   :  { %2580 = vmatmul.mubr.bf16.gmra.mrb[4].mxu1 %v4670_v48  ;;  %v4770_v48 = vld [vmem:[%s6552_s1 + $0x2d4] ss:$8 sps:$4 sm:$0xff]  }
  0x8b   :  { %3032 = vmatmul.mubr.bf16.gmra.mrb[4].mxu0 %v4674_v50  ;;  %2655 = vmatpush1.bf16.msra.mxu1 %v4671_v49  ;;  %v4773_v49 = vld [vmem:[%s6552_s1 + $0x6d4] ss:$8 sps:$4 sm:$0xff]   ;;  %v4774_v50 = vld [vmem:[%s6553_s0 + $0x3c4] ss:$68 sps:$4 sm:$0xff]  }
  0x8c   :  { %3107 = vmatpush1.bf16.msra.mxu0 %v4675_v51  ;;  %2656 = vmatprep.subr.bf16.mxu1 %v4680_v52  ;;  %v4776_v51 = vld [vmem:[%s6553_s0 + $0x3e4] ss:$68 sps:$4 sm:$0xff]   ;;  %v4768_v52 = vld [vmem:[%s6552_s1 + $0x2d0] ss:$8 sps:$4 sm:$0xff]  }
  0x8d   :  { %3108 = vmatprep.subr.bf16.mxu0 %v4683_v53  ;;  %2589 = vmatprep.mubr.bf16.mxu1 %v4684_v54  ;;  %v4771_v53 = vld [vmem:[%s6552_s1 + $0x6d0] ss:$8 sps:$4 sm:$0xff]   ;;  %v4781_v54 = vld [vmem:[%s6552_s1 + $0x2e4] ss:$8 sps:$4 sm:$0xff]  }
  0x8e   :  { %3041 = vmatprep.mubr.bf16.mxu0 %v4686_v55  ;;  %v4785_v55 = vld [vmem:[%s6552_s1 + $0x6e4] ss:$8 sps:$4 sm:$0xff]  }
  0x8f   :  { %2657 = vmatpush1.bf16.msra.mxu1 %v4678_v56  ;;  %v4778_v56 = vld [vmem:[%s6553_s0 + $0x3c0] ss:$68 sps:$4 sm:$0xff]  }
  0x90   :  { %3109 = vmatpush1.bf16.msra.mxu0 %v4681_v57  ;;  %2658 = vmatprep.subr.bf16.mxu1 %v4691_v58  ;;  %v4779_v57 = vld [vmem:[%s6552_s1 + $0x2e0] ss:$8 sps:$4 sm:$0xff]  }
  0x91   :  { %3110 = vmatprep.subr.bf16.mxu0 %v4695_v59  ;;  %v4782_v58 = vld [vmem:[%s6553_s0 + $0x3e0] ss:$68 sps:$4 sm:$0xff]  }
  0x92   :  { %2590 = vmatmul.mubr.bf16.gmra.mrb[8].mxu1 %v4688_v60  ;;  %v4783_v59 = vld [vmem:[%s6552_s1 + $0x6e0] ss:$8 sps:$4 sm:$0xff]   ;;  %v4788_v60 = vld [vmem:[%s6552_s1 + $0x2f4] ss:$8 sps:$4 sm:$0xff]  }
  0x93   :  { %3042 = vmatmul.mubr.bf16.gmra.mrb[8].mxu0 %v4692_v62  ;;  %2659 = vmatpush1.bf16.msra.mxu1 %v4689_v61  ;;  %v4791_v61 = vld [vmem:[%s6552_s1 + $0x6f4] ss:$8 sps:$4 sm:$0xff]  }
  0x94   :  { %3111 = vmatpush1.bf16.msra.mxu0 %v4693_v63  ;;  %2660 = vmatprep.subr.bf16.mxu1 %v4698_v0  ;;  %v4794_v62 = vld [vmem:[%s6553_s0 + $0x14] ss:$68 sps:$4 sm:$0xff]  }
  0x95   :  { %3112 = vmatprep.subr.bf16.mxu0 %v4701_v1  ;;  %2599 = vmatprep.mubr.bf16.mxu1 %v4702_v2  ;;  %v4797_v63 = vld [vmem:[%s6553_s0 + $0x34] ss:$68 sps:$4 sm:$0xff]   ;;  %v4800_v2 = vld [vmem:[%s6552_s1 + $0x304] ss:$8 sps:$4 sm:$0xff]  }
  0x96   :  { %3051 = vmatprep.mubr.bf16.mxu0 %v4704_v3  ;;  %v4786_v0 = vld [vmem:[%s6552_s1 + $0x2f0] ss:$8 sps:$4 sm:$0xff]   ;;  %v5796_v3 = vld [vmem:[%s6552_s1 + $0x704] ss:$8 sps:$4 sm:$0xff]  }
  0x97   :  { %2661 = vmatpush1.bf16.msra.mxu1 %v4696_v4  ;;  %v4789_v1 = vld [vmem:[%s6552_s1 + $0x6f0] ss:$8 sps:$4 sm:$0xff]  }
  0x98   :  { %3113 = vmatpush1.bf16.msra.mxu0 %v4699_v5  ;;  %2662 = vmatprep.subr.bf16.mxu1 %v4709_v6  ;;  %v4792_v4 = vld [vmem:[%s6553_s0 + $0x10] ss:$68 sps:$4 sm:$0xff]   ;;  %v4798_v6 = vld [vmem:[%s6552_s1 + $0x300] ss:$8 sps:$4 sm:$0xff]  }
  0x99   :  { %3114 = vmatprep.subr.bf16.mxu0 %v4713_v7  ;;  %v4795_v5 = vld [vmem:[%s6553_s0 + $0x30] ss:$68 sps:$4 sm:$0xff]   ;;  %v5810_v7 = vld [vmem:[%s6552_s1 + $0x700] ss:$8 sps:$4 sm:$0xff]  }
  0x9a   :  { %2600 = vmatmul.mubr.bf16.gmra.mrb[12].mxu1 %v4706_v8  ;;  %v4806_v8 = vld [vmem:[%s6552_s1 + $0x314] ss:$8 sps:$4 sm:$0xff]  }
  0x9b   :  { %3052 = vmatmul.mubr.bf16.gmra.mrb[12].mxu0 %v4710_v10  ;;  %2663 = vmatpush1.bf16.msra.mxu1 %v4707_v9  ;;  %v5819_v9 = vld [vmem:[%s6552_s1 + $0x714] ss:$8 sps:$4 sm:$0xff]  }
  0x9c   :  { %3115 = vmatpush1.bf16.msra.mxu0 %v4711_v11  ;;  %2664 = vmatprep.subr.bf16.mxu1 %v4716_v12  ;;  %v4810_v10 = vld [vmem:[%s6553_s0 + $0x9c] ss:$68 sps:$4 sm:$0xff]   ;;  %v4804_v12 = vld [vmem:[%s6552_s1 + $0x310] ss:$8 sps:$4 sm:$0xff]  }
  0x9d   :  { %3116 = vmatprep.subr.bf16.mxu0 %v4719_v13  ;;  %2609 = vmatprep.mubr.bf16.mxu1 %v4720_v14  ;;  %v4812_v11 = vld [vmem:[%s6553_s0 + $0xbc] ss:$68 sps:$4 sm:$0xff]   ;;  %v5834_v13 = vld [vmem:[%s6552_s1 + $0x710] ss:$8 sps:$4 sm:$0xff]   ;;  %v4817_v14 = vld [vmem:[%s6552_s1 + $0x324] ss:$8 sps:$4 sm:$0xff]  }
  0x9e   :  { %3061 = vmatprep.mubr.bf16.mxu0 %v4722_v15  ;;  %v5843_v15 = vld [vmem:[%s6552_s1 + $0x724] ss:$8 sps:$4 sm:$0xff]  }
  0x9f   :  { %2665 = vmatpush1.bf16.msra.mxu1 %v4714_v16  ;;  %v4814_v16 = vld [vmem:[%s6553_s0 + $0x98] ss:$68 sps:$4 sm:$0xff]  }
  0xa0   :  { %3117 = vmatpush1.bf16.msra.mxu0 %v4717_v17  ;;  %2666 = vmatprep.subr.bf16.mxu1 %v4727_v18  ;;  %v4815_v17 = vld [vmem:[%s6552_s1 + $0x320] ss:$8 sps:$4 sm:$0xff]   ;;  %v4818_v18 = vld [vmem:[%s6553_s0 + $0xb8] ss:$68 sps:$4 sm:$0xff]  }
  0xa1   :  { %3118 = vmatprep.subr.bf16.mxu0 %v4731_v19  ;;  %v5857_v19 = vld [vmem:[%s6552_s1 + $0x720] ss:$8 sps:$4 sm:$0xff]  }
  0xa2   :  { %2610 = vmatmul.mubr.bf16.gmra.mrb[16].mxu1 %v4724_v20  ;;  %v4824_v20 = vld [vmem:[%s6552_s1 + $0x334] ss:$8 sps:$4 sm:$0xff]  }
  0xa3   :  { %3062 = vmatmul.mubr.bf16.gmra.mrb[16].mxu0 %v4728_v22  ;;  %2667 = vmatpush1.bf16.msra.mxu1 %v4725_v21  ;;  %v5867_v21 = vld [vmem:[%s6552_s1 + $0x734] ss:$8 sps:$4 sm:$0xff]   ;;  %v4828_v22 = vld [vmem:[%s6553_s0 + $0x124] ss:$68 sps:$4 sm:$0xff]  }
  0xa4   :  { %3119 = vmatpush1.bf16.msra.mxu0 %v4729_v23  ;;  %2668 = vmatprep.subr.bf16.mxu1 %v4734_v24  ;;  %v4830_v23 = vld [vmem:[%s6553_s0 + $0x144] ss:$68 sps:$4 sm:$0xff]   ;;  %v4822_v24 = vld [vmem:[%s6552_s1 + $0x330] ss:$8 sps:$4 sm:$0xff]  }
  0xa5   :  { %3120 = vmatprep.subr.bf16.mxu0 %v4737_v25  ;;  %2619 = vmatprep.mubr.bf16.mxu1 %v4738_v26  ;;  %v5882_v25 = vld [vmem:[%s6552_s1 + $0x730] ss:$8 sps:$4 sm:$0xff]   ;;  %v4835_v26 = vld [vmem:[%s6552_s1 + $0x344] ss:$8 sps:$4 sm:$0xff]  }
  0xa6   :  { %3071 = vmatprep.mubr.bf16.mxu0 %v4740_v27  ;;  %v5891_v27 = vld [vmem:[%s6552_s1 + $0x744] ss:$8 sps:$4 sm:$0xff]  }
  0xa7   :  { %2669 = vmatpush1.bf16.msra.mxu1 %v4732_v28  ;;  %v4832_v28 = vld [vmem:[%s6553_s0 + $0x120] ss:$68 sps:$4 sm:$0xff]  }
  0xa8   :  { %3121 = vmatpush1.bf16.msra.mxu0 %v4735_v29  ;;  %2670 = vmatprep.subr.bf16.mxu1 %v4745_v30  ;;  %v4833_v29 = vld [vmem:[%s6552_s1 + $0x340] ss:$8 sps:$4 sm:$0xff]  }
  0xa9   :  { %3122 = vmatprep.subr.bf16.mxu0 %v4749_v31  ;;  %v4836_v30 = vld [vmem:[%s6553_s0 + $0x140] ss:$68 sps:$4 sm:$0xff]  }
  0xaa   :  { %2620 = vmatmul.mubr.bf16.gmra.mrb[20].mxu1 %v4742_v32  ;;  %v5905_v31 = vld [vmem:[%s6552_s1 + $0x740] ss:$8 sps:$4 sm:$0xff]   ;;  %v4842_v32 = vld [vmem:[%s6552_s1 + $0x354] ss:$8 sps:$4 sm:$0xff]  }
  0xab   :  { %3072 = vmatmul.mubr.bf16.gmra.mrb[20].mxu0 %v4746_v34  ;;  %2671 = vmatpush1.bf16.msra.mxu1 %v4743_v33  ;;  %v5915_v33 = vld [vmem:[%s6552_s1 + $0x754] ss:$8 sps:$4 sm:$0xff]   ;;  %v4846_v34 = vld [vmem:[%s6553_s0 + $0x1ac] ss:$68 sps:$4 sm:$0xff]  }
  0xac   :  { %3123 = vmatpush1.bf16.msra.mxu0 %v4747_v35  ;;  %2672 = vmatprep.subr.bf16.mxu1 %v4752_v36  ;;  %v4848_v35 = vld [vmem:[%s6553_s0 + $0x1cc] ss:$68 sps:$4 sm:$0xff]  }
  0xad   :  { %3124 = vmatprep.subr.bf16.mxu0 %v4755_v37  ;;  %2629 = vmatprep.mubr.bf16.mxu1 %v4756_v38  ;;  %v4840_v36 = vld [vmem:[%s6552_s1 + $0x350] ss:$8 sps:$4 sm:$0xff]   ;;  %v4853_v38 = vld [vmem:[%s6552_s1 + $0x364] ss:$8 sps:$4 sm:$0xff]  }
  0xae   :  { %3081 = vmatprep.mubr.bf16.mxu0 %v4758_v39  ;;  %v5930_v37 = vld [vmem:[%s6552_s1 + $0x750] ss:$8 sps:$4 sm:$0xff]   ;;  %v5939_v39 = vld [vmem:[%s6552_s1 + $0x764] ss:$8 sps:$4 sm:$0xff]  }
  0xaf   :  { %2673 = vmatpush1.bf16.msra.mxu1 %v4750_v40  ;;  %v4850_v40 = vld [vmem:[%s6553_s0 + $0x1a8] ss:$68 sps:$4 sm:$0xff]  }
  0xb0   :  { %3125 = vmatpush1.bf16.msra.mxu0 %v4753_v41  ;;  %2674 = vmatprep.subr.bf16.mxu1 %v4763_v42  ;;  %v4851_v41 = vld [vmem:[%s6552_s1 + $0x360] ss:$8 sps:$4 sm:$0xff]  }
  0xb1   :  { %3126 = vmatprep.subr.bf16.mxu0 %v4767_v43  ;;  %v4854_v42 = vld [vmem:[%s6553_s0 + $0x1c8] ss:$68 sps:$4 sm:$0xff]  }
  0xb2   :  { %2630 = vmatmul.mubr.bf16.gmra.mrb[24].mxu1 %v4760_v44  ;;  %v5953_v43 = vld [vmem:[%s6552_s1 + $0x760] ss:$8 sps:$4 sm:$0xff]   ;;  %v4860_v44 = vld [vmem:[%s6552_s1 + $0x374] ss:$8 sps:$4 sm:$0xff]  }
  0xb3   :  { %3082 = vmatmul.mubr.bf16.gmra.mrb[24].mxu0 %v4764_v46  ;;  %2675 = vmatpush1.bf16.msra.mxu1 %v4761_v45  ;;  %v5963_v45 = vld [vmem:[%s6552_s1 + $0x774] ss:$8 sps:$4 sm:$0xff]  }
  0xb4   :  { %3127 = vmatpush1.bf16.msra.mxu0 %v4765_v47  ;;  %2676 = vmatprep.subr.bf16.mxu1 %v4770_v48  ;;  %v4864_v46 = vld [vmem:[%s6553_s0 + $0x234] ss:$68 sps:$4 sm:$0xff]  }
  0xb5   :  { %3128 = vmatprep.subr.bf16.mxu0 %v4773_v49  ;;  %2639 = vmatprep.mubr.bf16.mxu1 %v4774_v50  ;;  %v4866_v47 = vld [vmem:[%s6553_s0 + $0x254] ss:$68 sps:$4 sm:$0xff]   ;;  %v4871_v50 = vld [vmem:[%s6552_s1 + $0x384] ss:$8 sps:$4 sm:$0xff]  }
  0xb6   :  { %3091 = vmatprep.mubr.bf16.mxu0 %v4776_v51  ;;  %v4858_v48 = vld [vmem:[%s6552_s1 + $0x370] ss:$8 sps:$4 sm:$0xff]   ;;  %v5987_v51 = vld [vmem:[%s6552_s1 + $0x784] ss:$8 sps:$4 sm:$0xff]  }
  0xb7   :  { %2677 = vmatpush1.bf16.msra.mxu1 %v4768_v52  ;;  %v5978_v49 = vld [vmem:[%s6552_s1 + $0x770] ss:$8 sps:$4 sm:$0xff]  }
  0xb8   :  { %3129 = vmatpush1.bf16.msra.mxu0 %v4771_v53  ;;  %2678 = vmatprep.subr.bf16.mxu1 %v4781_v54  ;;  %v4868_v52 = vld [vmem:[%s6553_s0 + $0x230] ss:$68 sps:$4 sm:$0xff]   ;;  %v4869_v53 = vld [vmem:[%s6552_s1 + $0x380] ss:$8 sps:$4 sm:$0xff]  }
  0xb9   :  { %3130 = vmatprep.subr.bf16.mxu0 %v4785_v55  ;;  %v4872_v54 = vld [vmem:[%s6553_s0 + $0x250] ss:$68 sps:$4 sm:$0xff]   ;;  %v6001_v55 = vld [vmem:[%s6552_s1 + $0x780] ss:$8 sps:$4 sm:$0xff]  }
  0xba   :  { %2640 = vmatmul.mubr.bf16.gmra.mrb[28].mxu1 %v4778_v56  ;;  %v4878_v56 = vld [vmem:[%s6552_s1 + $0x394] ss:$8 sps:$4 sm:$0xff]  }
  0xbb   :  { %3092 = vmatmul.mubr.bf16.gmra.mrb[28].mxu0 %v4782_v58  ;;  %2679 = vmatpush1.bf16.msra.mxu1 %v4779_v57  ;;  %v6011_v57 = vld [vmem:[%s6552_s1 + $0x794] ss:$8 sps:$4 sm:$0xff]  }
  0xbc   :  { %3131 = vmatpush1.bf16.msra.mxu0 %v4783_v59  ;;  %2680 = vmatprep.subr.bf16.mxu1 %v4788_v60  ;;  %v4882_v58 = vld [vmem:[%s6553_s0 + $0x2bc] ss:$68 sps:$4 sm:$0xff]   ;;  %v4876_v60 = vld [vmem:[%s6552_s1 + $0x390] ss:$8 sps:$4 sm:$0xff]  }
  0xbd   :  { %3132 = vmatprep.subr.bf16.mxu0 %v4791_v61  ;;  %2682 = vmatprep.mubr.bf16.mxu1 %v4794_v62  ;;  %v4884_v59 = vld [vmem:[%s6553_s0 + $0x2dc] ss:$68 sps:$4 sm:$0xff]   ;;  %v6026_v61 = vld [vmem:[%s6552_s1 + $0x790] ss:$8 sps:$4 sm:$0xff]   ;;  %v4889_v62 = vld [vmem:[%s6552_s1 + $0x3a4] ss:$8 sps:$4 sm:$0xff]  }
  0xbe   :  { %3134 = vmatprep.mubr.bf16.mxu0 %v4797_v63  ;;  %v6035_v63 = vld [vmem:[%s6552_s1 + $0x7a4] ss:$8 sps:$4 sm:$0xff]  }
  0xbf   :  { %2681 = vmatpush1.bf16.msra.mxu1 %v4786_v0  ;;  %v4886_v0 = vld [vmem:[%s6553_s0 + $0x2b8] ss:$68 sps:$4 sm:$0xff]  }
  0xc0   :  { %3133 = vmatpush1.bf16.msra.mxu0 %v4789_v1  ;;  %2763 = vmatprep.subr.bf16.mxu1 %v4800_v2  ;;  %v4887_v1 = vld [vmem:[%s6552_s1 + $0x3a0] ss:$8 sps:$4 sm:$0xff]   ;;  %v4890_v2 = vld [vmem:[%s6553_s0 + $0x2d8] ss:$68 sps:$4 sm:$0xff]  }
  0xc1   :  { %3215 = vmatprep.subr.bf16.mxu0 %v5796_v3 }
  0xc2   :  { %2683 = vmatmul.mubr.bf16.vlgmr.msra.gmra.mrb[0].mxu1 %v4792_v4  ;;  %v6049_v4 = vld [vmem:[%s6552_s1 + $0x7a0] ss:$8 sps:$4 sm:$0xff]  }
  0xc3   :  { %3135 = vmatmul.mubr.bf16.vlgmr.msra.gmra.mrb[0].mxu0 %v4795_v5  ;;  %2764 = vmatpush1.bf16.msra.mxu1 %v4798_v6  ;;  %v4896_v5 = vld [vmem:[%s6552_s1 + $0x3b4] ss:$8 sps:$4 sm:$0xff]  }
  0xc4   :  { %3216 = vmatpush1.bf16.msra.mxu0 %v5810_v7  ;;  %2765 = vmatprep.subr.bf16.mxu1 %v4806_v8  ;;  %v6059_v6 = vld [vmem:[%s6552_s1 + $0x7b4] ss:$8 sps:$4 sm:$0xff]   ;;  %v4900_v8 = vld [vmem:[%s6553_s0 + $0x344] ss:$68 sps:$4 sm:$0xff]  }
  0xc5   :  { %3217 = vmatprep.subr.bf16.mxu0 %v5819_v9  ;;  %2692 = vmatprep.mubr.bf16.mxu1 %v4810_v10  ;;  %v4902_v10 = vld [vmem:[%s6553_s0 + $0x364] ss:$68 sps:$4 sm:$0xff]  }
  0xc6   :  { %3144 = vmatprep.mubr.bf16.mxu0 %v4812_v11  ;;  %v4894_v11 = vld [vmem:[%s6552_s1 + $0x3b0] ss:$8 sps:$4 sm:$0xff]  }
  0xc7   :  { %2766 = vmatpush1.bf16.msra.mxu1 %v4804_v12  ;;  %v6073_v12 = vld [vmem:[%s6552_s1 + $0x7b0] ss:$8 sps:$4 sm:$0xff]  }
  0xc8   :  { %3218 = vmatpush1.bf16.msra.mxu0 %v5834_v13  ;;  %2767 = vmatprep.subr.bf16.mxu1 %v4817_v14  ;;  %v4907_v14 = vld [vmem:[%s6552_s1 + $0x3c4] ss:$8 sps:$4 sm:$0xff]  }
  0xc9   :  { %3219 = vmatprep.subr.bf16.mxu0 %v5843_v15 }
  0xca   :  { %2693 = vmatmul.mubr.bf16.gmra.mrb[4].mxu1 %v4814_v16  ;;  %v4904_v16 = vld [vmem:[%s6553_s0 + $0x340] ss:$68 sps:$4 sm:$0xff]  }
  0xcb   :  { %3145 = vmatmul.mubr.bf16.gmra.mrb[4].mxu0 %v4818_v18  ;;  %2768 = vmatpush1.bf16.msra.mxu1 %v4815_v17  ;;  %v6086_v17 = vld [vmem:[%s6552_s1 + $0x7c4] ss:$8 sps:$4 sm:$0xff]   ;;  %v4905_v18 = vld [vmem:[%s6552_s1 + $0x3c0] ss:$8 sps:$4 sm:$0xff]  }
  0xcc   :  { %3220 = vmatpush1.bf16.msra.mxu0 %v5857_v19  ;;  %2769 = vmatprep.subr.bf16.mxu1 %v4824_v20  ;;  %v4908_v20 = vld [vmem:[%s6553_s0 + $0x360] ss:$68 sps:$4 sm:$0xff]  }
  0xcd   :  { %3221 = vmatprep.subr.bf16.mxu0 %v5867_v21  ;;  %2702 = vmatprep.mubr.bf16.mxu1 %v4828_v22  ;;  %v6097_v22 = vld [vmem:[%s6552_s1 + $0x7c0] ss:$8 sps:$4 sm:$0xff]  }
  0xce   :  { %3154 = vmatprep.mubr.bf16.mxu0 %v4830_v23  ;;  %v4914_v23 = vld [vmem:[%s6552_s1 + $0x3d4] ss:$8 sps:$4 sm:$0xff]  }
  0xcf   :  { %2770 = vmatpush1.bf16.msra.mxu1 %v4822_v24  ;;  %v6106_v24 = vld [vmem:[%s6552_s1 + $0x7d4] ss:$8 sps:$4 sm:$0xff]  }
  0xd0   :  { %3222 = vmatpush1.bf16.msra.mxu0 %v5882_v25  ;;  %2771 = vmatprep.subr.bf16.mxu1 %v4835_v26  ;;  %v4918_v26 = vld [vmem:[%s6553_s0 + $0x3cc] ss:$68 sps:$4 sm:$0xff]  }
  0xd1   :  { %3223 = vmatprep.subr.bf16.mxu0 %v5891_v27 }
  0xd2   :  { %2703 = vmatmul.mubr.bf16.gmra.mrb[8].mxu1 %v4832_v28  ;;  %v4920_v28 = vld [vmem:[%s6553_s0 + $0x3ec] ss:$68 sps:$4 sm:$0xff]  }
  0xd3   :  { %3155 = vmatmul.mubr.bf16.gmra.mrb[8].mxu0 %v4836_v30  ;;  %2772 = vmatpush1.bf16.msra.mxu1 %v4833_v29  ;;  %v4912_v29 = vld [vmem:[%s6552_s1 + $0x3d0] ss:$8 sps:$4 sm:$0xff]  }
  0xd4   :  { %3224 = vmatpush1.bf16.msra.mxu0 %v5905_v31  ;;  %2773 = vmatprep.subr.bf16.mxu1 %v4842_v32  ;;  %v6121_v30 = vld [vmem:[%s6552_s1 + $0x7d0] ss:$8 sps:$4 sm:$0xff]   ;;  %v4925_v32 = vld [vmem:[%s6552_s1 + $0x3e4] ss:$8 sps:$4 sm:$0xff]  }
  0xd5   :  { %3225 = vmatprep.subr.bf16.mxu0 %v5915_v33  ;;  %2712 = vmatprep.mubr.bf16.mxu1 %v4846_v34  ;;  %v4922_v34 = vld [vmem:[%s6553_s0 + $0x3c8] ss:$68 sps:$4 sm:$0xff]  }
  0xd6   :  { %3164 = vmatprep.mubr.bf16.mxu0 %v4848_v35  ;;  %v6134_v35 = vld [vmem:[%s6552_s1 + $0x7e4] ss:$8 sps:$4 sm:$0xff]  }
  0xd7   :  { %2774 = vmatpush1.bf16.msra.mxu1 %v4840_v36  ;;  %v4923_v36 = vld [vmem:[%s6552_s1 + $0x3e0] ss:$8 sps:$4 sm:$0xff]  }
  0xd8   :  { %3226 = vmatpush1.bf16.msra.mxu0 %v5930_v37  ;;  %2775 = vmatprep.subr.bf16.mxu1 %v4853_v38  ;;  %v4926_v38 = vld [vmem:[%s6553_s0 + $0x3e8] ss:$68 sps:$4 sm:$0xff]  }
  0xd9   :  { %3227 = vmatprep.subr.bf16.mxu0 %v5939_v39 }
  0xda   :  { %2713 = vmatmul.mubr.bf16.gmra.mrb[12].mxu1 %v4850_v40  ;;  %v6145_v40 = vld [vmem:[%s6552_s1 + $0x7e0] ss:$8 sps:$4 sm:$0xff]  }
  0xdb   :  { %3165 = vmatmul.mubr.bf16.gmra.mrb[12].mxu0 %v4854_v42  ;;  %2776 = vmatpush1.bf16.msra.mxu1 %v4851_v41  ;;  %v4932_v41 = vld [vmem:[%s6552_s1 + $0x3f4] ss:$8 sps:$4 sm:$0xff]  }
  0xdc   :  { %3228 = vmatpush1.bf16.msra.mxu0 %v5953_v43  ;;  %2777 = vmatprep.subr.bf16.mxu1 %v4860_v44  ;;  %v6154_v42 = vld [vmem:[%s6552_s1 + $0x7f4] ss:$8 sps:$4 sm:$0xff]  }
  0xdd   :  { %3229 = vmatprep.subr.bf16.mxu0 %v5963_v45  ;;  %2722 = vmatprep.mubr.bf16.mxu1 %v4864_v46  ;;  %v4938_v44 = vld [vmem:[%s6553_s0 + $0x1c] ss:$68 sps:$4 sm:$0xff]  }
  0xde   :  { %3174 = vmatprep.mubr.bf16.mxu0 %v4866_v47  ;;  %v4941_v46 = vld [vmem:[%s6553_s0 + $0x3c] ss:$68 sps:$4 sm:$0xff]   ;;  %v4930_v47 = vld [vmem:[%s6552_s1 + $0x3f0] ss:$8 sps:$4 sm:$0xff]  }
  0xdf   :  { %2778 = vmatpush1.bf16.msra.mxu1 %v4858_v48  ;;  %v6170_v48 = vld [vmem:[%s6552_s1 + $0x7f0] ss:$8 sps:$4 sm:$0xff]  }
  0xe0   :  { %3230 = vmatpush1.bf16.msra.mxu0 %v5978_v49  ;;  %2779 = vmatprep.subr.bf16.mxu1 %v4871_v50  ;;  %v4944_v50 = vld [vmem:[%s6552_s1 + $0x804] ss:$8 sps:$4 sm:$0xff]  }
  0xe1   :  { %3231 = vmatprep.subr.bf16.mxu0 %v5987_v51 }
  0xe2   :  { %2723 = vmatmul.mubr.bf16.gmra.mrb[16].mxu1 %v4868_v52  ;;  %v4936_v52 = vld [vmem:[%s6553_s0 + $0x18] ss:$68 sps:$4 sm:$0xff]  }
  0xe3   :  { %3175 = vmatmul.mubr.bf16.gmra.mrb[16].mxu0 %v4872_v54  ;;  %2780 = vmatpush1.bf16.msra.mxu1 %v4869_v53  ;;  %v4939_v53 = vld [vmem:[%s6553_s0 + $0x38] ss:$68 sps:$4 sm:$0xff]   ;;  %v4942_v54 = vld [vmem:[%s6552_s1 + $0x800] ss:$8 sps:$4 sm:$0xff]  }
  0xe4   :  { %3232 = vmatpush1.bf16.msra.mxu0 %v6001_v55  ;;  %2781 = vmatprep.subr.bf16.mxu1 %v4878_v56  ;;  %v4945_v56 = vld [vmem:[%s6553_s0 + $0xa4] ss:$68 sps:$4 sm:$0xff]  }
  0xe5   :  { %3233 = vmatprep.subr.bf16.mxu0 %v6011_v57  ;;  %2732 = vmatprep.mubr.bf16.mxu1 %v4882_v58  ;;  %v4947_v58 = vld [vmem:[%s6553_s0 + $0xc4] ss:$68 sps:$4 sm:$0xff]  }
  0xe6   :  { %3184 = vmatprep.mubr.bf16.mxu0 %v4884_v59  ;;  %v4950_v59 = vld [vmem:[%s6553_s0 + $0xc0] ss:$68 sps:$4 sm:$0xff]  }
  0xe7   :  { %2782 = vmatpush1.bf16.msra.mxu1 %v4876_v60  ;;  %v4951_v60 = vld [vmem:[%s6553_s0 + $0x12c] ss:$68 sps:$4 sm:$0xff]  }
  0xe8   :  { %3234 = vmatpush1.bf16.msra.mxu0 %v6026_v61  ;;  %2783 = vmatprep.subr.bf16.mxu1 %v4889_v62  ;;  %v4978_v62 = vld [vmem:[%s6553_s0 + $0x1d8] ss:$68 sps:$4 sm:$0xff]  }
  0xe9   :  { %3235 = vmatprep.subr.bf16.mxu0 %v6035_v63 }
  0xea   :  { %2733 = vmatmul.mubr.bf16.gmra.mrb[20].mxu1 %v4886_v0  ;;  %v4979_v0 = vld [vmem:[%s6553_s0 + $0x258] ss:$68 sps:$4 sm:$0xff]  }
  0xeb   :  { %3185 = vmatmul.mubr.bf16.gmra.mrb[20].mxu0 %v4890_v2  ;;  %2784 = vmatpush1.bf16.msra.mxu1 %v4887_v1  ;;  %v4982_v1 = vld [vmem:[%s6553_s0 + $0x260] ss:$68 sps:$4 sm:$0xff]  }
  0xec   :  { %3236 = vmatpush1.bf16.msra.mxu0 %v6049_v4  ;;  %2785 = vmatprep.subr.bf16.mxu1 %v4896_v5  ;;  %v4983_v2 = vld [vmem:[%s6553_s0 + $0x2e4] ss:$68 sps:$4 sm:$0xff]  }
  0xed   :  { %3237 = vmatprep.subr.bf16.mxu0 %v6059_v6  ;;  %2742 = vmatprep.mubr.bf16.mxu1 %v4900_v8  ;;  %v4986_v5 = vld [vmem:[%s6553_s0 + $0x2e8] ss:$68 sps:$4 sm:$0xff]  }
  0xee   :  { %3194 = vmatprep.mubr.bf16.mxu0 %v4902_v10  ;;  %v4989_v8 = vld [vmem:[%s6553_s0 + $0x368] ss:$68 sps:$4 sm:$0xff]   ;;  %v4990_v10 = vld [vmem:[%s6553_s0 + $0x370] ss:$68 sps:$4 sm:$0xff]  }
  0xef   :  { %2786 = vmatpush1.bf16.msra.mxu1 %v4894_v11  ;;  %v4991_v11 = vld [vmem:[%s6553_s0 + $0x3f4] ss:$68 sps:$4 sm:$0xff]  }
  0xf0   :  { %3238 = vmatpush1.bf16.msra.mxu0 %v6073_v12  ;;  %2787 = vmatprep.subr.bf16.mxu1 %v4907_v14  ;;  %v4994_v14 = vld [vmem:[%s6553_s0 + $0x3f8] ss:$68 sps:$4 sm:$0xff]  }
  0xf1   :  { %3239 = vmatprep.subr.bf16.mxu0 %v6086_v17 }
  0xf2   :  { %2743 = vmatmul.mubr.bf16.gmra.mrb[24].mxu1 %v4904_v16 }
  0xf3   :  { %3195 = vmatmul.mubr.bf16.gmra.mrb[24].mxu0 %v4908_v20  ;;  %2788 = vmatpush1.bf16.msra.mxu1 %v4905_v18 }
  0xf4   :  { %3240 = vmatpush1.bf16.msra.mxu0 %v6097_v22  ;;  %2789 = vmatprep.subr.bf16.mxu1 %v4914_v23 }
  0xf5   :  { %3241 = vmatprep.subr.bf16.mxu0 %v6106_v24  ;;  %2752 = vmatprep.mubr.bf16.mxu1 %v4918_v26 }
  0xf6   :  { %3204 = vmatprep.mubr.bf16.mxu0 %v4920_v28 }
  0xf7   :  { %2790 = vmatpush1.bf16.msra.mxu1 %v4912_v29 }
  0xf8   :  { %3242 = vmatpush1.bf16.msra.mxu0 %v6121_v30  ;;  %2791 = vmatprep.subr.bf16.mxu1 %v4925_v32 }
  0xf9   :  { %3243 = vmatprep.subr.bf16.mxu0 %v6134_v35 }
  0xfa   :  { %2753 = vmatmul.mubr.bf16.gmra.mrb[28].mxu1 %v4922_v34 }
  0xfb   :  { %3205 = vmatmul.mubr.bf16.gmra.mrb[28].mxu0 %v4926_v38  ;;  %2792 = vmatpush1.bf16.msra.mxu1 %v4923_v36 }
  0xfc   :  { %3244 = vmatpush1.bf16.msra.mxu0 %v6145_v40  ;;  %2793 = vmatprep.subr.bf16.mxu1 %v4932_v41 }
  0xfd   :  { %3245 = vmatprep.subr.bf16.mxu0 %v6154_v42  ;;  %2795 = vmatprep.mubr.bf16.mxu1 %v4938_v44 }
  0xfe   :  { %3247 = vmatprep.mubr.bf16.mxu0 %v4941_v46 }
  0xff   :  { %2794 = vmatpush1.bf16.msra.mxu1 %v4930_v47 }
 0x100   :  { %3246 = vmatpush1.bf16.msra.mxu0 %v6170_v48  ;;  %4087 = vmatprep.subr.bf16.mxu1 %v5796_v3  ;;  %v4949_v3 = vld [vmem:[%s6553_s0 + $0xa0] ss:$68 sps:$4 sm:$0xff]  }
 0x101   :  { %3328 = vmatprep.subr.bf16.mxu0 %v4944_v50 }
 0x102   :  { %2796 = vmatmul.mubr.bf16.vlgmr.msra.gmra.mrb[0].mxu1 %v4936_v52  ;;  %v419_v52 = vlaneseq }
 0x103   :  { %3248 = vmatmul.mubr.bf16.vlgmr.msra.gmra.mrb[0].mxu0 %v4939_v53  ;;  %4103 = vmatpush1.bf16.msra.mxu1 %v5810_v7  ;;  %v4953_v7 = vld [vmem:[%s6553_s0 + $0x14c] ss:$68 sps:$4 sm:$0xff]  }
 0x104   :  { %3329 = vmatpush1.bf16.msra.mxu0 %v4942_v54  ;;  %4088 = vmatprep.subr.bf16.mxu1 %v5819_v9  ;;  %v4955_v9 = vld [vmem:[%s6553_s0 + $0x128] ss:$68 sps:$4 sm:$0xff]  }
 0x105   :  { %2805 = vmatprep.mubr.bf16.mxu1 %v4945_v56  ;;  %3257 = vmatprep.mubr.bf16.mxu0 %v4947_v58  ;;  %v420_v58 = vshrl.u32 %v419_v52, 7 }
 0x107   :  { %4104 = vmatpush1.bf16.msra.mxu1 %v5834_v13  ;;  %v4956_v13 = vld [vmem:[%s6553_s0 + $0x148] ss:$68 sps:$4 sm:$0xff]  }
 0x108   :  { %4089 = vmatprep.subr.bf16.mxu1 %v5843_v15  ;;  %v4957_v15 = vld [vmem:[%s6553_s0 + $0x1b4] ss:$68 sps:$4 sm:$0xff]  }
 0x10a   :  { %2806 = vmatmul.mubr.bf16.gmra.mrb[4].mxu1 %v4949_v3 }
 0x10b   :  { %3258 = vmatmul.mubr.bf16.gmra.mrb[4].mxu0 %v4950_v59  ;;  %4105 = vmatpush1.bf16.msra.mxu1 %v5857_v19  ;;  %v4959_v19 = vld [vmem:[%s6553_s0 + $0x1d4] ss:$68 sps:$4 sm:$0xff]   ;;  %v421_v59 = vsub.s32 0, %v420_v58 }
 0x10c   :  { %2815 = vmatprep.mubr.bf16.mxu1 %v4951_v60  ;;  %4090 = vmatprep.subr.bf16.mxu1 %v5867_v21  ;;  %v4961_v21 = vld [vmem:[%s6553_s0 + $0x1b0] ss:$68 sps:$4 sm:$0xff]   ;;  %v417_v60 = vld [vmem:[%s6554_s2] sm:$0x3] }
 0x10d   :  { %3267 = vmatprep.mubr.bf16.mxu0 %v4953_v7  ;;  %v425_v7 = vsub.s32 1, %v420_v58 }
 0x10f   :  { %4106 = vmatpush1.bf16.msra.mxu1 %v5882_v25  ;;  %v4962_v25 = vld [vmem:[%s6553_s0 + $0x1d0] ss:$68 sps:$4 sm:$0xff]  }
 0x110   :  { %4091 = vmatprep.subr.bf16.mxu1 %v5891_v27  ;;  %v4963_v27 = vld [vmem:[%s6553_s0 + $0x23c] ss:$68 sps:$4 sm:$0xff]  }
 0x112   :  { %2816 = vmatmul.mubr.bf16.gmra.mrb[8].mxu1 %v4955_v9 }
 0x113   :  { %3268 = vmatmul.mubr.bf16.gmra.mrb[8].mxu0 %v4956_v13  ;;  %4107 = vmatpush1.bf16.msra.mxu1 %v5905_v31  ;;  %v4995_v31 = vmov 0  }
 0x114   :  { %2825 = vmatprep.mubr.bf16.mxu1 %v4957_v15  ;;  %4092 = vmatprep.subr.bf16.mxu1 %v5915_v33  ;;  %v4965_v33 = vld [vmem:[%s6553_s0 + $0x238] ss:$68 sps:$4 sm:$0xff]  }
 0x115   :  { %3277 = vmatprep.mubr.bf16.mxu0 %v4959_v19  ;;  %v6393_v19 = vrot.slane %v417_v60, %v421_v59 }
 0x117   :  { %4108 = vmatpush1.bf16.msra.mxu1 %v5930_v37  ;;  %v4966_v37 = vld [vmem:[%s6553_s0 + $0x40] ss:$68 sps:$4 sm:$0xff]  }
 0x118   :  { %4093 = vmatprep.subr.bf16.mxu1 %v5939_v39  ;;  %v4967_v39 = vld [vmem:[%s6553_s0 + $0x2c4] ss:$68 sps:$4 sm:$0xff]  }
 0x11a   :  { %2826 = vmatmul.mubr.bf16.gmra.mrb[12].mxu1 %v4961_v21 }
 0x11b   :  { %3278 = vmatmul.mubr.bf16.gmra.mrb[12].mxu0 %v4962_v25  ;;  %4109 = vmatpush1.bf16.msra.mxu1 %v5953_v43  ;;  %v4969_v43 = vld [vmem:[%s6553_s0 + $0x2c0] ss:$68 sps:$4 sm:$0xff]   ;;  %v6397_v25 = vrot.slane %v417_v60, %v425_v7 }
 0x11c   :  { %2835 = vmatprep.mubr.bf16.mxu1 %v4963_v27  ;;  %4094 = vmatprep.subr.bf16.mxu1 %v5963_v45  ;;  %v4970_v45 = vld [vmem:[%s6553_s0 + $0xc8] ss:$68 sps:$4 sm:$0xff]  }
 0x11d   :  { %3360 = vmatprep.mubr.bf16.mxu0 %v4995_v31 }
 0x11f   :  { %4110 = vmatpush1.bf16.msra.mxu1 %v5978_v49  ;;  %v4971_v49 = vld [vmem:[%s6553_s0 + $0x34c] ss:$68 sps:$4 sm:$0xff]  }
 0x120   :  { %4095 = vmatprep.subr.bf16.mxu1 %v5987_v51  ;;  %v4973_v51 = vld [vmem:[%s6553_s0 + $0x348] ss:$68 sps:$4 sm:$0xff]  }
 0x122   :  { %2836 = vmatmul.mubr.bf16.gmra.mrb[16].mxu1 %v4965_v33 }
 0x123   :  { %4047 = vmatmul.mubr.msk.bf16.vlgmr.msra.gmra.mrb[0].mxu0 %vm2399_vm0, %v4966_v37  ;;  %4111 = vmatpush1.bf16.msra.mxu1 %v6001_v55  ;;  %v4974_v55 = vld [vmem:[%s6553_s0 + $0x150] ss:$68 sps:$4 sm:$0xff]  }
 0x124   :  { %2845 = vmatprep.mubr.bf16.mxu1 %v4967_v39  ;;  %4096 = vmatprep.subr.bf16.mxu1 %v6011_v57  ;;  %v4975_v57 = vld [vmem:[%s6553_s0 + $0x3d4] ss:$68 sps:$4 sm:$0xff]  }
 0x125   :  { %3370 = vmatprep.mubr.bf16.mxu0 %v4995_v31 }
 0x127   :  { %4112 = vmatpush1.bf16.msra.mxu1 %v6026_v61  ;;  %v4977_v61 = vld [vmem:[%s6553_s0 + $0x3d0] ss:$68 sps:$4 sm:$0xff]  }
 0x128   :  { %4097 = vmatprep.subr.bf16.mxu1 %v6035_v63  ;;  %v4981_v63 = vld [vmem:[%s6553_s0 + $0x25c] ss:$68 sps:$4 sm:$0xff]  }
 0x12a   :  { %2846 = vmatmul.mubr.bf16.gmra.mrb[20].mxu1 %v4969_v43 }
 0x12b   :  { %4048 = vmatmul.mubr.msk.bf16.gmra.mrb[4].mxu0 %vm2399_vm0, %v4970_v45  ;;  %4113 = vmatpush1.bf16.msra.mxu1 %v6049_v4  ;;  %v4985_v4 = vld [vmem:[%s6553_s0 + $0x2e0] ss:$68 sps:$4 sm:$0xff]  }
 0x12c   :  { %2855 = vmatprep.mubr.bf16.mxu1 %v4971_v49  ;;  %4098 = vmatprep.subr.bf16.mxu1 %v6059_v6  ;;  %v4987_v6 = vld [vmem:[%s6553_s0 + $0x36c] ss:$68 sps:$4 sm:$0xff]  }
 0x12d   :  { %3380 = vmatprep.mubr.bf16.mxu0 %v4995_v31 }
 0x12f   :  { %4114 = vmatpush1.bf16.msra.mxu1 %v6073_v12  ;;  %v4993_v12 = vld [vmem:[%s6553_s0 + $0x3f0] ss:$68 sps:$4 sm:$0xff]  }
 0x130   :  { %4099 = vmatprep.subr.bf16.mxu1 %v6086_v17 }
 0x132   :  { %2856 = vmatmul.mubr.bf16.gmra.mrb[24].mxu1 %v4973_v51 }
 0x133   :  { %4049 = vmatmul.mubr.msk.bf16.gmra.mrb[8].mxu0 %vm2399_vm0, %v4974_v55  ;;  %4115 = vmatpush1.bf16.msra.mxu1 %v6097_v22 }
 0x134   :  { %2865 = vmatprep.mubr.bf16.mxu1 %v4975_v57  ;;  %4100 = vmatprep.subr.bf16.mxu1 %v6106_v24 }
 0x135   :  { %3390 = vmatprep.mubr.bf16.mxu0 %v4995_v31 }
 0x137   :  { %4116 = vmatpush1.bf16.msra.mxu1 %v6121_v30 }
 0x138   :  { %4101 = vmatprep.subr.bf16.mxu1 %v6134_v35 }
 0x13a   :  { %2866 = vmatmul.mubr.bf16.gmra.mrb[28].mxu1 %v4977_v61 }
 0x13b   :  { %4050 = vmatmul.mubr.msk.bf16.gmra.mrb[12].mxu0 %vm2399_vm0, %v4978_v62  ;;  %4117 = vmatpush1.bf16.msra.mxu1 %v6145_v40 }
 0x13c   :  { %3287 = vmatprep.mubr.bf16.mxu1 %v4981_v63  ;;  %4102 = vmatprep.subr.bf16.mxu1 %v6154_v42 }
 0x13d   :  { %3400 = vmatprep.mubr.bf16.mxu0 %v4995_v31 }
 0x13f   :  { %4118 = vmatpush1.bf16.msra.mxu1 %v6170_v48 }
 0x142   :  { %3288 = vmatmul.mubr.bf16.vlgmr.msra.gmra.mrb[32].mxu1 %v4979_v0 }
 0x143   :  { %4051 = vmatmul.mubr.msk.bf16.gmra.mrb[32].mxu0 %vm2399_vm0, %v4982_v1  ;;  %3297 = vmatprep.mubr.bf16.mxu1 %v4983_v2 }
 0x144   :  { %3410 = vmatprep.mubr.bf16.mxu0 %v4995_v31 }
 0x14a   :  { %3298 = vmatmul.mubr.bf16.gmra.mrb[36].mxu1 %v4985_v4 }
 0x14b   :  { %4052 = vmatmul.mubr.msk.bf16.gmra.mrb[36].mxu0 %vm2399_vm0, %v4986_v5  ;;  %3307 = vmatprep.mubr.bf16.mxu1 %v4987_v6 }
 0x14c   :  { %3420 = vmatprep.mubr.bf16.mxu0 %v4995_v31 }
 0x152   :  { %3308 = vmatmul.mubr.bf16.gmra.mrb[40].mxu1 %v4989_v8 }
 0x153   :  { %4053 = vmatmul.mubr.msk.bf16.gmra.mrb[40].mxu0 %vm2399_vm0, %v4990_v10  ;;  %3317 = vmatprep.mubr.bf16.mxu1 %v4991_v11 }
 0x154   :  { %3430 = vmatprep.mubr.bf16.mxu0 %v4995_v31 }
 0x15a   :  { %3318 = vmatmul.mubr.bf16.gmra.mrb[44].mxu1 %v4993_v12 }
 0x15b   :  { %4054 = vmatmul.mubr.msk.bf16.gmra.mrb[44].mxu0 %vm2399_vm0, %v4994_v14 }
 0x1b6   :  { %v6342_v16 = vpop.f32.mrb[16].mxu0 }
 0x1b7   :  { %v6344_v17 = vpop.f32.mrb[17].mxu0 }
 0x1b8   :  { %v6346_v18 = vpop.f32.mrb[18].mxu0 }
 0x1b9   :  { %v6348_v20 = vpop.f32.mrb[19].mxu0 }
 0x1be   :  { %v6350_v22 = vpop.f32.mrb[20].mxu0 }
 0x1bf   :  { %v6352_v23 = vpop.f32.mrb[21].mxu0 }
 0x1c0   :  { %v6354_v24 = vpop.f32.mrb[22].mxu0 }
 0x1c1   :  { %v6356_v26 = vpop.f32.mrb[23].mxu0 }
 0x1c6   :  { %v6358_v28 = vpop.f32.mrb[24].mxu0 }
 0x1c7   :  { %v6360_v29 = vpop.f32.mrb[25].mxu0 }
 0x1c8   :  { %v6362_v30 = vpop.f32.mrb[26].mxu0 }
 0x1c9   :  { %v6364_v32 = vpop.f32.mrb[27].mxu0 }
 0x1ce   :  { %v6366_v34 = vpop.f32.mrb[28].mxu0 }
 0x1cf   :  { %v6368_v35 = vpop.f32.mrb[29].mxu0 }
 0x1d0   :  { %v6370_v36 = vpop.f32.mrb[30].mxu0 }
 0x1d1   :  { %v6372_v38 = vpop.f32.mrb[31].mxu0 }
 0x1d5   :  { %v2797_v40 = vpop.f32.mrb[0].mxu1 }
 0x1d6   :  { %v2799_v41 = vpop.f32.mrb[1].mxu1  ;;  %v4119_v27 = vadd.f32 %v2797_v40, %v6393_v19 }
 0x1d7   :  { %v2801_v42 = vpop.f32.mrb[2].mxu1  ;;  %v4121_v31 = vadd.f32 %v2799_v41, %v6397_v25 }
 0x1d8   :  { %v2803_v44 = vpop.f32.mrb[3].mxu1  ;;  %v4123_v39 = vadd.f32 %v2801_v42, %v6393_v19 }
 0x1d9   :  { %v4125_v55 = vadd.f32 %v2803_v44, %v6397_v25 }
 0x1dd   :  { %v2807_v46 = vpop.f32.mrb[4].mxu1 }
 0x1de   :  { %v2809_v47 = vpop.f32.mrb[5].mxu1  ;;  %v4127_v57 = vadd.f32 %v2807_v46, %v6393_v19 }
 0x1df   :  { %v2811_v48 = vpop.f32.mrb[6].mxu1  ;;  %v4129_v60 = vadd.f32 %v2809_v47, %v6397_v25 }
 0x1e0   :  { %v6374_v50 = vpop.f32.mrb[7].mxu1 }
 0x1e5   :  { %v6376_v53 = vpop.f32.mrb[8].mxu1 }
 0x1e6   :  { %v6378_v54 = vpop.f32.mrb[9].mxu1  ;;  %v4135_v47 = vadd.f32 %v6376_v53, %v6393_v19 }
 0x1e7   :  { %v6380_v56 = vpop.f32.mrb[10].mxu1 }
 0x1e8   :  { %v6382_v3 = vpop.f32.mrb[11].mxu1 }
 0x1ed   :  { %v6387_v9 = vpop.f32.mrb[12].mxu1 }
 0x1ee   :  { %v6389_v13 = vpop.f32.mrb[13].mxu1 }
 0x1ef   :  { %v6391_v15 = vpop.f32.mrb[14].mxu1 }
 0x1f0   :  { %v6395_v21 = vpop.f32.mrb[15].mxu1 }
 0x1f5   :  { %v2837_v33 = vpop.f32.mrb[16].mxu1 }
 0x1f6   :  { %v3362_v37 = vpop.f32.mrb[0].mxu0  ;;  %v4151_v43 = vadd.f32 %v2837_v33, %v6393_v19  ;;  %v2839_v49 = vpop.f32.mrb[17].mxu1 }
 0x1f7   :  { %v4120_v45 = vadd.f32 %v4119_v27, %v3362_v37  ;;  %v3364_v51 = vpop.f32.mrb[1].mxu0  ;;  %v4155_v61 = vadd.f32 %v2839_v49, %v6397_v25  ;;  %v2841_v63 = vpop.f32.mrb[18].mxu1 }
 0x1f8   :  { %v4122_v62 = vadd.f32 %v4121_v31, %v3364_v51  ;;  %v3366_v0 = vpop.f32.mrb[2].mxu0  ;;  %v4159_v2 = vadd.f32 %v2841_v63, %v6393_v19  ;;  %v2843_v5 = vpop.f32.mrb[19].mxu1  ;;  %v6409_v40 = vadd.f32 %v4151_v43, %v6342_v16  ;;  %v4131_v31 = vadd.f32 %v2811_v48, %v6393_v19 }
 0x1f9   :  { %vm3441_vm1 = vcmp.ge.f32.partialorder %v4120_v45, 0.0  ;;  %v3473_v1 = vmul.f32 0.2, %v4120_v45  ;;  %v4124_v4 = vadd.f32 %v4123_v39, %v3366_v0  ;;  %v3368_v6 = vpop.f32.mrb[3].mxu0  ;;  %v4163_v10 = vadd.f32 %v2843_v5, %v6397_v25 }
 0x1fa   :  { %vm3442_vm2 = vcmp.ge.f32.partialorder %v4122_v62, 0.0  ;;  %v3474_v8 = vmul.f32 0.2, %v4122_v62  ;;  %v4126_v11 = vadd.f32 %v4125_v55, %v3368_v6  ;;  %v6412_v44 = vadd.f32 %v4155_v61, %v6344_v17 }
 0x1fb   :  { %v3505_v12 = vsel %vm3441_vm1, %v4120_v45, %v3473_v1  ;;  %vm3443_vm3 = vcmp.ge.f32.partialorder %v4124_v4, 0.0  ;;  %v3475_v14 = vmul.f32 0.2, %v4124_v4  ;;  %v6415_v58 = vadd.f32 %v4159_v2, %v6346_v18 }
 0x1fc   :  { %v3506_v41 = vsel %vm3442_vm2, %v4122_v62, %v3474_v8  ;;  %vm3444_vm4 = vcmp.ge.f32.partialorder %v4126_v11, 0.0  ;;  %v3476_v42 = vmul.f32 0.2, %v4126_v11  ;;  %v6418_v59 = vadd.f32 %v4163_v10, %v6348_v20 }
 0x1fd   :  { %v4071_v46 = vpack.c.bf16 %v3506_v41, %v3505_v12  ;;  %v3507_v52 = vsel %vm3443_vm3, %v4124_v4, %v3475_v14  ;;  %v2847_v27 = vpop.f32.mrb[20].mxu1  ;;  %v4133_v20 = vadd.f32 %v6374_v50, %v6397_v25  ;;  %v4137_v14 = vadd.f32 %v6378_v54, %v6397_v25 }
 0x1fe   :  { %v3508_v7 = vsel %vm3444_vm4, %v4126_v11, %v3476_v42  ;;  %v3372_v16 = vpop.f32.mrb[4].mxu0  ;;  %v4167_v33 = vadd.f32 %v2847_v27, %v6393_v19  ;;  %v2849_v18 = vpop.f32.mrb[21].mxu1  ;;  %v4143_v54 = vadd.f32 %v6387_v9, %v6393_v19 }
 0x1ff   :  { %3633 = vst [vmem:[%s6555_s3] sm:$0xff] %v4071_v46  ;;  %v4072_v17 = vpack.c.bf16 %v3508_v7, %v3507_v52  ;;  %v4128_v37 = vadd.f32 %v4127_v57, %v3372_v16  ;;  %v3374_v39 = vpop.f32.mrb[5].mxu0  ;;  %v4171_v43 = vadd.f32 %v2849_v18, %v6397_v25  ;;  %v2851_v48 = vpop.f32.mrb[22].mxu1  ;;  %v4139_v46 = vadd.f32 %v6380_v56, %v6393_v19 }
 0x200   :  { %v4130_v45 = vadd.f32 %v4129_v60, %v3374_v39  ;;  %v3376_v49 = vpop.f32.mrb[6].mxu0  ;;  %v4175_v55 = vadd.f32 %v2851_v48, %v6393_v19  ;;  %v2853_v61 = vpop.f32.mrb[23].mxu1  ;;  %v6437_v2 = vadd.f32 %v4167_v33, %v6350_v22  ;;  %v4141_v7 = vadd.f32 %v6382_v3, %v6397_v25 }
 0x201   :  { %3634 = vst [vmem:[%s6555_s3 + $0x8] sm:$0xff] %v4072_v17  ;;  %vm3445_vm5 = vcmp.ge.f32.partialorder %v4128_v37, 0.0  ;;  %v3477_v51 = vmul.f32 0.2, %v4128_v37  ;;  %v4132_v57 = vadd.f32 %v4131_v31, %v3376_v49  ;;  %v3378_v62 = vpop.f32.mrb[7].mxu0  ;;  %v4179_v53 = vadd.f32 %v2853_v61, %v6397_v25 }
 0x202   :  { %vm3446_vm6 = vcmp.ge.f32.partialorder %v4130_v45, 0.0  ;;  %v3478_v50 = vmul.f32 0.2, %v4130_v45  ;;  %v4134_v63 = vadd.f32 %v4133_v20, %v3378_v62  ;;  %v6440_v6 = vadd.f32 %v4171_v43, %v6352_v23 }
 0x203   :  { %v3509_v0 = vsel %vm3445_vm5, %v4128_v37, %v3477_v51  ;;  %vm3447_vm7 = vcmp.ge.f32.partialorder %v4132_v57, 0.0  ;;  %v3479_v1 = vmul.f32 0.2, %v4132_v57  ;;  %v6443_v11 = vadd.f32 %v4175_v55, %v6354_v24 }
 0x204   :  { %v3510_v4 = vsel %vm3446_vm6, %v4130_v45, %v3478_v50  ;;  %vm3448_vm8 = vcmp.ge.f32.partialorder %v4134_v63, 0.0  ;;  %v3480_v5 = vmul.f32 0.2, %v4134_v63  ;;  %v6446_v12 = vadd.f32 %v4179_v53, %v6356_v26 }
 0x205   :  { %v4073_v8 = vpack.c.bf16 %v3510_v4, %v3509_v0  ;;  %v3511_v10 = vsel %vm3447_vm7, %v4132_v57, %v3479_v1  ;;  %v2857_v22 = vpop.f32.mrb[24].mxu1  ;;  %v4145_v50 = vadd.f32 %v6389_v13, %v6397_v25  ;;  %v4147_v0 = vadd.f32 %v6391_v15, %v6393_v19 }
 0x206   :  { %v3512_v41 = vsel %vm3448_vm8, %v4134_v63, %v3480_v5  ;;  %v3382_v42 = vpop.f32.mrb[8].mxu0  ;;  %v4183_v24 = vadd.f32 %v2857_v22, %v6393_v19  ;;  %v2859_v60 = vpop.f32.mrb[25].mxu1  ;;  %v4149_v5 = vadd.f32 %v6395_v21, %v6397_v25 }
 0x207   :  { %3635 = vst [vmem:[%s6555_s3 + $0x10] sm:$0xff] %v4073_v8  ;;  %v4074_v23 = vpack.c.bf16 %v3512_v41, %v3511_v10  ;;  %v4136_v52 = vadd.f32 %v4135_v47, %v3382_v42  ;;  %v3384_v26 = vpop.f32.mrb[9].mxu0  ;;  %v4187_v27 = vadd.f32 %v2859_v60, %v6397_v25  ;;  %v2861_v56 = vpop.f32.mrb[26].mxu1 }
 0x208   :  { %v4138_v16 = vadd.f32 %v4137_v14, %v3384_v26  ;;  %v3386_v31 = vpop.f32.mrb[10].mxu0  ;;  %v4191_v33 = vadd.f32 %v2861_v56, %v6393_v19  ;;  %v2863_v18 = vpop.f32.mrb[27].mxu1  ;;  %v6467_v45 = vadd.f32 %v4183_v24, %v6358_v28 }
 0x209   :  { %3636 = vst [vmem:[%s6555_s3 + $0x18] sm:$0xff] %v4074_v23  ;;  %vm3449_vm9 = vcmp.ge.f32.partialorder %v4136_v52, 0.0  ;;  %v3481_v17 = vmul.f32 0.2, %v4136_v52  ;;  %v4140_v37 = vadd.f32 %v4139_v46, %v3386_v31  ;;  %v3388_v39 = vpop.f32.mrb[11].mxu0  ;;  %v4195_v9 = vadd.f32 %v2863_v18, %v6397_v25 }
 0x20a   :  { %vm3450_vm10 = vcmp.ge.f32.partialorder %v4138_v16, 0.0  ;;  %v3482_v3 = vmul.f32 0.2, %v4138_v16  ;;  %v4142_v20 = vadd.f32 %v4141_v7, %v3388_v39  ;;  %v6470_v51 = vadd.f32 %v4187_v27, %v6360_v29 }
 0x20b   :  { %v3513_v47 = vsel %vm3449_vm9, %v4136_v52, %v3481_v17  ;;  %vm3451_vm11 = vcmp.ge.f32.partialorder %v4140_v37, 0.0  ;;  %v3483_v43 = vmul.f32 0.2, %v4140_v37  ;;  %v6473_v61 = vadd.f32 %v4191_v33, %v6362_v30 }
 0x20c   :  { %v3514_v48 = vsel %vm3450_vm10, %v4138_v16, %v3482_v3  ;;  %vm3452_vm12 = vcmp.ge.f32.partialorder %v4142_v20, 0.0  ;;  %v3484_v49 = vmul.f32 0.2, %v4142_v20  ;;  %v6476_v62 = vadd.f32 %v4195_v9, %v6364_v32 }
 0x20d   :  { %v4075_v55 = vpack.c.bf16 %v3514_v48, %v3513_v47  ;;  %v3515_v57 = vsel %vm3451_vm11, %v4140_v37, %v3483_v43  ;;  %v2867_v28 = vpop.f32.mrb[28].mxu1 }
 0x20e   :  { %v3516_v53 = vsel %vm3452_vm12, %v4142_v20, %v3484_v49  ;;  %v3392_v63 = vpop.f32.mrb[12].mxu0  ;;  %v4199_v30 = vadd.f32 %v2867_v28, %v6393_v19  ;;  %v2869_v4 = vpop.f32.mrb[29].mxu1 }
 0x20f   :  { %3637 = vst [vmem:[%s6555_s3 + $0x20] sm:$0xff] %v4075_v55  ;;  %v4076_v29 = vpack.c.bf16 %v3516_v53, %v3515_v57  ;;  %v4144_v1 = vadd.f32 %v4143_v54, %v3392_v63  ;;  %v3394_v32 = vpop.f32.mrb[13].mxu0  ;;  %v4203_v13 = vadd.f32 %v2869_v4, %v6397_v25  ;;  %v2871_v10 = vpop.f32.mrb[30].mxu1 }
 0x210   :  { %v4146_v8 = vadd.f32 %v4145_v50, %v3394_v32  ;;  %v3396_v14 = vpop.f32.mrb[14].mxu0  ;;  %v4207_v41 = vadd.f32 %v2871_v10, %v6393_v19  ;;  %v2873_v42 = vpop.f32.mrb[31].mxu1  ;;  %v6495_v26 = vadd.f32 %v4199_v30, %v6366_v34 }
 0x211   :  { %3638 = vst [vmem:[%s6555_s3 + $0x28] sm:$0xff] %v4076_v29  ;;  %vm3453_vm13 = vcmp.ge.f32.partialorder %v4144_v1, 0.0  ;;  %v3485_v15 = vmul.f32 0.2, %v4144_v1  ;;  %v4148_v22 = vadd.f32 %v4147_v0, %v3396_v14  ;;  %v3398_v46 = vpop.f32.mrb[15].mxu0  ;;  %v4211_v21 = vadd.f32 %v2873_v42, %v6397_v25 }
 0x212   :  { %vm3454_vm14 = vcmp.ge.f32.partialorder %v4146_v8, 0.0  ;;  %v3486_v23 = vmul.f32 0.2, %v4146_v8  ;;  %v4150_v24 = vadd.f32 %v4149_v5, %v3398_v46  ;;  %v6498_v27 = vadd.f32 %v4203_v13, %v6368_v35 }
 0x213   :  { %v3517_v52 = vsel %vm3453_vm13, %v4144_v1, %v3485_v15  ;;  %vm3455_vm15 = vcmp.ge.f32.partialorder %v4148_v22, 0.0  ;;  %v3487_v60 = vmul.f32 0.2, %v4148_v22  ;;  %v6501_v56 = vadd.f32 %v4207_v41, %v6370_v36 }
 0x214   :  { %v3518_v7 = vsel %vm3454_vm14, %v4146_v8, %v3486_v23  ;;  %vm3456_vm0 = vcmp.ge.f32.partialorder %v4150_v24, 0.0  ;;  %v3488_v54 = vmul.f32 0.2, %v4150_v24  ;;  %v6504_v25 = vadd.f32 %v4211_v21, %v6372_v38 }
 0x215   :  { %v4077_v19 = vpack.c.bf16 %v3518_v7, %v3517_v52  ;;  %v3519_v16 = vsel %vm3455_vm15, %v4148_v22, %v3487_v60  ;;  %v3289_v17 = vpop.f32.mrb[32].mxu1 }
 0x216   :  { %v3520_v31 = vsel %vm3456_vm0, %v4150_v24, %v3488_v54  ;;  %v3402_v33 = vpop.f32.mrb[32].mxu0  ;;  %v4153_v37 = vadd.f32 %v6409_v40, %v3289_v17  ;;  %v3291_v35 = vpop.f32.mrb[33].mxu1 }
 0x217   :  { %3639 = vst [vmem:[%s6555_s3 + $0x30] sm:$0xff] %v4077_v19  ;;  %v4078_v34 = vpack.c.bf16 %v3520_v31, %v3519_v16  ;;  %v3404_v18 = vpop.f32.mrb[33].mxu0  ;;  %v4157_v39 = vadd.f32 %v6412_v44, %v3291_v35  ;;  %v3293_v3 = vpop.f32.mrb[34].mxu1 }
 0x218   :  { %v3406_v36 = vpop.f32.mrb[34].mxu0  ;;  %v4154_v38 = vadd.f32 %v4153_v37, %v3402_v33  ;;  %v4161_v9 = vadd.f32 %v6415_v58, %v3293_v3  ;;  %v3295_v20 = vpop.f32.mrb[35].mxu1 }
 0x219   :  { %3640 = vst [vmem:[%s6555_s3 + $0x38] sm:$0xff] %v4078_v34  ;;  %v3408_v47 = vpop.f32.mrb[35].mxu0  ;;  %v4158_v43 = vadd.f32 %v4157_v39, %v3404_v18  ;;  %v4165_v48 = vadd.f32 %v6418_v59, %v3295_v20 }
 0x21a   :  { %vm3457_vm1 = vcmp.ge.f32.partialorder %v4154_v38, 0.0  ;;  %v3489_v40 = vmul.f32 0.2, %v4154_v38  ;;  %v4162_v49 = vadd.f32 %v4161_v9, %v3406_v36 }
 0x21b   :  { %vm3458_vm2 = vcmp.ge.f32.partialorder %v4158_v43, 0.0  ;;  %v3490_v55 = vmul.f32 0.2, %v4158_v43  ;;  %v4166_v44 = vadd.f32 %v4165_v48, %v3408_v47 }
 0x21c   :  { %v3521_v57 = vsel %vm3457_vm1, %v4154_v38, %v3489_v40  ;;  %vm3459_vm3 = vcmp.ge.f32.partialorder %v4162_v49, 0.0  ;;  %v3491_v50 = vmul.f32 0.2, %v4162_v49 }
 0x21d   :  { %v3522_v53 = vsel %vm3458_vm2, %v4158_v43, %v3490_v55  ;;  %vm3460_vm4 = vcmp.ge.f32.partialorder %v4166_v44, 0.0  ;;  %v3492_v28 = vmul.f32 0.2, %v4166_v44  ;;  %v3299_v63 = vpop.f32.mrb[36].mxu1 }
 0x21e   :  { %v3412_v0 = vpop.f32.mrb[36].mxu0  ;;  %v4079_v58 = vpack.c.bf16 %v3522_v53, %v3521_v57  ;;  %v3523_v29 = vsel %vm3459_vm3, %v4162_v49, %v3491_v50  ;;  %v4169_v30 = vadd.f32 %v6437_v2, %v3299_v63  ;;  %v3301_v1 = vpop.f32.mrb[37].mxu1 }
 0x21f   :  { %v3414_v59 = vpop.f32.mrb[37].mxu0  ;;  %v3524_v4 = vsel %vm3460_vm4, %v4166_v44, %v3492_v28  ;;  %v4173_v32 = vadd.f32 %v6440_v6, %v3301_v1  ;;  %v3303_v5 = vpop.f32.mrb[38].mxu1 }
 0x220   :  { %v3416_v13 = vpop.f32.mrb[38].mxu0  ;;  %3641 = vst [vmem:[%s6555_s3 + $0x40] sm:$0xff] %v4079_v58  ;;  %v4080_v8 = vpack.c.bf16 %v3524_v4, %v3523_v29  ;;  %v4170_v10 = vadd.f32 %v4169_v30, %v3412_v0  ;;  %v4177_v14 = vadd.f32 %v6443_v11, %v3303_v5  ;;  %v3305_v15 = vpop.f32.mrb[39].mxu1 }
 0x221   :  { %v3418_v41 = vpop.f32.mrb[39].mxu0  ;;  %v4174_v22 = vadd.f32 %v4173_v32, %v3414_v59  ;;  %v4181_v2 = vadd.f32 %v6446_v12, %v3305_v15 }
 0x222   :  { %3642 = vst [vmem:[%s6555_s3 + $0x48] sm:$0xff] %v4080_v8  ;;  %vm3461_vm5 = vcmp.ge.f32.partialorder %v4170_v10, 0.0  ;;  %v3493_v6 = vmul.f32 0.2, %v4170_v10  ;;  %v4178_v42 = vadd.f32 %v4177_v14, %v3416_v13 }
 0x223   :  { %vm3462_vm6 = vcmp.ge.f32.partialorder %v4174_v22, 0.0  ;;  %v3494_v46 = vmul.f32 0.2, %v4174_v22  ;;  %v4182_v23 = vadd.f32 %v4181_v2, %v3418_v41 }
 0x224   :  { %v3525_v21 = vsel %vm3461_vm5, %v4170_v10, %v3493_v6  ;;  %vm3463_vm7 = vcmp.ge.f32.partialorder %v4178_v42, 0.0  ;;  %v3495_v24 = vmul.f32 0.2, %v4178_v42 }
 0x225   :  { %v3526_v52 = vsel %vm3462_vm6, %v4174_v22, %v3494_v46  ;;  %vm3464_vm8 = vcmp.ge.f32.partialorder %v4182_v23, 0.0  ;;  %v3496_v11 = vmul.f32 0.2, %v4182_v23  ;;  %v3309_v60 = vpop.f32.mrb[40].mxu1 }
 0x226   :  { %v3422_v7 = vpop.f32.mrb[40].mxu0  ;;  %v4081_v54 = vpack.c.bf16 %v3526_v52, %v3525_v21  ;;  %v3527_v12 = vsel %vm3463_vm7, %v4178_v42, %v3495_v24  ;;  %v4185_v19 = vadd.f32 %v6467_v45, %v3309_v60  ;;  %v3311_v16 = vpop.f32.mrb[41].mxu1 }
 0x227   :  { %v3424_v31 = vpop.f32.mrb[41].mxu0  ;;  %v3528_v17 = vsel %vm3464_vm8, %v4182_v23, %v3496_v11  ;;  %v4189_v33 = vadd.f32 %v6470_v51, %v3311_v16  ;;  %v3313_v34 = vpop.f32.mrb[42].mxu1 }
 0x228   :  { %v3426_v37 = vpop.f32.mrb[42].mxu0  ;;  %3643 = vst [vmem:[%s6555_s3 + $0x50] sm:$0xff] %v4081_v54  ;;  %v4082_v35 = vpack.c.bf16 %v3528_v17, %v3527_v12  ;;  %v4186_v18 = vadd.f32 %v4185_v19, %v3422_v7  ;;  %v4193_v39 = vadd.f32 %v6473_v61, %v3313_v34  ;;  %v3315_v3 = vpop.f32.mrb[43].mxu1 }
 0x229   :  { %v3428_v36 = vpop.f32.mrb[43].mxu0  ;;  %v4190_v38 = vadd.f32 %v4189_v33, %v3424_v31  ;;  %v4197_v45 = vadd.f32 %v6476_v62, %v3315_v3 }
 0x22a   :  { %3644 = vst [vmem:[%s6555_s3 + $0x58] sm:$0xff] %v4082_v35  ;;  %vm3465_vm9 = vcmp.ge.f32.partialorder %v4186_v18, 0.0  ;;  %v3497_v51 = vmul.f32 0.2, %v4186_v18  ;;  %v4194_v9 = vadd.f32 %v4193_v39, %v3426_v37 }
 0x22b   :  { %vm3466_vm10 = vcmp.ge.f32.partialorder %v4190_v38, 0.0  ;;  %v3498_v20 = vmul.f32 0.2, %v4190_v38  ;;  %v4198_v47 = vadd.f32 %v4197_v45, %v3428_v36 }
 0x22c   :  { %v3529_v43 = vsel %vm3465_vm9, %v4186_v18, %v3497_v51  ;;  %vm3467_vm11 = vcmp.ge.f32.partialorder %v4194_v9, 0.0  ;;  %v3499_v48 = vmul.f32 0.2, %v4194_v9 }
 0x22d   :  { %v3530_v40 = vsel %vm3466_vm10, %v4190_v38, %v3498_v20  ;;  %vm3468_vm12 = vcmp.ge.f32.partialorder %v4198_v47, 0.0  ;;  %v3500_v61 = vmul.f32 0.2, %v4198_v47  ;;  %v3319_v49 = vpop.f32.mrb[44].mxu1 }
 0x22e   :  { %v3432_v55 = vpop.f32.mrb[44].mxu0  ;;  %v4083_v44 = vpack.c.bf16 %v3530_v40, %v3529_v43  ;;  %v3531_v62 = vsel %vm3467_vm11, %v4194_v9, %v3499_v48  ;;  %v4201_v57 = vadd.f32 %v6495_v26, %v3319_v49  ;;  %v3321_v50 = vpop.f32.mrb[45].mxu1 }
 0x22f   :  { %v3434_v53 = vpop.f32.mrb[45].mxu0  ;;  %v3532_v28 = vsel %vm3468_vm12, %v4198_v47, %v3500_v61  ;;  %v4205_v63 = vadd.f32 %v6498_v27, %v3321_v50  ;;  %v3323_v0 = vpop.f32.mrb[46].mxu1 }
 0x230   :  { %v3436_v58 = vpop.f32.mrb[46].mxu0  ;;  %3645 = vst [vmem:[%s6555_s3 + $0x60] sm:$0xff] %v4083_v44  ;;  %v4084_v29 = vpack.c.bf16 %v3532_v28, %v3531_v62  ;;  %v4202_v30 = vadd.f32 %v4201_v57, %v3432_v55  ;;  %v4209_v1 = vadd.f32 %v6501_v56, %v3323_v0  ;;  %v3325_v59 = vpop.f32.mrb[47].mxu1 }
 0x231   :  { %v3438_v4 = vpop.f32.mrb[47].mxu0  ;;  %v4206_v32 = vadd.f32 %v4205_v63, %v3434_v53  ;;  %v4213_v26 = vadd.f32 %v6504_v25, %v3325_v59 }
 0x232   :  { %3646 = vst [vmem:[%s6555_s3 + $0x68] sm:$0xff] %v4084_v29  ;;  %vm3469_vm13 = vcmp.ge.f32.partialorder %v4202_v30, 0.0  ;;  %v3501_v27 = vmul.f32 0.2, %v4202_v30  ;;  %v4210_v5 = vadd.f32 %v4209_v1, %v3436_v58 }
 0x233   :  { %vm3470_vm14 = vcmp.ge.f32.partialorder %v4206_v32, 0.0  ;;  %v3502_v13 = vmul.f32 0.2, %v4206_v32  ;;  %v4214_v8 = vadd.f32 %v4213_v26, %v3438_v4 }
 0x234   :  { %v3533_v10 = vsel %vm3469_vm13, %v4202_v30, %v3501_v27  ;;  %vm3471_vm15 = vcmp.ge.f32.partialorder %v4210_v5, 0.0  ;;  %v3503_v14 = vmul.f32 0.2, %v4210_v5 }
 0x235   :  { %v3534_v15 = vsel %vm3470_vm14, %v4206_v32, %v3502_v13  ;;  %vm3472_vm0 = vcmp.ge.f32.partialorder %v4214_v8, 0.0  ;;  %v3504_v56 = vmul.f32 0.2, %v4214_v8 }
 0x236   :  { %v4085_v41 = vpack.c.bf16 %v3534_v15, %v3533_v10  ;;  %v3535_v22 = vsel %vm3471_vm15, %v4210_v5, %v3503_v14 }
 0x237   :  { %v3536_v2 = vsel %vm3472_vm0, %v4214_v8, %v3504_v56 }
 0x238   :  { %3647 = vst [vmem:[%s6555_s3 + $0x70] sm:$0xff] %v4085_v41  ;;  %v4086_v25 = vpack.c.bf16 %v3536_v2, %v3535_v22 }
 0x23a   :  { %3648 = vst [vmem:[%s6555_s3 + $0x78] sm:$0xff] %v4086_v25 }

// kernel: discriminator_forward.8
= control target key start
LH: loop header
LB: loop body
LE: loop exit
PB: predicated region body
PF: predicated region fallthrough
CT: control target
= control target key end

     0   :  { %s14719_s1 = inlined_call_operand.vmem [shape: bf16[4096,512], index: 1, kind: input, shape index: {}]   ;;  %s14720_s0 = inlined_call_operand.vmem [shape: bf16[32,4096], index: 0, kind: input, shape index: {}]   ;;  %s14721_s2 = inlined_call_operand.vmem [shape: f32[1,512], index: 2, kind: input, shape index: {}]   ;;  %s14722_s3 = inlined_call_operand.vmem [shape: bf16[32,512], index: 3, kind: output, shape index: {}]  }
   0x1   :  { %v9728_v0 = vld [vmem:[%s14719_s1 + $0x4] ss:$16 sps:$4 sm:$0xff]   ;;  %v9730_v1 = vld [vmem:[%s14719_s1 + $0xc] ss:$16 sps:$4 sm:$0xff]   ;;  %v9732_v2 = vld [vmem:[%s14719_s1] ss:$16 sps:$4 sm:$0xff]  }
   0x2   :  { %6564 = vmatprep.subr.bf16.mxu0 %v9728_v0  ;;  %v9733_v3 = vld [vmem:[%s14719_s1 + $0x8] ss:$16 sps:$4 sm:$0xff]   ;;  %7412 = vmatprep.subr.bf16.mxu1 %v9730_v1  ;;  %v9734_v4 = vld [vmem:[%s14719_s1 + $0x24] ss:$16 sps:$4 sm:$0xff]   ;;  %v9736_v5 = vld [vmem:[%s14719_s1 + $0x2c] ss:$16 sps:$4 sm:$0xff]  }
   0x3   :  { %6565 = vmatpush1.bf16.msra.mxu0 %v9732_v2  ;;  %7413 = vmatpush1.bf16.msra.mxu1 %v9733_v3  ;;  %v9738_v6 = vld [vmem:[%s14719_s1 + $0x20] ss:$16 sps:$4 sm:$0xff]   ;;  %v9739_v7 = vld [vmem:[%s14719_s1 + $0x28] ss:$16 sps:$4 sm:$0xff]   ;;  %v9740_v8 = vld [vmem:[%s14719_s1 + $0x44] ss:$16 sps:$4 sm:$0xff]  }
   0x4   :  { %6566 = vmatprep.subr.bf16.mxu0 %v9734_v4  ;;  %7414 = vmatprep.subr.bf16.mxu1 %v9736_v5  ;;  %v9742_v9 = vld [vmem:[%s14719_s1 + $0x4c] ss:$16 sps:$4 sm:$0xff]   ;;  %v9744_v10 = vld [vmem:[%s14719_s1 + $0x40] ss:$16 sps:$4 sm:$0xff]   ;;  %v9745_v11 = vld [vmem:[%s14719_s1 + $0x48] ss:$16 sps:$4 sm:$0xff]  }
   0x5   :  { %v9746_v12 = vld [vmem:[%s14719_s1 + $0x64] ss:$16 sps:$4 sm:$0xff]   ;;  %v9748_v13 = vld [vmem:[%s14719_s1 + $0x6c] ss:$16 sps:$4 sm:$0xff]   ;;  %v9750_v14 = vld [vmem:[%s14719_s1 + $0x60] ss:$16 sps:$4 sm:$0xff]  }
   0x6   :  { %v9751_v15 = vld [vmem:[%s14719_s1 + $0x68] ss:$16 sps:$4 sm:$0xff]   ;;  %v9752_v16 = vld [vmem:[%s14719_s1 + $0x84] ss:$16 sps:$4 sm:$0xff]   ;;  %v9754_v17 = vld [vmem:[%s14719_s1 + $0x8c] ss:$16 sps:$4 sm:$0xff]  }
   0x7   :  { %6567 = vmatpush1.bf16.msra.mxu0 %v9738_v6  ;;  %7415 = vmatpush1.bf16.msra.mxu1 %v9739_v7  ;;  %v9756_v18 = vld [vmem:[%s14719_s1 + $0x80] ss:$16 sps:$4 sm:$0xff]   ;;  %v9757_v19 = vld [vmem:[%s14719_s1 + $0x88] ss:$16 sps:$4 sm:$0xff]   ;;  %v9758_v20 = vld [vmem:[%s14719_s1 + $0xa4] ss:$16 sps:$4 sm:$0xff]  }
   0x8   :  { %6568 = vmatprep.subr.bf16.mxu0 %v9740_v8  ;;  %7416 = vmatprep.subr.bf16.mxu1 %v9742_v9  ;;  %v9760_v21 = vld [vmem:[%s14719_s1 + $0xac] ss:$16 sps:$4 sm:$0xff]   ;;  %v9762_v22 = vld [vmem:[%s14719_s1 + $0xa0] ss:$16 sps:$4 sm:$0xff]   ;;  %v9763_v23 = vld [vmem:[%s14719_s1 + $0xa8] ss:$16 sps:$4 sm:$0xff]  }
   0x9   :  { %v9764_v24 = vld [vmem:[%s14719_s1 + $0xc4] ss:$16 sps:$4 sm:$0xff]   ;;  %v9766_v25 = vld [vmem:[%s14719_s1 + $0xcc] ss:$16 sps:$4 sm:$0xff]   ;;  %v9768_v26 = vld [vmem:[%s14719_s1 + $0xc0] ss:$16 sps:$4 sm:$0xff]  }
   0xa   :  { %v9769_v27 = vld [vmem:[%s14719_s1 + $0xc8] ss:$16 sps:$4 sm:$0xff]   ;;  %v9770_v28 = vld [vmem:[%s14719_s1 + $0xe4] ss:$16 sps:$4 sm:$0xff]   ;;  %v9772_v29 = vld [vmem:[%s14719_s1 + $0xec] ss:$16 sps:$4 sm:$0xff]  }
   0xb   :  { %6569 = vmatpush1.bf16.msra.mxu0 %v9744_v10  ;;  %7417 = vmatpush1.bf16.msra.mxu1 %v9745_v11  ;;  %v9774_v30 = vld [vmem:[%s14719_s1 + $0xe0] ss:$16 sps:$4 sm:$0xff]   ;;  %v9775_v31 = vld [vmem:[%s14719_s1 + $0xe8] ss:$16 sps:$4 sm:$0xff]   ;;  %v9776_v32 = vld [vmem:[%s14719_s1 + $0x104] ss:$16 sps:$4 sm:$0xff]  }
   0xc   :  { %6570 = vmatprep.subr.bf16.mxu0 %v9746_v12  ;;  %7418 = vmatprep.subr.bf16.mxu1 %v9748_v13  ;;  %v9778_v33 = vld [vmem:[%s14719_s1 + $0x10c] ss:$16 sps:$4 sm:$0xff]   ;;  %v9780_v34 = vld [vmem:[%s14719_s1 + $0x100] ss:$16 sps:$4 sm:$0xff]   ;;  %v9781_v35 = vld [vmem:[%s14719_s1 + $0x108] ss:$16 sps:$4 sm:$0xff]  }
   0xd   :  { %v9782_v36 = vld [vmem:[%s14719_s1 + $0x124] ss:$16 sps:$4 sm:$0xff]   ;;  %v9784_v37 = vld [vmem:[%s14719_s1 + $0x12c] ss:$16 sps:$4 sm:$0xff]   ;;  %v9786_v38 = vld [vmem:[%s14719_s1 + $0x120] ss:$16 sps:$4 sm:$0xff]  }
   0xe   :  { %v9787_v39 = vld [vmem:[%s14719_s1 + $0x128] ss:$16 sps:$4 sm:$0xff]   ;;  %v9788_v40 = vld [vmem:[%s14719_s1 + $0x144] ss:$16 sps:$4 sm:$0xff]   ;;  %v9790_v41 = vld [vmem:[%s14719_s1 + $0x14c] ss:$16 sps:$4 sm:$0xff]  }
   0xf   :  { %6571 = vmatpush1.bf16.msra.mxu0 %v9750_v14  ;;  %7419 = vmatpush1.bf16.msra.mxu1 %v9751_v15  ;;  %v9792_v42 = vld [vmem:[%s14719_s1 + $0x140] ss:$16 sps:$4 sm:$0xff]   ;;  %v9793_v43 = vld [vmem:[%s14719_s1 + $0x148] ss:$16 sps:$4 sm:$0xff]   ;;  %v9794_v44 = vld [vmem:[%s14719_s1 + $0x164] ss:$16 sps:$4 sm:$0xff]  }
  0x10   :  { %6572 = vmatprep.subr.bf16.mxu0 %v9752_v16  ;;  %7420 = vmatprep.subr.bf16.mxu1 %v9754_v17  ;;  %v9796_v45 = vld [vmem:[%s14719_s1 + $0x16c] ss:$16 sps:$4 sm:$0xff]   ;;  %v14_v46 = vld [vmem:[%s14720_s0] sm:$0xff]  ;;  %v9799_v49 = vld [vmem:[%s14719_s1 + $0x168] ss:$16 sps:$4 sm:$0xff]  }
  0x11   :  { %v30_v47 = vld [vmem:[%s14720_s0 + $0x80] sm:$0xff]  ;;  %v9802_v52 = vld [vmem:[%s14719_s1 + $0x18c] ss:$16 sps:$4 sm:$0xff]   ;;  %v9805_v54 = vld [vmem:[%s14719_s1 + $0x188] ss:$16 sps:$4 sm:$0xff]  }
  0x12   :  { %v9798_v48 = vld [vmem:[%s14719_s1 + $0x160] ss:$16 sps:$4 sm:$0xff]   ;;  %v8369_v50 = vcombine.high %v14_v46, %v30_v47  ;;  %v9800_v51 = vld [vmem:[%s14719_s1 + $0x184] ss:$16 sps:$4 sm:$0xff]   ;;  %v9808_v56 = vld [vmem:[%s14719_s1 + $0x1ac] ss:$16 sps:$4 sm:$0xff]   ;;  %v8368_v5 = vcombine.low %v14_v46, %v30_v47 }
  0x13   :  { %6573 = vmatpush1.bf16.msra.mxu0 %v9756_v18  ;;  %7421 = vmatpush1.bf16.msra.mxu1 %v9757_v19  ;;  %v9804_v53 = vld [vmem:[%s14719_s1 + $0x180] ss:$16 sps:$4 sm:$0xff]   ;;  %v9806_v55 = vld [vmem:[%s14719_s1 + $0x1a4] ss:$16 sps:$4 sm:$0xff]   ;;  %v9811_v58 = vld [vmem:[%s14719_s1 + $0x1a8] ss:$16 sps:$4 sm:$0xff]  }
  0x14   :  { %6574 = vmatprep.subr.bf16.mxu0 %v9758_v20  ;;  %7422 = vmatprep.subr.bf16.mxu1 %v9760_v21  ;;  %v9810_v57 = vld [vmem:[%s14719_s1 + $0x1a0] ss:$16 sps:$4 sm:$0xff]   ;;  %v9812_v59 = vld [vmem:[%s14719_s1 + $0x1c4] ss:$16 sps:$4 sm:$0xff]   ;;  %v9814_v60 = vld [vmem:[%s14719_s1 + $0x1cc] ss:$16 sps:$4 sm:$0xff]  }
  0x15   :  { %6596 = vmatprep.mubr.bf16.mxu0 %v8369_v50  ;;  %7444 = vmatprep.mubr.bf16.mxu1 %v8369_v50  ;;  %v9816_v61 = vld [vmem:[%s14719_s1 + $0x1c0] ss:$16 sps:$4 sm:$0xff]   ;;  %v9817_v62 = vld [vmem:[%s14719_s1 + $0x1c8] ss:$16 sps:$4 sm:$0xff]   ;;  %v9818_v63 = vld [vmem:[%s14719_s1 + $0x1e4] ss:$16 sps:$4 sm:$0xff]  }
  0x16   :  { %v9820_v0 = vld [vmem:[%s14719_s1 + $0x1ec] ss:$16 sps:$4 sm:$0xff]   ;;  %v9822_v1 = vld [vmem:[%s14719_s1 + $0x1e0] ss:$16 sps:$4 sm:$0xff]   ;;  %v9823_v2 = vld [vmem:[%s14719_s1 + $0x1e8] ss:$16 sps:$4 sm:$0xff]  }
  0x17   :  { %6575 = vmatpush1.bf16.msra.mxu0 %v9762_v22  ;;  %7423 = vmatpush1.bf16.msra.mxu1 %v9763_v23  ;;  %v9826_v3 = vld [vmem:[%s14719_s1 + $0x204] ss:$16 sps:$4 sm:$0xff]   ;;  %v9829_v4 = vld [vmem:[%s14719_s1 + $0x20c] ss:$16 sps:$4 sm:$0xff]   ;;  %v9824_v6 = vld [vmem:[%s14719_s1 + $0x200] ss:$16 sps:$4 sm:$0xff]  }
  0x18   :  { %6576 = vmatprep.subr.bf16.mxu0 %v9764_v24  ;;  %7424 = vmatprep.subr.bf16.mxu1 %v9766_v25  ;;  %v9827_v7 = vld [vmem:[%s14719_s1 + $0x208] ss:$16 sps:$4 sm:$0xff]   ;;  %v9832_v8 = vld [vmem:[%s14719_s1 + $0x224] ss:$16 sps:$4 sm:$0xff]   ;;  %v9835_v9 = vld [vmem:[%s14719_s1 + $0x22c] ss:$16 sps:$4 sm:$0xff]  }
  0x19   :  { %v9830_v10 = vld [vmem:[%s14719_s1 + $0x220] ss:$16 sps:$4 sm:$0xff]   ;;  %v9833_v11 = vld [vmem:[%s14719_s1 + $0x228] ss:$16 sps:$4 sm:$0xff]   ;;  %v9838_v12 = vld [vmem:[%s14719_s1 + $0x244] ss:$16 sps:$4 sm:$0xff]  }
  0x1a   :  { %v9841_v13 = vld [vmem:[%s14719_s1 + $0x24c] ss:$16 sps:$4 sm:$0xff]   ;;  %v9836_v14 = vld [vmem:[%s14719_s1 + $0x240] ss:$16 sps:$4 sm:$0xff]   ;;  %v9839_v15 = vld [vmem:[%s14719_s1 + $0x248] ss:$16 sps:$4 sm:$0xff]  }
  0x1b   :  { %6577 = vmatpush1.bf16.msra.mxu0 %v9768_v26  ;;  %7425 = vmatpush1.bf16.msra.mxu1 %v9769_v27  ;;  %v9844_v16 = vld [vmem:[%s14719_s1 + $0x264] ss:$16 sps:$4 sm:$0xff]   ;;  %v9847_v17 = vld [vmem:[%s14719_s1 + $0x26c] ss:$16 sps:$4 sm:$0xff]   ;;  %v9842_v18 = vld [vmem:[%s14719_s1 + $0x260] ss:$16 sps:$4 sm:$0xff]  }
  0x1c   :  { %6578 = vmatprep.subr.bf16.mxu0 %v9770_v28  ;;  %7426 = vmatprep.subr.bf16.mxu1 %v9772_v29  ;;  %v9845_v19 = vld [vmem:[%s14719_s1 + $0x268] ss:$16 sps:$4 sm:$0xff]   ;;  %v9850_v20 = vld [vmem:[%s14719_s1 + $0x284] ss:$16 sps:$4 sm:$0xff]   ;;  %v9853_v21 = vld [vmem:[%s14719_s1 + $0x28c] ss:$16 sps:$4 sm:$0xff]  }
  0x1d   :  { %v9848_v22 = vld [vmem:[%s14719_s1 + $0x280] ss:$16 sps:$4 sm:$0xff]   ;;  %v9851_v23 = vld [vmem:[%s14719_s1 + $0x288] ss:$16 sps:$4 sm:$0xff]   ;;  %v9856_v24 = vld [vmem:[%s14719_s1 + $0x2a4] ss:$16 sps:$4 sm:$0xff]  }
  0x1e   :  { %v9859_v25 = vld [vmem:[%s14719_s1 + $0x2ac] ss:$16 sps:$4 sm:$0xff]   ;;  %v46_v26 = vld [vmem:[%s14720_s0 + $0x100] sm:$0xff]  ;;  %v9875_v46 = vld [vmem:[%s14719_s1 + $0x308] ss:$16 sps:$4 sm:$0xff]  }
  0x1f   :  { %6579 = vmatpush1.bf16.msra.mxu0 %v9774_v30  ;;  %7427 = vmatpush1.bf16.msra.mxu1 %v9775_v31  ;;  %v62_v27 = vld [vmem:[%s14720_s0 + $0x180] sm:$0xff]  ;;  %v9857_v30 = vld [vmem:[%s14719_s1 + $0x2a8] ss:$16 sps:$4 sm:$0xff]  }
  0x20   :  { %6580 = vmatprep.subr.bf16.mxu0 %v9776_v32  ;;  %7428 = vmatprep.subr.bf16.mxu1 %v9778_v33  ;;  %v8401_v28 = vcombine.high %v46_v26, %v62_v27  ;;  %v9854_v29 = vld [vmem:[%s14719_s1 + $0x2a0] ss:$16 sps:$4 sm:$0xff]   ;;  %v8400_v31 = vcombine.low %v46_v26, %v62_v27  ;;  %v9862_v32 = vld [vmem:[%s14719_s1 + $0x2c4] ss:$16 sps:$4 sm:$0xff]   ;;  %v9865_v33 = vld [vmem:[%s14719_s1 + $0x2cc] ss:$16 sps:$4 sm:$0xff]  }
  0x21   :  { %v9880_v47 = vld [vmem:[%s14719_s1 + $0x324] ss:$16 sps:$4 sm:$0xff]   ;;  %v9881_v50 = vld [vmem:[%s14719_s1 + $0x328] ss:$16 sps:$4 sm:$0xff]  }
  0x22   :  { %v11738_v27 = vld [vmem:[%s14720_s0 + $0x90] sm:$0xff] }
  0x23   :  { %6581 = vmatpush1.bf16.msra.mxu0 %v9780_v34  ;;  %7429 = vmatpush1.bf16.msra.mxu1 %v9781_v35  ;;  %v11569_v34 = vld [vmem:[%s14720_s0 + $0x8] sm:$0xff] }
  0x24   :  { %6582 = vmatprep.subr.bf16.mxu0 %v9782_v36  ;;  %7430 = vmatprep.subr.bf16.mxu1 %v9784_v37  ;;  %v11574_v35 = vld [vmem:[%s14720_s0 + $0x88] sm:$0xff]  ;;  %v9860_v36 = vld [vmem:[%s14719_s1 + $0x2c0] ss:$16 sps:$4 sm:$0xff]  }
  0x25   :  { %v9863_v37 = vld [vmem:[%s14719_s1 + $0x2c8] ss:$16 sps:$4 sm:$0xff]  }
  0x27   :  { %6583 = vmatpush1.bf16.msra.mxu0 %v9786_v38  ;;  %7431 = vmatpush1.bf16.msra.mxu1 %v9787_v39  ;;  %v8371_v38 = vcombine.high %v11569_v34, %v11574_v35  ;;  %v9868_v39 = vld [vmem:[%s14719_s1 + $0x2e4] ss:$16 sps:$4 sm:$0xff]  }
  0x28   :  { %6584 = vmatprep.subr.bf16.mxu0 %v9788_v40  ;;  %7432 = vmatprep.subr.bf16.mxu1 %v9790_v41  ;;  %v9871_v40 = vld [vmem:[%s14719_s1 + $0x2ec] ss:$16 sps:$4 sm:$0xff]   ;;  %v9866_v41 = vld [vmem:[%s14719_s1 + $0x2e0] ss:$16 sps:$4 sm:$0xff]  }
  0x2b   :  { %6585 = vmatpush1.bf16.msra.mxu0 %v9792_v42  ;;  %7433 = vmatpush1.bf16.msra.mxu1 %v9793_v43  ;;  %v9869_v42 = vld [vmem:[%s14719_s1 + $0x2e8] ss:$16 sps:$4 sm:$0xff]   ;;  %v9874_v43 = vld [vmem:[%s14719_s1 + $0x304] ss:$16 sps:$4 sm:$0xff]  }
  0x2c   :  { %6586 = vmatprep.subr.bf16.mxu0 %v9794_v44  ;;  %7434 = vmatprep.subr.bf16.mxu1 %v9796_v45  ;;  %v9877_v44 = vld [vmem:[%s14719_s1 + $0x30c] ss:$16 sps:$4 sm:$0xff]   ;;  %v9872_v45 = vld [vmem:[%s14719_s1 + $0x300] ss:$16 sps:$4 sm:$0xff]  }
  0x2f   :  { %6587 = vmatpush1.bf16.msra.mxu0 %v9798_v48  ;;  %7435 = vmatpush1.bf16.msra.mxu1 %v9799_v49  ;;  %v9883_v48 = vld [vmem:[%s14719_s1 + $0x32c] ss:$16 sps:$4 sm:$0xff]   ;;  %v9878_v49 = vld [vmem:[%s14719_s1 + $0x320] ss:$16 sps:$4 sm:$0xff]  }
  0x30   :  { %6588 = vmatprep.subr.bf16.mxu0 %v9800_v51  ;;  %7436 = vmatprep.subr.bf16.mxu1 %v9802_v52  ;;  %v9886_v51 = vld [vmem:[%s14719_s1 + $0x344] ss:$16 sps:$4 sm:$0xff]   ;;  %v9889_v52 = vld [vmem:[%s14719_s1 + $0x34c] ss:$16 sps:$4 sm:$0xff]  }
  0x33   :  { %6589 = vmatpush1.bf16.msra.mxu0 %v9804_v53  ;;  %7437 = vmatpush1.bf16.msra.mxu1 %v9805_v54  ;;  %v9884_v53 = vld [vmem:[%s14719_s1 + $0x340] ss:$16 sps:$4 sm:$0xff]   ;;  %v9887_v54 = vld [vmem:[%s14719_s1 + $0x348] ss:$16 sps:$4 sm:$0xff]  }
  0x34   :  { %6590 = vmatprep.subr.bf16.mxu0 %v9806_v55  ;;  %7438 = vmatprep.subr.bf16.mxu1 %v9808_v56  ;;  %v9892_v55 = vld [vmem:[%s14719_s1 + $0x364] ss:$16 sps:$4 sm:$0xff]   ;;  %v9895_v56 = vld [vmem:[%s14719_s1 + $0x36c] ss:$16 sps:$4 sm:$0xff]  }
  0x37   :  { %6591 = vmatpush1.bf16.msra.mxu0 %v9810_v57  ;;  %7439 = vmatpush1.bf16.msra.mxu1 %v9811_v58  ;;  %v9890_v57 = vld [vmem:[%s14719_s1 + $0x360] ss:$16 sps:$4 sm:$0xff]   ;;  %v9893_v58 = vld [vmem:[%s14719_s1 + $0x368] ss:$16 sps:$4 sm:$0xff]  }
  0x38   :  { %6592 = vmatprep.subr.bf16.mxu0 %v9812_v59  ;;  %7440 = vmatprep.subr.bf16.mxu1 %v9814_v60  ;;  %v9898_v59 = vld [vmem:[%s14719_s1 + $0x384] ss:$16 sps:$4 sm:$0xff]   ;;  %v9901_v60 = vld [vmem:[%s14719_s1 + $0x38c] ss:$16 sps:$4 sm:$0xff]  }
  0x3b   :  { %6593 = vmatpush1.bf16.msra.mxu0 %v9816_v61  ;;  %7441 = vmatpush1.bf16.msra.mxu1 %v9817_v62  ;;  %v9896_v61 = vld [vmem:[%s14719_s1 + $0x380] ss:$16 sps:$4 sm:$0xff]   ;;  %v9899_v62 = vld [vmem:[%s14719_s1 + $0x388] ss:$16 sps:$4 sm:$0xff]  }
  0x3c   :  { %6594 = vmatprep.subr.bf16.mxu0 %v9818_v63  ;;  %7442 = vmatprep.subr.bf16.mxu1 %v9820_v0  ;;  %v9904_v63 = vld [vmem:[%s14719_s1 + $0x3a4] ss:$16 sps:$4 sm:$0xff]   ;;  %v9907_v0 = vld [vmem:[%s14719_s1 + $0x3ac] ss:$16 sps:$4 sm:$0xff]  }
  0x3f   :  { %6595 = vmatpush1.bf16.msra.mxu0 %v9822_v1  ;;  %7443 = vmatpush1.bf16.msra.mxu1 %v9823_v2  ;;  %v9902_v1 = vld [vmem:[%s14719_s1 + $0x3a0] ss:$16 sps:$4 sm:$0xff]   ;;  %v9905_v2 = vld [vmem:[%s14719_s1 + $0x3a8] ss:$16 sps:$4 sm:$0xff]  }
  0x40   :  { %6617 = vmatprep.subr.bf16.mxu0 %v9826_v3  ;;  %7465 = vmatprep.subr.bf16.mxu1 %v9829_v4  ;;  %v9910_v3 = vld [vmem:[%s14719_s1 + $0x3c4] ss:$16 sps:$4 sm:$0xff]   ;;  %v9913_v4 = vld [vmem:[%s14719_s1 + $0x3cc] ss:$16 sps:$4 sm:$0xff]  }
  0x42   :  { %6597 = vmatmul.mubr.bf16.vlgmr.msra.gmra.mrb[0].mxu0 %v8368_v5  ;;  %7445 = vmatmul.mubr.bf16.vlgmr.msra.gmra.mrb[0].mxu1 %v8368_v5  ;;  %v9908_v5 = vld [vmem:[%s14719_s1 + $0x3c0] ss:$16 sps:$4 sm:$0xff]  }
  0x43   :  { %6618 = vmatpush1.bf16.msra.mxu0 %v9824_v6  ;;  %7466 = vmatpush1.bf16.msra.mxu1 %v9827_v7  ;;  %v9911_v6 = vld [vmem:[%s14719_s1 + $0x3c8] ss:$16 sps:$4 sm:$0xff]   ;;  %v9916_v7 = vld [vmem:[%s14719_s1 + $0x3e4] ss:$16 sps:$4 sm:$0xff]  }
  0x44   :  { %6619 = vmatprep.subr.bf16.mxu0 %v9832_v8  ;;  %7467 = vmatprep.subr.bf16.mxu1 %v9835_v9  ;;  %v9919_v8 = vld [vmem:[%s14719_s1 + $0x3ec] ss:$16 sps:$4 sm:$0xff]   ;;  %v9914_v9 = vld [vmem:[%s14719_s1 + $0x3e0] ss:$16 sps:$4 sm:$0xff]  }
  0x45   :  { %6606 = vmatprep.mubr.bf16.mxu0 %v8401_v28  ;;  %7454 = vmatprep.mubr.bf16.mxu1 %v8401_v28  ;;  %v9932_v28 = vld [vmem:[%s14719_s1 + $0x440] ss:$16 sps:$4 sm:$0xff]  }
  0x47   :  { %6620 = vmatpush1.bf16.msra.mxu0 %v9830_v10  ;;  %7468 = vmatpush1.bf16.msra.mxu1 %v9833_v11  ;;  %v9917_v10 = vld [vmem:[%s14719_s1 + $0x3e8] ss:$16 sps:$4 sm:$0xff]   ;;  %v9922_v11 = vld [vmem:[%s14719_s1 + $0x404] ss:$16 sps:$4 sm:$0xff]  }
  0x48   :  { %6621 = vmatprep.subr.bf16.mxu0 %v9838_v12  ;;  %7469 = vmatprep.subr.bf16.mxu1 %v9841_v13  ;;  %v9925_v12 = vld [vmem:[%s14719_s1 + $0x40c] ss:$16 sps:$4 sm:$0xff]   ;;  %v9920_v13 = vld [vmem:[%s14719_s1 + $0x400] ss:$16 sps:$4 sm:$0xff]  }
  0x4a   :  { %6607 = vmatmul.mubr.bf16.gmra.mrb[4].mxu0 %v8400_v31  ;;  %7455 = vmatmul.mubr.bf16.gmra.mrb[4].mxu1 %v8400_v31  ;;  %v9943_v31 = vld [vmem:[%s14719_s1 + $0x46c] ss:$16 sps:$4 sm:$0xff]  }
  0x4b   :  { %6622 = vmatpush1.bf16.msra.mxu0 %v9836_v14  ;;  %7470 = vmatpush1.bf16.msra.mxu1 %v9839_v15  ;;  %v9923_v14 = vld [vmem:[%s14719_s1 + $0x408] ss:$16 sps:$4 sm:$0xff]   ;;  %v8370_v15 = vcombine.low %v11569_v34, %v11574_v35  ;;  %v9946_v35 = vld [vmem:[%s14719_s1 + $0x484] ss:$16 sps:$4 sm:$0xff]  }
  0x4c   :  { %6623 = vmatprep.subr.bf16.mxu0 %v9844_v16  ;;  %7471 = vmatprep.subr.bf16.mxu1 %v9847_v17  ;;  %v47_v16 = vld [vmem:[%s14720_s0 + $0x108] sm:$0xff] }
  0x4d   :  { %6649 = vmatprep.mubr.bf16.mxu0 %v8371_v38  ;;  %7497 = vmatprep.mubr.bf16.mxu1 %v8371_v38  ;;  %v63_v17 = vld [vmem:[%s14720_s0 + $0x188] sm:$0xff] }
  0x4e   :  { %v8402_v26 = vcombine.low %v47_v16, %v63_v17  ;;  %v9941_v34 = vld [vmem:[%s14719_s1 + $0x468] ss:$16 sps:$4 sm:$0xff]  }
  0x4f   :  { %6624 = vmatpush1.bf16.msra.mxu0 %v9842_v18  ;;  %7472 = vmatpush1.bf16.msra.mxu1 %v9845_v19  ;;  %v9928_v18 = vld [vmem:[%s14719_s1 + $0x424] ss:$16 sps:$4 sm:$0xff]   ;;  %v9931_v19 = vld [vmem:[%s14719_s1 + $0x42c] ss:$16 sps:$4 sm:$0xff]   ;;  %v9947_v38 = vld [vmem:[%s14719_s1 + $0x488] ss:$16 sps:$4 sm:$0xff]  }
  0x50   :  { %6625 = vmatprep.subr.bf16.mxu0 %v9850_v20  ;;  %7473 = vmatprep.subr.bf16.mxu1 %v9853_v21  ;;  %v8403_v20 = vcombine.high %v47_v16, %v63_v17  ;;  %v9926_v21 = vld [vmem:[%s14719_s1 + $0x420] ss:$16 sps:$4 sm:$0xff]   ;;  %v10015_v16 = vld [vmem:[%s14719_s1 + $0x5ec] ss:$16 sps:$4 sm:$0xff]  }
  0x51   :  { %v10010_v17 = vld [vmem:[%s14719_s1 + $0x5e0] ss:$16 sps:$4 sm:$0xff]  }
  0x53   :  { %6626 = vmatpush1.bf16.msra.mxu0 %v9848_v22  ;;  %7474 = vmatpush1.bf16.msra.mxu1 %v9851_v23  ;;  %v9929_v22 = vld [vmem:[%s14719_s1 + $0x428] ss:$16 sps:$4 sm:$0xff]   ;;  %v9934_v23 = vld [vmem:[%s14719_s1 + $0x444] ss:$16 sps:$4 sm:$0xff]  }
  0x54   :  { %6627 = vmatprep.subr.bf16.mxu0 %v9856_v24  ;;  %7475 = vmatprep.subr.bf16.mxu1 %v9859_v25  ;;  %v9937_v24 = vld [vmem:[%s14719_s1 + $0x44c] ss:$16 sps:$4 sm:$0xff]   ;;  %v11733_v25 = vld [vmem:[%s14720_s0 + $0x10] sm:$0xff] }
  0x57   :  { %6628 = vmatpush1.bf16.msra.mxu0 %v9854_v29  ;;  %7476 = vmatpush1.bf16.msra.mxu1 %v9857_v30  ;;  %v9935_v29 = vld [vmem:[%s14719_s1 + $0x448] ss:$16 sps:$4 sm:$0xff]   ;;  %v9940_v30 = vld [vmem:[%s14719_s1 + $0x464] ss:$16 sps:$4 sm:$0xff]  }
  0x58   :  { %6629 = vmatprep.subr.bf16.mxu0 %v9862_v32  ;;  %7477 = vmatprep.subr.bf16.mxu1 %v9865_v33  ;;  %v8373_v32 = vcombine.high %v11733_v25, %v11738_v27  ;;  %v9938_v33 = vld [vmem:[%s14719_s1 + $0x460] ss:$16 sps:$4 sm:$0xff]  }
  0x5b   :  { %6630 = vmatpush1.bf16.msra.mxu0 %v9860_v36  ;;  %7478 = vmatpush1.bf16.msra.mxu1 %v9863_v37  ;;  %v9949_v36 = vld [vmem:[%s14719_s1 + $0x48c] ss:$16 sps:$4 sm:$0xff]   ;;  %v9944_v37 = vld [vmem:[%s14719_s1 + $0x480] ss:$16 sps:$4 sm:$0xff]  }
  0x5c   :  { %6631 = vmatprep.subr.bf16.mxu0 %v9868_v39  ;;  %7479 = vmatprep.subr.bf16.mxu1 %v9871_v40  ;;  %v9952_v39 = vld [vmem:[%s14719_s1 + $0x4a4] ss:$16 sps:$4 sm:$0xff]   ;;  %v9955_v40 = vld [vmem:[%s14719_s1 + $0x4ac] ss:$16 sps:$4 sm:$0xff]  }
  0x5f   :  { %6632 = vmatpush1.bf16.msra.mxu0 %v9866_v41  ;;  %7480 = vmatpush1.bf16.msra.mxu1 %v9869_v42  ;;  %v9950_v41 = vld [vmem:[%s14719_s1 + $0x4a0] ss:$16 sps:$4 sm:$0xff]   ;;  %v9953_v42 = vld [vmem:[%s14719_s1 + $0x4a8] ss:$16 sps:$4 sm:$0xff]  }
  0x60   :  { %6633 = vmatprep.subr.bf16.mxu0 %v9874_v43  ;;  %7481 = vmatprep.subr.bf16.mxu1 %v9877_v44  ;;  %v9958_v43 = vld [vmem:[%s14719_s1 + $0x4c4] ss:$16 sps:$4 sm:$0xff]   ;;  %v9961_v44 = vld [vmem:[%s14719_s1 + $0x4cc] ss:$16 sps:$4 sm:$0xff]  }
  0x63   :  { %6634 = vmatpush1.bf16.msra.mxu0 %v9872_v45  ;;  %7482 = vmatpush1.bf16.msra.mxu1 %v9875_v46  ;;  %v9956_v45 = vld [vmem:[%s14719_s1 + $0x4c0] ss:$16 sps:$4 sm:$0xff]   ;;  %v9959_v46 = vld [vmem:[%s14719_s1 + $0x4c8] ss:$16 sps:$4 sm:$0xff]  }
  0x64   :  { %6635 = vmatprep.subr.bf16.mxu0 %v9880_v47  ;;  %7483 = vmatprep.subr.bf16.mxu1 %v9883_v48  ;;  %v9964_v47 = vld [vmem:[%s14719_s1 + $0x4e4] ss:$16 sps:$4 sm:$0xff]   ;;  %v9967_v48 = vld [vmem:[%s14719_s1 + $0x4ec] ss:$16 sps:$4 sm:$0xff]  }
  0x67   :  { %6636 = vmatpush1.bf16.msra.mxu0 %v9878_v49  ;;  %7484 = vmatpush1.bf16.msra.mxu1 %v9881_v50  ;;  %v9962_v49 = vld [vmem:[%s14719_s1 + $0x4e0] ss:$16 sps:$4 sm:$0xff]   ;;  %v9965_v50 = vld [vmem:[%s14719_s1 + $0x4e8] ss:$16 sps:$4 sm:$0xff]  }
  0x68   :  { %6637 = vmatprep.subr.bf16.mxu0 %v9886_v51  ;;  %7485 = vmatprep.subr.bf16.mxu1 %v9889_v52  ;;  %v9970_v51 = vld [vmem:[%s14719_s1 + $0x504] ss:$16 sps:$4 sm:$0xff]   ;;  %v9973_v52 = vld [vmem:[%s14719_s1 + $0x50c] ss:$16 sps:$4 sm:$0xff]  }
  0x6b   :  { %6638 = vmatpush1.bf16.msra.mxu0 %v9884_v53  ;;  %7486 = vmatpush1.bf16.msra.mxu1 %v9887_v54  ;;  %v9968_v53 = vld [vmem:[%s14719_s1 + $0x500] ss:$16 sps:$4 sm:$0xff]   ;;  %v9971_v54 = vld [vmem:[%s14719_s1 + $0x508] ss:$16 sps:$4 sm:$0xff]  }
  0x6c   :  { %6639 = vmatprep.subr.bf16.mxu0 %v9892_v55  ;;  %7487 = vmatprep.subr.bf16.mxu1 %v9895_v56  ;;  %v9976_v55 = vld [vmem:[%s14719_s1 + $0x524] ss:$16 sps:$4 sm:$0xff]   ;;  %v9979_v56 = vld [vmem:[%s14719_s1 + $0x52c] ss:$16 sps:$4 sm:$0xff]  }
  0x6f   :  { %6640 = vmatpush1.bf16.msra.mxu0 %v9890_v57  ;;  %7488 = vmatpush1.bf16.msra.mxu1 %v9893_v58  ;;  %v9974_v57 = vld [vmem:[%s14719_s1 + $0x520] ss:$16 sps:$4 sm:$0xff]   ;;  %v9977_v58 = vld [vmem:[%s14719_s1 + $0x528] ss:$16 sps:$4 sm:$0xff]  }
  0x70   :  { %6641 = vmatprep.subr.bf16.mxu0 %v9898_v59  ;;  %7489 = vmatprep.subr.bf16.mxu1 %v9901_v60  ;;  %v9982_v59 = vld [vmem:[%s14719_s1 + $0x544] ss:$16 sps:$4 sm:$0xff]   ;;  %v9985_v60 = vld [vmem:[%s14719_s1 + $0x54c] ss:$16 sps:$4 sm:$0xff]  }
  0x73   :  { %6642 = vmatpush1.bf16.msra.mxu0 %v9896_v61  ;;  %7490 = vmatpush1.bf16.msra.mxu1 %v9899_v62  ;;  %v9980_v61 = vld [vmem:[%s14719_s1 + $0x540] ss:$16 sps:$4 sm:$0xff]   ;;  %v9983_v62 = vld [vmem:[%s14719_s1 + $0x548] ss:$16 sps:$4 sm:$0xff]  }
  0x74   :  { %6643 = vmatprep.subr.bf16.mxu0 %v9904_v63  ;;  %7491 = vmatprep.subr.bf16.mxu1 %v9907_v0  ;;  %v9988_v63 = vld [vmem:[%s14719_s1 + $0x564] ss:$16 sps:$4 sm:$0xff]   ;;  %v9991_v0 = vld [vmem:[%s14719_s1 + $0x56c] ss:$16 sps:$4 sm:$0xff]  }
  0x77   :  { %6644 = vmatpush1.bf16.msra.mxu0 %v9902_v1  ;;  %7492 = vmatpush1.bf16.msra.mxu1 %v9905_v2  ;;  %v9986_v1 = vld [vmem:[%s14719_s1 + $0x560] ss:$16 sps:$4 sm:$0xff]   ;;  %v9989_v2 = vld [vmem:[%s14719_s1 + $0x568] ss:$16 sps:$4 sm:$0xff]  }
  0x78   :  { %6645 = vmatprep.subr.bf16.mxu0 %v9910_v3  ;;  %7493 = vmatprep.subr.bf16.mxu1 %v9913_v4  ;;  %v9994_v3 = vld [vmem:[%s14719_s1 + $0x584] ss:$16 sps:$4 sm:$0xff]   ;;  %v9997_v4 = vld [vmem:[%s14719_s1 + $0x58c] ss:$16 sps:$4 sm:$0xff]  }
  0x7b   :  { %6646 = vmatpush1.bf16.msra.mxu0 %v9908_v5  ;;  %7494 = vmatpush1.bf16.msra.mxu1 %v9911_v6  ;;  %v9992_v5 = vld [vmem:[%s14719_s1 + $0x580] ss:$16 sps:$4 sm:$0xff]   ;;  %v9995_v6 = vld [vmem:[%s14719_s1 + $0x588] ss:$16 sps:$4 sm:$0xff]  }
  0x7c   :  { %6647 = vmatprep.subr.bf16.mxu0 %v9916_v7  ;;  %7495 = vmatprep.subr.bf16.mxu1 %v9919_v8  ;;  %v10000_v7 = vld [vmem:[%s14719_s1 + $0x5a4] ss:$16 sps:$4 sm:$0xff]   ;;  %v10003_v8 = vld [vmem:[%s14719_s1 + $0x5ac] ss:$16 sps:$4 sm:$0xff]  }
  0x7f   :  { %6648 = vmatpush1.bf16.msra.mxu0 %v9914_v9  ;;  %7496 = vmatpush1.bf16.msra.mxu1 %v9917_v10  ;;  %v9998_v9 = vld [vmem:[%s14719_s1 + $0x5a0] ss:$16 sps:$4 sm:$0xff]   ;;  %v10001_v10 = vld [vmem:[%s14719_s1 + $0x5a8] ss:$16 sps:$4 sm:$0xff]  }
  0x80   :  { %6670 = vmatprep.subr.bf16.mxu0 %v9922_v11  ;;  %7518 = vmatprep.subr.bf16.mxu1 %v9925_v12  ;;  %v10006_v11 = vld [vmem:[%s14719_s1 + $0x5c4] ss:$16 sps:$4 sm:$0xff]   ;;  %v10009_v12 = vld [vmem:[%s14719_s1 + $0x5cc] ss:$16 sps:$4 sm:$0xff]  }
  0x82   :  { %6650 = vmatmul.mubr.bf16.vlgmr.msra.gmra.mrb[0].mxu0 %v8370_v15  ;;  %7498 = vmatmul.mubr.bf16.vlgmr.msra.gmra.mrb[0].mxu1 %v8370_v15  ;;  %v10012_v15 = vld [vmem:[%s14719_s1 + $0x5e4] ss:$16 sps:$4 sm:$0xff]  }
  0x83   :  { %6671 = vmatpush1.bf16.msra.mxu0 %v9920_v13  ;;  %7519 = vmatpush1.bf16.msra.mxu1 %v9923_v14  ;;  %v10004_v13 = vld [vmem:[%s14719_s1 + $0x5c0] ss:$16 sps:$4 sm:$0xff]   ;;  %v10007_v14 = vld [vmem:[%s14719_s1 + $0x5c8] ss:$16 sps:$4 sm:$0xff]  }
  0x84   :  { %6672 = vmatprep.subr.bf16.mxu0 %v9928_v18  ;;  %7520 = vmatprep.subr.bf16.mxu1 %v9931_v19  ;;  %v10013_v18 = vld [vmem:[%s14719_s1 + $0x5e8] ss:$16 sps:$4 sm:$0xff]   ;;  %v10018_v19 = vld [vmem:[%s14719_s1 + $0x604] ss:$16 sps:$4 sm:$0xff]  }
  0x85   :  { %6659 = vmatprep.mubr.bf16.mxu0 %v8403_v20  ;;  %7507 = vmatprep.mubr.bf16.mxu1 %v8403_v20  ;;  %v10021_v20 = vld [vmem:[%s14719_s1 + $0x60c] ss:$16 sps:$4 sm:$0xff]  }
  0x87   :  { %6673 = vmatpush1.bf16.msra.mxu0 %v9926_v21  ;;  %7521 = vmatpush1.bf16.msra.mxu1 %v9929_v22  ;;  %v48_v21 = vld [vmem:[%s14720_s0 + $0x110] sm:$0xff]  ;;  %v8372_v22 = vcombine.low %v11733_v25, %v11738_v27  ;;  %v10027_v27 = vld [vmem:[%s14719_s1 + $0x62c] ss:$16 sps:$4 sm:$0xff]  }
  0x88   :  { %6674 = vmatprep.subr.bf16.mxu0 %v9934_v23  ;;  %7522 = vmatprep.subr.bf16.mxu1 %v9937_v24  ;;  %v64_v23 = vld [vmem:[%s14720_s0 + $0x190] sm:$0xff] }
  0x89   :  { %v10016_v24 = vld [vmem:[%s14719_s1 + $0x600] ss:$16 sps:$4 sm:$0xff]   ;;  %v10024_v25 = vld [vmem:[%s14719_s1 + $0x624] ss:$16 sps:$4 sm:$0xff]  }
  0x8a   :  { %6660 = vmatmul.mubr.bf16.gmra.mrb[4].mxu0 %v8402_v26  ;;  %7508 = vmatmul.mubr.bf16.gmra.mrb[4].mxu1 %v8402_v26  ;;  %v10019_v26 = vld [vmem:[%s14719_s1 + $0x608] ss:$16 sps:$4 sm:$0xff]  }
  0x8b   :  { %6675 = vmatpush1.bf16.msra.mxu0 %v9932_v28  ;;  %7523 = vmatpush1.bf16.msra.mxu1 %v9935_v29  ;;  %v8405_v28 = vcombine.high %v48_v21, %v64_v23  ;;  %v10022_v29 = vld [vmem:[%s14719_s1 + $0x620] ss:$16 sps:$4 sm:$0xff]  }
  0x8c   :  { %6676 = vmatprep.subr.bf16.mxu0 %v9940_v30  ;;  %7524 = vmatprep.subr.bf16.mxu1 %v9943_v31  ;;  %v10025_v30 = vld [vmem:[%s14719_s1 + $0x628] ss:$16 sps:$4 sm:$0xff]   ;;  %v10030_v31 = vld [vmem:[%s14719_s1 + $0x644] ss:$16 sps:$4 sm:$0xff]  }
  0x8d   :  { %6702 = vmatprep.mubr.bf16.mxu0 %v8373_v32  ;;  %7550 = vmatprep.mubr.bf16.mxu1 %v8373_v32  ;;  %v10033_v32 = vld [vmem:[%s14719_s1 + $0x64c] ss:$16 sps:$4 sm:$0xff]  }
  0x8f   :  { %6677 = vmatpush1.bf16.msra.mxu0 %v9938_v33  ;;  %7525 = vmatpush1.bf16.msra.mxu1 %v9941_v34  ;;  %v11945_v33 = vld [vmem:[%s14720_s0 + $0x18] sm:$0xff]  ;;  %v8404_v34 = vcombine.low %v48_v21, %v64_v23  ;;  %v10100_v21 = vld [vmem:[%s14719_s1 + $0x7c0] ss:$16 sps:$4 sm:$0xff]   ;;  %v10108_v23 = vld [vmem:[%s14719_s1 + $0x7e4] ss:$16 sps:$4 sm:$0xff]  }
  0x90   :  { %6678 = vmatprep.subr.bf16.mxu0 %v9946_v35  ;;  %7526 = vmatprep.subr.bf16.mxu1 %v9949_v36  ;;  %v11950_v35 = vld [vmem:[%s14720_s0 + $0x98] sm:$0xff]  ;;  %v10028_v36 = vld [vmem:[%s14719_s1 + $0x640] ss:$16 sps:$4 sm:$0xff]  }
  0x93   :  { %6679 = vmatpush1.bf16.msra.mxu0 %v9944_v37  ;;  %7527 = vmatpush1.bf16.msra.mxu1 %v9947_v38  ;;  %v10031_v37 = vld [vmem:[%s14719_s1 + $0x648] ss:$16 sps:$4 sm:$0xff]   ;;  %v10036_v38 = vld [vmem:[%s14719_s1 + $0x664] ss:$16 sps:$4 sm:$0xff]  }
  0x94   :  { %6680 = vmatprep.subr.bf16.mxu0 %v9952_v39  ;;  %7528 = vmatprep.subr.bf16.mxu1 %v9955_v40  ;;  %v10039_v39 = vld [vmem:[%s14719_s1 + $0x66c] ss:$16 sps:$4 sm:$0xff]   ;;  %v8375_v40 = vcombine.high %v11945_v33, %v11950_v35 }
  0x97   :  { %6681 = vmatpush1.bf16.msra.mxu0 %v9950_v41  ;;  %7529 = vmatpush1.bf16.msra.mxu1 %v9953_v42  ;;  %v10034_v41 = vld [vmem:[%s14719_s1 + $0x660] ss:$16 sps:$4 sm:$0xff]   ;;  %v10037_v42 = vld [vmem:[%s14719_s1 + $0x668] ss:$16 sps:$4 sm:$0xff]  }
  0x98   :  { %6682 = vmatprep.subr.bf16.mxu0 %v9958_v43  ;;  %7530 = vmatprep.subr.bf16.mxu1 %v9961_v44  ;;  %v10042_v43 = vld [vmem:[%s14719_s1 + $0x684] ss:$16 sps:$4 sm:$0xff]   ;;  %v10045_v44 = vld [vmem:[%s14719_s1 + $0x68c] ss:$16 sps:$4 sm:$0xff]  }
  0x9b   :  { %6683 = vmatpush1.bf16.msra.mxu0 %v9956_v45  ;;  %7531 = vmatpush1.bf16.msra.mxu1 %v9959_v46  ;;  %v10040_v45 = vld [vmem:[%s14719_s1 + $0x680] ss:$16 sps:$4 sm:$0xff]   ;;  %v10043_v46 = vld [vmem:[%s14719_s1 + $0x688] ss:$16 sps:$4 sm:$0xff]  }
  0x9c   :  { %6684 = vmatprep.subr.bf16.mxu0 %v9964_v47  ;;  %7532 = vmatprep.subr.bf16.mxu1 %v9967_v48  ;;  %v10048_v47 = vld [vmem:[%s14719_s1 + $0x6a4] ss:$16 sps:$4 sm:$0xff]   ;;  %v10051_v48 = vld [vmem:[%s14719_s1 + $0x6ac] ss:$16 sps:$4 sm:$0xff]  }
  0x9f   :  { %6685 = vmatpush1.bf16.msra.mxu0 %v9962_v49  ;;  %7533 = vmatpush1.bf16.msra.mxu1 %v9965_v50  ;;  %v10046_v49 = vld [vmem:[%s14719_s1 + $0x6a0] ss:$16 sps:$4 sm:$0xff]   ;;  %v10049_v50 = vld [vmem:[%s14719_s1 + $0x6a8] ss:$16 sps:$4 sm:$0xff]  }
  0xa0   :  { %6686 = vmatprep.subr.bf16.mxu0 %v9970_v51  ;;  %7534 = vmatprep.subr.bf16.mxu1 %v9973_v52  ;;  %v10054_v51 = vld [vmem:[%s14719_s1 + $0x6c4] ss:$16 sps:$4 sm:$0xff]   ;;  %v10057_v52 = vld [vmem:[%s14719_s1 + $0x6cc] ss:$16 sps:$4 sm:$0xff]  }
  0xa3   :  { %6687 = vmatpush1.bf16.msra.mxu0 %v9968_v53  ;;  %7535 = vmatpush1.bf16.msra.mxu1 %v9971_v54  ;;  %v10052_v53 = vld [vmem:[%s14719_s1 + $0x6c0] ss:$16 sps:$4 sm:$0xff]   ;;  %v10055_v54 = vld [vmem:[%s14719_s1 + $0x6c8] ss:$16 sps:$4 sm:$0xff]  }
  0xa4   :  { %6688 = vmatprep.subr.bf16.mxu0 %v9976_v55  ;;  %7536 = vmatprep.subr.bf16.mxu1 %v9979_v56  ;;  %v10060_v55 = vld [vmem:[%s14719_s1 + $0x6e4] ss:$16 sps:$4 sm:$0xff]   ;;  %v10063_v56 = vld [vmem:[%s14719_s1 + $0x6ec] ss:$16 sps:$4 sm:$0xff]  }
  0xa7   :  { %6689 = vmatpush1.bf16.msra.mxu0 %v9974_v57  ;;  %7537 = vmatpush1.bf16.msra.mxu1 %v9977_v58  ;;  %v10058_v57 = vld [vmem:[%s14719_s1 + $0x6e0] ss:$16 sps:$4 sm:$0xff]   ;;  %v10061_v58 = vld [vmem:[%s14719_s1 + $0x6e8] ss:$16 sps:$4 sm:$0xff]  }
  0xa8   :  { %6690 = vmatprep.subr.bf16.mxu0 %v9982_v59  ;;  %7538 = vmatprep.subr.bf16.mxu1 %v9985_v60  ;;  %v10066_v59 = vld [vmem:[%s14719_s1 + $0x704] ss:$16 sps:$4 sm:$0xff]   ;;  %v10069_v60 = vld [vmem:[%s14719_s1 + $0x70c] ss:$16 sps:$4 sm:$0xff]  }
  0xab   :  { %6691 = vmatpush1.bf16.msra.mxu0 %v9980_v61  ;;  %7539 = vmatpush1.bf16.msra.mxu1 %v9983_v62  ;;  %v10064_v61 = vld [vmem:[%s14719_s1 + $0x700] ss:$16 sps:$4 sm:$0xff]   ;;  %v10067_v62 = vld [vmem:[%s14719_s1 + $0x708] ss:$16 sps:$4 sm:$0xff]  }
  0xac   :  { %6692 = vmatprep.subr.bf16.mxu0 %v9988_v63  ;;  %7540 = vmatprep.subr.bf16.mxu1 %v9991_v0  ;;  %v10072_v63 = vld [vmem:[%s14719_s1 + $0x724] ss:$16 sps:$4 sm:$0xff]   ;;  %v10075_v0 = vld [vmem:[%s14719_s1 + $0x72c] ss:$16 sps:$4 sm:$0xff]  }
  0xaf   :  { %6693 = vmatpush1.bf16.msra.mxu0 %v9986_v1  ;;  %7541 = vmatpush1.bf16.msra.mxu1 %v9989_v2  ;;  %v10070_v1 = vld [vmem:[%s14719_s1 + $0x720] ss:$16 sps:$4 sm:$0xff]   ;;  %v10073_v2 = vld [vmem:[%s14719_s1 + $0x728] ss:$16 sps:$4 sm:$0xff]  }
  0xb0   :  { %6694 = vmatprep.subr.bf16.mxu0 %v9994_v3  ;;  %7542 = vmatprep.subr.bf16.mxu1 %v9997_v4  ;;  %v10078_v3 = vld [vmem:[%s14719_s1 + $0x744] ss:$16 sps:$4 sm:$0xff]   ;;  %v10081_v4 = vld [vmem:[%s14719_s1 + $0x74c] ss:$16 sps:$4 sm:$0xff]  }
  0xb3   :  { %6695 = vmatpush1.bf16.msra.mxu0 %v9992_v5  ;;  %7543 = vmatpush1.bf16.msra.mxu1 %v9995_v6  ;;  %v10076_v5 = vld [vmem:[%s14719_s1 + $0x740] ss:$16 sps:$4 sm:$0xff]   ;;  %v10079_v6 = vld [vmem:[%s14719_s1 + $0x748] ss:$16 sps:$4 sm:$0xff]  }
  0xb4   :  { %6696 = vmatprep.subr.bf16.mxu0 %v10000_v7  ;;  %7544 = vmatprep.subr.bf16.mxu1 %v10003_v8  ;;  %v10084_v7 = vld [vmem:[%s14719_s1 + $0x764] ss:$16 sps:$4 sm:$0xff]   ;;  %v10087_v8 = vld [vmem:[%s14719_s1 + $0x76c] ss:$16 sps:$4 sm:$0xff]  }
  0xb7   :  { %6697 = vmatpush1.bf16.msra.mxu0 %v9998_v9  ;;  %7545 = vmatpush1.bf16.msra.mxu1 %v10001_v10  ;;  %v10082_v9 = vld [vmem:[%s14719_s1 + $0x760] ss:$16 sps:$4 sm:$0xff]   ;;  %v10085_v10 = vld [vmem:[%s14719_s1 + $0x768] ss:$16 sps:$4 sm:$0xff]  }
  0xb8   :  { %6698 = vmatprep.subr.bf16.mxu0 %v10006_v11  ;;  %7546 = vmatprep.subr.bf16.mxu1 %v10009_v12  ;;  %v10090_v11 = vld [vmem:[%s14719_s1 + $0x784] ss:$16 sps:$4 sm:$0xff]   ;;  %v10093_v12 = vld [vmem:[%s14719_s1 + $0x78c] ss:$16 sps:$4 sm:$0xff]  }
  0xbb   :  { %6699 = vmatpush1.bf16.msra.mxu0 %v10004_v13  ;;  %7547 = vmatpush1.bf16.msra.mxu1 %v10007_v14  ;;  %v10088_v13 = vld [vmem:[%s14719_s1 + $0x780] ss:$16 sps:$4 sm:$0xff]   ;;  %v10091_v14 = vld [vmem:[%s14719_s1 + $0x788] ss:$16 sps:$4 sm:$0xff]  }
  0xbc   :  { %6700 = vmatprep.subr.bf16.mxu0 %v10012_v15  ;;  %7548 = vmatprep.subr.bf16.mxu1 %v10015_v16  ;;  %v10096_v15 = vld [vmem:[%s14719_s1 + $0x7a4] ss:$16 sps:$4 sm:$0xff]   ;;  %v10099_v16 = vld [vmem:[%s14719_s1 + $0x7ac] ss:$16 sps:$4 sm:$0xff]  }
  0xbf   :  { %6701 = vmatpush1.bf16.msra.mxu0 %v10010_v17  ;;  %7549 = vmatpush1.bf16.msra.mxu1 %v10013_v18  ;;  %v10094_v17 = vld [vmem:[%s14719_s1 + $0x7a0] ss:$16 sps:$4 sm:$0xff]   ;;  %v10097_v18 = vld [vmem:[%s14719_s1 + $0x7a8] ss:$16 sps:$4 sm:$0xff]  }
  0xc0   :  { %6723 = vmatprep.subr.bf16.mxu0 %v10018_v19  ;;  %7571 = vmatprep.subr.bf16.mxu1 %v10021_v20  ;;  %v10102_v19 = vld [vmem:[%s14719_s1 + $0x7c4] ss:$16 sps:$4 sm:$0xff]   ;;  %v10105_v20 = vld [vmem:[%s14719_s1 + $0x7cc] ss:$16 sps:$4 sm:$0xff]  }
  0xc2   :  { %6703 = vmatmul.mubr.bf16.vlgmr.msra.gmra.mrb[0].mxu0 %v8372_v22  ;;  %7551 = vmatmul.mubr.bf16.vlgmr.msra.gmra.mrb[0].mxu1 %v8372_v22  ;;  %v10103_v22 = vld [vmem:[%s14719_s1 + $0x7c8] ss:$16 sps:$4 sm:$0xff]  }
  0xc3   :  { %6724 = vmatpush1.bf16.msra.mxu0 %v10016_v24  ;;  %7572 = vmatpush1.bf16.msra.mxu1 %v10019_v26  ;;  %v10111_v24 = vld [vmem:[%s14719_s1 + $0x7ec] ss:$16 sps:$4 sm:$0xff]   ;;  %v10106_v26 = vld [vmem:[%s14719_s1 + $0x7e0] ss:$16 sps:$4 sm:$0xff]  }
  0xc4   :  { %6725 = vmatprep.subr.bf16.mxu0 %v10024_v25  ;;  %7573 = vmatprep.subr.bf16.mxu1 %v10027_v27  ;;  %v10109_v25 = vld [vmem:[%s14719_s1 + $0x7e8] ss:$16 sps:$4 sm:$0xff]   ;;  %v10114_v27 = vld [vmem:[%s14719_s1 + $0x804] ss:$16 sps:$4 sm:$0xff]  }
  0xc5   :  { %6712 = vmatprep.mubr.bf16.mxu0 %v8405_v28  ;;  %7560 = vmatprep.mubr.bf16.mxu1 %v8405_v28  ;;  %v10117_v28 = vld [vmem:[%s14719_s1 + $0x80c] ss:$16 sps:$4 sm:$0xff]  }
  0xc7   :  { %6726 = vmatpush1.bf16.msra.mxu0 %v10022_v29  ;;  %7574 = vmatpush1.bf16.msra.mxu1 %v10025_v30  ;;  %v49_v29 = vld [vmem:[%s14720_s0 + $0x118] sm:$0xff]  ;;  %v8374_v30 = vcombine.low %v11945_v33, %v11950_v35 }
  0xc8   :  { %6727 = vmatprep.subr.bf16.mxu0 %v10030_v31  ;;  %7575 = vmatprep.subr.bf16.mxu1 %v10033_v32  ;;  %v65_v31 = vld [vmem:[%s14720_s0 + $0x198] sm:$0xff]  ;;  %v10112_v32 = vld [vmem:[%s14719_s1 + $0x800] ss:$16 sps:$4 sm:$0xff]  }
  0xc9   :  { %v10123_v33 = vld [vmem:[%s14719_s1 + $0x82c] ss:$16 sps:$4 sm:$0xff]   ;;  %v8407_v35 = vcombine.high %v49_v29, %v65_v31 }
  0xca   :  { %6713 = vmatmul.mubr.bf16.gmra.mrb[4].mxu0 %v8404_v34  ;;  %7561 = vmatmul.mubr.bf16.gmra.mrb[4].mxu1 %v8404_v34  ;;  %v10115_v34 = vld [vmem:[%s14719_s1 + $0x808] ss:$16 sps:$4 sm:$0xff]  }
  0xcb   :  { %6728 = vmatpush1.bf16.msra.mxu0 %v10028_v36  ;;  %7576 = vmatpush1.bf16.msra.mxu1 %v10031_v37  ;;  %v10120_v36 = vld [vmem:[%s14719_s1 + $0x824] ss:$16 sps:$4 sm:$0xff]   ;;  %v10118_v37 = vld [vmem:[%s14719_s1 + $0x820] ss:$16 sps:$4 sm:$0xff]  }
  0xcc   :  { %6729 = vmatprep.subr.bf16.mxu0 %v10036_v38  ;;  %7577 = vmatprep.subr.bf16.mxu1 %v10039_v39  ;;  %v10121_v38 = vld [vmem:[%s14719_s1 + $0x828] ss:$16 sps:$4 sm:$0xff]   ;;  %v10126_v39 = vld [vmem:[%s14719_s1 + $0x844] ss:$16 sps:$4 sm:$0xff]  }
  0xcd   :  { %6755 = vmatprep.mubr.bf16.mxu0 %v8375_v40  ;;  %7603 = vmatprep.mubr.bf16.mxu1 %v8375_v40  ;;  %v10129_v40 = vld [vmem:[%s14719_s1 + $0x84c] ss:$16 sps:$4 sm:$0xff]  }
  0xcf   :  { %6730 = vmatpush1.bf16.msra.mxu0 %v10034_v41  ;;  %7578 = vmatpush1.bf16.msra.mxu1 %v10037_v42  ;;  %v12157_v41 = vld [vmem:[%s14720_s0 + $0x20] sm:$0xff]  ;;  %v8406_v42 = vcombine.low %v49_v29, %v65_v31 }
  0xd0   :  { %6731 = vmatprep.subr.bf16.mxu0 %v10042_v43  ;;  %7579 = vmatprep.subr.bf16.mxu1 %v10045_v44  ;;  %v12162_v43 = vld [vmem:[%s14720_s0 + $0xa0] sm:$0xff] }
  0xd1   :  { %v10124_v44 = vld [vmem:[%s14719_s1 + $0x840] ss:$16 sps:$4 sm:$0xff]   ;;  %v10204_v31 = vld [vmem:[%s14719_s1 + $0x9e4] ss:$16 sps:$4 sm:$0xff]  }
  0xd2   :  { %v10196_v29 = vld [vmem:[%s14719_s1 + $0x9c0] ss:$16 sps:$4 sm:$0xff]  }
  0xd3   :  { %6732 = vmatpush1.bf16.msra.mxu0 %v10040_v45  ;;  %7580 = vmatpush1.bf16.msra.mxu1 %v10043_v46  ;;  %v10127_v45 = vld [vmem:[%s14719_s1 + $0x848] ss:$16 sps:$4 sm:$0xff]   ;;  %v10132_v46 = vld [vmem:[%s14719_s1 + $0x864] ss:$16 sps:$4 sm:$0xff]  }
  0xd4   :  { %6733 = vmatprep.subr.bf16.mxu0 %v10048_v47  ;;  %7581 = vmatprep.subr.bf16.mxu1 %v10051_v48  ;;  %v10135_v47 = vld [vmem:[%s14719_s1 + $0x86c] ss:$16 sps:$4 sm:$0xff]   ;;  %v8377_v48 = vcombine.high %v12157_v41, %v12162_v43 }
  0xd7   :  { %6734 = vmatpush1.bf16.msra.mxu0 %v10046_v49  ;;  %7582 = vmatpush1.bf16.msra.mxu1 %v10049_v50  ;;  %v10130_v49 = vld [vmem:[%s14719_s1 + $0x860] ss:$16 sps:$4 sm:$0xff]   ;;  %v10133_v50 = vld [vmem:[%s14719_s1 + $0x868] ss:$16 sps:$4 sm:$0xff]  }
  0xd8   :  { %6735 = vmatprep.subr.bf16.mxu0 %v10054_v51  ;;  %7583 = vmatprep.subr.bf16.mxu1 %v10057_v52  ;;  %v10138_v51 = vld [vmem:[%s14719_s1 + $0x884] ss:$16 sps:$4 sm:$0xff]   ;;  %v10141_v52 = vld [vmem:[%s14719_s1 + $0x88c] ss:$16 sps:$4 sm:$0xff]  }
  0xdb   :  { %6736 = vmatpush1.bf16.msra.mxu0 %v10052_v53  ;;  %7584 = vmatpush1.bf16.msra.mxu1 %v10055_v54  ;;  %v10136_v53 = vld [vmem:[%s14719_s1 + $0x880] ss:$16 sps:$4 sm:$0xff]   ;;  %v10139_v54 = vld [vmem:[%s14719_s1 + $0x888] ss:$16 sps:$4 sm:$0xff]  }
  0xdc   :  { %6737 = vmatprep.subr.bf16.mxu0 %v10060_v55  ;;  %7585 = vmatprep.subr.bf16.mxu1 %v10063_v56  ;;  %v10144_v55 = vld [vmem:[%s14719_s1 + $0x8a4] ss:$16 sps:$4 sm:$0xff]   ;;  %v10147_v56 = vld [vmem:[%s14719_s1 + $0x8ac] ss:$16 sps:$4 sm:$0xff]  }
  0xdf   :  { %6738 = vmatpush1.bf16.msra.mxu0 %v10058_v57  ;;  %7586 = vmatpush1.bf16.msra.mxu1 %v10061_v58  ;;  %v10142_v57 = vld [vmem:[%s14719_s1 + $0x8a0] ss:$16 sps:$4 sm:$0xff]   ;;  %v10145_v58 = vld [vmem:[%s14719_s1 + $0x8a8] ss:$16 sps:$4 sm:$0xff]  }
  0xe0   :  { %6739 = vmatprep.subr.bf16.mxu0 %v10066_v59  ;;  %7587 = vmatprep.subr.bf16.mxu1 %v10069_v60  ;;  %v10150_v59 = vld [vmem:[%s14719_s1 + $0x8c4] ss:$16 sps:$4 sm:$0xff]   ;;  %v10153_v60 = vld [vmem:[%s14719_s1 + $0x8cc] ss:$16 sps:$4 sm:$0xff]  }
  0xe3   :  { %6740 = vmatpush1.bf16.msra.mxu0 %v10064_v61  ;;  %7588 = vmatpush1.bf16.msra.mxu1 %v10067_v62  ;;  %v10148_v61 = vld [vmem:[%s14719_s1 + $0x8c0] ss:$16 sps:$4 sm:$0xff]   ;;  %v10151_v62 = vld [vmem:[%s14719_s1 + $0x8c8] ss:$16 sps:$4 sm:$0xff]  }
  0xe4   :  { %6741 = vmatprep.subr.bf16.mxu0 %v10072_v63  ;;  %7589 = vmatprep.subr.bf16.mxu1 %v10075_v0  ;;  %v10156_v63 = vld [vmem:[%s14719_s1 + $0x8e4] ss:$16 sps:$4 sm:$0xff]   ;;  %v10159_v0 = vld [vmem:[%s14719_s1 + $0x8ec] ss:$16 sps:$4 sm:$0xff]  }
  0xe7   :  { %6742 = vmatpush1.bf16.msra.mxu0 %v10070_v1  ;;  %7590 = vmatpush1.bf16.msra.mxu1 %v10073_v2  ;;  %v10154_v1 = vld [vmem:[%s14719_s1 + $0x8e0] ss:$16 sps:$4 sm:$0xff]   ;;  %v10157_v2 = vld [vmem:[%s14719_s1 + $0x8e8] ss:$16 sps:$4 sm:$0xff]  }
  0xe8   :  { %6743 = vmatprep.subr.bf16.mxu0 %v10078_v3  ;;  %7591 = vmatprep.subr.bf16.mxu1 %v10081_v4  ;;  %v10162_v3 = vld [vmem:[%s14719_s1 + $0x904] ss:$16 sps:$4 sm:$0xff]   ;;  %v10165_v4 = vld [vmem:[%s14719_s1 + $0x90c] ss:$16 sps:$4 sm:$0xff]  }
  0xeb   :  { %6744 = vmatpush1.bf16.msra.mxu0 %v10076_v5  ;;  %7592 = vmatpush1.bf16.msra.mxu1 %v10079_v6  ;;  %v10160_v5 = vld [vmem:[%s14719_s1 + $0x900] ss:$16 sps:$4 sm:$0xff]   ;;  %v10163_v6 = vld [vmem:[%s14719_s1 + $0x908] ss:$16 sps:$4 sm:$0xff]  }
  0xec   :  { %6745 = vmatprep.subr.bf16.mxu0 %v10084_v7  ;;  %7593 = vmatprep.subr.bf16.mxu1 %v10087_v8  ;;  %v10168_v7 = vld [vmem:[%s14719_s1 + $0x924] ss:$16 sps:$4 sm:$0xff]   ;;  %v10171_v8 = vld [vmem:[%s14719_s1 + $0x92c] ss:$16 sps:$4 sm:$0xff]  }
  0xef   :  { %6746 = vmatpush1.bf16.msra.mxu0 %v10082_v9  ;;  %7594 = vmatpush1.bf16.msra.mxu1 %v10085_v10  ;;  %v10166_v9 = vld [vmem:[%s14719_s1 + $0x920] ss:$16 sps:$4 sm:$0xff]   ;;  %v10169_v10 = vld [vmem:[%s14719_s1 + $0x928] ss:$16 sps:$4 sm:$0xff]  }
  0xf0   :  { %6747 = vmatprep.subr.bf16.mxu0 %v10090_v11  ;;  %7595 = vmatprep.subr.bf16.mxu1 %v10093_v12  ;;  %v10174_v11 = vld [vmem:[%s14719_s1 + $0x944] ss:$16 sps:$4 sm:$0xff]   ;;  %v10177_v12 = vld [vmem:[%s14719_s1 + $0x94c] ss:$16 sps:$4 sm:$0xff]  }
  0xf3   :  { %6748 = vmatpush1.bf16.msra.mxu0 %v10088_v13  ;;  %7596 = vmatpush1.bf16.msra.mxu1 %v10091_v14  ;;  %v10172_v13 = vld [vmem:[%s14719_s1 + $0x940] ss:$16 sps:$4 sm:$0xff]   ;;  %v10175_v14 = vld [vmem:[%s14719_s1 + $0x948] ss:$16 sps:$4 sm:$0xff]  }
  0xf4   :  { %6749 = vmatprep.subr.bf16.mxu0 %v10096_v15  ;;  %7597 = vmatprep.subr.bf16.mxu1 %v10099_v16  ;;  %v10180_v15 = vld [vmem:[%s14719_s1 + $0x964] ss:$16 sps:$4 sm:$0xff]   ;;  %v10183_v16 = vld [vmem:[%s14719_s1 + $0x96c] ss:$16 sps:$4 sm:$0xff]  }
  0xf7   :  { %6750 = vmatpush1.bf16.msra.mxu0 %v10094_v17  ;;  %7598 = vmatpush1.bf16.msra.mxu1 %v10097_v18  ;;  %v10178_v17 = vld [vmem:[%s14719_s1 + $0x960] ss:$16 sps:$4 sm:$0xff]   ;;  %v10181_v18 = vld [vmem:[%s14719_s1 + $0x968] ss:$16 sps:$4 sm:$0xff]  }
  0xf8   :  { %6751 = vmatprep.subr.bf16.mxu0 %v10102_v19  ;;  %7599 = vmatprep.subr.bf16.mxu1 %v10105_v20  ;;  %v10186_v19 = vld [vmem:[%s14719_s1 + $0x984] ss:$16 sps:$4 sm:$0xff]   ;;  %v10189_v20 = vld [vmem:[%s14719_s1 + $0x98c] ss:$16 sps:$4 sm:$0xff]  }
  0xfb   :  { %6752 = vmatpush1.bf16.msra.mxu0 %v10100_v21  ;;  %7600 = vmatpush1.bf16.msra.mxu1 %v10103_v22  ;;  %v10184_v21 = vld [vmem:[%s14719_s1 + $0x980] ss:$16 sps:$4 sm:$0xff]   ;;  %v10187_v22 = vld [vmem:[%s14719_s1 + $0x988] ss:$16 sps:$4 sm:$0xff]  }
  0xfc   :  { %6753 = vmatprep.subr.bf16.mxu0 %v10108_v23  ;;  %7601 = vmatprep.subr.bf16.mxu1 %v10111_v24  ;;  %v10192_v23 = vld [vmem:[%s14719_s1 + $0x9a4] ss:$16 sps:$4 sm:$0xff]   ;;  %v10195_v24 = vld [vmem:[%s14719_s1 + $0x9ac] ss:$16 sps:$4 sm:$0xff]  }
  0xff   :  { %6754 = vmatpush1.bf16.msra.mxu0 %v10106_v26  ;;  %7602 = vmatpush1.bf16.msra.mxu1 %v10109_v25  ;;  %v10190_v26 = vld [vmem:[%s14719_s1 + $0x9a0] ss:$16 sps:$4 sm:$0xff]   ;;  %v10193_v25 = vld [vmem:[%s14719_s1 + $0x9a8] ss:$16 sps:$4 sm:$0xff]  }
 0x100   :  { %6776 = vmatprep.subr.bf16.mxu0 %v10114_v27  ;;  %7624 = vmatprep.subr.bf16.mxu1 %v10117_v28  ;;  %v10198_v27 = vld [vmem:[%s14719_s1 + $0x9c4] ss:$16 sps:$4 sm:$0xff]   ;;  %v10201_v28 = vld [vmem:[%s14719_s1 + $0x9cc] ss:$16 sps:$4 sm:$0xff]  }
 0x102   :  { %6756 = vmatmul.mubr.bf16.vlgmr.msra.gmra.mrb[0].mxu0 %v8374_v30  ;;  %7604 = vmatmul.mubr.bf16.vlgmr.msra.gmra.mrb[0].mxu1 %v8374_v30  ;;  %v10199_v30 = vld [vmem:[%s14719_s1 + $0x9c8] ss:$16 sps:$4 sm:$0xff]  }
 0x103   :  { %6777 = vmatpush1.bf16.msra.mxu0 %v10112_v32  ;;  %7625 = vmatpush1.bf16.msra.mxu1 %v10115_v34  ;;  %v10207_v32 = vld [vmem:[%s14719_s1 + $0x9ec] ss:$16 sps:$4 sm:$0xff]   ;;  %v10202_v34 = vld [vmem:[%s14719_s1 + $0x9e0] ss:$16 sps:$4 sm:$0xff]  }
 0x104   :  { %6778 = vmatprep.subr.bf16.mxu0 %v10120_v36  ;;  %7626 = vmatprep.subr.bf16.mxu1 %v10123_v33  ;;  %v10205_v36 = vld [vmem:[%s14719_s1 + $0x9e8] ss:$16 sps:$4 sm:$0xff]   ;;  %v10210_v33 = vld [vmem:[%s14719_s1 + $0xa04] ss:$16 sps:$4 sm:$0xff]  }
 0x105   :  { %6765 = vmatprep.mubr.bf16.mxu0 %v8407_v35  ;;  %7613 = vmatprep.mubr.bf16.mxu1 %v8407_v35  ;;  %v10213_v35 = vld [vmem:[%s14719_s1 + $0xa0c] ss:$16 sps:$4 sm:$0xff]  }
 0x107   :  { %6779 = vmatpush1.bf16.msra.mxu0 %v10118_v37  ;;  %7627 = vmatpush1.bf16.msra.mxu1 %v10121_v38  ;;  %v50_v37 = vld [vmem:[%s14720_s0 + $0x120] sm:$0xff] }
 0x108   :  { %6780 = vmatprep.subr.bf16.mxu0 %v10126_v39  ;;  %7628 = vmatprep.subr.bf16.mxu1 %v10129_v40  ;;  %v66_v38 = vld [vmem:[%s14720_s0 + $0x1a0] sm:$0xff]  ;;  %v8376_v39 = vcombine.low %v12157_v41, %v12162_v43  ;;  %v10219_v41 = vld [vmem:[%s14719_s1 + $0xa2c] ss:$16 sps:$4 sm:$0xff]  }
 0x109   :  { %v10208_v40 = vld [vmem:[%s14719_s1 + $0xa00] ss:$16 sps:$4 sm:$0xff]  }
 0x10a   :  { %6766 = vmatmul.mubr.bf16.gmra.mrb[4].mxu0 %v8406_v42  ;;  %7614 = vmatmul.mubr.bf16.gmra.mrb[4].mxu1 %v8406_v42  ;;  %v10211_v42 = vld [vmem:[%s14719_s1 + $0xa08] ss:$16 sps:$4 sm:$0xff]   ;;  %v10214_v43 = vld [vmem:[%s14719_s1 + $0xa20] ss:$16 sps:$4 sm:$0xff]  }
 0x10b   :  { %6781 = vmatpush1.bf16.msra.mxu0 %v10124_v44  ;;  %7629 = vmatpush1.bf16.msra.mxu1 %v10127_v45  ;;  %v10216_v44 = vld [vmem:[%s14719_s1 + $0xa24] ss:$16 sps:$4 sm:$0xff]   ;;  %v10217_v45 = vld [vmem:[%s14719_s1 + $0xa28] ss:$16 sps:$4 sm:$0xff]  }
 0x10c   :  { %6782 = vmatprep.subr.bf16.mxu0 %v10132_v46  ;;  %7630 = vmatprep.subr.bf16.mxu1 %v10135_v47  ;;  %v8409_v46 = vcombine.high %v50_v37, %v66_v38  ;;  %v10222_v47 = vld [vmem:[%s14719_s1 + $0xa44] ss:$16 sps:$4 sm:$0xff]  }
 0x10d   :  { %6808 = vmatprep.mubr.bf16.mxu0 %v8377_v48  ;;  %7656 = vmatprep.mubr.bf16.mxu1 %v8377_v48  ;;  %v10225_v48 = vld [vmem:[%s14719_s1 + $0xa4c] ss:$16 sps:$4 sm:$0xff]  }
 0x10f   :  { %6783 = vmatpush1.bf16.msra.mxu0 %v10130_v49  ;;  %7631 = vmatpush1.bf16.msra.mxu1 %v10133_v50  ;;  %v12369_v49 = vld [vmem:[%s14720_s0 + $0x28] sm:$0xff] }
 0x110   :  { %6784 = vmatprep.subr.bf16.mxu0 %v10138_v51  ;;  %7632 = vmatprep.subr.bf16.mxu1 %v10141_v52  ;;  %v12374_v50 = vld [vmem:[%s14720_s0 + $0xa8] sm:$0xff]  ;;  %v8408_v51 = vcombine.low %v50_v37, %v66_v38  ;;  %v10220_v52 = vld [vmem:[%s14719_s1 + $0xa40] ss:$16 sps:$4 sm:$0xff]  }
 0x111   :  { %v10292_v37 = vld [vmem:[%s14719_s1 + $0xbc0] ss:$16 sps:$4 sm:$0xff]   ;;  %v10295_v38 = vld [vmem:[%s14719_s1 + $0xbc8] ss:$16 sps:$4 sm:$0xff]  }
 0x113   :  { %6785 = vmatpush1.bf16.msra.mxu0 %v10136_v53  ;;  %7633 = vmatpush1.bf16.msra.mxu1 %v10139_v54  ;;  %v10223_v53 = vld [vmem:[%s14719_s1 + $0xa48] ss:$16 sps:$4 sm:$0xff]   ;;  %v10228_v54 = vld [vmem:[%s14719_s1 + $0xa64] ss:$16 sps:$4 sm:$0xff]  }
 0x114   :  { %6786 = vmatprep.subr.bf16.mxu0 %v10144_v55  ;;  %7634 = vmatprep.subr.bf16.mxu1 %v10147_v56  ;;  %v10231_v55 = vld [vmem:[%s14719_s1 + $0xa6c] ss:$16 sps:$4 sm:$0xff]   ;;  %v8379_v56 = vcombine.high %v12369_v49, %v12374_v50 }
 0x117   :  { %6787 = vmatpush1.bf16.msra.mxu0 %v10142_v57  ;;  %7635 = vmatpush1.bf16.msra.mxu1 %v10145_v58  ;;  %v10226_v57 = vld [vmem:[%s14719_s1 + $0xa60] ss:$16 sps:$4 sm:$0xff]   ;;  %v10229_v58 = vld [vmem:[%s14719_s1 + $0xa68] ss:$16 sps:$4 sm:$0xff]  }
 0x118   :  { %6788 = vmatprep.subr.bf16.mxu0 %v10150_v59  ;;  %7636 = vmatprep.subr.bf16.mxu1 %v10153_v60  ;;  %v10234_v59 = vld [vmem:[%s14719_s1 + $0xa84] ss:$16 sps:$4 sm:$0xff]   ;;  %v10237_v60 = vld [vmem:[%s14719_s1 + $0xa8c] ss:$16 sps:$4 sm:$0xff]  }
 0x11b   :  { %6789 = vmatpush1.bf16.msra.mxu0 %v10148_v61  ;;  %7637 = vmatpush1.bf16.msra.mxu1 %v10151_v62  ;;  %v10232_v61 = vld [vmem:[%s14719_s1 + $0xa80] ss:$16 sps:$4 sm:$0xff]   ;;  %v10235_v62 = vld [vmem:[%s14719_s1 + $0xa88] ss:$16 sps:$4 sm:$0xff]  }
 0x11c   :  { %6790 = vmatprep.subr.bf16.mxu0 %v10156_v63  ;;  %7638 = vmatprep.subr.bf16.mxu1 %v10159_v0  ;;  %v10240_v63 = vld [vmem:[%s14719_s1 + $0xaa4] ss:$16 sps:$4 sm:$0xff]   ;;  %v10243_v0 = vld [vmem:[%s14719_s1 + $0xaac] ss:$16 sps:$4 sm:$0xff]  }
 0x11f   :  { %6791 = vmatpush1.bf16.msra.mxu0 %v10154_v1  ;;  %7639 = vmatpush1.bf16.msra.mxu1 %v10157_v2  ;;  %v10238_v1 = vld [vmem:[%s14719_s1 + $0xaa0] ss:$16 sps:$4 sm:$0xff]   ;;  %v10241_v2 = vld [vmem:[%s14719_s1 + $0xaa8] ss:$16 sps:$4 sm:$0xff]  }
 0x120   :  { %6792 = vmatprep.subr.bf16.mxu0 %v10162_v3  ;;  %7640 = vmatprep.subr.bf16.mxu1 %v10165_v4  ;;  %v10246_v3 = vld [vmem:[%s14719_s1 + $0xac4] ss:$16 sps:$4 sm:$0xff]   ;;  %v10249_v4 = vld [vmem:[%s14719_s1 + $0xacc] ss:$16 sps:$4 sm:$0xff]  }
 0x123   :  { %6793 = vmatpush1.bf16.msra.mxu0 %v10160_v5  ;;  %7641 = vmatpush1.bf16.msra.mxu1 %v10163_v6  ;;  %v10244_v5 = vld [vmem:[%s14719_s1 + $0xac0] ss:$16 sps:$4 sm:$0xff]   ;;  %v10247_v6 = vld [vmem:[%s14719_s1 + $0xac8] ss:$16 sps:$4 sm:$0xff]  }
 0x124   :  { %6794 = vmatprep.subr.bf16.mxu0 %v10168_v7  ;;  %7642 = vmatprep.subr.bf16.mxu1 %v10171_v8  ;;  %v10252_v7 = vld [vmem:[%s14719_s1 + $0xae4] ss:$16 sps:$4 sm:$0xff]   ;;  %v10255_v8 = vld [vmem:[%s14719_s1 + $0xaec] ss:$16 sps:$4 sm:$0xff]  }
 0x127   :  { %6795 = vmatpush1.bf16.msra.mxu0 %v10166_v9  ;;  %7643 = vmatpush1.bf16.msra.mxu1 %v10169_v10  ;;  %v10250_v9 = vld [vmem:[%s14719_s1 + $0xae0] ss:$16 sps:$4 sm:$0xff]   ;;  %v10253_v10 = vld [vmem:[%s14719_s1 + $0xae8] ss:$16 sps:$4 sm:$0xff]  }
 0x128   :  { %6796 = vmatprep.subr.bf16.mxu0 %v10174_v11  ;;  %7644 = vmatprep.subr.bf16.mxu1 %v10177_v12  ;;  %v10258_v11 = vld [vmem:[%s14719_s1 + $0xb04] ss:$16 sps:$4 sm:$0xff]   ;;  %v10261_v12 = vld [vmem:[%s14719_s1 + $0xb0c] ss:$16 sps:$4 sm:$0xff]  }
 0x12b   :  { %6797 = vmatpush1.bf16.msra.mxu0 %v10172_v13  ;;  %7645 = vmatpush1.bf16.msra.mxu1 %v10175_v14  ;;  %v10256_v13 = vld [vmem:[%s14719_s1 + $0xb00] ss:$16 sps:$4 sm:$0xff]   ;;  %v10259_v14 = vld [vmem:[%s14719_s1 + $0xb08] ss:$16 sps:$4 sm:$0xff]  }
 0x12c   :  { %6798 = vmatprep.subr.bf16.mxu0 %v10180_v15  ;;  %7646 = vmatprep.subr.bf16.mxu1 %v10183_v16  ;;  %v10264_v15 = vld [vmem:[%s14719_s1 + $0xb24] ss:$16 sps:$4 sm:$0xff]   ;;  %v10267_v16 = vld [vmem:[%s14719_s1 + $0xb2c] ss:$16 sps:$4 sm:$0xff]  }
 0x12f   :  { %6799 = vmatpush1.bf16.msra.mxu0 %v10178_v17  ;;  %7647 = vmatpush1.bf16.msra.mxu1 %v10181_v18  ;;  %v10262_v17 = vld [vmem:[%s14719_s1 + $0xb20] ss:$16 sps:$4 sm:$0xff]   ;;  %v10265_v18 = vld [vmem:[%s14719_s1 + $0xb28] ss:$16 sps:$4 sm:$0xff]  }
 0x130   :  { %6800 = vmatprep.subr.bf16.mxu0 %v10186_v19  ;;  %7648 = vmatprep.subr.bf16.mxu1 %v10189_v20  ;;  %v10270_v19 = vld [vmem:[%s14719_s1 + $0xb44] ss:$16 sps:$4 sm:$0xff]   ;;  %v10273_v20 = vld [vmem:[%s14719_s1 + $0xb4c] ss:$16 sps:$4 sm:$0xff]  }
 0x133   :  { %6801 = vmatpush1.bf16.msra.mxu0 %v10184_v21  ;;  %7649 = vmatpush1.bf16.msra.mxu1 %v10187_v22  ;;  %v10268_v21 = vld [vmem:[%s14719_s1 + $0xb40] ss:$16 sps:$4 sm:$0xff]   ;;  %v10271_v22 = vld [vmem:[%s14719_s1 + $0xb48] ss:$16 sps:$4 sm:$0xff]  }
 0x134   :  { %6802 = vmatprep.subr.bf16.mxu0 %v10192_v23  ;;  %7650 = vmatprep.subr.bf16.mxu1 %v10195_v24  ;;  %v10276_v23 = vld [vmem:[%s14719_s1 + $0xb64] ss:$16 sps:$4 sm:$0xff]   ;;  %v10279_v24 = vld [vmem:[%s14719_s1 + $0xb6c] ss:$16 sps:$4 sm:$0xff]  }
 0x137   :  { %6803 = vmatpush1.bf16.msra.mxu0 %v10190_v26  ;;  %7651 = vmatpush1.bf16.msra.mxu1 %v10193_v25  ;;  %v10274_v26 = vld [vmem:[%s14719_s1 + $0xb60] ss:$16 sps:$4 sm:$0xff]   ;;  %v10277_v25 = vld [vmem:[%s14719_s1 + $0xb68] ss:$16 sps:$4 sm:$0xff]  }
 0x138   :  { %6804 = vmatprep.subr.bf16.mxu0 %v10198_v27  ;;  %7652 = vmatprep.subr.bf16.mxu1 %v10201_v28  ;;  %v10282_v27 = vld [vmem:[%s14719_s1 + $0xb84] ss:$16 sps:$4 sm:$0xff]   ;;  %v10285_v28 = vld [vmem:[%s14719_s1 + $0xb8c] ss:$16 sps:$4 sm:$0xff]  }
 0x13b   :  { %6805 = vmatpush1.bf16.msra.mxu0 %v10196_v29  ;;  %7653 = vmatpush1.bf16.msra.mxu1 %v10199_v30  ;;  %v10280_v29 = vld [vmem:[%s14719_s1 + $0xb80] ss:$16 sps:$4 sm:$0xff]   ;;  %v10283_v30 = vld [vmem:[%s14719_s1 + $0xb88] ss:$16 sps:$4 sm:$0xff]  }
 0x13c   :  { %6806 = vmatprep.subr.bf16.mxu0 %v10204_v31  ;;  %7654 = vmatprep.subr.bf16.mxu1 %v10207_v32  ;;  %v10288_v31 = vld [vmem:[%s14719_s1 + $0xba4] ss:$16 sps:$4 sm:$0xff]   ;;  %v10291_v32 = vld [vmem:[%s14719_s1 + $0xbac] ss:$16 sps:$4 sm:$0xff]  }
 0x13f   :  { %6807 = vmatpush1.bf16.msra.mxu0 %v10202_v34  ;;  %7655 = vmatpush1.bf16.msra.mxu1 %v10205_v36  ;;  %v10286_v34 = vld [vmem:[%s14719_s1 + $0xba0] ss:$16 sps:$4 sm:$0xff]   ;;  %v10289_v36 = vld [vmem:[%s14719_s1 + $0xba8] ss:$16 sps:$4 sm:$0xff]  }
 0x140   :  { %6829 = vmatprep.subr.bf16.mxu0 %v10210_v33  ;;  %7677 = vmatprep.subr.bf16.mxu1 %v10213_v35  ;;  %v10294_v33 = vld [vmem:[%s14719_s1 + $0xbc4] ss:$16 sps:$4 sm:$0xff]   ;;  %v10297_v35 = vld [vmem:[%s14719_s1 + $0xbcc] ss:$16 sps:$4 sm:$0xff]  }
 0x142   :  { %6809 = vmatmul.mubr.bf16.vlgmr.msra.gmra.mrb[0].mxu0 %v8376_v39  ;;  %7657 = vmatmul.mubr.bf16.vlgmr.msra.gmra.mrb[0].mxu1 %v8376_v39  ;;  %v10300_v39 = vld [vmem:[%s14719_s1 + $0xbe4] ss:$16 sps:$4 sm:$0xff]  }
 0x143   :  { %6830 = vmatpush1.bf16.msra.mxu0 %v10208_v40  ;;  %7678 = vmatpush1.bf16.msra.mxu1 %v10211_v42  ;;  %v10303_v40 = vld [vmem:[%s14719_s1 + $0xbec] ss:$16 sps:$4 sm:$0xff]   ;;  %v10298_v42 = vld [vmem:[%s14719_s1 + $0xbe0] ss:$16 sps:$4 sm:$0xff]  }
 0x144   :  { %6831 = vmatprep.subr.bf16.mxu0 %v10216_v44  ;;  %7679 = vmatprep.subr.bf16.mxu1 %v10219_v41  ;;  %v10301_v44 = vld [vmem:[%s14719_s1 + $0xbe8] ss:$16 sps:$4 sm:$0xff]   ;;  %v10306_v41 = vld [vmem:[%s14719_s1 + $0xc04] ss:$16 sps:$4 sm:$0xff]  }
 0x145   :  { %6818 = vmatprep.mubr.bf16.mxu0 %v8409_v46  ;;  %7666 = vmatprep.mubr.bf16.mxu1 %v8409_v46  ;;  %v67_v46 = vld [vmem:[%s14720_s0 + $0x1a8] sm:$0xff] }
 0x147   :  { %6832 = vmatpush1.bf16.msra.mxu0 %v10214_v43  ;;  %7680 = vmatpush1.bf16.msra.mxu1 %v10217_v45  ;;  %v10309_v43 = vld [vmem:[%s14719_s1 + $0xc0c] ss:$16 sps:$4 sm:$0xff]  }
 0x148   :  { %6833 = vmatprep.subr.bf16.mxu0 %v10222_v47  ;;  %7681 = vmatprep.subr.bf16.mxu1 %v10225_v48  ;;  %v51_v45 = vld [vmem:[%s14720_s0 + $0x128] sm:$0xff]  ;;  %v8378_v47 = vcombine.low %v12369_v49, %v12374_v50  ;;  %v10304_v48 = vld [vmem:[%s14719_s1 + $0xc00] ss:$16 sps:$4 sm:$0xff]  }
 0x149   :  { %v10315_v49 = vld [vmem:[%s14719_s1 + $0xc2c] ss:$16 sps:$4 sm:$0xff]   ;;  %v10310_v50 = vld [vmem:[%s14719_s1 + $0xc20] ss:$16 sps:$4 sm:$0xff]  }
 0x14a   :  { %6819 = vmatmul.mubr.bf16.gmra.mrb[4].mxu0 %v8408_v51  ;;  %7667 = vmatmul.mubr.bf16.gmra.mrb[4].mxu1 %v8408_v51  ;;  %v10307_v51 = vld [vmem:[%s14719_s1 + $0xc08] ss:$16 sps:$4 sm:$0xff]  }
 0x14b   :  { %6834 = vmatpush1.bf16.msra.mxu0 %v10220_v52  ;;  %7682 = vmatpush1.bf16.msra.mxu1 %v10223_v53  ;;  %v10312_v52 = vld [vmem:[%s14719_s1 + $0xc24] ss:$16 sps:$4 sm:$0xff]   ;;  %v10313_v53 = vld [vmem:[%s14719_s1 + $0xc28] ss:$16 sps:$4 sm:$0xff]  }
 0x14c   :  { %6835 = vmatprep.subr.bf16.mxu0 %v10228_v54  ;;  %7683 = vmatprep.subr.bf16.mxu1 %v10231_v55  ;;  %v8411_v54 = vcombine.high %v51_v45, %v67_v46  ;;  %v10318_v55 = vld [vmem:[%s14719_s1 + $0xc44] ss:$16 sps:$4 sm:$0xff]  }
 0x14d   :  { %6861 = vmatprep.mubr.bf16.mxu0 %v8379_v56  ;;  %7709 = vmatprep.mubr.bf16.mxu1 %v8379_v56  ;;  %v10321_v56 = vld [vmem:[%s14719_s1 + $0xc4c] ss:$16 sps:$4 sm:$0xff]  }
 0x14f   :  { %6836 = vmatpush1.bf16.msra.mxu0 %v10226_v57  ;;  %7684 = vmatpush1.bf16.msra.mxu1 %v10229_v58  ;;  %v12581_v57 = vld [vmem:[%s14720_s0 + $0x30] sm:$0xff] }
 0x150   :  { %6837 = vmatprep.subr.bf16.mxu0 %v10234_v59  ;;  %7685 = vmatprep.subr.bf16.mxu1 %v10237_v60  ;;  %v12586_v58 = vld [vmem:[%s14720_s0 + $0xb0] sm:$0xff]  ;;  %v8410_v59 = vcombine.low %v51_v45, %v67_v46  ;;  %v10391_v46 = vld [vmem:[%s14719_s1 + $0xdc8] ss:$16 sps:$4 sm:$0xff]  }
 0x151   :  { %v10316_v60 = vld [vmem:[%s14719_s1 + $0xc40] ss:$16 sps:$4 sm:$0xff]  }
 0x152   :  { %v10388_v45 = vld [vmem:[%s14719_s1 + $0xdc0] ss:$16 sps:$4 sm:$0xff]  }
 0x153   :  { %6838 = vmatpush1.bf16.msra.mxu0 %v10232_v61  ;;  %7686 = vmatpush1.bf16.msra.mxu1 %v10235_v62  ;;  %v10319_v61 = vld [vmem:[%s14719_s1 + $0xc48] ss:$16 sps:$4 sm:$0xff]   ;;  %v10324_v62 = vld [vmem:[%s14719_s1 + $0xc64] ss:$16 sps:$4 sm:$0xff]  }
 0x154   :  { %6839 = vmatprep.subr.bf16.mxu0 %v10240_v63  ;;  %7687 = vmatprep.subr.bf16.mxu1 %v10243_v0  ;;  %v10327_v63 = vld [vmem:[%s14719_s1 + $0xc6c] ss:$16 sps:$4 sm:$0xff]   ;;  %v8381_v0 = vcombine.high %v12581_v57, %v12586_v58 }
 0x157   :  { %6840 = vmatpush1.bf16.msra.mxu0 %v10238_v1  ;;  %7688 = vmatpush1.bf16.msra.mxu1 %v10241_v2  ;;  %v10322_v1 = vld [vmem:[%s14719_s1 + $0xc60] ss:$16 sps:$4 sm:$0xff]   ;;  %v10325_v2 = vld [vmem:[%s14719_s1 + $0xc68] ss:$16 sps:$4 sm:$0xff]  }
 0x158   :  { %6841 = vmatprep.subr.bf16.mxu0 %v10246_v3  ;;  %7689 = vmatprep.subr.bf16.mxu1 %v10249_v4  ;;  %v10330_v3 = vld [vmem:[%s14719_s1 + $0xc84] ss:$16 sps:$4 sm:$0xff]   ;;  %v10333_v4 = vld [vmem:[%s14719_s1 + $0xc8c] ss:$16 sps:$4 sm:$0xff]  }
 0x15b   :  { %6842 = vmatpush1.bf16.msra.mxu0 %v10244_v5  ;;  %7690 = vmatpush1.bf16.msra.mxu1 %v10247_v6  ;;  %v10328_v5 = vld [vmem:[%s14719_s1 + $0xc80] ss:$16 sps:$4 sm:$0xff]   ;;  %v10331_v6 = vld [vmem:[%s14719_s1 + $0xc88] ss:$16 sps:$4 sm:$0xff]  }
 0x15c   :  { %6843 = vmatprep.subr.bf16.mxu0 %v10252_v7  ;;  %7691 = vmatprep.subr.bf16.mxu1 %v10255_v8  ;;  %v10336_v7 = vld [vmem:[%s14719_s1 + $0xca4] ss:$16 sps:$4 sm:$0xff]   ;;  %v10339_v8 = vld [vmem:[%s14719_s1 + $0xcac] ss:$16 sps:$4 sm:$0xff]  }
 0x15f   :  { %6844 = vmatpush1.bf16.msra.mxu0 %v10250_v9  ;;  %7692 = vmatpush1.bf16.msra.mxu1 %v10253_v10  ;;  %v10334_v9 = vld [vmem:[%s14719_s1 + $0xca0] ss:$16 sps:$4 sm:$0xff]   ;;  %v10337_v10 = vld [vmem:[%s14719_s1 + $0xca8] ss:$16 sps:$4 sm:$0xff]  }
 0x160   :  { %6845 = vmatprep.subr.bf16.mxu0 %v10258_v11  ;;  %7693 = vmatprep.subr.bf16.mxu1 %v10261_v12  ;;  %v10342_v11 = vld [vmem:[%s14719_s1 + $0xcc4] ss:$16 sps:$4 sm:$0xff]   ;;  %v10345_v12 = vld [vmem:[%s14719_s1 + $0xccc] ss:$16 sps:$4 sm:$0xff]  }
 0x163   :  { %6846 = vmatpush1.bf16.msra.mxu0 %v10256_v13  ;;  %7694 = vmatpush1.bf16.msra.mxu1 %v10259_v14  ;;  %v10340_v13 = vld [vmem:[%s14719_s1 + $0xcc0] ss:$16 sps:$4 sm:$0xff]   ;;  %v10343_v14 = vld [vmem:[%s14719_s1 + $0xcc8] ss:$16 sps:$4 sm:$0xff]  }
 0x164   :  { %6847 = vmatprep.subr.bf16.mxu0 %v10264_v15  ;;  %7695 = vmatprep.subr.bf16.mxu1 %v10267_v16  ;;  %v10348_v15 = vld [vmem:[%s14719_s1 + $0xce4] ss:$16 sps:$4 sm:$0xff]   ;;  %v10351_v16 = vld [vmem:[%s14719_s1 + $0xcec] ss:$16 sps:$4 sm:$0xff]  }
 0x167   :  { %6848 = vmatpush1.bf16.msra.mxu0 %v10262_v17  ;;  %7696 = vmatpush1.bf16.msra.mxu1 %v10265_v18  ;;  %v10346_v17 = vld [vmem:[%s14719_s1 + $0xce0] ss:$16 sps:$4 sm:$0xff]   ;;  %v10349_v18 = vld [vmem:[%s14719_s1 + $0xce8] ss:$16 sps:$4 sm:$0xff]  }
 0x168   :  { %6849 = vmatprep.subr.bf16.mxu0 %v10270_v19  ;;  %7697 = vmatprep.subr.bf16.mxu1 %v10273_v20  ;;  %v10354_v19 = vld [vmem:[%s14719_s1 + $0xd04] ss:$16 sps:$4 sm:$0xff]   ;;  %v10357_v20 = vld [vmem:[%s14719_s1 + $0xd0c] ss:$16 sps:$4 sm:$0xff]  }
 0x16b   :  { %6850 = vmatpush1.bf16.msra.mxu0 %v10268_v21  ;;  %7698 = vmatpush1.bf16.msra.mxu1 %v10271_v22  ;;  %v10352_v21 = vld [vmem:[%s14719_s1 + $0xd00] ss:$16 sps:$4 sm:$0xff]   ;;  %v10355_v22 = vld [vmem:[%s14719_s1 + $0xd08] ss:$16 sps:$4 sm:$0xff]  }
 0x16c   :  { %6851 = vmatprep.subr.bf16.mxu0 %v10276_v23  ;;  %7699 = vmatprep.subr.bf16.mxu1 %v10279_v24  ;;  %v10360_v23 = vld [vmem:[%s14719_s1 + $0xd24] ss:$16 sps:$4 sm:$0xff]   ;;  %v10363_v24 = vld [vmem:[%s14719_s1 + $0xd2c] ss:$16 sps:$4 sm:$0xff]  }
 0x16f   :  { %6852 = vmatpush1.bf16.msra.mxu0 %v10274_v26  ;;  %7700 = vmatpush1.bf16.msra.mxu1 %v10277_v25  ;;  %v10358_v26 = vld [vmem:[%s14719_s1 + $0xd20] ss:$16 sps:$4 sm:$0xff]   ;;  %v10361_v25 = vld [vmem:[%s14719_s1 + $0xd28] ss:$16 sps:$4 sm:$0xff]  }
 0x170   :  { %6853 = vmatprep.subr.bf16.mxu0 %v10282_v27  ;;  %7701 = vmatprep.subr.bf16.mxu1 %v10285_v28  ;;  %v10366_v27 = vld [vmem:[%s14719_s1 + $0xd44] ss:$16 sps:$4 sm:$0xff]   ;;  %v10369_v28 = vld [vmem:[%s14719_s1 + $0xd4c] ss:$16 sps:$4 sm:$0xff]  }
 0x173   :  { %6854 = vmatpush1.bf16.msra.mxu0 %v10280_v29  ;;  %7702 = vmatpush1.bf16.msra.mxu1 %v10283_v30  ;;  %v10364_v29 = vld [vmem:[%s14719_s1 + $0xd40] ss:$16 sps:$4 sm:$0xff]   ;;  %v10367_v30 = vld [vmem:[%s14719_s1 + $0xd48] ss:$16 sps:$4 sm:$0xff]  }
 0x174   :  { %6855 = vmatprep.subr.bf16.mxu0 %v10288_v31  ;;  %7703 = vmatprep.subr.bf16.mxu1 %v10291_v32  ;;  %v10372_v31 = vld [vmem:[%s14719_s1 + $0xd64] ss:$16 sps:$4 sm:$0xff]   ;;  %v10375_v32 = vld [vmem:[%s14719_s1 + $0xd6c] ss:$16 sps:$4 sm:$0xff]  }
 0x177   :  { %6856 = vmatpush1.bf16.msra.mxu0 %v10286_v34  ;;  %7704 = vmatpush1.bf16.msra.mxu1 %v10289_v36  ;;  %v10370_v34 = vld [vmem:[%s14719_s1 + $0xd60] ss:$16 sps:$4 sm:$0xff]   ;;  %v10373_v36 = vld [vmem:[%s14719_s1 + $0xd68] ss:$16 sps:$4 sm:$0xff]  }
 0x178   :  { %6857 = vmatprep.subr.bf16.mxu0 %v10294_v33  ;;  %7705 = vmatprep.subr.bf16.mxu1 %v10297_v35  ;;  %v10378_v33 = vld [vmem:[%s14719_s1 + $0xd84] ss:$16 sps:$4 sm:$0xff]   ;;  %v10381_v35 = vld [vmem:[%s14719_s1 + $0xd8c] ss:$16 sps:$4 sm:$0xff]  }
 0x17b   :  { %6858 = vmatpush1.bf16.msra.mxu0 %v10292_v37  ;;  %7706 = vmatpush1.bf16.msra.mxu1 %v10295_v38  ;;  %v10376_v37 = vld [vmem:[%s14719_s1 + $0xd80] ss:$16 sps:$4 sm:$0xff]   ;;  %v10379_v38 = vld [vmem:[%s14719_s1 + $0xd88] ss:$16 sps:$4 sm:$0xff]  }
 0x17c   :  { %6859 = vmatprep.subr.bf16.mxu0 %v10300_v39  ;;  %7707 = vmatprep.subr.bf16.mxu1 %v10303_v40  ;;  %v10384_v39 = vld [vmem:[%s14719_s1 + $0xda4] ss:$16 sps:$4 sm:$0xff]   ;;  %v10387_v40 = vld [vmem:[%s14719_s1 + $0xdac] ss:$16 sps:$4 sm:$0xff]  }
 0x17f   :  { %6860 = vmatpush1.bf16.msra.mxu0 %v10298_v42  ;;  %7708 = vmatpush1.bf16.msra.mxu1 %v10301_v44  ;;  %v10382_v42 = vld [vmem:[%s14719_s1 + $0xda0] ss:$16 sps:$4 sm:$0xff]   ;;  %v10385_v44 = vld [vmem:[%s14719_s1 + $0xda8] ss:$16 sps:$4 sm:$0xff]  }
 0x180   :  { %6882 = vmatprep.subr.bf16.mxu0 %v10306_v41  ;;  %7730 = vmatprep.subr.bf16.mxu1 %v10309_v43  ;;  %v10390_v41 = vld [vmem:[%s14719_s1 + $0xdc4] ss:$16 sps:$4 sm:$0xff]   ;;  %v10393_v43 = vld [vmem:[%s14719_s1 + $0xdcc] ss:$16 sps:$4 sm:$0xff]  }
 0x182   :  { %6862 = vmatmul.mubr.bf16.vlgmr.msra.gmra.mrb[0].mxu0 %v8378_v47  ;;  %7710 = vmatmul.mubr.bf16.vlgmr.msra.gmra.mrb[0].mxu1 %v8378_v47  ;;  %v10396_v47 = vld [vmem:[%s14719_s1 + $0xde4] ss:$16 sps:$4 sm:$0xff]  }
 0x183   :  { %6883 = vmatpush1.bf16.msra.mxu0 %v10304_v48  ;;  %7731 = vmatpush1.bf16.msra.mxu1 %v10307_v51  ;;  %v10399_v48 = vld [vmem:[%s14719_s1 + $0xdec] ss:$16 sps:$4 sm:$0xff]   ;;  %v10394_v51 = vld [vmem:[%s14719_s1 + $0xde0] ss:$16 sps:$4 sm:$0xff]  }
 0x184   :  { %6884 = vmatprep.subr.bf16.mxu0 %v10312_v52  ;;  %7732 = vmatprep.subr.bf16.mxu1 %v10315_v49  ;;  %v10397_v52 = vld [vmem:[%s14719_s1 + $0xde8] ss:$16 sps:$4 sm:$0xff]   ;;  %v10402_v49 = vld [vmem:[%s14719_s1 + $0xe04] ss:$16 sps:$4 sm:$0xff]  }
 0x185   :  { %6871 = vmatprep.mubr.bf16.mxu0 %v8411_v54  ;;  %7719 = vmatprep.mubr.bf16.mxu1 %v8411_v54  ;;  %v68_v54 = vld [vmem:[%s14720_s0 + $0x1b0] sm:$0xff] }
 0x187   :  { %6885 = vmatpush1.bf16.msra.mxu0 %v10310_v50  ;;  %7733 = vmatpush1.bf16.msra.mxu1 %v10313_v53  ;;  %v10405_v50 = vld [vmem:[%s14719_s1 + $0xe0c] ss:$16 sps:$4 sm:$0xff]   ;;  %v52_v53 = vld [vmem:[%s14720_s0 + $0x130] sm:$0xff] }
 0x188   :  { %6886 = vmatprep.subr.bf16.mxu0 %v10318_v55  ;;  %7734 = vmatprep.subr.bf16.mxu1 %v10321_v56  ;;  %v8380_v55 = vcombine.low %v12581_v57, %v12586_v58  ;;  %v10400_v56 = vld [vmem:[%s14719_s1 + $0xe00] ss:$16 sps:$4 sm:$0xff]   ;;  %v10411_v57 = vld [vmem:[%s14719_s1 + $0xe2c] ss:$16 sps:$4 sm:$0xff]  }
 0x189   :  { %v10406_v58 = vld [vmem:[%s14719_s1 + $0xe20] ss:$16 sps:$4 sm:$0xff]  }
 0x18a   :  { %6872 = vmatmul.mubr.bf16.gmra.mrb[4].mxu0 %v8410_v59  ;;  %7720 = vmatmul.mubr.bf16.gmra.mrb[4].mxu1 %v8410_v59  ;;  %v10403_v59 = vld [vmem:[%s14719_s1 + $0xe08] ss:$16 sps:$4 sm:$0xff]  }
 0x18b   :  { %6887 = vmatpush1.bf16.msra.mxu0 %v10316_v60  ;;  %7735 = vmatpush1.bf16.msra.mxu1 %v10319_v61  ;;  %v10408_v60 = vld [vmem:[%s14719_s1 + $0xe24] ss:$16 sps:$4 sm:$0xff]   ;;  %v10409_v61 = vld [vmem:[%s14719_s1 + $0xe28] ss:$16 sps:$4 sm:$0xff]  }
 0x18c   :  { %6888 = vmatprep.subr.bf16.mxu0 %v10324_v62  ;;  %7736 = vmatprep.subr.bf16.mxu1 %v10327_v63  ;;  %v8413_v62 = vcombine.high %v52_v53, %v68_v54  ;;  %v10414_v63 = vld [vmem:[%s14719_s1 + $0xe44] ss:$16 sps:$4 sm:$0xff]  }
 0x18d   :  { %6914 = vmatprep.mubr.bf16.mxu0 %v8381_v0  ;;  %7762 = vmatprep.mubr.bf16.mxu1 %v8381_v0  ;;  %v10417_v0 = vld [vmem:[%s14719_s1 + $0xe4c] ss:$16 sps:$4 sm:$0xff]  }
 0x18f   :  { %6889 = vmatpush1.bf16.msra.mxu0 %v10322_v1  ;;  %7737 = vmatpush1.bf16.msra.mxu1 %v10325_v2  ;;  %v12793_v1 = vld [vmem:[%s14720_s0 + $0x38] sm:$0xff] }
 0x190   :  { %6890 = vmatprep.subr.bf16.mxu0 %v10330_v3  ;;  %7738 = vmatprep.subr.bf16.mxu1 %v10333_v4  ;;  %v12798_v2 = vld [vmem:[%s14720_s0 + $0xb8] sm:$0xff]  ;;  %v8412_v3 = vcombine.low %v52_v53, %v68_v54  ;;  %v10412_v4 = vld [vmem:[%s14719_s1 + $0xe40] ss:$16 sps:$4 sm:$0xff]  }
 0x191   :  { %v10484_v53 = vld [vmem:[%s14719_s1 + $0xfc0] ss:$16 sps:$4 sm:$0xff]   ;;  %v10487_v54 = vld [vmem:[%s14719_s1 + $0xfc8] ss:$16 sps:$4 sm:$0xff]  }
 0x193   :  { %6891 = vmatpush1.bf16.msra.mxu0 %v10328_v5  ;;  %7739 = vmatpush1.bf16.msra.mxu1 %v10331_v6  ;;  %v10415_v5 = vld [vmem:[%s14719_s1 + $0xe48] ss:$16 sps:$4 sm:$0xff]   ;;  %v10420_v6 = vld [vmem:[%s14719_s1 + $0xe64] ss:$16 sps:$4 sm:$0xff]  }
 0x194   :  { %6892 = vmatprep.subr.bf16.mxu0 %v10336_v7  ;;  %7740 = vmatprep.subr.bf16.mxu1 %v10339_v8  ;;  %v10423_v7 = vld [vmem:[%s14719_s1 + $0xe6c] ss:$16 sps:$4 sm:$0xff]   ;;  %v8383_v8 = vcombine.high %v12793_v1, %v12798_v2 }
 0x197   :  { %6893 = vmatpush1.bf16.msra.mxu0 %v10334_v9  ;;  %7741 = vmatpush1.bf16.msra.mxu1 %v10337_v10  ;;  %v10418_v9 = vld [vmem:[%s14719_s1 + $0xe60] ss:$16 sps:$4 sm:$0xff]   ;;  %v10421_v10 = vld [vmem:[%s14719_s1 + $0xe68] ss:$16 sps:$4 sm:$0xff]  }
 0x198   :  { %6894 = vmatprep.subr.bf16.mxu0 %v10342_v11  ;;  %7742 = vmatprep.subr.bf16.mxu1 %v10345_v12  ;;  %v10426_v11 = vld [vmem:[%s14719_s1 + $0xe84] ss:$16 sps:$4 sm:$0xff]   ;;  %v10429_v12 = vld [vmem:[%s14719_s1 + $0xe8c] ss:$16 sps:$4 sm:$0xff]  }
 0x19b   :  { %6895 = vmatpush1.bf16.msra.mxu0 %v10340_v13  ;;  %7743 = vmatpush1.bf16.msra.mxu1 %v10343_v14  ;;  %v10424_v13 = vld [vmem:[%s14719_s1 + $0xe80] ss:$16 sps:$4 sm:$0xff]   ;;  %v10427_v14 = vld [vmem:[%s14719_s1 + $0xe88] ss:$16 sps:$4 sm:$0xff]  }
 0x19c   :  { %6896 = vmatprep.subr.bf16.mxu0 %v10348_v15  ;;  %7744 = vmatprep.subr.bf16.mxu1 %v10351_v16  ;;  %v10432_v15 = vld [vmem:[%s14719_s1 + $0xea4] ss:$16 sps:$4 sm:$0xff]   ;;  %v10435_v16 = vld [vmem:[%s14719_s1 + $0xeac] ss:$16 sps:$4 sm:$0xff]  }
 0x19f   :  { %6897 = vmatpush1.bf16.msra.mxu0 %v10346_v17  ;;  %7745 = vmatpush1.bf16.msra.mxu1 %v10349_v18  ;;  %v10430_v17 = vld [vmem:[%s14719_s1 + $0xea0] ss:$16 sps:$4 sm:$0xff]   ;;  %v10433_v18 = vld [vmem:[%s14719_s1 + $0xea8] ss:$16 sps:$4 sm:$0xff]  }
 0x1a0   :  { %6898 = vmatprep.subr.bf16.mxu0 %v10354_v19  ;;  %7746 = vmatprep.subr.bf16.mxu1 %v10357_v20  ;;  %v10438_v19 = vld [vmem:[%s14719_s1 + $0xec4] ss:$16 sps:$4 sm:$0xff]   ;;  %v10441_v20 = vld [vmem:[%s14719_s1 + $0xecc] ss:$16 sps:$4 sm:$0xff]  }
 0x1a3   :  { %6899 = vmatpush1.bf16.msra.mxu0 %v10352_v21  ;;  %7747 = vmatpush1.bf16.msra.mxu1 %v10355_v22  ;;  %v10436_v21 = vld [vmem:[%s14719_s1 + $0xec0] ss:$16 sps:$4 sm:$0xff]   ;;  %v10439_v22 = vld [vmem:[%s14719_s1 + $0xec8] ss:$16 sps:$4 sm:$0xff]  }
 0x1a4   :  { %6900 = vmatprep.subr.bf16.mxu0 %v10360_v23  ;;  %7748 = vmatprep.subr.bf16.mxu1 %v10363_v24  ;;  %v10444_v23 = vld [vmem:[%s14719_s1 + $0xee4] ss:$16 sps:$4 sm:$0xff]   ;;  %v10447_v24 = vld [vmem:[%s14719_s1 + $0xeec] ss:$16 sps:$4 sm:$0xff]  }
 0x1a7   :  { %6901 = vmatpush1.bf16.msra.mxu0 %v10358_v26  ;;  %7749 = vmatpush1.bf16.msra.mxu1 %v10361_v25  ;;  %v10442_v26 = vld [vmem:[%s14719_s1 + $0xee0] ss:$16 sps:$4 sm:$0xff]   ;;  %v10445_v25 = vld [vmem:[%s14719_s1 + $0xee8] ss:$16 sps:$4 sm:$0xff]  }
 0x1a8   :  { %6902 = vmatprep.subr.bf16.mxu0 %v10366_v27  ;;  %7750 = vmatprep.subr.bf16.mxu1 %v10369_v28  ;;  %v10450_v27 = vld [vmem:[%s14719_s1 + $0xf04] ss:$16 sps:$4 sm:$0xff]   ;;  %v10453_v28 = vld [vmem:[%s14719_s1 + $0xf0c] ss:$16 sps:$4 sm:$0xff]  }
 0x1ab   :  { %6903 = vmatpush1.bf16.msra.mxu0 %v10364_v29  ;;  %7751 = vmatpush1.bf16.msra.mxu1 %v10367_v30  ;;  %v10448_v29 = vld [vmem:[%s14719_s1 + $0xf00] ss:$16 sps:$4 sm:$0xff]   ;;  %v10451_v30 = vld [vmem:[%s14719_s1 + $0xf08] ss:$16 sps:$4 sm:$0xff]  }
 0x1ac   :  { %6904 = vmatprep.subr.bf16.mxu0 %v10372_v31  ;;  %7752 = vmatprep.subr.bf16.mxu1 %v10375_v32  ;;  %v10456_v31 = vld [vmem:[%s14719_s1 + $0xf24] ss:$16 sps:$4 sm:$0xff]   ;;  %v10459_v32 = vld [vmem:[%s14719_s1 + $0xf2c] ss:$16 sps:$4 sm:$0xff]  }
 0x1af   :  { %6905 = vmatpush1.bf16.msra.mxu0 %v10370_v34  ;;  %7753 = vmatpush1.bf16.msra.mxu1 %v10373_v36  ;;  %v10454_v34 = vld [vmem:[%s14719_s1 + $0xf20] ss:$16 sps:$4 sm:$0xff]   ;;  %v10457_v36 = vld [vmem:[%s14719_s1 + $0xf28] ss:$16 sps:$4 sm:$0xff]  }
 0x1b0   :  { %6906 = vmatprep.subr.bf16.mxu0 %v10378_v33  ;;  %7754 = vmatprep.subr.bf16.mxu1 %v10381_v35  ;;  %v10462_v33 = vld [vmem:[%s14719_s1 + $0xf44] ss:$16 sps:$4 sm:$0xff]   ;;  %v10465_v35 = vld [vmem:[%s14719_s1 + $0xf4c] ss:$16 sps:$4 sm:$0xff]  }
 0x1b3   :  { %6907 = vmatpush1.bf16.msra.mxu0 %v10376_v37  ;;  %7755 = vmatpush1.bf16.msra.mxu1 %v10379_v38  ;;  %v10460_v37 = vld [vmem:[%s14719_s1 + $0xf40] ss:$16 sps:$4 sm:$0xff]   ;;  %v10463_v38 = vld [vmem:[%s14719_s1 + $0xf48] ss:$16 sps:$4 sm:$0xff]  }
 0x1b4   :  { %6908 = vmatprep.subr.bf16.mxu0 %v10384_v39  ;;  %7756 = vmatprep.subr.bf16.mxu1 %v10387_v40  ;;  %v10468_v39 = vld [vmem:[%s14719_s1 + $0xf64] ss:$16 sps:$4 sm:$0xff]   ;;  %v10471_v40 = vld [vmem:[%s14719_s1 + $0xf6c] ss:$16 sps:$4 sm:$0xff]  }
 0x1b7   :  { %6909 = vmatpush1.bf16.msra.mxu0 %v10382_v42  ;;  %7757 = vmatpush1.bf16.msra.mxu1 %v10385_v44  ;;  %v10466_v42 = vld [vmem:[%s14719_s1 + $0xf60] ss:$16 sps:$4 sm:$0xff]   ;;  %v10469_v44 = vld [vmem:[%s14719_s1 + $0xf68] ss:$16 sps:$4 sm:$0xff]  }
 0x1b8   :  { %6910 = vmatprep.subr.bf16.mxu0 %v10390_v41  ;;  %7758 = vmatprep.subr.bf16.mxu1 %v10393_v43  ;;  %v10474_v41 = vld [vmem:[%s14719_s1 + $0xf84] ss:$16 sps:$4 sm:$0xff]   ;;  %v10477_v43 = vld [vmem:[%s14719_s1 + $0xf8c] ss:$16 sps:$4 sm:$0xff]  }
 0x1bb   :  { %6911 = vmatpush1.bf16.msra.mxu0 %v10388_v45  ;;  %7759 = vmatpush1.bf16.msra.mxu1 %v10391_v46  ;;  %v10472_v45 = vld [vmem:[%s14719_s1 + $0xf80] ss:$16 sps:$4 sm:$0xff]   ;;  %v10475_v46 = vld [vmem:[%s14719_s1 + $0xf88] ss:$16 sps:$4 sm:$0xff]  }
 0x1bc   :  { %6912 = vmatprep.subr.bf16.mxu0 %v10396_v47  ;;  %7760 = vmatprep.subr.bf16.mxu1 %v10399_v48  ;;  %v10480_v47 = vld [vmem:[%s14719_s1 + $0xfa4] ss:$16 sps:$4 sm:$0xff]   ;;  %v10483_v48 = vld [vmem:[%s14719_s1 + $0xfac] ss:$16 sps:$4 sm:$0xff]  }
 0x1bf   :  { %6913 = vmatpush1.bf16.msra.mxu0 %v10394_v51  ;;  %7761 = vmatpush1.bf16.msra.mxu1 %v10397_v52  ;;  %v10478_v51 = vld [vmem:[%s14719_s1 + $0xfa0] ss:$16 sps:$4 sm:$0xff]   ;;  %v10481_v52 = vld [vmem:[%s14719_s1 + $0xfa8] ss:$16 sps:$4 sm:$0xff]  }
 0x1c0   :  { %6935 = vmatprep.subr.bf16.mxu0 %v10402_v49  ;;  %7783 = vmatprep.subr.bf16.mxu1 %v10405_v50  ;;  %v10486_v49 = vld [vmem:[%s14719_s1 + $0xfc4] ss:$16 sps:$4 sm:$0xff]   ;;  %v10489_v50 = vld [vmem:[%s14719_s1 + $0xfcc] ss:$16 sps:$4 sm:$0xff]  }
 0x1c2   :  { %6915 = vmatmul.mubr.bf16.vlgmr.msra.gmra.mrb[0].mxu0 %v8380_v55  ;;  %7763 = vmatmul.mubr.bf16.vlgmr.msra.gmra.mrb[0].mxu1 %v8380_v55  ;;  %v10492_v55 = vld [vmem:[%s14719_s1 + $0xfe4] ss:$16 sps:$4 sm:$0xff]  }
 0x1c3   :  { %6936 = vmatpush1.bf16.msra.mxu0 %v10400_v56  ;;  %7784 = vmatpush1.bf16.msra.mxu1 %v10403_v59  ;;  %v10495_v56 = vld [vmem:[%s14719_s1 + $0xfec] ss:$16 sps:$4 sm:$0xff]   ;;  %v10490_v59 = vld [vmem:[%s14719_s1 + $0xfe0] ss:$16 sps:$4 sm:$0xff]  }
 0x1c4   :  { %6937 = vmatprep.subr.bf16.mxu0 %v10408_v60  ;;  %7785 = vmatprep.subr.bf16.mxu1 %v10411_v57  ;;  %v10493_v60 = vld [vmem:[%s14719_s1 + $0xfe8] ss:$16 sps:$4 sm:$0xff]   ;;  %v10498_v57 = vld [vmem:[%s14719_s1 + $0x1004] ss:$16 sps:$4 sm:$0xff]  }
 0x1c5   :  { %6924 = vmatprep.mubr.bf16.mxu0 %v8413_v62  ;;  %7772 = vmatprep.mubr.bf16.mxu1 %v8413_v62  ;;  %v69_v62 = vld [vmem:[%s14720_s0 + $0x1b8] sm:$0xff] }
 0x1c7   :  { %6938 = vmatpush1.bf16.msra.mxu0 %v10406_v58  ;;  %7786 = vmatpush1.bf16.msra.mxu1 %v10409_v61  ;;  %v10501_v58 = vld [vmem:[%s14719_s1 + $0x100c] ss:$16 sps:$4 sm:$0xff]  }
 0x1c8   :  { %6939 = vmatprep.subr.bf16.mxu0 %v10414_v63  ;;  %7787 = vmatprep.subr.bf16.mxu1 %v10417_v0  ;;  %v53_v61 = vld [vmem:[%s14720_s0 + $0x138] sm:$0xff]  ;;  %v8382_v63 = vcombine.low %v12793_v1, %v12798_v2  ;;  %v10496_v0 = vld [vmem:[%s14719_s1 + $0x1000] ss:$16 sps:$4 sm:$0xff]  }
 0x1c9   :  { %v10507_v1 = vld [vmem:[%s14719_s1 + $0x102c] ss:$16 sps:$4 sm:$0xff]   ;;  %v10502_v2 = vld [vmem:[%s14719_s1 + $0x1020] ss:$16 sps:$4 sm:$0xff]  }
 0x1ca   :  { %6925 = vmatmul.mubr.bf16.gmra.mrb[4].mxu0 %v8412_v3  ;;  %7773 = vmatmul.mubr.bf16.gmra.mrb[4].mxu1 %v8412_v3  ;;  %v10499_v3 = vld [vmem:[%s14719_s1 + $0x1008] ss:$16 sps:$4 sm:$0xff]  }
 0x1cb   :  { %6940 = vmatpush1.bf16.msra.mxu0 %v10412_v4  ;;  %7788 = vmatpush1.bf16.msra.mxu1 %v10415_v5  ;;  %v10504_v4 = vld [vmem:[%s14719_s1 + $0x1024] ss:$16 sps:$4 sm:$0xff]   ;;  %v10505_v5 = vld [vmem:[%s14719_s1 + $0x1028] ss:$16 sps:$4 sm:$0xff]  }
 0x1cc   :  { %6941 = vmatprep.subr.bf16.mxu0 %v10420_v6  ;;  %7789 = vmatprep.subr.bf16.mxu1 %v10423_v7  ;;  %v8415_v6 = vcombine.high %v53_v61, %v69_v62  ;;  %v10510_v7 = vld [vmem:[%s14719_s1 + $0x1044] ss:$16 sps:$4 sm:$0xff]  }
 0x1cd   :  { %6967 = vmatprep.mubr.bf16.mxu0 %v8383_v8  ;;  %7815 = vmatprep.mubr.bf16.mxu1 %v8383_v8  ;;  %v10513_v8 = vld [vmem:[%s14719_s1 + $0x104c] ss:$16 sps:$4 sm:$0xff]  }
 0x1cf   :  { %6942 = vmatpush1.bf16.msra.mxu0 %v10418_v9  ;;  %7790 = vmatpush1.bf16.msra.mxu1 %v10421_v10  ;;  %v13005_v9 = vld [vmem:[%s14720_s0 + $0x40] sm:$0xff] }
 0x1d0   :  { %6943 = vmatprep.subr.bf16.mxu0 %v10426_v11  ;;  %7791 = vmatprep.subr.bf16.mxu1 %v10429_v12  ;;  %v13010_v10 = vld [vmem:[%s14720_s0 + $0xc0] sm:$0xff]  ;;  %v8414_v11 = vcombine.low %v53_v61, %v69_v62  ;;  %v10583_v62 = vld [vmem:[%s14719_s1 + $0x11c8] ss:$16 sps:$4 sm:$0xff]  }
 0x1d1   :  { %v10508_v12 = vld [vmem:[%s14719_s1 + $0x1040] ss:$16 sps:$4 sm:$0xff]  }
 0x1d2   :  { %v10580_v61 = vld [vmem:[%s14719_s1 + $0x11c0] ss:$16 sps:$4 sm:$0xff]  }
 0x1d3   :  { %6944 = vmatpush1.bf16.msra.mxu0 %v10424_v13  ;;  %7792 = vmatpush1.bf16.msra.mxu1 %v10427_v14  ;;  %v10511_v13 = vld [vmem:[%s14719_s1 + $0x1048] ss:$16 sps:$4 sm:$0xff]   ;;  %v10516_v14 = vld [vmem:[%s14719_s1 + $0x1064] ss:$16 sps:$4 sm:$0xff]  }
 0x1d4   :  { %6945 = vmatprep.subr.bf16.mxu0 %v10432_v15  ;;  %7793 = vmatprep.subr.bf16.mxu1 %v10435_v16  ;;  %v10519_v15 = vld [vmem:[%s14719_s1 + $0x106c] ss:$16 sps:$4 sm:$0xff]   ;;  %v8385_v16 = vcombine.high %v13005_v9, %v13010_v10 }
 0x1d7   :  { %6946 = vmatpush1.bf16.msra.mxu0 %v10430_v17  ;;  %7794 = vmatpush1.bf16.msra.mxu1 %v10433_v18  ;;  %v10514_v17 = vld [vmem:[%s14719_s1 + $0x1060] ss:$16 sps:$4 sm:$0xff]   ;;  %v10517_v18 = vld [vmem:[%s14719_s1 + $0x1068] ss:$16 sps:$4 sm:$0xff]  }
 0x1d8   :  { %6947 = vmatprep.subr.bf16.mxu0 %v10438_v19  ;;  %7795 = vmatprep.subr.bf16.mxu1 %v10441_v20  ;;  %v10522_v19 = vld [vmem:[%s14719_s1 + $0x1084] ss:$16 sps:$4 sm:$0xff]   ;;  %v10525_v20 = vld [vmem:[%s14719_s1 + $0x108c] ss:$16 sps:$4 sm:$0xff]  }
 0x1db   :  { %6948 = vmatpush1.bf16.msra.mxu0 %v10436_v21  ;;  %7796 = vmatpush1.bf16.msra.mxu1 %v10439_v22  ;;  %v10520_v21 = vld [vmem:[%s14719_s1 + $0x1080] ss:$16 sps:$4 sm:$0xff]   ;;  %v10523_v22 = vld [vmem:[%s14719_s1 + $0x1088] ss:$16 sps:$4 sm:$0xff]  }
 0x1dc   :  { %6949 = vmatprep.subr.bf16.mxu0 %v10444_v23  ;;  %7797 = vmatprep.subr.bf16.mxu1 %v10447_v24  ;;  %v10528_v23 = vld [vmem:[%s14719_s1 + $0x10a4] ss:$16 sps:$4 sm:$0xff]   ;;  %v10531_v24 = vld [vmem:[%s14719_s1 + $0x10ac] ss:$16 sps:$4 sm:$0xff]  }
 0x1df   :  { %6950 = vmatpush1.bf16.msra.mxu0 %v10442_v26  ;;  %7798 = vmatpush1.bf16.msra.mxu1 %v10445_v25  ;;  %v10526_v26 = vld [vmem:[%s14719_s1 + $0x10a0] ss:$16 sps:$4 sm:$0xff]   ;;  %v10529_v25 = vld [vmem:[%s14719_s1 + $0x10a8] ss:$16 sps:$4 sm:$0xff]  }
 0x1e0   :  { %6951 = vmatprep.subr.bf16.mxu0 %v10450_v27  ;;  %7799 = vmatprep.subr.bf16.mxu1 %v10453_v28  ;;  %v10534_v27 = vld [vmem:[%s14719_s1 + $0x10c4] ss:$16 sps:$4 sm:$0xff]   ;;  %v10537_v28 = vld [vmem:[%s14719_s1 + $0x10cc] ss:$16 sps:$4 sm:$0xff]  }
 0x1e3   :  { %6952 = vmatpush1.bf16.msra.mxu0 %v10448_v29  ;;  %7800 = vmatpush1.bf16.msra.mxu1 %v10451_v30  ;;  %v10532_v29 = vld [vmem:[%s14719_s1 + $0x10c0] ss:$16 sps:$4 sm:$0xff]   ;;  %v10535_v30 = vld [vmem:[%s14719_s1 + $0x10c8] ss:$16 sps:$4 sm:$0xff]  }
 0x1e4   :  { %6953 = vmatprep.subr.bf16.mxu0 %v10456_v31  ;;  %7801 = vmatprep.subr.bf16.mxu1 %v10459_v32  ;;  %v10540_v31 = vld [vmem:[%s14719_s1 + $0x10e4] ss:$16 sps:$4 sm:$0xff]   ;;  %v10543_v32 = vld [vmem:[%s14719_s1 + $0x10ec] ss:$16 sps:$4 sm:$0xff]  }
 0x1e7   :  { %6954 = vmatpush1.bf16.msra.mxu0 %v10454_v34  ;;  %7802 = vmatpush1.bf16.msra.mxu1 %v10457_v36  ;;  %v10538_v34 = vld [vmem:[%s14719_s1 + $0x10e0] ss:$16 sps:$4 sm:$0xff]   ;;  %v10541_v36 = vld [vmem:[%s14719_s1 + $0x10e8] ss:$16 sps:$4 sm:$0xff]  }
 0x1e8   :  { %6955 = vmatprep.subr.bf16.mxu0 %v10462_v33  ;;  %7803 = vmatprep.subr.bf16.mxu1 %v10465_v35  ;;  %v10546_v33 = vld [vmem:[%s14719_s1 + $0x1104] ss:$16 sps:$4 sm:$0xff]   ;;  %v10549_v35 = vld [vmem:[%s14719_s1 + $0x110c] ss:$16 sps:$4 sm:$0xff]  }
 0x1eb   :  { %6956 = vmatpush1.bf16.msra.mxu0 %v10460_v37  ;;  %7804 = vmatpush1.bf16.msra.mxu1 %v10463_v38  ;;  %v10544_v37 = vld [vmem:[%s14719_s1 + $0x1100] ss:$16 sps:$4 sm:$0xff]   ;;  %v10547_v38 = vld [vmem:[%s14719_s1 + $0x1108] ss:$16 sps:$4 sm:$0xff]  }
 0x1ec   :  { %6957 = vmatprep.subr.bf16.mxu0 %v10468_v39  ;;  %7805 = vmatprep.subr.bf16.mxu1 %v10471_v40  ;;  %v10552_v39 = vld [vmem:[%s14719_s1 + $0x1124] ss:$16 sps:$4 sm:$0xff]   ;;  %v10555_v40 = vld [vmem:[%s14719_s1 + $0x112c] ss:$16 sps:$4 sm:$0xff]  }
 0x1ef   :  { %6958 = vmatpush1.bf16.msra.mxu0 %v10466_v42  ;;  %7806 = vmatpush1.bf16.msra.mxu1 %v10469_v44  ;;  %v10550_v42 = vld [vmem:[%s14719_s1 + $0x1120] ss:$16 sps:$4 sm:$0xff]   ;;  %v10553_v44 = vld [vmem:[%s14719_s1 + $0x1128] ss:$16 sps:$4 sm:$0xff]  }
 0x1f0   :  { %6959 = vmatprep.subr.bf16.mxu0 %v10474_v41  ;;  %7807 = vmatprep.subr.bf16.mxu1 %v10477_v43  ;;  %v10558_v41 = vld [vmem:[%s14719_s1 + $0x1144] ss:$16 sps:$4 sm:$0xff]   ;;  %v10561_v43 = vld [vmem:[%s14719_s1 + $0x114c] ss:$16 sps:$4 sm:$0xff]  }
 0x1f3   :  { %6960 = vmatpush1.bf16.msra.mxu0 %v10472_v45  ;;  %7808 = vmatpush1.bf16.msra.mxu1 %v10475_v46  ;;  %v10556_v45 = vld [vmem:[%s14719_s1 + $0x1140] ss:$16 sps:$4 sm:$0xff]   ;;  %v10559_v46 = vld [vmem:[%s14719_s1 + $0x1148] ss:$16 sps:$4 sm:$0xff]  }
 0x1f4   :  { %6961 = vmatprep.subr.bf16.mxu0 %v10480_v47  ;;  %7809 = vmatprep.subr.bf16.mxu1 %v10483_v48  ;;  %v10564_v47 = vld [vmem:[%s14719_s1 + $0x1164] ss:$16 sps:$4 sm:$0xff]   ;;  %v10567_v48 = vld [vmem:[%s14719_s1 + $0x116c] ss:$16 sps:$4 sm:$0xff]  }
 0x1f7   :  { %6962 = vmatpush1.bf16.msra.mxu0 %v10478_v51  ;;  %7810 = vmatpush1.bf16.msra.mxu1 %v10481_v52  ;;  %v10562_v51 = vld [vmem:[%s14719_s1 + $0x1160] ss:$16 sps:$4 sm:$0xff]   ;;  %v10565_v52 = vld [vmem:[%s14719_s1 + $0x1168] ss:$16 sps:$4 sm:$0xff]  }
 0x1f8   :  { %6963 = vmatprep.subr.bf16.mxu0 %v10486_v49  ;;  %7811 = vmatprep.subr.bf16.mxu1 %v10489_v50  ;;  %v10570_v49 = vld [vmem:[%s14719_s1 + $0x1184] ss:$16 sps:$4 sm:$0xff]   ;;  %v10573_v50 = vld [vmem:[%s14719_s1 + $0x118c] ss:$16 sps:$4 sm:$0xff]  }
 0x1fb   :  { %6964 = vmatpush1.bf16.msra.mxu0 %v10484_v53  ;;  %7812 = vmatpush1.bf16.msra.mxu1 %v10487_v54  ;;  %v10568_v53 = vld [vmem:[%s14719_s1 + $0x1180] ss:$16 sps:$4 sm:$0xff]   ;;  %v10571_v54 = vld [vmem:[%s14719_s1 + $0x1188] ss:$16 sps:$4 sm:$0xff]  }
 0x1fc   :  { %6965 = vmatprep.subr.bf16.mxu0 %v10492_v55  ;;  %7813 = vmatprep.subr.bf16.mxu1 %v10495_v56  ;;  %v10576_v55 = vld [vmem:[%s14719_s1 + $0x11a4] ss:$16 sps:$4 sm:$0xff]   ;;  %v10579_v56 = vld [vmem:[%s14719_s1 + $0x11ac] ss:$16 sps:$4 sm:$0xff]  }
 0x1ff   :  { %6966 = vmatpush1.bf16.msra.mxu0 %v10490_v59  ;;  %7814 = vmatpush1.bf16.msra.mxu1 %v10493_v60  ;;  %v10574_v59 = vld [vmem:[%s14719_s1 + $0x11a0] ss:$16 sps:$4 sm:$0xff]   ;;  %v10577_v60 = vld [vmem:[%s14719_s1 + $0x11a8] ss:$16 sps:$4 sm:$0xff]  }
 0x200   :  { %6988 = vmatprep.subr.bf16.mxu0 %v10498_v57  ;;  %7836 = vmatprep.subr.bf16.mxu1 %v10501_v58  ;;  %v10582_v57 = vld [vmem:[%s14719_s1 + $0x11c4] ss:$16 sps:$4 sm:$0xff]   ;;  %v10585_v58 = vld [vmem:[%s14719_s1 + $0x11cc] ss:$16 sps:$4 sm:$0xff]  }
 0x202   :  { %6968 = vmatmul.mubr.bf16.vlgmr.msra.gmra.mrb[0].mxu0 %v8382_v63  ;;  %7816 = vmatmul.mubr.bf16.vlgmr.msra.gmra.mrb[0].mxu1 %v8382_v63  ;;  %v10588_v63 = vld [vmem:[%s14719_s1 + $0x11e4] ss:$16 sps:$4 sm:$0xff]  }
 0x203   :  { %6989 = vmatpush1.bf16.msra.mxu0 %v10496_v0  ;;  %7837 = vmatpush1.bf16.msra.mxu1 %v10499_v3  ;;  %v10591_v0 = vld [vmem:[%s14719_s1 + $0x11ec] ss:$16 sps:$4 sm:$0xff]   ;;  %v10586_v3 = vld [vmem:[%s14719_s1 + $0x11e0] ss:$16 sps:$4 sm:$0xff]  }
 0x204   :  { %6990 = vmatprep.subr.bf16.mxu0 %v10504_v4  ;;  %7838 = vmatprep.subr.bf16.mxu1 %v10507_v1  ;;  %v10589_v4 = vld [vmem:[%s14719_s1 + $0x11e8] ss:$16 sps:$4 sm:$0xff]   ;;  %v10594_v1 = vld [vmem:[%s14719_s1 + $0x1204] ss:$16 sps:$4 sm:$0xff]  }
 0x205   :  { %6977 = vmatprep.mubr.bf16.mxu0 %v8415_v6  ;;  %7825 = vmatprep.mubr.bf16.mxu1 %v8415_v6  ;;  %v70_v6 = vld [vmem:[%s14720_s0 + $0x1c0] sm:$0xff] }
 0x207   :  { %6991 = vmatpush1.bf16.msra.mxu0 %v10502_v2  ;;  %7839 = vmatpush1.bf16.msra.mxu1 %v10505_v5  ;;  %v10597_v2 = vld [vmem:[%s14719_s1 + $0x120c] ss:$16 sps:$4 sm:$0xff]   ;;  %v54_v5 = vld [vmem:[%s14720_s0 + $0x140] sm:$0xff] }
 0x208   :  { %6992 = vmatprep.subr.bf16.mxu0 %v10510_v7  ;;  %7840 = vmatprep.subr.bf16.mxu1 %v10513_v8  ;;  %v8384_v7 = vcombine.low %v13005_v9, %v13010_v10  ;;  %v10592_v8 = vld [vmem:[%s14719_s1 + $0x1200] ss:$16 sps:$4 sm:$0xff]   ;;  %v10603_v9 = vld [vmem:[%s14719_s1 + $0x122c] ss:$16 sps:$4 sm:$0xff]  }
 0x209   :  { %v10598_v10 = vld [vmem:[%s14719_s1 + $0x1220] ss:$16 sps:$4 sm:$0xff]  }
 0x20a   :  { %6978 = vmatmul.mubr.bf16.gmra.mrb[4].mxu0 %v8414_v11  ;;  %7826 = vmatmul.mubr.bf16.gmra.mrb[4].mxu1 %v8414_v11  ;;  %v10595_v11 = vld [vmem:[%s14719_s1 + $0x1208] ss:$16 sps:$4 sm:$0xff]  }
 0x20b   :  { %6993 = vmatpush1.bf16.msra.mxu0 %v10508_v12  ;;  %7841 = vmatpush1.bf16.msra.mxu1 %v10511_v13  ;;  %v10600_v12 = vld [vmem:[%s14719_s1 + $0x1224] ss:$16 sps:$4 sm:$0xff]   ;;  %v10601_v13 = vld [vmem:[%s14719_s1 + $0x1228] ss:$16 sps:$4 sm:$0xff]  }
 0x20c   :  { %6994 = vmatprep.subr.bf16.mxu0 %v10516_v14  ;;  %7842 = vmatprep.subr.bf16.mxu1 %v10519_v15  ;;  %v8417_v14 = vcombine.high %v54_v5, %v70_v6  ;;  %v10606_v15 = vld [vmem:[%s14719_s1 + $0x1244] ss:$16 sps:$4 sm:$0xff]  }
 0x20d   :  { %7020 = vmatprep.mubr.bf16.mxu0 %v8385_v16  ;;  %7868 = vmatprep.mubr.bf16.mxu1 %v8385_v16  ;;  %v10609_v16 = vld [vmem:[%s14719_s1 + $0x124c] ss:$16 sps:$4 sm:$0xff]  }
 0x20f   :  { %6995 = vmatpush1.bf16.msra.mxu0 %v10514_v17  ;;  %7843 = vmatpush1.bf16.msra.mxu1 %v10517_v18  ;;  %v13217_v17 = vld [vmem:[%s14720_s0 + $0x48] sm:$0xff] }
 0x210   :  { %6996 = vmatprep.subr.bf16.mxu0 %v10522_v19  ;;  %7844 = vmatprep.subr.bf16.mxu1 %v10525_v20  ;;  %v13222_v18 = vld [vmem:[%s14720_s0 + $0xc8] sm:$0xff]  ;;  %v8416_v19 = vcombine.low %v54_v5, %v70_v6  ;;  %v10604_v20 = vld [vmem:[%s14719_s1 + $0x1240] ss:$16 sps:$4 sm:$0xff]  }
 0x211   :  { %v10676_v5 = vld [vmem:[%s14719_s1 + $0x13c0] ss:$16 sps:$4 sm:$0xff]   ;;  %v10679_v6 = vld [vmem:[%s14719_s1 + $0x13c8] ss:$16 sps:$4 sm:$0xff]  }
 0x213   :  { %6997 = vmatpush1.bf16.msra.mxu0 %v10520_v21  ;;  %7845 = vmatpush1.bf16.msra.mxu1 %v10523_v22  ;;  %v10607_v21 = vld [vmem:[%s14719_s1 + $0x1248] ss:$16 sps:$4 sm:$0xff]   ;;  %v10612_v22 = vld [vmem:[%s14719_s1 + $0x1264] ss:$16 sps:$4 sm:$0xff]  }
 0x214   :  { %6998 = vmatprep.subr.bf16.mxu0 %v10528_v23  ;;  %7846 = vmatprep.subr.bf16.mxu1 %v10531_v24  ;;  %v10615_v23 = vld [vmem:[%s14719_s1 + $0x126c] ss:$16 sps:$4 sm:$0xff]   ;;  %v8387_v24 = vcombine.high %v13217_v17, %v13222_v18 }
 0x217   :  { %6999 = vmatpush1.bf16.msra.mxu0 %v10526_v26  ;;  %7847 = vmatpush1.bf16.msra.mxu1 %v10529_v25  ;;  %v10610_v26 = vld [vmem:[%s14719_s1 + $0x1260] ss:$16 sps:$4 sm:$0xff]   ;;  %v10613_v25 = vld [vmem:[%s14719_s1 + $0x1268] ss:$16 sps:$4 sm:$0xff]  }
 0x218   :  { %7000 = vmatprep.subr.bf16.mxu0 %v10534_v27  ;;  %7848 = vmatprep.subr.bf16.mxu1 %v10537_v28  ;;  %v10618_v27 = vld [vmem:[%s14719_s1 + $0x1284] ss:$16 sps:$4 sm:$0xff]   ;;  %v10621_v28 = vld [vmem:[%s14719_s1 + $0x128c] ss:$16 sps:$4 sm:$0xff]  }
 0x21b   :  { %7001 = vmatpush1.bf16.msra.mxu0 %v10532_v29  ;;  %7849 = vmatpush1.bf16.msra.mxu1 %v10535_v30  ;;  %v10616_v29 = vld [vmem:[%s14719_s1 + $0x1280] ss:$16 sps:$4 sm:$0xff]   ;;  %v10619_v30 = vld [vmem:[%s14719_s1 + $0x1288] ss:$16 sps:$4 sm:$0xff]  }
 0x21c   :  { %7002 = vmatprep.subr.bf16.mxu0 %v10540_v31  ;;  %7850 = vmatprep.subr.bf16.mxu1 %v10543_v32  ;;  %v10624_v31 = vld [vmem:[%s14719_s1 + $0x12a4] ss:$16 sps:$4 sm:$0xff]   ;;  %v10627_v32 = vld [vmem:[%s14719_s1 + $0x12ac] ss:$16 sps:$4 sm:$0xff]  }
 0x21f   :  { %7003 = vmatpush1.bf16.msra.mxu0 %v10538_v34  ;;  %7851 = vmatpush1.bf16.msra.mxu1 %v10541_v36  ;;  %v10622_v34 = vld [vmem:[%s14719_s1 + $0x12a0] ss:$16 sps:$4 sm:$0xff]   ;;  %v10625_v36 = vld [vmem:[%s14719_s1 + $0x12a8] ss:$16 sps:$4 sm:$0xff]  }
 0x220   :  { %7004 = vmatprep.subr.bf16.mxu0 %v10546_v33  ;;  %7852 = vmatprep.subr.bf16.mxu1 %v10549_v35  ;;  %v10630_v33 = vld [vmem:[%s14719_s1 + $0x12c4] ss:$16 sps:$4 sm:$0xff]   ;;  %v10633_v35 = vld [vmem:[%s14719_s1 + $0x12cc] ss:$16 sps:$4 sm:$0xff]  }
 0x223   :  { %7005 = vmatpush1.bf16.msra.mxu0 %v10544_v37  ;;  %7853 = vmatpush1.bf16.msra.mxu1 %v10547_v38  ;;  %v10628_v37 = vld [vmem:[%s14719_s1 + $0x12c0] ss:$16 sps:$4 sm:$0xff]   ;;  %v10631_v38 = vld [vmem:[%s14719_s1 + $0x12c8] ss:$16 sps:$4 sm:$0xff]  }
 0x224   :  { %7006 = vmatprep.subr.bf16.mxu0 %v10552_v39  ;;  %7854 = vmatprep.subr.bf16.mxu1 %v10555_v40  ;;  %v10636_v39 = vld [vmem:[%s14719_s1 + $0x12e4] ss:$16 sps:$4 sm:$0xff]   ;;  %v10639_v40 = vld [vmem:[%s14719_s1 + $0x12ec] ss:$16 sps:$4 sm:$0xff]  }
 0x227   :  { %7007 = vmatpush1.bf16.msra.mxu0 %v10550_v42  ;;  %7855 = vmatpush1.bf16.msra.mxu1 %v10553_v44  ;;  %v10634_v42 = vld [vmem:[%s14719_s1 + $0x12e0] ss:$16 sps:$4 sm:$0xff]   ;;  %v10637_v44 = vld [vmem:[%s14719_s1 + $0x12e8] ss:$16 sps:$4 sm:$0xff]  }
 0x228   :  { %7008 = vmatprep.subr.bf16.mxu0 %v10558_v41  ;;  %7856 = vmatprep.subr.bf16.mxu1 %v10561_v43  ;;  %v10642_v41 = vld [vmem:[%s14719_s1 + $0x1304] ss:$16 sps:$4 sm:$0xff]   ;;  %v10645_v43 = vld [vmem:[%s14719_s1 + $0x130c] ss:$16 sps:$4 sm:$0xff]  }
 0x22b   :  { %7009 = vmatpush1.bf16.msra.mxu0 %v10556_v45  ;;  %7857 = vmatpush1.bf16.msra.mxu1 %v10559_v46  ;;  %v10640_v45 = vld [vmem:[%s14719_s1 + $0x1300] ss:$16 sps:$4 sm:$0xff]   ;;  %v10643_v46 = vld [vmem:[%s14719_s1 + $0x1308] ss:$16 sps:$4 sm:$0xff]  }
 0x22c   :  { %7010 = vmatprep.subr.bf16.mxu0 %v10564_v47  ;;  %7858 = vmatprep.subr.bf16.mxu1 %v10567_v48  ;;  %v10648_v47 = vld [vmem:[%s14719_s1 + $0x1324] ss:$16 sps:$4 sm:$0xff]   ;;  %v10651_v48 = vld [vmem:[%s14719_s1 + $0x132c] ss:$16 sps:$4 sm:$0xff]  }
 0x22f   :  { %7011 = vmatpush1.bf16.msra.mxu0 %v10562_v51  ;;  %7859 = vmatpush1.bf16.msra.mxu1 %v10565_v52  ;;  %v10646_v51 = vld [vmem:[%s14719_s1 + $0x1320] ss:$16 sps:$4 sm:$0xff]   ;;  %v10649_v52 = vld [vmem:[%s14719_s1 + $0x1328] ss:$16 sps:$4 sm:$0xff]  }
 0x230   :  { %7012 = vmatprep.subr.bf16.mxu0 %v10570_v49  ;;  %7860 = vmatprep.subr.bf16.mxu1 %v10573_v50  ;;  %v10654_v49 = vld [vmem:[%s14719_s1 + $0x1344] ss:$16 sps:$4 sm:$0xff]   ;;  %v10657_v50 = vld [vmem:[%s14719_s1 + $0x134c] ss:$16 sps:$4 sm:$0xff]  }
 0x233   :  { %7013 = vmatpush1.bf16.msra.mxu0 %v10568_v53  ;;  %7861 = vmatpush1.bf16.msra.mxu1 %v10571_v54  ;;  %v10652_v53 = vld [vmem:[%s14719_s1 + $0x1340] ss:$16 sps:$4 sm:$0xff]   ;;  %v10655_v54 = vld [vmem:[%s14719_s1 + $0x1348] ss:$16 sps:$4 sm:$0xff]  }
 0x234   :  { %7014 = vmatprep.subr.bf16.mxu0 %v10576_v55  ;;  %7862 = vmatprep.subr.bf16.mxu1 %v10579_v56  ;;  %v10660_v55 = vld [vmem:[%s14719_s1 + $0x1364] ss:$16 sps:$4 sm:$0xff]   ;;  %v10663_v56 = vld [vmem:[%s14719_s1 + $0x136c] ss:$16 sps:$4 sm:$0xff]  }
 0x237   :  { %7015 = vmatpush1.bf16.msra.mxu0 %v10574_v59  ;;  %7863 = vmatpush1.bf16.msra.mxu1 %v10577_v60  ;;  %v10658_v59 = vld [vmem:[%s14719_s1 + $0x1360] ss:$16 sps:$4 sm:$0xff]   ;;  %v10661_v60 = vld [vmem:[%s14719_s1 + $0x1368] ss:$16 sps:$4 sm:$0xff]  }
 0x238   :  { %7016 = vmatprep.subr.bf16.mxu0 %v10582_v57  ;;  %7864 = vmatprep.subr.bf16.mxu1 %v10585_v58  ;;  %v10666_v57 = vld [vmem:[%s14719_s1 + $0x1384] ss:$16 sps:$4 sm:$0xff]   ;;  %v10669_v58 = vld [vmem:[%s14719_s1 + $0x138c] ss:$16 sps:$4 sm:$0xff]  }
 0x23b   :  { %7017 = vmatpush1.bf16.msra.mxu0 %v10580_v61  ;;  %7865 = vmatpush1.bf16.msra.mxu1 %v10583_v62  ;;  %v10664_v61 = vld [vmem:[%s14719_s1 + $0x1380] ss:$16 sps:$4 sm:$0xff]   ;;  %v10667_v62 = vld [vmem:[%s14719_s1 + $0x1388] ss:$16 sps:$4 sm:$0xff]  }
 0x23c   :  { %7018 = vmatprep.subr.bf16.mxu0 %v10588_v63  ;;  %7866 = vmatprep.subr.bf16.mxu1 %v10591_v0  ;;  %v10672_v63 = vld [vmem:[%s14719_s1 + $0x13a4] ss:$16 sps:$4 sm:$0xff]   ;;  %v10675_v0 = vld [vmem:[%s14719_s1 + $0x13ac] ss:$16 sps:$4 sm:$0xff]  }
 0x23f   :  { %7019 = vmatpush1.bf16.msra.mxu0 %v10586_v3  ;;  %7867 = vmatpush1.bf16.msra.mxu1 %v10589_v4  ;;  %v10670_v3 = vld [vmem:[%s14719_s1 + $0x13a0] ss:$16 sps:$4 sm:$0xff]   ;;  %v10673_v4 = vld [vmem:[%s14719_s1 + $0x13a8] ss:$16 sps:$4 sm:$0xff]  }
 0x240   :  { %7041 = vmatprep.subr.bf16.mxu0 %v10594_v1  ;;  %7889 = vmatprep.subr.bf16.mxu1 %v10597_v2  ;;  %v10678_v1 = vld [vmem:[%s14719_s1 + $0x13c4] ss:$16 sps:$4 sm:$0xff]   ;;  %v10681_v2 = vld [vmem:[%s14719_s1 + $0x13cc] ss:$16 sps:$4 sm:$0xff]  }
 0x242   :  { %7021 = vmatmul.mubr.bf16.vlgmr.msra.gmra.mrb[0].mxu0 %v8384_v7  ;;  %7869 = vmatmul.mubr.bf16.vlgmr.msra.gmra.mrb[0].mxu1 %v8384_v7  ;;  %v10684_v7 = vld [vmem:[%s14719_s1 + $0x13e4] ss:$16 sps:$4 sm:$0xff]  }
 0x243   :  { %7042 = vmatpush1.bf16.msra.mxu0 %v10592_v8  ;;  %7890 = vmatpush1.bf16.msra.mxu1 %v10595_v11  ;;  %v10687_v8 = vld [vmem:[%s14719_s1 + $0x13ec] ss:$16 sps:$4 sm:$0xff]   ;;  %v10682_v11 = vld [vmem:[%s14719_s1 + $0x13e0] ss:$16 sps:$4 sm:$0xff]  }
 0x244   :  { %7043 = vmatprep.subr.bf16.mxu0 %v10600_v12  ;;  %7891 = vmatprep.subr.bf16.mxu1 %v10603_v9  ;;  %v10685_v12 = vld [vmem:[%s14719_s1 + $0x13e8] ss:$16 sps:$4 sm:$0xff]   ;;  %v10690_v9 = vld [vmem:[%s14719_s1 + $0x1404] ss:$16 sps:$4 sm:$0xff]  }
 0x245   :  { %7030 = vmatprep.mubr.bf16.mxu0 %v8417_v14  ;;  %7878 = vmatprep.mubr.bf16.mxu1 %v8417_v14  ;;  %v55_v14 = vld [vmem:[%s14720_s0 + $0x148] sm:$0xff] }
 0x247   :  { %7044 = vmatpush1.bf16.msra.mxu0 %v10598_v10  ;;  %7892 = vmatpush1.bf16.msra.mxu1 %v10601_v13  ;;  %v10693_v10 = vld [vmem:[%s14719_s1 + $0x140c] ss:$16 sps:$4 sm:$0xff]   ;;  %v8386_v13 = vcombine.low %v13217_v17, %v13222_v18  ;;  %v10696_v17 = vld [vmem:[%s14719_s1 + $0x1424] ss:$16 sps:$4 sm:$0xff]  }
 0x248   :  { %7045 = vmatprep.subr.bf16.mxu0 %v10606_v15  ;;  %7893 = vmatprep.subr.bf16.mxu1 %v10609_v16  ;;  %v71_v15 = vld [vmem:[%s14720_s0 + $0x1c8] sm:$0xff]  ;;  %v10688_v16 = vld [vmem:[%s14719_s1 + $0x1400] ss:$16 sps:$4 sm:$0xff]  }
 0x249   :  { %v10699_v18 = vld [vmem:[%s14719_s1 + $0x142c] ss:$16 sps:$4 sm:$0xff]  }
 0x24a   :  { %7031 = vmatmul.mubr.bf16.gmra.mrb[4].mxu0 %v8416_v19  ;;  %7879 = vmatmul.mubr.bf16.gmra.mrb[4].mxu1 %v8416_v19  ;;  %v10691_v19 = vld [vmem:[%s14719_s1 + $0x1408] ss:$16 sps:$4 sm:$0xff]  }
 0x24b   :  { %7046 = vmatpush1.bf16.msra.mxu0 %v10604_v20  ;;  %7894 = vmatpush1.bf16.msra.mxu1 %v10607_v21  ;;  %v8419_v20 = vcombine.high %v55_v14, %v71_v15  ;;  %v10694_v21 = vld [vmem:[%s14719_s1 + $0x1420] ss:$16 sps:$4 sm:$0xff]  }
 0x24c   :  { %7047 = vmatprep.subr.bf16.mxu0 %v10612_v22  ;;  %7895 = vmatprep.subr.bf16.mxu1 %v10615_v23  ;;  %v10697_v22 = vld [vmem:[%s14719_s1 + $0x1428] ss:$16 sps:$4 sm:$0xff]   ;;  %v10702_v23 = vld [vmem:[%s14719_s1 + $0x1444] ss:$16 sps:$4 sm:$0xff]  }
 0x24d   :  { %7073 = vmatprep.mubr.bf16.mxu0 %v8387_v24  ;;  %7921 = vmatprep.mubr.bf16.mxu1 %v8387_v24  ;;  %v10705_v24 = vld [vmem:[%s14719_s1 + $0x144c] ss:$16 sps:$4 sm:$0xff]  }
 0x24f   :  { %7048 = vmatpush1.bf16.msra.mxu0 %v10610_v26  ;;  %7896 = vmatpush1.bf16.msra.mxu1 %v10613_v25  ;;  %v8418_v26 = vcombine.low %v55_v14, %v71_v15  ;;  %v13429_v25 = vld [vmem:[%s14720_s0 + $0x50] sm:$0xff]  ;;  %v10775_v14 = vld [vmem:[%s14719_s1 + $0x15c8] ss:$16 sps:$4 sm:$0xff]  }
 0x250   :  { %7049 = vmatprep.subr.bf16.mxu0 %v10618_v27  ;;  %7897 = vmatprep.subr.bf16.mxu1 %v10621_v28  ;;  %v13434_v27 = vld [vmem:[%s14720_s0 + $0xd0] sm:$0xff] }
 0x251   :  { %v10700_v28 = vld [vmem:[%s14719_s1 + $0x1440] ss:$16 sps:$4 sm:$0xff]   ;;  %v10780_v15 = vld [vmem:[%s14719_s1 + $0x15e4] ss:$16 sps:$4 sm:$0xff]  }
 0x253   :  { %7050 = vmatpush1.bf16.msra.mxu0 %v10616_v29  ;;  %7898 = vmatpush1.bf16.msra.mxu1 %v10619_v30  ;;  %v10703_v29 = vld [vmem:[%s14719_s1 + $0x1448] ss:$16 sps:$4 sm:$0xff]   ;;  %v10708_v30 = vld [vmem:[%s14719_s1 + $0x1464] ss:$16 sps:$4 sm:$0xff]  }
 0x254   :  { %7051 = vmatprep.subr.bf16.mxu0 %v10624_v31  ;;  %7899 = vmatprep.subr.bf16.mxu1 %v10627_v32  ;;  %v10711_v31 = vld [vmem:[%s14719_s1 + $0x146c] ss:$16 sps:$4 sm:$0xff]   ;;  %v8389_v32 = vcombine.high %v13429_v25, %v13434_v27 }
 0x257   :  { %7052 = vmatpush1.bf16.msra.mxu0 %v10622_v34  ;;  %7900 = vmatpush1.bf16.msra.mxu1 %v10625_v36  ;;  %v10706_v34 = vld [vmem:[%s14719_s1 + $0x1460] ss:$16 sps:$4 sm:$0xff]   ;;  %v10709_v36 = vld [vmem:[%s14719_s1 + $0x1468] ss:$16 sps:$4 sm:$0xff]  }
 0x258   :  { %7053 = vmatprep.subr.bf16.mxu0 %v10630_v33  ;;  %7901 = vmatprep.subr.bf16.mxu1 %v10633_v35  ;;  %v10714_v33 = vld [vmem:[%s14719_s1 + $0x1484] ss:$16 sps:$4 sm:$0xff]   ;;  %v10717_v35 = vld [vmem:[%s14719_s1 + $0x148c] ss:$16 sps:$4 sm:$0xff]  }
 0x25b   :  { %7054 = vmatpush1.bf16.msra.mxu0 %v10628_v37  ;;  %7902 = vmatpush1.bf16.msra.mxu1 %v10631_v38  ;;  %v10712_v37 = vld [vmem:[%s14719_s1 + $0x1480] ss:$16 sps:$4 sm:$0xff]   ;;  %v10715_v38 = vld [vmem:[%s14719_s1 + $0x1488] ss:$16 sps:$4 sm:$0xff]  }
 0x25c   :  { %7055 = vmatprep.subr.bf16.mxu0 %v10636_v39  ;;  %7903 = vmatprep.subr.bf16.mxu1 %v10639_v40  ;;  %v10720_v39 = vld [vmem:[%s14719_s1 + $0x14a4] ss:$16 sps:$4 sm:$0xff]   ;;  %v10723_v40 = vld [vmem:[%s14719_s1 + $0x14ac] ss:$16 sps:$4 sm:$0xff]  }
 0x25f   :  { %7056 = vmatpush1.bf16.msra.mxu0 %v10634_v42  ;;  %7904 = vmatpush1.bf16.msra.mxu1 %v10637_v44  ;;  %v10718_v42 = vld [vmem:[%s14719_s1 + $0x14a0] ss:$16 sps:$4 sm:$0xff]   ;;  %v10721_v44 = vld [vmem:[%s14719_s1 + $0x14a8] ss:$16 sps:$4 sm:$0xff]  }
 0x260   :  { %7057 = vmatprep.subr.bf16.mxu0 %v10642_v41  ;;  %7905 = vmatprep.subr.bf16.mxu1 %v10645_v43  ;;  %v10726_v41 = vld [vmem:[%s14719_s1 + $0x14c4] ss:$16 sps:$4 sm:$0xff]   ;;  %v10729_v43 = vld [vmem:[%s14719_s1 + $0x14cc] ss:$16 sps:$4 sm:$0xff]  }
 0x263   :  { %7058 = vmatpush1.bf16.msra.mxu0 %v10640_v45  ;;  %7906 = vmatpush1.bf16.msra.mxu1 %v10643_v46  ;;  %v10724_v45 = vld [vmem:[%s14719_s1 + $0x14c0] ss:$16 sps:$4 sm:$0xff]   ;;  %v10727_v46 = vld [vmem:[%s14719_s1 + $0x14c8] ss:$16 sps:$4 sm:$0xff]  }
 0x264   :  { %7059 = vmatprep.subr.bf16.mxu0 %v10648_v47  ;;  %7907 = vmatprep.subr.bf16.mxu1 %v10651_v48  ;;  %v10732_v47 = vld [vmem:[%s14719_s1 + $0x14e4] ss:$16 sps:$4 sm:$0xff]   ;;  %v10735_v48 = vld [vmem:[%s14719_s1 + $0x14ec] ss:$16 sps:$4 sm:$0xff]  }
 0x267   :  { %7060 = vmatpush1.bf16.msra.mxu0 %v10646_v51  ;;  %7908 = vmatpush1.bf16.msra.mxu1 %v10649_v52  ;;  %v10730_v51 = vld [vmem:[%s14719_s1 + $0x14e0] ss:$16 sps:$4 sm:$0xff]   ;;  %v10733_v52 = vld [vmem:[%s14719_s1 + $0x14e8] ss:$16 sps:$4 sm:$0xff]  }
 0x268   :  { %7061 = vmatprep.subr.bf16.mxu0 %v10654_v49  ;;  %7909 = vmatprep.subr.bf16.mxu1 %v10657_v50  ;;  %v10738_v49 = vld [vmem:[%s14719_s1 + $0x1504] ss:$16 sps:$4 sm:$0xff]   ;;  %v10741_v50 = vld [vmem:[%s14719_s1 + $0x150c] ss:$16 sps:$4 sm:$0xff]  }
 0x26b   :  { %7062 = vmatpush1.bf16.msra.mxu0 %v10652_v53  ;;  %7910 = vmatpush1.bf16.msra.mxu1 %v10655_v54  ;;  %v10736_v53 = vld [vmem:[%s14719_s1 + $0x1500] ss:$16 sps:$4 sm:$0xff]   ;;  %v10739_v54 = vld [vmem:[%s14719_s1 + $0x1508] ss:$16 sps:$4 sm:$0xff]  }
 0x26c   :  { %7063 = vmatprep.subr.bf16.mxu0 %v10660_v55  ;;  %7911 = vmatprep.subr.bf16.mxu1 %v10663_v56  ;;  %v10744_v55 = vld [vmem:[%s14719_s1 + $0x1524] ss:$16 sps:$4 sm:$0xff]   ;;  %v10747_v56 = vld [vmem:[%s14719_s1 + $0x152c] ss:$16 sps:$4 sm:$0xff]  }
 0x26f   :  { %7064 = vmatpush1.bf16.msra.mxu0 %v10658_v59  ;;  %7912 = vmatpush1.bf16.msra.mxu1 %v10661_v60  ;;  %v10742_v59 = vld [vmem:[%s14719_s1 + $0x1520] ss:$16 sps:$4 sm:$0xff]   ;;  %v10745_v60 = vld [vmem:[%s14719_s1 + $0x1528] ss:$16 sps:$4 sm:$0xff]  }
 0x270   :  { %7065 = vmatprep.subr.bf16.mxu0 %v10666_v57  ;;  %7913 = vmatprep.subr.bf16.mxu1 %v10669_v58  ;;  %v10750_v57 = vld [vmem:[%s14719_s1 + $0x1544] ss:$16 sps:$4 sm:$0xff]   ;;  %v10753_v58 = vld [vmem:[%s14719_s1 + $0x154c] ss:$16 sps:$4 sm:$0xff]  }
 0x273   :  { %7066 = vmatpush1.bf16.msra.mxu0 %v10664_v61  ;;  %7914 = vmatpush1.bf16.msra.mxu1 %v10667_v62  ;;  %v10748_v61 = vld [vmem:[%s14719_s1 + $0x1540] ss:$16 sps:$4 sm:$0xff]   ;;  %v10751_v62 = vld [vmem:[%s14719_s1 + $0x1548] ss:$16 sps:$4 sm:$0xff]  }
 0x274   :  { %7067 = vmatprep.subr.bf16.mxu0 %v10672_v63  ;;  %7915 = vmatprep.subr.bf16.mxu1 %v10675_v0  ;;  %v10756_v63 = vld [vmem:[%s14719_s1 + $0x1564] ss:$16 sps:$4 sm:$0xff]   ;;  %v10759_v0 = vld [vmem:[%s14719_s1 + $0x156c] ss:$16 sps:$4 sm:$0xff]  }
 0x277   :  { %7068 = vmatpush1.bf16.msra.mxu0 %v10670_v3  ;;  %7916 = vmatpush1.bf16.msra.mxu1 %v10673_v4  ;;  %v10754_v3 = vld [vmem:[%s14719_s1 + $0x1560] ss:$16 sps:$4 sm:$0xff]   ;;  %v10757_v4 = vld [vmem:[%s14719_s1 + $0x1568] ss:$16 sps:$4 sm:$0xff]  }
 0x278   :  { %7069 = vmatprep.subr.bf16.mxu0 %v10678_v1  ;;  %7917 = vmatprep.subr.bf16.mxu1 %v10681_v2  ;;  %v10762_v1 = vld [vmem:[%s14719_s1 + $0x1584] ss:$16 sps:$4 sm:$0xff]   ;;  %v10765_v2 = vld [vmem:[%s14719_s1 + $0x158c] ss:$16 sps:$4 sm:$0xff]  }
 0x27b   :  { %7070 = vmatpush1.bf16.msra.mxu0 %v10676_v5  ;;  %7918 = vmatpush1.bf16.msra.mxu1 %v10679_v6  ;;  %v10760_v5 = vld [vmem:[%s14719_s1 + $0x1580] ss:$16 sps:$4 sm:$0xff]   ;;  %v10763_v6 = vld [vmem:[%s14719_s1 + $0x1588] ss:$16 sps:$4 sm:$0xff]  }
 0x27c   :  { %7071 = vmatprep.subr.bf16.mxu0 %v10684_v7  ;;  %7919 = vmatprep.subr.bf16.mxu1 %v10687_v8  ;;  %v10768_v7 = vld [vmem:[%s14719_s1 + $0x15a4] ss:$16 sps:$4 sm:$0xff]   ;;  %v10771_v8 = vld [vmem:[%s14719_s1 + $0x15ac] ss:$16 sps:$4 sm:$0xff]  }
 0x27f   :  { %7072 = vmatpush1.bf16.msra.mxu0 %v10682_v11  ;;  %7920 = vmatpush1.bf16.msra.mxu1 %v10685_v12  ;;  %v10766_v11 = vld [vmem:[%s14719_s1 + $0x15a0] ss:$16 sps:$4 sm:$0xff]   ;;  %v10769_v12 = vld [vmem:[%s14719_s1 + $0x15a8] ss:$16 sps:$4 sm:$0xff]  }
 0x280   :  { %7094 = vmatprep.subr.bf16.mxu0 %v10690_v9  ;;  %7942 = vmatprep.subr.bf16.mxu1 %v10693_v10  ;;  %v10774_v9 = vld [vmem:[%s14719_s1 + $0x15c4] ss:$16 sps:$4 sm:$0xff]   ;;  %v10777_v10 = vld [vmem:[%s14719_s1 + $0x15cc] ss:$16 sps:$4 sm:$0xff]  }
 0x282   :  { %7074 = vmatmul.mubr.bf16.vlgmr.msra.gmra.mrb[0].mxu0 %v8386_v13  ;;  %7922 = vmatmul.mubr.bf16.vlgmr.msra.gmra.mrb[0].mxu1 %v8386_v13  ;;  %v10772_v13 = vld [vmem:[%s14719_s1 + $0x15c0] ss:$16 sps:$4 sm:$0xff]  }
 0x283   :  { %7095 = vmatpush1.bf16.msra.mxu0 %v10688_v16  ;;  %7943 = vmatpush1.bf16.msra.mxu1 %v10691_v19  ;;  %v10783_v16 = vld [vmem:[%s14719_s1 + $0x15ec] ss:$16 sps:$4 sm:$0xff]   ;;  %v10778_v19 = vld [vmem:[%s14719_s1 + $0x15e0] ss:$16 sps:$4 sm:$0xff]  }
 0x284   :  { %7096 = vmatprep.subr.bf16.mxu0 %v10696_v17  ;;  %7944 = vmatprep.subr.bf16.mxu1 %v10699_v18  ;;  %v10781_v17 = vld [vmem:[%s14719_s1 + $0x15e8] ss:$16 sps:$4 sm:$0xff]   ;;  %v10786_v18 = vld [vmem:[%s14719_s1 + $0x1604] ss:$16 sps:$4 sm:$0xff]  }
 0x285   :  { %7083 = vmatprep.mubr.bf16.mxu0 %v8419_v20  ;;  %7931 = vmatprep.mubr.bf16.mxu1 %v8419_v20  ;;  %v10789_v20 = vld [vmem:[%s14719_s1 + $0x160c] ss:$16 sps:$4 sm:$0xff]  }
 0x287   :  { %7097 = vmatpush1.bf16.msra.mxu0 %v10694_v21  ;;  %7945 = vmatpush1.bf16.msra.mxu1 %v10697_v22  ;;  %v8388_v21 = vcombine.low %v13429_v25, %v13434_v27  ;;  %v56_v22 = vld [vmem:[%s14720_s0 + $0x150] sm:$0xff]  ;;  %v10795_v27 = vld [vmem:[%s14719_s1 + $0x162c] ss:$16 sps:$4 sm:$0xff]  }
 0x288   :  { %7098 = vmatprep.subr.bf16.mxu0 %v10702_v23  ;;  %7946 = vmatprep.subr.bf16.mxu1 %v10705_v24  ;;  %v72_v23 = vld [vmem:[%s14720_s0 + $0x1d0] sm:$0xff] }
 0x289   :  { %v10784_v24 = vld [vmem:[%s14719_s1 + $0x1600] ss:$16 sps:$4 sm:$0xff]   ;;  %v10792_v25 = vld [vmem:[%s14719_s1 + $0x1624] ss:$16 sps:$4 sm:$0xff]  }
 0x28a   :  { %7084 = vmatmul.mubr.bf16.gmra.mrb[4].mxu0 %v8418_v26  ;;  %7932 = vmatmul.mubr.bf16.gmra.mrb[4].mxu1 %v8418_v26  ;;  %v10787_v26 = vld [vmem:[%s14719_s1 + $0x1608] ss:$16 sps:$4 sm:$0xff]  }
 0x28b   :  { %7099 = vmatpush1.bf16.msra.mxu0 %v10700_v28  ;;  %7947 = vmatpush1.bf16.msra.mxu1 %v10703_v29  ;;  %v8421_v28 = vcombine.high %v56_v22, %v72_v23  ;;  %v10790_v29 = vld [vmem:[%s14719_s1 + $0x1620] ss:$16 sps:$4 sm:$0xff]  }
 0x28c   :  { %7100 = vmatprep.subr.bf16.mxu0 %v10708_v30  ;;  %7948 = vmatprep.subr.bf16.mxu1 %v10711_v31  ;;  %v10793_v30 = vld [vmem:[%s14719_s1 + $0x1628] ss:$16 sps:$4 sm:$0xff]   ;;  %v10798_v31 = vld [vmem:[%s14719_s1 + $0x1644] ss:$16 sps:$4 sm:$0xff]  }
 0x28d   :  { %7126 = vmatprep.mubr.bf16.mxu0 %v8389_v32  ;;  %7974 = vmatprep.mubr.bf16.mxu1 %v8389_v32  ;;  %v10801_v32 = vld [vmem:[%s14719_s1 + $0x164c] ss:$16 sps:$4 sm:$0xff]  }
 0x28f   :  { %7101 = vmatpush1.bf16.msra.mxu0 %v10706_v34  ;;  %7949 = vmatpush1.bf16.msra.mxu1 %v10709_v36  ;;  %v8420_v34 = vcombine.low %v56_v22, %v72_v23  ;;  %v13641_v36 = vld [vmem:[%s14720_s0 + $0x58] sm:$0xff]  ;;  %v10876_v23 = vld [vmem:[%s14719_s1 + $0x17e4] ss:$16 sps:$4 sm:$0xff]  }
 0x290   :  { %7102 = vmatprep.subr.bf16.mxu0 %v10714_v33  ;;  %7950 = vmatprep.subr.bf16.mxu1 %v10717_v35  ;;  %v13646_v33 = vld [vmem:[%s14720_s0 + $0xd8] sm:$0xff]  ;;  %v10796_v35 = vld [vmem:[%s14719_s1 + $0x1640] ss:$16 sps:$4 sm:$0xff]  }
 0x291   :  { %v10871_v22 = vld [vmem:[%s14719_s1 + $0x17c8] ss:$16 sps:$4 sm:$0xff]  }
 0x293   :  { %7103 = vmatpush1.bf16.msra.mxu0 %v10712_v37  ;;  %7951 = vmatpush1.bf16.msra.mxu1 %v10715_v38  ;;  %v10799_v37 = vld [vmem:[%s14719_s1 + $0x1648] ss:$16 sps:$4 sm:$0xff]   ;;  %v10804_v38 = vld [vmem:[%s14719_s1 + $0x1664] ss:$16 sps:$4 sm:$0xff]  }
 0x294   :  { %7104 = vmatprep.subr.bf16.mxu0 %v10720_v39  ;;  %7952 = vmatprep.subr.bf16.mxu1 %v10723_v40  ;;  %v10807_v39 = vld [vmem:[%s14719_s1 + $0x166c] ss:$16 sps:$4 sm:$0xff]   ;;  %v8391_v40 = vcombine.high %v13641_v36, %v13646_v33 }
 0x297   :  { %7105 = vmatpush1.bf16.msra.mxu0 %v10718_v42  ;;  %7953 = vmatpush1.bf16.msra.mxu1 %v10721_v44  ;;  %v10802_v42 = vld [vmem:[%s14719_s1 + $0x1660] ss:$16 sps:$4 sm:$0xff]   ;;  %v10805_v44 = vld [vmem:[%s14719_s1 + $0x1668] ss:$16 sps:$4 sm:$0xff]  }
 0x298   :  { %7106 = vmatprep.subr.bf16.mxu0 %v10726_v41  ;;  %7954 = vmatprep.subr.bf16.mxu1 %v10729_v43  ;;  %v10810_v41 = vld [vmem:[%s14719_s1 + $0x1684] ss:$16 sps:$4 sm:$0xff]   ;;  %v10813_v43 = vld [vmem:[%s14719_s1 + $0x168c] ss:$16 sps:$4 sm:$0xff]  }
 0x29b   :  { %7107 = vmatpush1.bf16.msra.mxu0 %v10724_v45  ;;  %7955 = vmatpush1.bf16.msra.mxu1 %v10727_v46  ;;  %v10808_v45 = vld [vmem:[%s14719_s1 + $0x1680] ss:$16 sps:$4 sm:$0xff]   ;;  %v10811_v46 = vld [vmem:[%s14719_s1 + $0x1688] ss:$16 sps:$4 sm:$0xff]  }
 0x29c   :  { %7108 = vmatprep.subr.bf16.mxu0 %v10732_v47  ;;  %7956 = vmatprep.subr.bf16.mxu1 %v10735_v48  ;;  %v10816_v47 = vld [vmem:[%s14719_s1 + $0x16a4] ss:$16 sps:$4 sm:$0xff]   ;;  %v10819_v48 = vld [vmem:[%s14719_s1 + $0x16ac] ss:$16 sps:$4 sm:$0xff]  }
 0x29f   :  { %7109 = vmatpush1.bf16.msra.mxu0 %v10730_v51  ;;  %7957 = vmatpush1.bf16.msra.mxu1 %v10733_v52  ;;  %v10814_v51 = vld [vmem:[%s14719_s1 + $0x16a0] ss:$16 sps:$4 sm:$0xff]   ;;  %v10817_v52 = vld [vmem:[%s14719_s1 + $0x16a8] ss:$16 sps:$4 sm:$0xff]  }
 0x2a0   :  { %7110 = vmatprep.subr.bf16.mxu0 %v10738_v49  ;;  %7958 = vmatprep.subr.bf16.mxu1 %v10741_v50  ;;  %v10822_v49 = vld [vmem:[%s14719_s1 + $0x16c4] ss:$16 sps:$4 sm:$0xff]   ;;  %v10825_v50 = vld [vmem:[%s14719_s1 + $0x16cc] ss:$16 sps:$4 sm:$0xff]  }
 0x2a3   :  { %7111 = vmatpush1.bf16.msra.mxu0 %v10736_v53  ;;  %7959 = vmatpush1.bf16.msra.mxu1 %v10739_v54  ;;  %v10820_v53 = vld [vmem:[%s14719_s1 + $0x16c0] ss:$16 sps:$4 sm:$0xff]   ;;  %v10823_v54 = vld [vmem:[%s14719_s1 + $0x16c8] ss:$16 sps:$4 sm:$0xff]  }
 0x2a4   :  { %7112 = vmatprep.subr.bf16.mxu0 %v10744_v55  ;;  %7960 = vmatprep.subr.bf16.mxu1 %v10747_v56  ;;  %v10828_v55 = vld [vmem:[%s14719_s1 + $0x16e4] ss:$16 sps:$4 sm:$0xff]   ;;  %v10831_v56 = vld [vmem:[%s14719_s1 + $0x16ec] ss:$16 sps:$4 sm:$0xff]  }
 0x2a7   :  { %7113 = vmatpush1.bf16.msra.mxu0 %v10742_v59  ;;  %7961 = vmatpush1.bf16.msra.mxu1 %v10745_v60  ;;  %v10826_v59 = vld [vmem:[%s14719_s1 + $0x16e0] ss:$16 sps:$4 sm:$0xff]   ;;  %v10829_v60 = vld [vmem:[%s14719_s1 + $0x16e8] ss:$16 sps:$4 sm:$0xff]  }
 0x2a8   :  { %7114 = vmatprep.subr.bf16.mxu0 %v10750_v57  ;;  %7962 = vmatprep.subr.bf16.mxu1 %v10753_v58  ;;  %v10834_v57 = vld [vmem:[%s14719_s1 + $0x1704] ss:$16 sps:$4 sm:$0xff]   ;;  %v10837_v58 = vld [vmem:[%s14719_s1 + $0x170c] ss:$16 sps:$4 sm:$0xff]  }
 0x2ab   :  { %7115 = vmatpush1.bf16.msra.mxu0 %v10748_v61  ;;  %7963 = vmatpush1.bf16.msra.mxu1 %v10751_v62  ;;  %v10832_v61 = vld [vmem:[%s14719_s1 + $0x1700] ss:$16 sps:$4 sm:$0xff]   ;;  %v10835_v62 = vld [vmem:[%s14719_s1 + $0x1708] ss:$16 sps:$4 sm:$0xff]  }
 0x2ac   :  { %7116 = vmatprep.subr.bf16.mxu0 %v10756_v63  ;;  %7964 = vmatprep.subr.bf16.mxu1 %v10759_v0  ;;  %v10840_v63 = vld [vmem:[%s14719_s1 + $0x1724] ss:$16 sps:$4 sm:$0xff]   ;;  %v10843_v0 = vld [vmem:[%s14719_s1 + $0x172c] ss:$16 sps:$4 sm:$0xff]  }
 0x2af   :  { %7117 = vmatpush1.bf16.msra.mxu0 %v10754_v3  ;;  %7965 = vmatpush1.bf16.msra.mxu1 %v10757_v4  ;;  %v10838_v3 = vld [vmem:[%s14719_s1 + $0x1720] ss:$16 sps:$4 sm:$0xff]   ;;  %v10841_v4 = vld [vmem:[%s14719_s1 + $0x1728] ss:$16 sps:$4 sm:$0xff]  }
 0x2b0   :  { %7118 = vmatprep.subr.bf16.mxu0 %v10762_v1  ;;  %7966 = vmatprep.subr.bf16.mxu1 %v10765_v2  ;;  %v10846_v1 = vld [vmem:[%s14719_s1 + $0x1744] ss:$16 sps:$4 sm:$0xff]   ;;  %v10849_v2 = vld [vmem:[%s14719_s1 + $0x174c] ss:$16 sps:$4 sm:$0xff]  }
 0x2b3   :  { %7119 = vmatpush1.bf16.msra.mxu0 %v10760_v5  ;;  %7967 = vmatpush1.bf16.msra.mxu1 %v10763_v6  ;;  %v10844_v5 = vld [vmem:[%s14719_s1 + $0x1740] ss:$16 sps:$4 sm:$0xff]   ;;  %v10847_v6 = vld [vmem:[%s14719_s1 + $0x1748] ss:$16 sps:$4 sm:$0xff]  }
 0x2b4   :  { %7120 = vmatprep.subr.bf16.mxu0 %v10768_v7  ;;  %7968 = vmatprep.subr.bf16.mxu1 %v10771_v8  ;;  %v10852_v7 = vld [vmem:[%s14719_s1 + $0x1764] ss:$16 sps:$4 sm:$0xff]   ;;  %v10855_v8 = vld [vmem:[%s14719_s1 + $0x176c] ss:$16 sps:$4 sm:$0xff]  }
 0x2b7   :  { %7121 = vmatpush1.bf16.msra.mxu0 %v10766_v11  ;;  %7969 = vmatpush1.bf16.msra.mxu1 %v10769_v12  ;;  %v10850_v11 = vld [vmem:[%s14719_s1 + $0x1760] ss:$16 sps:$4 sm:$0xff]   ;;  %v10853_v12 = vld [vmem:[%s14719_s1 + $0x1768] ss:$16 sps:$4 sm:$0xff]  }
 0x2b8   :  { %7122 = vmatprep.subr.bf16.mxu0 %v10774_v9  ;;  %7970 = vmatprep.subr.bf16.mxu1 %v10777_v10  ;;  %v10858_v9 = vld [vmem:[%s14719_s1 + $0x1784] ss:$16 sps:$4 sm:$0xff]   ;;  %v10861_v10 = vld [vmem:[%s14719_s1 + $0x178c] ss:$16 sps:$4 sm:$0xff]  }
 0x2bb   :  { %7123 = vmatpush1.bf16.msra.mxu0 %v10772_v13  ;;  %7971 = vmatpush1.bf16.msra.mxu1 %v10775_v14  ;;  %v10856_v13 = vld [vmem:[%s14719_s1 + $0x1780] ss:$16 sps:$4 sm:$0xff]   ;;  %v10859_v14 = vld [vmem:[%s14719_s1 + $0x1788] ss:$16 sps:$4 sm:$0xff]  }
 0x2bc   :  { %7124 = vmatprep.subr.bf16.mxu0 %v10780_v15  ;;  %7972 = vmatprep.subr.bf16.mxu1 %v10783_v16  ;;  %v10864_v15 = vld [vmem:[%s14719_s1 + $0x17a4] ss:$16 sps:$4 sm:$0xff]   ;;  %v10867_v16 = vld [vmem:[%s14719_s1 + $0x17ac] ss:$16 sps:$4 sm:$0xff]  }
 0x2bf   :  { %7125 = vmatpush1.bf16.msra.mxu0 %v10778_v19  ;;  %7973 = vmatpush1.bf16.msra.mxu1 %v10781_v17  ;;  %v10862_v19 = vld [vmem:[%s14719_s1 + $0x17a0] ss:$16 sps:$4 sm:$0xff]   ;;  %v10865_v17 = vld [vmem:[%s14719_s1 + $0x17a8] ss:$16 sps:$4 sm:$0xff]  }
 0x2c0   :  { %7147 = vmatprep.subr.bf16.mxu0 %v10786_v18  ;;  %7995 = vmatprep.subr.bf16.mxu1 %v10789_v20  ;;  %v10870_v18 = vld [vmem:[%s14719_s1 + $0x17c4] ss:$16 sps:$4 sm:$0xff]   ;;  %v10873_v20 = vld [vmem:[%s14719_s1 + $0x17cc] ss:$16 sps:$4 sm:$0xff]  }
 0x2c2   :  { %7127 = vmatmul.mubr.bf16.vlgmr.msra.gmra.mrb[0].mxu0 %v8388_v21  ;;  %7975 = vmatmul.mubr.bf16.vlgmr.msra.gmra.mrb[0].mxu1 %v8388_v21  ;;  %v10868_v21 = vld [vmem:[%s14719_s1 + $0x17c0] ss:$16 sps:$4 sm:$0xff]  }
 0x2c3   :  { %7148 = vmatpush1.bf16.msra.mxu0 %v10784_v24  ;;  %7996 = vmatpush1.bf16.msra.mxu1 %v10787_v26  ;;  %v10879_v24 = vld [vmem:[%s14719_s1 + $0x17ec] ss:$16 sps:$4 sm:$0xff]   ;;  %v10874_v26 = vld [vmem:[%s14719_s1 + $0x17e0] ss:$16 sps:$4 sm:$0xff]  }
 0x2c4   :  { %7149 = vmatprep.subr.bf16.mxu0 %v10792_v25  ;;  %7997 = vmatprep.subr.bf16.mxu1 %v10795_v27  ;;  %v10877_v25 = vld [vmem:[%s14719_s1 + $0x17e8] ss:$16 sps:$4 sm:$0xff]   ;;  %v10882_v27 = vld [vmem:[%s14719_s1 + $0x1804] ss:$16 sps:$4 sm:$0xff]  }
 0x2c5   :  { %7136 = vmatprep.mubr.bf16.mxu0 %v8421_v28  ;;  %7984 = vmatprep.mubr.bf16.mxu1 %v8421_v28  ;;  %v10885_v28 = vld [vmem:[%s14719_s1 + $0x180c] ss:$16 sps:$4 sm:$0xff]  }
 0x2c7   :  { %7150 = vmatpush1.bf16.msra.mxu0 %v10790_v29  ;;  %7998 = vmatpush1.bf16.msra.mxu1 %v10793_v30  ;;  %v8390_v29 = vcombine.low %v13641_v36, %v13646_v33  ;;  %v57_v30 = vld [vmem:[%s14720_s0 + $0x158] sm:$0xff]  ;;  %v10888_v36 = vld [vmem:[%s14719_s1 + $0x1824] ss:$16 sps:$4 sm:$0xff]  }
 0x2c8   :  { %7151 = vmatprep.subr.bf16.mxu0 %v10798_v31  ;;  %7999 = vmatprep.subr.bf16.mxu1 %v10801_v32  ;;  %v73_v31 = vld [vmem:[%s14720_s0 + $0x1d8] sm:$0xff]  ;;  %v10880_v32 = vld [vmem:[%s14719_s1 + $0x1800] ss:$16 sps:$4 sm:$0xff]  }
 0x2c9   :  { %v10891_v33 = vld [vmem:[%s14719_s1 + $0x182c] ss:$16 sps:$4 sm:$0xff]  }
 0x2ca   :  { %7137 = vmatmul.mubr.bf16.gmra.mrb[4].mxu0 %v8420_v34  ;;  %7985 = vmatmul.mubr.bf16.gmra.mrb[4].mxu1 %v8420_v34  ;;  %v10883_v34 = vld [vmem:[%s14719_s1 + $0x1808] ss:$16 sps:$4 sm:$0xff]  }
 0x2cb   :  { %7152 = vmatpush1.bf16.msra.mxu0 %v10796_v35  ;;  %8000 = vmatpush1.bf16.msra.mxu1 %v10799_v37  ;;  %v8423_v35 = vcombine.high %v57_v30, %v73_v31  ;;  %v10886_v37 = vld [vmem:[%s14719_s1 + $0x1820] ss:$16 sps:$4 sm:$0xff]  }
 0x2cc   :  { %7153 = vmatprep.subr.bf16.mxu0 %v10804_v38  ;;  %8001 = vmatprep.subr.bf16.mxu1 %v10807_v39  ;;  %v10889_v38 = vld [vmem:[%s14719_s1 + $0x1828] ss:$16 sps:$4 sm:$0xff]   ;;  %v10894_v39 = vld [vmem:[%s14719_s1 + $0x1844] ss:$16 sps:$4 sm:$0xff]  }
 0x2cd   :  { %7179 = vmatprep.mubr.bf16.mxu0 %v8391_v40  ;;  %8027 = vmatprep.mubr.bf16.mxu1 %v8391_v40  ;;  %v10897_v40 = vld [vmem:[%s14719_s1 + $0x184c] ss:$16 sps:$4 sm:$0xff]  }
 0x2cf   :  { %7154 = vmatpush1.bf16.msra.mxu0 %v10802_v42  ;;  %8002 = vmatpush1.bf16.msra.mxu1 %v10805_v44  ;;  %v8422_v42 = vcombine.low %v57_v30, %v73_v31  ;;  %v13853_v44 = vld [vmem:[%s14720_s0 + $0x60] sm:$0xff]  ;;  %v10967_v30 = vld [vmem:[%s14719_s1 + $0x19c8] ss:$16 sps:$4 sm:$0xff]  }
 0x2d0   :  { %7155 = vmatprep.subr.bf16.mxu0 %v10810_v41  ;;  %8003 = vmatprep.subr.bf16.mxu1 %v10813_v43  ;;  %v13858_v41 = vld [vmem:[%s14720_s0 + $0xe0] sm:$0xff] }
 0x2d1   :  { %v10892_v43 = vld [vmem:[%s14719_s1 + $0x1840] ss:$16 sps:$4 sm:$0xff]   ;;  %v10972_v31 = vld [vmem:[%s14719_s1 + $0x19e4] ss:$16 sps:$4 sm:$0xff]  }
 0x2d3   :  { %7156 = vmatpush1.bf16.msra.mxu0 %v10808_v45  ;;  %8004 = vmatpush1.bf16.msra.mxu1 %v10811_v46  ;;  %v10895_v45 = vld [vmem:[%s14719_s1 + $0x1848] ss:$16 sps:$4 sm:$0xff]   ;;  %v10900_v46 = vld [vmem:[%s14719_s1 + $0x1864] ss:$16 sps:$4 sm:$0xff]  }
 0x2d4   :  { %7157 = vmatprep.subr.bf16.mxu0 %v10816_v47  ;;  %8005 = vmatprep.subr.bf16.mxu1 %v10819_v48  ;;  %v10903_v47 = vld [vmem:[%s14719_s1 + $0x186c] ss:$16 sps:$4 sm:$0xff]   ;;  %v8393_v48 = vcombine.high %v13853_v44, %v13858_v41 }
 0x2d7   :  { %7158 = vmatpush1.bf16.msra.mxu0 %v10814_v51  ;;  %8006 = vmatpush1.bf16.msra.mxu1 %v10817_v52  ;;  %v10898_v51 = vld [vmem:[%s14719_s1 + $0x1860] ss:$16 sps:$4 sm:$0xff]   ;;  %v10901_v52 = vld [vmem:[%s14719_s1 + $0x1868] ss:$16 sps:$4 sm:$0xff]  }
 0x2d8   :  { %7159 = vmatprep.subr.bf16.mxu0 %v10822_v49  ;;  %8007 = vmatprep.subr.bf16.mxu1 %v10825_v50  ;;  %v10906_v49 = vld [vmem:[%s14719_s1 + $0x1884] ss:$16 sps:$4 sm:$0xff]   ;;  %v10909_v50 = vld [vmem:[%s14719_s1 + $0x188c] ss:$16 sps:$4 sm:$0xff]  }
 0x2db   :  { %7160 = vmatpush1.bf16.msra.mxu0 %v10820_v53  ;;  %8008 = vmatpush1.bf16.msra.mxu1 %v10823_v54  ;;  %v10904_v53 = vld [vmem:[%s14719_s1 + $0x1880] ss:$16 sps:$4 sm:$0xff]   ;;  %v10907_v54 = vld [vmem:[%s14719_s1 + $0x1888] ss:$16 sps:$4 sm:$0xff]  }
 0x2dc   :  { %7161 = vmatprep.subr.bf16.mxu0 %v10828_v55  ;;  %8009 = vmatprep.subr.bf16.mxu1 %v10831_v56  ;;  %v10912_v55 = vld [vmem:[%s14719_s1 + $0x18a4] ss:$16 sps:$4 sm:$0xff]   ;;  %v10915_v56 = vld [vmem:[%s14719_s1 + $0x18ac] ss:$16 sps:$4 sm:$0xff]  }
 0x2df   :  { %7162 = vmatpush1.bf16.msra.mxu0 %v10826_v59  ;;  %8010 = vmatpush1.bf16.msra.mxu1 %v10829_v60  ;;  %v10910_v59 = vld [vmem:[%s14719_s1 + $0x18a0] ss:$16 sps:$4 sm:$0xff]   ;;  %v10913_v60 = vld [vmem:[%s14719_s1 + $0x18a8] ss:$16 sps:$4 sm:$0xff]  }
 0x2e0   :  { %7163 = vmatprep.subr.bf16.mxu0 %v10834_v57  ;;  %8011 = vmatprep.subr.bf16.mxu1 %v10837_v58  ;;  %v10918_v57 = vld [vmem:[%s14719_s1 + $0x18c4] ss:$16 sps:$4 sm:$0xff]   ;;  %v10921_v58 = vld [vmem:[%s14719_s1 + $0x18cc] ss:$16 sps:$4 sm:$0xff]  }
 0x2e3   :  { %7164 = vmatpush1.bf16.msra.mxu0 %v10832_v61  ;;  %8012 = vmatpush1.bf16.msra.mxu1 %v10835_v62  ;;  %v10916_v61 = vld [vmem:[%s14719_s1 + $0x18c0] ss:$16 sps:$4 sm:$0xff]   ;;  %v10919_v62 = vld [vmem:[%s14719_s1 + $0x18c8] ss:$16 sps:$4 sm:$0xff]  }
 0x2e4   :  { %7165 = vmatprep.subr.bf16.mxu0 %v10840_v63  ;;  %8013 = vmatprep.subr.bf16.mxu1 %v10843_v0  ;;  %v10924_v63 = vld [vmem:[%s14719_s1 + $0x18e4] ss:$16 sps:$4 sm:$0xff]   ;;  %v10927_v0 = vld [vmem:[%s14719_s1 + $0x18ec] ss:$16 sps:$4 sm:$0xff]  }
 0x2e7   :  { %7166 = vmatpush1.bf16.msra.mxu0 %v10838_v3  ;;  %8014 = vmatpush1.bf16.msra.mxu1 %v10841_v4  ;;  %v10922_v3 = vld [vmem:[%s14719_s1 + $0x18e0] ss:$16 sps:$4 sm:$0xff]   ;;  %v10925_v4 = vld [vmem:[%s14719_s1 + $0x18e8] ss:$16 sps:$4 sm:$0xff]  }
 0x2e8   :  { %7167 = vmatprep.subr.bf16.mxu0 %v10846_v1  ;;  %8015 = vmatprep.subr.bf16.mxu1 %v10849_v2  ;;  %v10930_v1 = vld [vmem:[%s14719_s1 + $0x1904] ss:$16 sps:$4 sm:$0xff]   ;;  %v10933_v2 = vld [vmem:[%s14719_s1 + $0x190c] ss:$16 sps:$4 sm:$0xff]  }
 0x2eb   :  { %7168 = vmatpush1.bf16.msra.mxu0 %v10844_v5  ;;  %8016 = vmatpush1.bf16.msra.mxu1 %v10847_v6  ;;  %v10928_v5 = vld [vmem:[%s14719_s1 + $0x1900] ss:$16 sps:$4 sm:$0xff]   ;;  %v10931_v6 = vld [vmem:[%s14719_s1 + $0x1908] ss:$16 sps:$4 sm:$0xff]  }
 0x2ec   :  { %7169 = vmatprep.subr.bf16.mxu0 %v10852_v7  ;;  %8017 = vmatprep.subr.bf16.mxu1 %v10855_v8  ;;  %v10936_v7 = vld [vmem:[%s14719_s1 + $0x1924] ss:$16 sps:$4 sm:$0xff]   ;;  %v10939_v8 = vld [vmem:[%s14719_s1 + $0x192c] ss:$16 sps:$4 sm:$0xff]  }
 0x2ef   :  { %7170 = vmatpush1.bf16.msra.mxu0 %v10850_v11  ;;  %8018 = vmatpush1.bf16.msra.mxu1 %v10853_v12  ;;  %v10934_v11 = vld [vmem:[%s14719_s1 + $0x1920] ss:$16 sps:$4 sm:$0xff]   ;;  %v10937_v12 = vld [vmem:[%s14719_s1 + $0x1928] ss:$16 sps:$4 sm:$0xff]  }
 0x2f0   :  { %7171 = vmatprep.subr.bf16.mxu0 %v10858_v9  ;;  %8019 = vmatprep.subr.bf16.mxu1 %v10861_v10  ;;  %v10942_v9 = vld [vmem:[%s14719_s1 + $0x1944] ss:$16 sps:$4 sm:$0xff]   ;;  %v10945_v10 = vld [vmem:[%s14719_s1 + $0x194c] ss:$16 sps:$4 sm:$0xff]  }
 0x2f3   :  { %7172 = vmatpush1.bf16.msra.mxu0 %v10856_v13  ;;  %8020 = vmatpush1.bf16.msra.mxu1 %v10859_v14  ;;  %v10940_v13 = vld [vmem:[%s14719_s1 + $0x1940] ss:$16 sps:$4 sm:$0xff]   ;;  %v10943_v14 = vld [vmem:[%s14719_s1 + $0x1948] ss:$16 sps:$4 sm:$0xff]  }
 0x2f4   :  { %7173 = vmatprep.subr.bf16.mxu0 %v10864_v15  ;;  %8021 = vmatprep.subr.bf16.mxu1 %v10867_v16  ;;  %v10948_v15 = vld [vmem:[%s14719_s1 + $0x1964] ss:$16 sps:$4 sm:$0xff]   ;;  %v10951_v16 = vld [vmem:[%s14719_s1 + $0x196c] ss:$16 sps:$4 sm:$0xff]  }
 0x2f7   :  { %7174 = vmatpush1.bf16.msra.mxu0 %v10862_v19  ;;  %8022 = vmatpush1.bf16.msra.mxu1 %v10865_v17  ;;  %v10946_v19 = vld [vmem:[%s14719_s1 + $0x1960] ss:$16 sps:$4 sm:$0xff]   ;;  %v10949_v17 = vld [vmem:[%s14719_s1 + $0x1968] ss:$16 sps:$4 sm:$0xff]  }
 0x2f8   :  { %7175 = vmatprep.subr.bf16.mxu0 %v10870_v18  ;;  %8023 = vmatprep.subr.bf16.mxu1 %v10873_v20  ;;  %v10954_v18 = vld [vmem:[%s14719_s1 + $0x1984] ss:$16 sps:$4 sm:$0xff]   ;;  %v10957_v20 = vld [vmem:[%s14719_s1 + $0x198c] ss:$16 sps:$4 sm:$0xff]  }
 0x2fb   :  { %7176 = vmatpush1.bf16.msra.mxu0 %v10868_v21  ;;  %8024 = vmatpush1.bf16.msra.mxu1 %v10871_v22  ;;  %v10952_v21 = vld [vmem:[%s14719_s1 + $0x1980] ss:$16 sps:$4 sm:$0xff]   ;;  %v10955_v22 = vld [vmem:[%s14719_s1 + $0x1988] ss:$16 sps:$4 sm:$0xff]  }
 0x2fc   :  { %7177 = vmatprep.subr.bf16.mxu0 %v10876_v23  ;;  %8025 = vmatprep.subr.bf16.mxu1 %v10879_v24  ;;  %v10960_v23 = vld [vmem:[%s14719_s1 + $0x19a4] ss:$16 sps:$4 sm:$0xff]   ;;  %v10963_v24 = vld [vmem:[%s14719_s1 + $0x19ac] ss:$16 sps:$4 sm:$0xff]  }
 0x2ff   :  { %7178 = vmatpush1.bf16.msra.mxu0 %v10874_v26  ;;  %8026 = vmatpush1.bf16.msra.mxu1 %v10877_v25  ;;  %v10958_v26 = vld [vmem:[%s14719_s1 + $0x19a0] ss:$16 sps:$4 sm:$0xff]   ;;  %v10961_v25 = vld [vmem:[%s14719_s1 + $0x19a8] ss:$16 sps:$4 sm:$0xff]  }
 0x300   :  { %7200 = vmatprep.subr.bf16.mxu0 %v10882_v27  ;;  %8048 = vmatprep.subr.bf16.mxu1 %v10885_v28  ;;  %v10966_v27 = vld [vmem:[%s14719_s1 + $0x19c4] ss:$16 sps:$4 sm:$0xff]   ;;  %v10969_v28 = vld [vmem:[%s14719_s1 + $0x19cc] ss:$16 sps:$4 sm:$0xff]  }
 0x302   :  { %7180 = vmatmul.mubr.bf16.vlgmr.msra.gmra.mrb[0].mxu0 %v8390_v29  ;;  %8028 = vmatmul.mubr.bf16.vlgmr.msra.gmra.mrb[0].mxu1 %v8390_v29  ;;  %v10964_v29 = vld [vmem:[%s14719_s1 + $0x19c0] ss:$16 sps:$4 sm:$0xff]  }
 0x303   :  { %7201 = vmatpush1.bf16.msra.mxu0 %v10880_v32  ;;  %8049 = vmatpush1.bf16.msra.mxu1 %v10883_v34  ;;  %v10975_v32 = vld [vmem:[%s14719_s1 + $0x19ec] ss:$16 sps:$4 sm:$0xff]   ;;  %v10970_v34 = vld [vmem:[%s14719_s1 + $0x19e0] ss:$16 sps:$4 sm:$0xff]  }
 0x304   :  { %7202 = vmatprep.subr.bf16.mxu0 %v10888_v36  ;;  %8050 = vmatprep.subr.bf16.mxu1 %v10891_v33  ;;  %v10973_v36 = vld [vmem:[%s14719_s1 + $0x19e8] ss:$16 sps:$4 sm:$0xff]   ;;  %v10978_v33 = vld [vmem:[%s14719_s1 + $0x1a04] ss:$16 sps:$4 sm:$0xff]  }
 0x305   :  { %7189 = vmatprep.mubr.bf16.mxu0 %v8423_v35  ;;  %8037 = vmatprep.mubr.bf16.mxu1 %v8423_v35  ;;  %v10981_v35 = vld [vmem:[%s14719_s1 + $0x1a0c] ss:$16 sps:$4 sm:$0xff]  }
 0x307   :  { %7203 = vmatpush1.bf16.msra.mxu0 %v10886_v37  ;;  %8051 = vmatpush1.bf16.msra.mxu1 %v10889_v38  ;;  %v8392_v37 = vcombine.low %v13853_v44, %v13858_v41  ;;  %v58_v38 = vld [vmem:[%s14720_s0 + $0x160] sm:$0xff]  ;;  %v10987_v41 = vld [vmem:[%s14719_s1 + $0x1a2c] ss:$16 sps:$4 sm:$0xff]  }
 0x308   :  { %7204 = vmatprep.subr.bf16.mxu0 %v10894_v39  ;;  %8052 = vmatprep.subr.bf16.mxu1 %v10897_v40  ;;  %v74_v39 = vld [vmem:[%s14720_s0 + $0x1e0] sm:$0xff] }
 0x309   :  { %v10976_v40 = vld [vmem:[%s14719_s1 + $0x1a00] ss:$16 sps:$4 sm:$0xff]   ;;  %v10984_v44 = vld [vmem:[%s14719_s1 + $0x1a24] ss:$16 sps:$4 sm:$0xff]  }
 0x30a   :  { %7190 = vmatmul.mubr.bf16.gmra.mrb[4].mxu0 %v8422_v42  ;;  %8038 = vmatmul.mubr.bf16.gmra.mrb[4].mxu1 %v8422_v42  ;;  %v10979_v42 = vld [vmem:[%s14719_s1 + $0x1a08] ss:$16 sps:$4 sm:$0xff]  }
 0x30b   :  { %7205 = vmatpush1.bf16.msra.mxu0 %v10892_v43  ;;  %8053 = vmatpush1.bf16.msra.mxu1 %v10895_v45  ;;  %v8425_v43 = vcombine.high %v58_v38, %v74_v39  ;;  %v10982_v45 = vld [vmem:[%s14719_s1 + $0x1a20] ss:$16 sps:$4 sm:$0xff]  }
 0x30c   :  { %7206 = vmatprep.subr.bf16.mxu0 %v10900_v46  ;;  %8054 = vmatprep.subr.bf16.mxu1 %v10903_v47  ;;  %v10985_v46 = vld [vmem:[%s14719_s1 + $0x1a28] ss:$16 sps:$4 sm:$0xff]   ;;  %v10990_v47 = vld [vmem:[%s14719_s1 + $0x1a44] ss:$16 sps:$4 sm:$0xff]  }
 0x30d   :  { %7232 = vmatprep.mubr.bf16.mxu0 %v8393_v48  ;;  %8080 = vmatprep.mubr.bf16.mxu1 %v8393_v48  ;;  %v10993_v48 = vld [vmem:[%s14719_s1 + $0x1a4c] ss:$16 sps:$4 sm:$0xff]  }
 0x30f   :  { %7207 = vmatpush1.bf16.msra.mxu0 %v10898_v51  ;;  %8055 = vmatpush1.bf16.msra.mxu1 %v10901_v52  ;;  %v8424_v51 = vcombine.low %v58_v38, %v74_v39  ;;  %v14065_v52 = vld [vmem:[%s14720_s0 + $0x68] sm:$0xff]  ;;  %v11068_v39 = vld [vmem:[%s14719_s1 + $0x1be4] ss:$16 sps:$4 sm:$0xff]  }
 0x310   :  { %7208 = vmatprep.subr.bf16.mxu0 %v10906_v49  ;;  %8056 = vmatprep.subr.bf16.mxu1 %v10909_v50  ;;  %v14070_v49 = vld [vmem:[%s14720_s0 + $0xe8] sm:$0xff]  ;;  %v10988_v50 = vld [vmem:[%s14719_s1 + $0x1a40] ss:$16 sps:$4 sm:$0xff]  }
 0x311   :  { %v11063_v38 = vld [vmem:[%s14719_s1 + $0x1bc8] ss:$16 sps:$4 sm:$0xff]  }
 0x313   :  { %7209 = vmatpush1.bf16.msra.mxu0 %v10904_v53  ;;  %8057 = vmatpush1.bf16.msra.mxu1 %v10907_v54  ;;  %v10991_v53 = vld [vmem:[%s14719_s1 + $0x1a48] ss:$16 sps:$4 sm:$0xff]   ;;  %v10996_v54 = vld [vmem:[%s14719_s1 + $0x1a64] ss:$16 sps:$4 sm:$0xff]  }
 0x314   :  { %7210 = vmatprep.subr.bf16.mxu0 %v10912_v55  ;;  %8058 = vmatprep.subr.bf16.mxu1 %v10915_v56  ;;  %v10999_v55 = vld [vmem:[%s14719_s1 + $0x1a6c] ss:$16 sps:$4 sm:$0xff]   ;;  %v8395_v56 = vcombine.high %v14065_v52, %v14070_v49 }
 0x317   :  { %7211 = vmatpush1.bf16.msra.mxu0 %v10910_v59  ;;  %8059 = vmatpush1.bf16.msra.mxu1 %v10913_v60  ;;  %v10994_v59 = vld [vmem:[%s14719_s1 + $0x1a60] ss:$16 sps:$4 sm:$0xff]   ;;  %v10997_v60 = vld [vmem:[%s14719_s1 + $0x1a68] ss:$16 sps:$4 sm:$0xff]  }
 0x318   :  { %7212 = vmatprep.subr.bf16.mxu0 %v10918_v57  ;;  %8060 = vmatprep.subr.bf16.mxu1 %v10921_v58  ;;  %v11002_v57 = vld [vmem:[%s14719_s1 + $0x1a84] ss:$16 sps:$4 sm:$0xff]   ;;  %v11005_v58 = vld [vmem:[%s14719_s1 + $0x1a8c] ss:$16 sps:$4 sm:$0xff]  }
 0x31b   :  { %7213 = vmatpush1.bf16.msra.mxu0 %v10916_v61  ;;  %8061 = vmatpush1.bf16.msra.mxu1 %v10919_v62  ;;  %v11000_v61 = vld [vmem:[%s14719_s1 + $0x1a80] ss:$16 sps:$4 sm:$0xff]   ;;  %v11003_v62 = vld [vmem:[%s14719_s1 + $0x1a88] ss:$16 sps:$4 sm:$0xff]  }
 0x31c   :  { %7214 = vmatprep.subr.bf16.mxu0 %v10924_v63  ;;  %8062 = vmatprep.subr.bf16.mxu1 %v10927_v0  ;;  %v11008_v63 = vld [vmem:[%s14719_s1 + $0x1aa4] ss:$16 sps:$4 sm:$0xff]   ;;  %v11011_v0 = vld [vmem:[%s14719_s1 + $0x1aac] ss:$16 sps:$4 sm:$0xff]  }
 0x31f   :  { %7215 = vmatpush1.bf16.msra.mxu0 %v10922_v3  ;;  %8063 = vmatpush1.bf16.msra.mxu1 %v10925_v4  ;;  %v11006_v3 = vld [vmem:[%s14719_s1 + $0x1aa0] ss:$16 sps:$4 sm:$0xff]   ;;  %v11009_v4 = vld [vmem:[%s14719_s1 + $0x1aa8] ss:$16 sps:$4 sm:$0xff]  }
 0x320   :  { %7216 = vmatprep.subr.bf16.mxu0 %v10930_v1  ;;  %8064 = vmatprep.subr.bf16.mxu1 %v10933_v2  ;;  %v11014_v1 = vld [vmem:[%s14719_s1 + $0x1ac4] ss:$16 sps:$4 sm:$0xff]   ;;  %v11017_v2 = vld [vmem:[%s14719_s1 + $0x1acc] ss:$16 sps:$4 sm:$0xff]  }
 0x323   :  { %7217 = vmatpush1.bf16.msra.mxu0 %v10928_v5  ;;  %8065 = vmatpush1.bf16.msra.mxu1 %v10931_v6  ;;  %v11012_v5 = vld [vmem:[%s14719_s1 + $0x1ac0] ss:$16 sps:$4 sm:$0xff]   ;;  %v11015_v6 = vld [vmem:[%s14719_s1 + $0x1ac8] ss:$16 sps:$4 sm:$0xff]  }
 0x324   :  { %7218 = vmatprep.subr.bf16.mxu0 %v10936_v7  ;;  %8066 = vmatprep.subr.bf16.mxu1 %v10939_v8  ;;  %v11020_v7 = vld [vmem:[%s14719_s1 + $0x1ae4] ss:$16 sps:$4 sm:$0xff]   ;;  %v11023_v8 = vld [vmem:[%s14719_s1 + $0x1aec] ss:$16 sps:$4 sm:$0xff]  }
 0x327   :  { %7219 = vmatpush1.bf16.msra.mxu0 %v10934_v11  ;;  %8067 = vmatpush1.bf16.msra.mxu1 %v10937_v12  ;;  %v11018_v11 = vld [vmem:[%s14719_s1 + $0x1ae0] ss:$16 sps:$4 sm:$0xff]   ;;  %v11021_v12 = vld [vmem:[%s14719_s1 + $0x1ae8] ss:$16 sps:$4 sm:$0xff]  }
 0x328   :  { %7220 = vmatprep.subr.bf16.mxu0 %v10942_v9  ;;  %8068 = vmatprep.subr.bf16.mxu1 %v10945_v10  ;;  %v11026_v9 = vld [vmem:[%s14719_s1 + $0x1b04] ss:$16 sps:$4 sm:$0xff]   ;;  %v11029_v10 = vld [vmem:[%s14719_s1 + $0x1b0c] ss:$16 sps:$4 sm:$0xff]  }
 0x32b   :  { %7221 = vmatpush1.bf16.msra.mxu0 %v10940_v13  ;;  %8069 = vmatpush1.bf16.msra.mxu1 %v10943_v14  ;;  %v11024_v13 = vld [vmem:[%s14719_s1 + $0x1b00] ss:$16 sps:$4 sm:$0xff]   ;;  %v11027_v14 = vld [vmem:[%s14719_s1 + $0x1b08] ss:$16 sps:$4 sm:$0xff]  }
 0x32c   :  { %7222 = vmatprep.subr.bf16.mxu0 %v10948_v15  ;;  %8070 = vmatprep.subr.bf16.mxu1 %v10951_v16  ;;  %v11032_v15 = vld [vmem:[%s14719_s1 + $0x1b24] ss:$16 sps:$4 sm:$0xff]   ;;  %v11035_v16 = vld [vmem:[%s14719_s1 + $0x1b2c] ss:$16 sps:$4 sm:$0xff]  }
 0x32f   :  { %7223 = vmatpush1.bf16.msra.mxu0 %v10946_v19  ;;  %8071 = vmatpush1.bf16.msra.mxu1 %v10949_v17  ;;  %v11030_v19 = vld [vmem:[%s14719_s1 + $0x1b20] ss:$16 sps:$4 sm:$0xff]   ;;  %v11033_v17 = vld [vmem:[%s14719_s1 + $0x1b28] ss:$16 sps:$4 sm:$0xff]  }
 0x330   :  { %7224 = vmatprep.subr.bf16.mxu0 %v10954_v18  ;;  %8072 = vmatprep.subr.bf16.mxu1 %v10957_v20  ;;  %v11038_v18 = vld [vmem:[%s14719_s1 + $0x1b44] ss:$16 sps:$4 sm:$0xff]   ;;  %v11041_v20 = vld [vmem:[%s14719_s1 + $0x1b4c] ss:$16 sps:$4 sm:$0xff]  }
 0x333   :  { %7225 = vmatpush1.bf16.msra.mxu0 %v10952_v21  ;;  %8073 = vmatpush1.bf16.msra.mxu1 %v10955_v22  ;;  %v11036_v21 = vld [vmem:[%s14719_s1 + $0x1b40] ss:$16 sps:$4 sm:$0xff]   ;;  %v11039_v22 = vld [vmem:[%s14719_s1 + $0x1b48] ss:$16 sps:$4 sm:$0xff]  }
 0x334   :  { %7226 = vmatprep.subr.bf16.mxu0 %v10960_v23  ;;  %8074 = vmatprep.subr.bf16.mxu1 %v10963_v24  ;;  %v11044_v23 = vld [vmem:[%s14719_s1 + $0x1b64] ss:$16 sps:$4 sm:$0xff]   ;;  %v11047_v24 = vld [vmem:[%s14719_s1 + $0x1b6c] ss:$16 sps:$4 sm:$0xff]  }
 0x337   :  { %7227 = vmatpush1.bf16.msra.mxu0 %v10958_v26  ;;  %8075 = vmatpush1.bf16.msra.mxu1 %v10961_v25  ;;  %v11042_v26 = vld [vmem:[%s14719_s1 + $0x1b60] ss:$16 sps:$4 sm:$0xff]   ;;  %v11045_v25 = vld [vmem:[%s14719_s1 + $0x1b68] ss:$16 sps:$4 sm:$0xff]  }
 0x338   :  { %7228 = vmatprep.subr.bf16.mxu0 %v10966_v27  ;;  %8076 = vmatprep.subr.bf16.mxu1 %v10969_v28  ;;  %v11050_v27 = vld [vmem:[%s14719_s1 + $0x1b84] ss:$16 sps:$4 sm:$0xff]   ;;  %v11053_v28 = vld [vmem:[%s14719_s1 + $0x1b8c] ss:$16 sps:$4 sm:$0xff]  }
 0x33b   :  { %7229 = vmatpush1.bf16.msra.mxu0 %v10964_v29  ;;  %8077 = vmatpush1.bf16.msra.mxu1 %v10967_v30  ;;  %v11048_v29 = vld [vmem:[%s14719_s1 + $0x1b80] ss:$16 sps:$4 sm:$0xff]   ;;  %v11051_v30 = vld [vmem:[%s14719_s1 + $0x1b88] ss:$16 sps:$4 sm:$0xff]  }
 0x33c   :  { %7230 = vmatprep.subr.bf16.mxu0 %v10972_v31  ;;  %8078 = vmatprep.subr.bf16.mxu1 %v10975_v32  ;;  %v11056_v31 = vld [vmem:[%s14719_s1 + $0x1ba4] ss:$16 sps:$4 sm:$0xff]   ;;  %v11059_v32 = vld [vmem:[%s14719_s1 + $0x1bac] ss:$16 sps:$4 sm:$0xff]  }
 0x33f   :  { %7231 = vmatpush1.bf16.msra.mxu0 %v10970_v34  ;;  %8079 = vmatpush1.bf16.msra.mxu1 %v10973_v36  ;;  %v11054_v34 = vld [vmem:[%s14719_s1 + $0x1ba0] ss:$16 sps:$4 sm:$0xff]   ;;  %v11057_v36 = vld [vmem:[%s14719_s1 + $0x1ba8] ss:$16 sps:$4 sm:$0xff]  }
 0x340   :  { %7253 = vmatprep.subr.bf16.mxu0 %v10978_v33  ;;  %8101 = vmatprep.subr.bf16.mxu1 %v10981_v35  ;;  %v11062_v33 = vld [vmem:[%s14719_s1 + $0x1bc4] ss:$16 sps:$4 sm:$0xff]   ;;  %v11065_v35 = vld [vmem:[%s14719_s1 + $0x1bcc] ss:$16 sps:$4 sm:$0xff]  }
 0x342   :  { %7233 = vmatmul.mubr.bf16.vlgmr.msra.gmra.mrb[0].mxu0 %v8392_v37  ;;  %8081 = vmatmul.mubr.bf16.vlgmr.msra.gmra.mrb[0].mxu1 %v8392_v37  ;;  %v11060_v37 = vld [vmem:[%s14719_s1 + $0x1bc0] ss:$16 sps:$4 sm:$0xff]  }
 0x343   :  { %7254 = vmatpush1.bf16.msra.mxu0 %v10976_v40  ;;  %8102 = vmatpush1.bf16.msra.mxu1 %v10979_v42  ;;  %v11071_v40 = vld [vmem:[%s14719_s1 + $0x1bec] ss:$16 sps:$4 sm:$0xff]   ;;  %v11066_v42 = vld [vmem:[%s14719_s1 + $0x1be0] ss:$16 sps:$4 sm:$0xff]  }
 0x344   :  { %7255 = vmatprep.subr.bf16.mxu0 %v10984_v44  ;;  %8103 = vmatprep.subr.bf16.mxu1 %v10987_v41  ;;  %v11069_v44 = vld [vmem:[%s14719_s1 + $0x1be8] ss:$16 sps:$4 sm:$0xff]   ;;  %v11074_v41 = vld [vmem:[%s14719_s1 + $0x1c04] ss:$16 sps:$4 sm:$0xff]  }
 0x345   :  { %7242 = vmatprep.mubr.bf16.mxu0 %v8425_v43  ;;  %8090 = vmatprep.mubr.bf16.mxu1 %v8425_v43  ;;  %v11077_v43 = vld [vmem:[%s14719_s1 + $0x1c0c] ss:$16 sps:$4 sm:$0xff]  }
 0x347   :  { %7256 = vmatpush1.bf16.msra.mxu0 %v10982_v45  ;;  %8104 = vmatpush1.bf16.msra.mxu1 %v10985_v46  ;;  %v8394_v45 = vcombine.low %v14065_v52, %v14070_v49  ;;  %v59_v46 = vld [vmem:[%s14720_s0 + $0x168] sm:$0xff]  ;;  %v11080_v52 = vld [vmem:[%s14719_s1 + $0x1c24] ss:$16 sps:$4 sm:$0xff]  }
 0x348   :  { %7257 = vmatprep.subr.bf16.mxu0 %v10990_v47  ;;  %8105 = vmatprep.subr.bf16.mxu1 %v10993_v48  ;;  %v75_v47 = vld [vmem:[%s14720_s0 + $0x1e8] sm:$0xff]  ;;  %v11072_v48 = vld [vmem:[%s14719_s1 + $0x1c00] ss:$16 sps:$4 sm:$0xff]  }
 0x349   :  { %v11083_v49 = vld [vmem:[%s14719_s1 + $0x1c2c] ss:$16 sps:$4 sm:$0xff]  }
 0x34a   :  { %7243 = vmatmul.mubr.bf16.gmra.mrb[4].mxu0 %v8424_v51  ;;  %8091 = vmatmul.mubr.bf16.gmra.mrb[4].mxu1 %v8424_v51  ;;  %v11075_v51 = vld [vmem:[%s14719_s1 + $0x1c08] ss:$16 sps:$4 sm:$0xff]  }
 0x34b   :  { %7258 = vmatpush1.bf16.msra.mxu0 %v10988_v50  ;;  %8106 = vmatpush1.bf16.msra.mxu1 %v10991_v53  ;;  %v8427_v50 = vcombine.high %v59_v46, %v75_v47  ;;  %v11078_v53 = vld [vmem:[%s14719_s1 + $0x1c20] ss:$16 sps:$4 sm:$0xff]  }
 0x34c   :  { %7259 = vmatprep.subr.bf16.mxu0 %v10996_v54  ;;  %8107 = vmatprep.subr.bf16.mxu1 %v10999_v55  ;;  %v11081_v54 = vld [vmem:[%s14719_s1 + $0x1c28] ss:$16 sps:$4 sm:$0xff]   ;;  %v11086_v55 = vld [vmem:[%s14719_s1 + $0x1c44] ss:$16 sps:$4 sm:$0xff]  }
 0x34d   :  { %7285 = vmatprep.mubr.bf16.mxu0 %v8395_v56  ;;  %8133 = vmatprep.mubr.bf16.mxu1 %v8395_v56  ;;  %v11089_v56 = vld [vmem:[%s14719_s1 + $0x1c4c] ss:$16 sps:$4 sm:$0xff]  }
 0x34f   :  { %7260 = vmatpush1.bf16.msra.mxu0 %v10994_v59  ;;  %8108 = vmatpush1.bf16.msra.mxu1 %v10997_v60  ;;  %v8426_v59 = vcombine.low %v59_v46, %v75_v47  ;;  %v14277_v60 = vld [vmem:[%s14720_s0 + $0x70] sm:$0xff]  ;;  %v11159_v46 = vld [vmem:[%s14719_s1 + $0x1dc8] ss:$16 sps:$4 sm:$0xff]  }
 0x350   :  { %7261 = vmatprep.subr.bf16.mxu0 %v11002_v57  ;;  %8109 = vmatprep.subr.bf16.mxu1 %v11005_v58  ;;  %v14282_v57 = vld [vmem:[%s14720_s0 + $0xf0] sm:$0xff] }
 0x351   :  { %v11084_v58 = vld [vmem:[%s14719_s1 + $0x1c40] ss:$16 sps:$4 sm:$0xff]   ;;  %v11164_v47 = vld [vmem:[%s14719_s1 + $0x1de4] ss:$16 sps:$4 sm:$0xff]  }
 0x353   :  { %7262 = vmatpush1.bf16.msra.mxu0 %v11000_v61  ;;  %8110 = vmatpush1.bf16.msra.mxu1 %v11003_v62  ;;  %v11087_v61 = vld [vmem:[%s14719_s1 + $0x1c48] ss:$16 sps:$4 sm:$0xff]   ;;  %v11092_v62 = vld [vmem:[%s14719_s1 + $0x1c64] ss:$16 sps:$4 sm:$0xff]  }
 0x354   :  { %7263 = vmatprep.subr.bf16.mxu0 %v11008_v63  ;;  %8111 = vmatprep.subr.bf16.mxu1 %v11011_v0  ;;  %v11095_v63 = vld [vmem:[%s14719_s1 + $0x1c6c] ss:$16 sps:$4 sm:$0xff]   ;;  %v8397_v0 = vcombine.high %v14277_v60, %v14282_v57 }
 0x357   :  { %7264 = vmatpush1.bf16.msra.mxu0 %v11006_v3  ;;  %8112 = vmatpush1.bf16.msra.mxu1 %v11009_v4  ;;  %v11090_v3 = vld [vmem:[%s14719_s1 + $0x1c60] ss:$16 sps:$4 sm:$0xff]   ;;  %v11093_v4 = vld [vmem:[%s14719_s1 + $0x1c68] ss:$16 sps:$4 sm:$0xff]  }
 0x358   :  { %7265 = vmatprep.subr.bf16.mxu0 %v11014_v1  ;;  %8113 = vmatprep.subr.bf16.mxu1 %v11017_v2  ;;  %v11098_v1 = vld [vmem:[%s14719_s1 + $0x1c84] ss:$16 sps:$4 sm:$0xff]   ;;  %v11101_v2 = vld [vmem:[%s14719_s1 + $0x1c8c] ss:$16 sps:$4 sm:$0xff]  }
 0x35b   :  { %7266 = vmatpush1.bf16.msra.mxu0 %v11012_v5  ;;  %8114 = vmatpush1.bf16.msra.mxu1 %v11015_v6  ;;  %v11096_v5 = vld [vmem:[%s14719_s1 + $0x1c80] ss:$16 sps:$4 sm:$0xff]   ;;  %v11099_v6 = vld [vmem:[%s14719_s1 + $0x1c88] ss:$16 sps:$4 sm:$0xff]  }
 0x35c   :  { %7267 = vmatprep.subr.bf16.mxu0 %v11020_v7  ;;  %8115 = vmatprep.subr.bf16.mxu1 %v11023_v8  ;;  %v11104_v7 = vld [vmem:[%s14719_s1 + $0x1ca4] ss:$16 sps:$4 sm:$0xff]   ;;  %v11107_v8 = vld [vmem:[%s14719_s1 + $0x1cac] ss:$16 sps:$4 sm:$0xff]  }
 0x35f   :  { %7268 = vmatpush1.bf16.msra.mxu0 %v11018_v11  ;;  %8116 = vmatpush1.bf16.msra.mxu1 %v11021_v12  ;;  %v11102_v11 = vld [vmem:[%s14719_s1 + $0x1ca0] ss:$16 sps:$4 sm:$0xff]   ;;  %v11105_v12 = vld [vmem:[%s14719_s1 + $0x1ca8] ss:$16 sps:$4 sm:$0xff]  }
 0x360   :  { %7269 = vmatprep.subr.bf16.mxu0 %v11026_v9  ;;  %8117 = vmatprep.subr.bf16.mxu1 %v11029_v10  ;;  %v11110_v9 = vld [vmem:[%s14719_s1 + $0x1cc4] ss:$16 sps:$4 sm:$0xff]   ;;  %v11113_v10 = vld [vmem:[%s14719_s1 + $0x1ccc] ss:$16 sps:$4 sm:$0xff]  }
 0x363   :  { %7270 = vmatpush1.bf16.msra.mxu0 %v11024_v13  ;;  %8118 = vmatpush1.bf16.msra.mxu1 %v11027_v14  ;;  %v11108_v13 = vld [vmem:[%s14719_s1 + $0x1cc0] ss:$16 sps:$4 sm:$0xff]   ;;  %v11111_v14 = vld [vmem:[%s14719_s1 + $0x1cc8] ss:$16 sps:$4 sm:$0xff]  }
 0x364   :  { %7271 = vmatprep.subr.bf16.mxu0 %v11032_v15  ;;  %8119 = vmatprep.subr.bf16.mxu1 %v11035_v16  ;;  %v11116_v15 = vld [vmem:[%s14719_s1 + $0x1ce4] ss:$16 sps:$4 sm:$0xff]   ;;  %v11119_v16 = vld [vmem:[%s14719_s1 + $0x1cec] ss:$16 sps:$4 sm:$0xff]  }
 0x367   :  { %7272 = vmatpush1.bf16.msra.mxu0 %v11030_v19  ;;  %8120 = vmatpush1.bf16.msra.mxu1 %v11033_v17  ;;  %v11114_v19 = vld [vmem:[%s14719_s1 + $0x1ce0] ss:$16 sps:$4 sm:$0xff]   ;;  %v11117_v17 = vld [vmem:[%s14719_s1 + $0x1ce8] ss:$16 sps:$4 sm:$0xff]  }
 0x368   :  { %7273 = vmatprep.subr.bf16.mxu0 %v11038_v18  ;;  %8121 = vmatprep.subr.bf16.mxu1 %v11041_v20  ;;  %v11122_v18 = vld [vmem:[%s14719_s1 + $0x1d04] ss:$16 sps:$4 sm:$0xff]   ;;  %v11125_v20 = vld [vmem:[%s14719_s1 + $0x1d0c] ss:$16 sps:$4 sm:$0xff]  }
 0x36b   :  { %7274 = vmatpush1.bf16.msra.mxu0 %v11036_v21  ;;  %8122 = vmatpush1.bf16.msra.mxu1 %v11039_v22  ;;  %v11120_v21 = vld [vmem:[%s14719_s1 + $0x1d00] ss:$16 sps:$4 sm:$0xff]   ;;  %v11123_v22 = vld [vmem:[%s14719_s1 + $0x1d08] ss:$16 sps:$4 sm:$0xff]  }
 0x36c   :  { %7275 = vmatprep.subr.bf16.mxu0 %v11044_v23  ;;  %8123 = vmatprep.subr.bf16.mxu1 %v11047_v24  ;;  %v11128_v23 = vld [vmem:[%s14719_s1 + $0x1d24] ss:$16 sps:$4 sm:$0xff]   ;;  %v11131_v24 = vld [vmem:[%s14719_s1 + $0x1d2c] ss:$16 sps:$4 sm:$0xff]  }
 0x36f   :  { %7276 = vmatpush1.bf16.msra.mxu0 %v11042_v26  ;;  %8124 = vmatpush1.bf16.msra.mxu1 %v11045_v25  ;;  %v11126_v26 = vld [vmem:[%s14719_s1 + $0x1d20] ss:$16 sps:$4 sm:$0xff]   ;;  %v11129_v25 = vld [vmem:[%s14719_s1 + $0x1d28] ss:$16 sps:$4 sm:$0xff]  }
 0x370   :  { %7277 = vmatprep.subr.bf16.mxu0 %v11050_v27  ;;  %8125 = vmatprep.subr.bf16.mxu1 %v11053_v28  ;;  %v11134_v27 = vld [vmem:[%s14719_s1 + $0x1d44] ss:$16 sps:$4 sm:$0xff]   ;;  %v11137_v28 = vld [vmem:[%s14719_s1 + $0x1d4c] ss:$16 sps:$4 sm:$0xff]  }
 0x373   :  { %7278 = vmatpush1.bf16.msra.mxu0 %v11048_v29  ;;  %8126 = vmatpush1.bf16.msra.mxu1 %v11051_v30  ;;  %v11132_v29 = vld [vmem:[%s14719_s1 + $0x1d40] ss:$16 sps:$4 sm:$0xff]   ;;  %v11135_v30 = vld [vmem:[%s14719_s1 + $0x1d48] ss:$16 sps:$4 sm:$0xff]  }
 0x374   :  { %7279 = vmatprep.subr.bf16.mxu0 %v11056_v31  ;;  %8127 = vmatprep.subr.bf16.mxu1 %v11059_v32  ;;  %v11140_v31 = vld [vmem:[%s14719_s1 + $0x1d64] ss:$16 sps:$4 sm:$0xff]   ;;  %v11143_v32 = vld [vmem:[%s14719_s1 + $0x1d6c] ss:$16 sps:$4 sm:$0xff]  }
 0x377   :  { %7280 = vmatpush1.bf16.msra.mxu0 %v11054_v34  ;;  %8128 = vmatpush1.bf16.msra.mxu1 %v11057_v36  ;;  %v11138_v34 = vld [vmem:[%s14719_s1 + $0x1d60] ss:$16 sps:$4 sm:$0xff]   ;;  %v11141_v36 = vld [vmem:[%s14719_s1 + $0x1d68] ss:$16 sps:$4 sm:$0xff]  }
 0x378   :  { %7281 = vmatprep.subr.bf16.mxu0 %v11062_v33  ;;  %8129 = vmatprep.subr.bf16.mxu1 %v11065_v35  ;;  %v11146_v33 = vld [vmem:[%s14719_s1 + $0x1d84] ss:$16 sps:$4 sm:$0xff]   ;;  %v11149_v35 = vld [vmem:[%s14719_s1 + $0x1d8c] ss:$16 sps:$4 sm:$0xff]  }
 0x37b   :  { %7282 = vmatpush1.bf16.msra.mxu0 %v11060_v37  ;;  %8130 = vmatpush1.bf16.msra.mxu1 %v11063_v38  ;;  %v11144_v37 = vld [vmem:[%s14719_s1 + $0x1d80] ss:$16 sps:$4 sm:$0xff]   ;;  %v11147_v38 = vld [vmem:[%s14719_s1 + $0x1d88] ss:$16 sps:$4 sm:$0xff]  }
 0x37c   :  { %7283 = vmatprep.subr.bf16.mxu0 %v11068_v39  ;;  %8131 = vmatprep.subr.bf16.mxu1 %v11071_v40  ;;  %v11152_v39 = vld [vmem:[%s14719_s1 + $0x1da4] ss:$16 sps:$4 sm:$0xff]   ;;  %v11155_v40 = vld [vmem:[%s14719_s1 + $0x1dac] ss:$16 sps:$4 sm:$0xff]  }
 0x37f   :  { %7284 = vmatpush1.bf16.msra.mxu0 %v11066_v42  ;;  %8132 = vmatpush1.bf16.msra.mxu1 %v11069_v44  ;;  %v11150_v42 = vld [vmem:[%s14719_s1 + $0x1da0] ss:$16 sps:$4 sm:$0xff]   ;;  %v11153_v44 = vld [vmem:[%s14719_s1 + $0x1da8] ss:$16 sps:$4 sm:$0xff]  }
 0x380   :  { %7306 = vmatprep.subr.bf16.mxu0 %v11074_v41  ;;  %8154 = vmatprep.subr.bf16.mxu1 %v11077_v43  ;;  %v11158_v41 = vld [vmem:[%s14719_s1 + $0x1dc4] ss:$16 sps:$4 sm:$0xff]   ;;  %v11161_v43 = vld [vmem:[%s14719_s1 + $0x1dcc] ss:$16 sps:$4 sm:$0xff]  }
 0x382   :  { %7286 = vmatmul.mubr.bf16.vlgmr.msra.gmra.mrb[0].mxu0 %v8394_v45  ;;  %8134 = vmatmul.mubr.bf16.vlgmr.msra.gmra.mrb[0].mxu1 %v8394_v45  ;;  %v11156_v45 = vld [vmem:[%s14719_s1 + $0x1dc0] ss:$16 sps:$4 sm:$0xff]  }
 0x383   :  { %7307 = vmatpush1.bf16.msra.mxu0 %v11072_v48  ;;  %8155 = vmatpush1.bf16.msra.mxu1 %v11075_v51  ;;  %v11167_v48 = vld [vmem:[%s14719_s1 + $0x1dec] ss:$16 sps:$4 sm:$0xff]   ;;  %v11162_v51 = vld [vmem:[%s14719_s1 + $0x1de0] ss:$16 sps:$4 sm:$0xff]  }
 0x384   :  { %7308 = vmatprep.subr.bf16.mxu0 %v11080_v52  ;;  %8156 = vmatprep.subr.bf16.mxu1 %v11083_v49  ;;  %v11165_v52 = vld [vmem:[%s14719_s1 + $0x1de8] ss:$16 sps:$4 sm:$0xff]   ;;  %v11170_v49 = vld [vmem:[%s14719_s1 + $0x1e04] ss:$16 sps:$4 sm:$0xff]  }
 0x385   :  { %7295 = vmatprep.mubr.bf16.mxu0 %v8427_v50  ;;  %8143 = vmatprep.mubr.bf16.mxu1 %v8427_v50  ;;  %v11173_v50 = vld [vmem:[%s14719_s1 + $0x1e0c] ss:$16 sps:$4 sm:$0xff]  }
 0x387   :  { %7309 = vmatpush1.bf16.msra.mxu0 %v11078_v53  ;;  %8157 = vmatpush1.bf16.msra.mxu1 %v11081_v54  ;;  %v8396_v53 = vcombine.low %v14277_v60, %v14282_v57  ;;  %v60_v54 = vld [vmem:[%s14720_s0 + $0x170] sm:$0xff]  ;;  %v11179_v57 = vld [vmem:[%s14719_s1 + $0x1e2c] ss:$16 sps:$4 sm:$0xff]  }
 0x388   :  { %7310 = vmatprep.subr.bf16.mxu0 %v11086_v55  ;;  %8158 = vmatprep.subr.bf16.mxu1 %v11089_v56  ;;  %v76_v55 = vld [vmem:[%s14720_s0 + $0x1f0] sm:$0xff] }
 0x389   :  { %v11168_v56 = vld [vmem:[%s14719_s1 + $0x1e00] ss:$16 sps:$4 sm:$0xff]   ;;  %v11176_v60 = vld [vmem:[%s14719_s1 + $0x1e24] ss:$16 sps:$4 sm:$0xff]  }
 0x38a   :  { %7296 = vmatmul.mubr.bf16.gmra.mrb[4].mxu0 %v8426_v59  ;;  %8144 = vmatmul.mubr.bf16.gmra.mrb[4].mxu1 %v8426_v59  ;;  %v11171_v59 = vld [vmem:[%s14719_s1 + $0x1e08] ss:$16 sps:$4 sm:$0xff]  }
 0x38b   :  { %7311 = vmatpush1.bf16.msra.mxu0 %v11084_v58  ;;  %8159 = vmatpush1.bf16.msra.mxu1 %v11087_v61  ;;  %v8429_v58 = vcombine.high %v60_v54, %v76_v55  ;;  %v11174_v61 = vld [vmem:[%s14719_s1 + $0x1e20] ss:$16 sps:$4 sm:$0xff]  }
 0x38c   :  { %7312 = vmatprep.subr.bf16.mxu0 %v11092_v62  ;;  %8160 = vmatprep.subr.bf16.mxu1 %v11095_v63  ;;  %v11177_v62 = vld [vmem:[%s14719_s1 + $0x1e28] ss:$16 sps:$4 sm:$0xff]   ;;  %v11182_v63 = vld [vmem:[%s14719_s1 + $0x1e44] ss:$16 sps:$4 sm:$0xff]  }
 0x38d   :  { %7338 = vmatprep.mubr.bf16.mxu0 %v8397_v0  ;;  %8186 = vmatprep.mubr.bf16.mxu1 %v8397_v0  ;;  %v11185_v0 = vld [vmem:[%s14719_s1 + $0x1e4c] ss:$16 sps:$4 sm:$0xff]  }
 0x38f   :  { %7313 = vmatpush1.bf16.msra.mxu0 %v11090_v3  ;;  %8161 = vmatpush1.bf16.msra.mxu1 %v11093_v4  ;;  %v8428_v3 = vcombine.low %v60_v54, %v76_v55  ;;  %v14489_v4 = vld [vmem:[%s14720_s0 + $0x78] sm:$0xff]  ;;  %v11260_v55 = vld [vmem:[%s14719_s1 + $0x1fe4] ss:$16 sps:$4 sm:$0xff]  }
 0x390   :  { %7314 = vmatprep.subr.bf16.mxu0 %v11098_v1  ;;  %8162 = vmatprep.subr.bf16.mxu1 %v11101_v2  ;;  %v14494_v1 = vld [vmem:[%s14720_s0 + $0xf8] sm:$0xff]  ;;  %v11180_v2 = vld [vmem:[%s14719_s1 + $0x1e40] ss:$16 sps:$4 sm:$0xff]  }
 0x391   :  { %v11255_v54 = vld [vmem:[%s14719_s1 + $0x1fc8] ss:$16 sps:$4 sm:$0xff]  }
 0x393   :  { %7315 = vmatpush1.bf16.msra.mxu0 %v11096_v5  ;;  %8163 = vmatpush1.bf16.msra.mxu1 %v11099_v6  ;;  %v11183_v5 = vld [vmem:[%s14719_s1 + $0x1e48] ss:$16 sps:$4 sm:$0xff]   ;;  %v11188_v6 = vld [vmem:[%s14719_s1 + $0x1e64] ss:$16 sps:$4 sm:$0xff]  }
 0x394   :  { %7316 = vmatprep.subr.bf16.mxu0 %v11104_v7  ;;  %8164 = vmatprep.subr.bf16.mxu1 %v11107_v8  ;;  %v11191_v7 = vld [vmem:[%s14719_s1 + $0x1e6c] ss:$16 sps:$4 sm:$0xff]   ;;  %v8399_v8 = vcombine.high %v14489_v4, %v14494_v1 }
 0x397   :  { %7317 = vmatpush1.bf16.msra.mxu0 %v11102_v11  ;;  %8165 = vmatpush1.bf16.msra.mxu1 %v11105_v12  ;;  %v11186_v11 = vld [vmem:[%s14719_s1 + $0x1e60] ss:$16 sps:$4 sm:$0xff]   ;;  %v11189_v12 = vld [vmem:[%s14719_s1 + $0x1e68] ss:$16 sps:$4 sm:$0xff]  }
 0x398   :  { %7318 = vmatprep.subr.bf16.mxu0 %v11110_v9  ;;  %8166 = vmatprep.subr.bf16.mxu1 %v11113_v10  ;;  %v11194_v9 = vld [vmem:[%s14719_s1 + $0x1e84] ss:$16 sps:$4 sm:$0xff]   ;;  %v11197_v10 = vld [vmem:[%s14719_s1 + $0x1e8c] ss:$16 sps:$4 sm:$0xff]  }
 0x39b   :  { %7319 = vmatpush1.bf16.msra.mxu0 %v11108_v13  ;;  %8167 = vmatpush1.bf16.msra.mxu1 %v11111_v14  ;;  %v11192_v13 = vld [vmem:[%s14719_s1 + $0x1e80] ss:$16 sps:$4 sm:$0xff]   ;;  %v11195_v14 = vld [vmem:[%s14719_s1 + $0x1e88] ss:$16 sps:$4 sm:$0xff]  }
 0x39c   :  { %7320 = vmatprep.subr.bf16.mxu0 %v11116_v15  ;;  %8168 = vmatprep.subr.bf16.mxu1 %v11119_v16  ;;  %v11200_v15 = vld [vmem:[%s14719_s1 + $0x1ea4] ss:$16 sps:$4 sm:$0xff]   ;;  %v11203_v16 = vld [vmem:[%s14719_s1 + $0x1eac] ss:$16 sps:$4 sm:$0xff]  }
 0x39f   :  { %7321 = vmatpush1.bf16.msra.mxu0 %v11114_v19  ;;  %8169 = vmatpush1.bf16.msra.mxu1 %v11117_v17  ;;  %v11198_v19 = vld [vmem:[%s14719_s1 + $0x1ea0] ss:$16 sps:$4 sm:$0xff]   ;;  %v11201_v17 = vld [vmem:[%s14719_s1 + $0x1ea8] ss:$16 sps:$4 sm:$0xff]  }
 0x3a0   :  { %7322 = vmatprep.subr.bf16.mxu0 %v11122_v18  ;;  %8170 = vmatprep.subr.bf16.mxu1 %v11125_v20  ;;  %v11206_v18 = vld [vmem:[%s14719_s1 + $0x1ec4] ss:$16 sps:$4 sm:$0xff]   ;;  %v11209_v20 = vld [vmem:[%s14719_s1 + $0x1ecc] ss:$16 sps:$4 sm:$0xff]  }
 0x3a3   :  { %7323 = vmatpush1.bf16.msra.mxu0 %v11120_v21  ;;  %8171 = vmatpush1.bf16.msra.mxu1 %v11123_v22  ;;  %v11204_v21 = vld [vmem:[%s14719_s1 + $0x1ec0] ss:$16 sps:$4 sm:$0xff]   ;;  %v11207_v22 = vld [vmem:[%s14719_s1 + $0x1ec8] ss:$16 sps:$4 sm:$0xff]  }
 0x3a4   :  { %7324 = vmatprep.subr.bf16.mxu0 %v11128_v23  ;;  %8172 = vmatprep.subr.bf16.mxu1 %v11131_v24  ;;  %v11212_v23 = vld [vmem:[%s14719_s1 + $0x1ee4] ss:$16 sps:$4 sm:$0xff]   ;;  %v11215_v24 = vld [vmem:[%s14719_s1 + $0x1eec] ss:$16 sps:$4 sm:$0xff]  }
 0x3a7   :  { %7325 = vmatpush1.bf16.msra.mxu0 %v11126_v26  ;;  %8173 = vmatpush1.bf16.msra.mxu1 %v11129_v25  ;;  %v11210_v26 = vld [vmem:[%s14719_s1 + $0x1ee0] ss:$16 sps:$4 sm:$0xff]   ;;  %v11213_v25 = vld [vmem:[%s14719_s1 + $0x1ee8] ss:$16 sps:$4 sm:$0xff]  }
 0x3a8   :  { %7326 = vmatprep.subr.bf16.mxu0 %v11134_v27  ;;  %8174 = vmatprep.subr.bf16.mxu1 %v11137_v28  ;;  %v11218_v27 = vld [vmem:[%s14719_s1 + $0x1f04] ss:$16 sps:$4 sm:$0xff]   ;;  %v11221_v28 = vld [vmem:[%s14719_s1 + $0x1f0c] ss:$16 sps:$4 sm:$0xff]  }
 0x3ab   :  { %7327 = vmatpush1.bf16.msra.mxu0 %v11132_v29  ;;  %8175 = vmatpush1.bf16.msra.mxu1 %v11135_v30  ;;  %v11216_v29 = vld [vmem:[%s14719_s1 + $0x1f00] ss:$16 sps:$4 sm:$0xff]   ;;  %v11219_v30 = vld [vmem:[%s14719_s1 + $0x1f08] ss:$16 sps:$4 sm:$0xff]  }
 0x3ac   :  { %7328 = vmatprep.subr.bf16.mxu0 %v11140_v31  ;;  %8176 = vmatprep.subr.bf16.mxu1 %v11143_v32  ;;  %v11224_v31 = vld [vmem:[%s14719_s1 + $0x1f24] ss:$16 sps:$4 sm:$0xff]   ;;  %v11227_v32 = vld [vmem:[%s14719_s1 + $0x1f2c] ss:$16 sps:$4 sm:$0xff]  }
 0x3af   :  { %7329 = vmatpush1.bf16.msra.mxu0 %v11138_v34  ;;  %8177 = vmatpush1.bf16.msra.mxu1 %v11141_v36  ;;  %v11222_v34 = vld [vmem:[%s14719_s1 + $0x1f20] ss:$16 sps:$4 sm:$0xff]   ;;  %v11225_v36 = vld [vmem:[%s14719_s1 + $0x1f28] ss:$16 sps:$4 sm:$0xff]  }
 0x3b0   :  { %7330 = vmatprep.subr.bf16.mxu0 %v11146_v33  ;;  %8178 = vmatprep.subr.bf16.mxu1 %v11149_v35  ;;  %v11230_v33 = vld [vmem:[%s14719_s1 + $0x1f44] ss:$16 sps:$4 sm:$0xff]   ;;  %v11233_v35 = vld [vmem:[%s14719_s1 + $0x1f4c] ss:$16 sps:$4 sm:$0xff]  }
 0x3b3   :  { %7331 = vmatpush1.bf16.msra.mxu0 %v11144_v37  ;;  %8179 = vmatpush1.bf16.msra.mxu1 %v11147_v38  ;;  %v11228_v37 = vld [vmem:[%s14719_s1 + $0x1f40] ss:$16 sps:$4 sm:$0xff]   ;;  %v11231_v38 = vld [vmem:[%s14719_s1 + $0x1f48] ss:$16 sps:$4 sm:$0xff]  }
 0x3b4   :  { %7332 = vmatprep.subr.bf16.mxu0 %v11152_v39  ;;  %8180 = vmatprep.subr.bf16.mxu1 %v11155_v40  ;;  %v11236_v39 = vld [vmem:[%s14719_s1 + $0x1f64] ss:$16 sps:$4 sm:$0xff]   ;;  %v11239_v40 = vld [vmem:[%s14719_s1 + $0x1f6c] ss:$16 sps:$4 sm:$0xff]  }
 0x3b7   :  { %7333 = vmatpush1.bf16.msra.mxu0 %v11150_v42  ;;  %8181 = vmatpush1.bf16.msra.mxu1 %v11153_v44  ;;  %v11234_v42 = vld [vmem:[%s14719_s1 + $0x1f60] ss:$16 sps:$4 sm:$0xff]   ;;  %v11237_v44 = vld [vmem:[%s14719_s1 + $0x1f68] ss:$16 sps:$4 sm:$0xff]  }
 0x3b8   :  { %7334 = vmatprep.subr.bf16.mxu0 %v11158_v41  ;;  %8182 = vmatprep.subr.bf16.mxu1 %v11161_v43  ;;  %v11242_v41 = vld [vmem:[%s14719_s1 + $0x1f84] ss:$16 sps:$4 sm:$0xff]   ;;  %v11245_v43 = vld [vmem:[%s14719_s1 + $0x1f8c] ss:$16 sps:$4 sm:$0xff]  }
 0x3bb   :  { %7335 = vmatpush1.bf16.msra.mxu0 %v11156_v45  ;;  %8183 = vmatpush1.bf16.msra.mxu1 %v11159_v46  ;;  %v11240_v45 = vld [vmem:[%s14719_s1 + $0x1f80] ss:$16 sps:$4 sm:$0xff]   ;;  %v11243_v46 = vld [vmem:[%s14719_s1 + $0x1f88] ss:$16 sps:$4 sm:$0xff]  }
 0x3bc   :  { %7336 = vmatprep.subr.bf16.mxu0 %v11164_v47  ;;  %8184 = vmatprep.subr.bf16.mxu1 %v11167_v48  ;;  %v11248_v47 = vld [vmem:[%s14719_s1 + $0x1fa4] ss:$16 sps:$4 sm:$0xff]   ;;  %v11251_v48 = vld [vmem:[%s14719_s1 + $0x1fac] ss:$16 sps:$4 sm:$0xff]  }
 0x3bf   :  { %7337 = vmatpush1.bf16.msra.mxu0 %v11162_v51  ;;  %8185 = vmatpush1.bf16.msra.mxu1 %v11165_v52  ;;  %v11246_v51 = vld [vmem:[%s14719_s1 + $0x1fa0] ss:$16 sps:$4 sm:$0xff]   ;;  %v11249_v52 = vld [vmem:[%s14719_s1 + $0x1fa8] ss:$16 sps:$4 sm:$0xff]  }
 0x3c0   :  { %7359 = vmatprep.subr.bf16.mxu0 %v11170_v49  ;;  %8207 = vmatprep.subr.bf16.mxu1 %v11173_v50  ;;  %v11254_v49 = vld [vmem:[%s14719_s1 + $0x1fc4] ss:$16 sps:$4 sm:$0xff]   ;;  %v11257_v50 = vld [vmem:[%s14719_s1 + $0x1fcc] ss:$16 sps:$4 sm:$0xff]  }
 0x3c2   :  { %7339 = vmatmul.mubr.bf16.vlgmr.msra.gmra.mrb[0].mxu0 %v8396_v53  ;;  %8187 = vmatmul.mubr.bf16.vlgmr.msra.gmra.mrb[0].mxu1 %v8396_v53  ;;  %v11252_v53 = vld [vmem:[%s14719_s1 + $0x1fc0] ss:$16 sps:$4 sm:$0xff]  }
 0x3c3   :  { %7360 = vmatpush1.bf16.msra.mxu0 %v11168_v56  ;;  %8208 = vmatpush1.bf16.msra.mxu1 %v11171_v59  ;;  %v11263_v56 = vld [vmem:[%s14719_s1 + $0x1fec] ss:$16 sps:$4 sm:$0xff]   ;;  %v11258_v59 = vld [vmem:[%s14719_s1 + $0x1fe0] ss:$16 sps:$4 sm:$0xff]  }
 0x3c4   :  { %7361 = vmatprep.subr.bf16.mxu0 %v11176_v60  ;;  %8209 = vmatprep.subr.bf16.mxu1 %v11179_v57  ;;  %v11261_v60 = vld [vmem:[%s14719_s1 + $0x1fe8] ss:$16 sps:$4 sm:$0xff]  }
 0x3c5   :  { %7348 = vmatprep.mubr.bf16.mxu0 %v8429_v58  ;;  %8196 = vmatprep.mubr.bf16.mxu1 %v8429_v58  ;;  %v61_v57 = vld [vmem:[%s14720_s0 + $0x178] sm:$0xff] }
 0x3c6   :  { %v77_v58 = vld [vmem:[%s14720_s0 + $0x1f8] sm:$0xff] }
 0x3c7   :  { %7362 = vmatpush1.bf16.msra.mxu0 %v11174_v61  ;;  %8210 = vmatpush1.bf16.msra.mxu1 %v11177_v62  ;;  %v8398_v61 = vcombine.low %v14489_v4, %v14494_v1  ;;  %v8431_v62 = vcombine.high %v61_v57, %v77_v58 }
 0x3c8   :  { %7363 = vmatprep.subr.bf16.mxu0 %v11182_v63  ;;  %8211 = vmatprep.subr.bf16.mxu1 %v11185_v0  ;;  %v8430_v63 = vcombine.low %v61_v57, %v77_v58  ;;  %v1104_v0 = vlaneseq }
 0x3ca   :  { %7349 = vmatmul.mubr.bf16.gmra.mrb[4].mxu0 %v8428_v3  ;;  %8197 = vmatmul.mubr.bf16.gmra.mrb[4].mxu1 %v8428_v3  ;;  %v1105_v3 = vshrl.u32 %v1104_v0, 7 }
 0x3cb   :  { %7364 = vmatpush1.bf16.msra.mxu0 %v11180_v2  ;;  %8212 = vmatpush1.bf16.msra.mxu1 %v11183_v5 }
 0x3cc   :  { %7365 = vmatprep.subr.bf16.mxu0 %v11188_v6  ;;  %8213 = vmatprep.subr.bf16.mxu1 %v11191_v7  ;;  %v1106_v2 = vsub.s32 0, %v1105_v3  ;;  %v1114_v5 = vsub.s32 2, %v1105_v3  ;;  %v1102_v6 = vld [vmem:[%s14721_s2] sm:$0xf]  ;;  %v1110_v7 = vsub.s32 1, %v1105_v3  ;;  %v1118_v4 = vsub.s32 3, %v1105_v3 }
 0x3cd   :  { %7391 = vmatprep.mubr.bf16.mxu0 %v8399_v8  ;;  %8239 = vmatprep.mubr.bf16.mxu1 %v8399_v8 }
 0x3ce   :  { %v14671_v1 = vrot.slane %v1102_v6, %v1106_v2  ;;  %v14673_v8 = vrot.slane %v1102_v6, %v1114_v5 }
 0x3cf   :  { %7366 = vmatpush1.bf16.msra.mxu0 %v11186_v11  ;;  %8214 = vmatpush1.bf16.msra.mxu1 %v11189_v12  ;;  %v14675_v11 = vrot.slane %v1102_v6, %v1110_v7  ;;  %v14677_v12 = vrot.slane %v1102_v6, %v1118_v4 }
 0x3d0   :  { %7367 = vmatprep.subr.bf16.mxu0 %v11194_v9  ;;  %8215 = vmatprep.subr.bf16.mxu1 %v11197_v10 }
 0x3d3   :  { %7368 = vmatpush1.bf16.msra.mxu0 %v11192_v13  ;;  %8216 = vmatpush1.bf16.msra.mxu1 %v11195_v14 }
 0x3d4   :  { %7369 = vmatprep.subr.bf16.mxu0 %v11200_v15  ;;  %8217 = vmatprep.subr.bf16.mxu1 %v11203_v16 }
 0x3d7   :  { %7370 = vmatpush1.bf16.msra.mxu0 %v11198_v19  ;;  %8218 = vmatpush1.bf16.msra.mxu1 %v11201_v17 }
 0x3d8   :  { %7371 = vmatprep.subr.bf16.mxu0 %v11206_v18  ;;  %8219 = vmatprep.subr.bf16.mxu1 %v11209_v20 }
 0x3db   :  { %7372 = vmatpush1.bf16.msra.mxu0 %v11204_v21  ;;  %8220 = vmatpush1.bf16.msra.mxu1 %v11207_v22 }
 0x3dc   :  { %7373 = vmatprep.subr.bf16.mxu0 %v11212_v23  ;;  %8221 = vmatprep.subr.bf16.mxu1 %v11215_v24 }
 0x3df   :  { %7374 = vmatpush1.bf16.msra.mxu0 %v11210_v26  ;;  %8222 = vmatpush1.bf16.msra.mxu1 %v11213_v25 }
 0x3e0   :  { %7375 = vmatprep.subr.bf16.mxu0 %v11218_v27  ;;  %8223 = vmatprep.subr.bf16.mxu1 %v11221_v28 }
 0x3e3   :  { %7376 = vmatpush1.bf16.msra.mxu0 %v11216_v29  ;;  %8224 = vmatpush1.bf16.msra.mxu1 %v11219_v30 }
 0x3e4   :  { %7377 = vmatprep.subr.bf16.mxu0 %v11224_v31  ;;  %8225 = vmatprep.subr.bf16.mxu1 %v11227_v32 }
 0x3e7   :  { %7378 = vmatpush1.bf16.msra.mxu0 %v11222_v34  ;;  %8226 = vmatpush1.bf16.msra.mxu1 %v11225_v36 }
 0x3e8   :  { %7379 = vmatprep.subr.bf16.mxu0 %v11230_v33  ;;  %8227 = vmatprep.subr.bf16.mxu1 %v11233_v35 }
 0x3eb   :  { %7380 = vmatpush1.bf16.msra.mxu0 %v11228_v37  ;;  %8228 = vmatpush1.bf16.msra.mxu1 %v11231_v38 }
 0x3ec   :  { %7381 = vmatprep.subr.bf16.mxu0 %v11236_v39  ;;  %8229 = vmatprep.subr.bf16.mxu1 %v11239_v40 }
 0x3ef   :  { %7382 = vmatpush1.bf16.msra.mxu0 %v11234_v42  ;;  %8230 = vmatpush1.bf16.msra.mxu1 %v11237_v44 }
 0x3f0   :  { %7383 = vmatprep.subr.bf16.mxu0 %v11242_v41  ;;  %8231 = vmatprep.subr.bf16.mxu1 %v11245_v43 }
 0x3f3   :  { %7384 = vmatpush1.bf16.msra.mxu0 %v11240_v45  ;;  %8232 = vmatpush1.bf16.msra.mxu1 %v11243_v46 }
 0x3f4   :  { %7385 = vmatprep.subr.bf16.mxu0 %v11248_v47  ;;  %8233 = vmatprep.subr.bf16.mxu1 %v11251_v48 }
 0x3f7   :  { %7386 = vmatpush1.bf16.msra.mxu0 %v11246_v51  ;;  %8234 = vmatpush1.bf16.msra.mxu1 %v11249_v52 }
 0x3f8   :  { %7387 = vmatprep.subr.bf16.mxu0 %v11254_v49  ;;  %8235 = vmatprep.subr.bf16.mxu1 %v11257_v50 }
 0x3fb   :  { %7388 = vmatpush1.bf16.msra.mxu0 %v11252_v53  ;;  %8236 = vmatpush1.bf16.msra.mxu1 %v11255_v54 }
 0x3fc   :  { %7389 = vmatprep.subr.bf16.mxu0 %v11260_v55  ;;  %8237 = vmatprep.subr.bf16.mxu1 %v11263_v56 }
 0x3ff   :  { %7390 = vmatpush1.bf16.msra.mxu0 %v11258_v59  ;;  %8238 = vmatpush1.bf16.msra.mxu1 %v11261_v60 }
 0x402   :  { %7392 = vmatmul.mubr.bf16.vlgmr.msra.gmra.mrb[0].mxu0 %v8398_v61  ;;  %8240 = vmatmul.mubr.bf16.vlgmr.msra.gmra.mrb[0].mxu1 %v8398_v61 }
 0x403   :  { %7401 = vmatprep.mubr.bf16.mxu0 %v8431_v62  ;;  %8249 = vmatprep.mubr.bf16.mxu1 %v8431_v62 }
 0x40a   :  { %7402 = vmatmul.mubr.bf16.gmra.mrb[4].mxu0 %v8430_v63  ;;  %8250 = vmatmul.mubr.bf16.gmra.mrb[4].mxu1 %v8430_v63 }
 0x4d5   :  { %v7393_v9 = vpop.f32.mrb[0].mxu0  ;;  %v8241_v10 = vpop.f32.mrb[0].mxu1 }
 0x4d6   :  { %v9472_v13 = vadd.f32 %v7393_v9, %v14671_v1  ;;  %v9480_v14 = vadd.f32 %v8241_v10, %v14673_v8  ;;  %v7395_v15 = vpop.f32.mrb[1].mxu0  ;;  %v8243_v16 = vpop.f32.mrb[1].mxu1 }
 0x4d7   :  { %v9473_v19 = vadd.f32 %v7395_v15, %v14675_v11  ;;  %v9481_v17 = vadd.f32 %v8243_v16, %v14677_v12  ;;  %v7397_v18 = vpop.f32.mrb[2].mxu0  ;;  %v8245_v20 = vpop.f32.mrb[2].mxu1 }
 0x4d8   :  { %vm8260_vm0 = vcmp.ge.f32.partialorder %v9472_v13, 0.0  ;;  %v8276_v21 = vmul.f32 0.2, %v9472_v13  ;;  %vm8262_vm1 = vcmp.ge.f32.partialorder %v9480_v14, 0.0  ;;  %v8278_v22 = vmul.f32 0.2, %v9480_v14 }
 0x4d9   :  { %vm8261_vm2 = vcmp.ge.f32.partialorder %v9473_v19, 0.0  ;;  %v8277_v23 = vmul.f32 0.2, %v9473_v19  ;;  %vm8263_vm3 = vcmp.ge.f32.partialorder %v9481_v17, 0.0  ;;  %v8279_v24 = vmul.f32 0.2, %v9481_v17 }
 0x4da   :  { %v8292_v26 = vsel %vm8260_vm0, %v9472_v13, %v8276_v21  ;;  %v8294_v25 = vsel %vm8262_vm1, %v9480_v14, %v8278_v22  ;;  %v9474_v27 = vadd.f32 %v7397_v18, %v14671_v1  ;;  %v9482_v28 = vadd.f32 %v8245_v20, %v14673_v8  ;;  %v7399_v29 = vpop.f32.mrb[3].mxu0  ;;  %v8247_v30 = vpop.f32.mrb[3].mxu1 }
 0x4db   :  { %v8293_v31 = vsel %vm8261_vm2, %v9473_v19, %v8277_v23  ;;  %v8295_v32 = vsel %vm8263_vm3, %v9481_v17, %v8279_v24  ;;  %v9475_v34 = vadd.f32 %v7399_v29, %v14675_v11  ;;  %v9483_v36 = vadd.f32 %v8247_v30, %v14677_v12 }
 0x4dc   :  { %v9464_v33 = vpack.c.bf16 %v8293_v31, %v8292_v26  ;;  %v9465_v35 = vpack.c.bf16 %v8295_v32, %v8294_v25  ;;  %vm8264_vm4 = vcmp.ge.f32.partialorder %v9474_v27, 0.0  ;;  %v8280_v37 = vmul.f32 0.2, %v9474_v27 }
 0x4dd   :  { %vm8266_vm5 = vcmp.ge.f32.partialorder %v9482_v28, 0.0  ;;  %v8282_v38 = vmul.f32 0.2, %v9482_v28  ;;  %vm8265_vm6 = vcmp.ge.f32.partialorder %v9475_v34, 0.0  ;;  %v8281_v39 = vmul.f32 0.2, %v9475_v34 }
 0x4de   :  { %8356 = vst [vmem:[%s14722_s3] sm:$0xff] %v9464_v33  ;;  %8357 = vst [vmem:[%s14722_s3 + $0x8] sm:$0xff] %v9465_v35  ;;  %v8296_v40 = vsel %vm8264_vm4, %v9474_v27, %v8280_v37  ;;  %vm8267_vm7 = vcmp.ge.f32.partialorder %v9483_v36, 0.0  ;;  %v8283_v42 = vmul.f32 0.2, %v9483_v36  ;;  %v7403_v44 = vpop.f32.mrb[4].mxu0  ;;  %v8251_v41 = vpop.f32.mrb[4].mxu1 }
 0x4df   :  { %v8298_v43 = vsel %vm8266_vm5, %v9482_v28, %v8282_v38  ;;  %v8297_v45 = vsel %vm8265_vm6, %v9475_v34, %v8281_v39  ;;  %v9476_v46 = vadd.f32 %v7403_v44, %v14671_v1  ;;  %v9484_v47 = vadd.f32 %v8251_v41, %v14673_v8  ;;  %v7405_v48 = vpop.f32.mrb[5].mxu0  ;;  %v8253_v51 = vpop.f32.mrb[5].mxu1 }
 0x4e0   :  { %v9466_v52 = vpack.c.bf16 %v8297_v45, %v8296_v40  ;;  %v8299_v49 = vsel %vm8267_vm7, %v9483_v36, %v8283_v42  ;;  %v9477_v50 = vadd.f32 %v7405_v48, %v14675_v11  ;;  %v9485_v53 = vadd.f32 %v8253_v51, %v14677_v12  ;;  %v7407_v54 = vpop.f32.mrb[6].mxu0  ;;  %v8255_v55 = vpop.f32.mrb[6].mxu1 }
 0x4e1   :  { %v9467_v56 = vpack.c.bf16 %v8299_v49, %v8298_v43  ;;  %vm8268_vm8 = vcmp.ge.f32.partialorder %v9476_v46, 0.0  ;;  %v8284_v59 = vmul.f32 0.2, %v9476_v46  ;;  %vm8270_vm9 = vcmp.ge.f32.partialorder %v9484_v47, 0.0  ;;  %v7409_v60 = vpop.f32.mrb[7].mxu0  ;;  %v8257_v57 = vpop.f32.mrb[7].mxu1 }
 0x4e2   :  { %8358 = vst [vmem:[%s14722_s3 + $0x10] sm:$0xff] %v9466_v52  ;;  %v8286_v58 = vmul.f32 0.2, %v9484_v47  ;;  %vm8269_vm10 = vcmp.ge.f32.partialorder %v9477_v50, 0.0  ;;  %v8285_v61 = vmul.f32 0.2, %v9477_v50  ;;  %v9478_v0 = vadd.f32 %v7407_v54, %v14671_v1 }
 0x4e3   :  { %vm8271_vm11 = vcmp.ge.f32.partialorder %v9485_v53, 0.0  ;;  %8359 = vst [vmem:[%s14722_s3 + $0x18] sm:$0xff] %v9467_v56  ;;  %v8300_v62 = vsel %vm8268_vm8, %v9476_v46, %v8284_v59  ;;  %v8287_v63 = vmul.f32 0.2, %v9485_v53  ;;  %v9486_v3 = vadd.f32 %v8255_v55, %v14673_v8 }
 0x4e4   :  { %v8302_v2 = vsel %vm8270_vm9, %v9484_v47, %v8286_v58  ;;  %v8301_v5 = vsel %vm8269_vm10, %v9477_v50, %v8285_v61  ;;  %v9479_v6 = vadd.f32 %v7409_v60, %v14675_v11  ;;  %v9487_v7 = vadd.f32 %v8257_v57, %v14677_v12 }
 0x4e5   :  { %v9468_v4 = vpack.c.bf16 %v8301_v5, %v8300_v62  ;;  %v8303_v9 = vsel %vm8271_vm11, %v9485_v53, %v8287_v63  ;;  %vm8272_vm12 = vcmp.ge.f32.partialorder %v9478_v0, 0.0  ;;  %v8288_v10 = vmul.f32 0.2, %v9478_v0 }
 0x4e6   :  { %v9469_v13 = vpack.c.bf16 %v8303_v9, %v8302_v2  ;;  %vm8274_vm13 = vcmp.ge.f32.partialorder %v9486_v3, 0.0  ;;  %v8290_v14 = vmul.f32 0.2, %v9486_v3  ;;  %vm8273_vm14 = vcmp.ge.f32.partialorder %v9479_v6, 0.0 }
 0x4e7   :  { %8360 = vst [vmem:[%s14722_s3 + $0x20] sm:$0xff] %v9468_v4  ;;  %v8304_v1 = vsel %vm8272_vm12, %v9478_v0, %v8288_v10  ;;  %v8289_v8 = vmul.f32 0.2, %v9479_v6  ;;  %vm8275_vm15 = vcmp.ge.f32.partialorder %v9487_v7, 0.0  ;;  %v8291_v15 = vmul.f32 0.2, %v9487_v7 }
 0x4e8   :  { %8361 = vst [vmem:[%s14722_s3 + $0x28] sm:$0xff] %v9469_v13  ;;  %v8306_v11 = vsel %vm8274_vm13, %v9486_v3, %v8290_v14 }
 0x4e9   :  { %v8305_v12 = vsel %vm8273_vm14, %v9479_v6, %v8289_v8  ;;  %v8307_v16 = vsel %vm8275_vm15, %v9487_v7, %v8291_v15 }
 0x4ea   :  { %v9470_v19 = vpack.c.bf16 %v8305_v12, %v8304_v1  ;;  %v9471_v17 = vpack.c.bf16 %v8307_v16, %v8306_v11 }
 0x4ec   :  { %8362 = vst [vmem:[%s14722_s3 + $0x30] sm:$0xff] %v9470_v19  ;;  %8363 = vst [vmem:[%s14722_s3 + $0x38] sm:$0xff] %v9471_v17 }

// kernel: discriminator_forward.9
= control target key start
LH: loop header
LB: loop body
LE: loop exit
PB: predicated region body
PF: predicated region fallthrough
CT: control target
= control target key end

     0   :  { %v7626_v22 = vmov 1966171168   ;;  %v1068_v24 = vlaneseq  ;;  %vm5878_vm0 = vcmask 1024   ;;  %s9327_s1 = inlined_call_operand.vmem [shape: bf16[8192,1], index: 1, kind: input, shape index: {}]   ;;  %s9328_s0 = inlined_call_operand.vmem [shape: bf16[2,8192], index: 0, kind: input, shape index: {}]   ;;  %s9329_s2 = inlined_call_operand.<no memory space> [shape: f32[1,1], index: 2, kind: input, shape index: {}]   ;;  %s9330_s3 = inlined_call_operand.vmem [shape: f32[2,1], index: 3, kind: output, shape index: {}]  }
   0x1   :  { %v7102_v0 = vld [vmem:[%s9327_s1 + $0x40] sm:$0xff]   ;;  %v7106_v4 = vld [vmem:[%s9327_s1 + $0x48] sm:$0xff]   ;;  %v7110_v8 = vld [vmem:[%s9327_s1 + $0x50] sm:$0xff]   ;;  %v1066_v23 = vunpack.c.l.s4 %v7626_v22 }
   0x2   :  { %v7103_v1 = vld [vmem:[%s9327_s1 + $0xc0] sm:$0xff]   ;;  %6397 = vmatprep.subr.bf16.mxu0 %v7102_v0  ;;  %v7107_v5 = vld [vmem:[%s9327_s1 + $0xc8] sm:$0xff]   ;;  %v7111_v9 = vld [vmem:[%s9327_s1 + $0xd0] sm:$0xff]   ;;  %v1069_v30 = vshrl.u32 %v1068_v24, 7 }
   0x3   :  { %v7104_v2 = vld [vmem:[%s9327_s1] sm:$0xff]   ;;  %6419 = vmatprep.subr.bf16.mxu1 %v7103_v1  ;;  %v7108_v6 = vld [vmem:[%s9327_s1 + $0x8] sm:$0xff]   ;;  %v7112_v10 = vld [vmem:[%s9327_s1 + $0x10] sm:$0xff]   ;;  %v1067_v29 = vunpack.c.0.s8 %v1066_v23 }
   0x4   :  { %v7105_v3 = vld [vmem:[%s9327_s1 + $0x80] sm:$0xff]   ;;  %6398 = vmatpush3.bf16.msra.mxu0 %v7104_v2  ;;  %v7109_v7 = vld [vmem:[%s9327_s1 + $0x88] sm:$0xff]   ;;  %v7113_v11 = vld [vmem:[%s9327_s1 + $0x90] sm:$0xff]  }
   0x5   :  { %6420 = vmatpush3.bf16.msra.mxu1 %v7105_v3  ;;  %6399 = vmatprep.subr.bf16.mxu0 %v7106_v4  ;;  %v7114_v12 = vld [vmem:[%s9327_s1 + $0x58] sm:$0xff]   ;;  %v7118_v16 = vld [vmem:[%s9327_s1 + $0x60] sm:$0xff]   ;;  %v7122_v20 = vld [vmem:[%s9327_s1 + $0x68] sm:$0xff]   ;;  %v7737_v35 = vsub.s32 %v1067_v29, %v1069_v30 }
   0x6   :  { %6421 = vmatprep.subr.bf16.mxu1 %v7107_v5  ;;  %v7115_v13 = vld [vmem:[%s9327_s1 + $0xd8] sm:$0xff]   ;;  %v7119_v17 = vld [vmem:[%s9327_s1 + $0xe0] sm:$0xff]   ;;  %v7123_v21 = vld [vmem:[%s9327_s1 + $0xe8] sm:$0xff]  }
   0x7   :  { %v7116_v14 = vld [vmem:[%s9327_s1 + $0x18] sm:$0xff]   ;;  %v7120_v18 = vld [vmem:[%s9327_s1 + $0x20] sm:$0xff]   ;;  %v7124_v25 = vld [vmem:[%s9327_s1 + $0x28] sm:$0xff]  }
   0x8   :  { %6400 = vmatpush3.bf16.msra.mxu0 %v7108_v6  ;;  %v7117_v15 = vld [vmem:[%s9327_s1 + $0x98] sm:$0xff]   ;;  %v7121_v19 = vld [vmem:[%s9327_s1 + $0xa0] sm:$0xff]   ;;  %v7125_v26 = vld [vmem:[%s9327_s1 + $0xa8] sm:$0xff]  }
   0x9   :  { %6422 = vmatpush3.bf16.msra.mxu1 %v7109_v7  ;;  %6401 = vmatprep.subr.bf16.mxu0 %v7110_v8  ;;  %v7126_v27 = vld [vmem:[%s9327_s1 + $0x70] sm:$0xff]   ;;  %v7130_v33 = vld [vmem:[%s9327_s1 + $0x78] sm:$0xff]   ;;  %v17_v38 = vld [vmem:[%s9328_s0] sm:$0xff] }
   0xa   :  { %6423 = vmatprep.subr.bf16.mxu1 %v7111_v9  ;;  %v7127_v28 = vld [vmem:[%s9327_s1 + $0xf0] sm:$0xff]   ;;  %v7131_v34 = vld [vmem:[%s9327_s1 + $0xf8] sm:$0xff]   ;;  %v1064_v39 = vcombine.high %v17_v38, %v17_v38  ;;  %v1071_v40 = vrot.slane %v17_v38, %v7737_v35  ;;  %v7135_v41 = vld [vmem:[%s9327_s1 + $0x140] sm:$0xff]  }
   0xb   :  { %v7128_v31 = vld [vmem:[%s9327_s1 + $0x30] sm:$0xff]   ;;  %v7132_v36 = vld [vmem:[%s9327_s1 + $0x38] sm:$0xff]   ;;  %v7136_v42 = vld [vmem:[%s9327_s1 + $0x1c0] sm:$0xff]  }
   0xc   :  { %6402 = vmatpush3.bf16.msra.mxu0 %v7112_v10  ;;  %v7129_v32 = vld [vmem:[%s9327_s1 + $0xb0] sm:$0xff]   ;;  %v7133_v37 = vld [vmem:[%s9327_s1 + $0xb8] sm:$0xff]   ;;  %v1079_v43 = vcombine.high %v1071_v40, %v1071_v40  ;;  %v1087_v44 = vrot.slane %v1071_v40, %v7737_v35  ;;  %v7757_v45 = vrot.slane %v1064_v39, %v7737_v35  ;;  %v7137_v46 = vld [vmem:[%s9327_s1 + $0x100] sm:$0xff]  }
   0xd   :  { %6424 = vmatpush3.bf16.msra.mxu1 %v7113_v11  ;;  %6403 = vmatprep.subr.bf16.mxu0 %v7114_v12  ;;  %v7138_v48 = vld [vmem:[%s9327_s1 + $0x180] sm:$0xff]   ;;  %v7139_v51 = vld [vmem:[%s9327_s1 + $0x148] sm:$0xff]   ;;  %v7143_v58 = vld [vmem:[%s9327_s1 + $0x150] sm:$0xff]  }
   0xe   :  { %6425 = vmatprep.subr.bf16.mxu1 %v7115_v13  ;;  %v1101_v47 = vrot.slane %v1079_v43, %v7737_v35  ;;  %v1080_v49 = vcombine.high %v7757_v45, %v7757_v45  ;;  %v1109_v50 = vcombine.high %v1087_v44, %v1087_v44  ;;  %v7140_v53 = vld [vmem:[%s9327_s1 + $0x1c8] sm:$0xff]   ;;  %v7144_v59 = vld [vmem:[%s9327_s1 + $0x1d0] sm:$0xff]   ;;  %v7147_v62 = vld [vmem:[%s9327_s1 + $0x158] sm:$0xff]  }
   0xf   :  { %v7141_v55 = vld [vmem:[%s9327_s1 + $0x108] sm:$0xff]   ;;  %v7145_v60 = vld [vmem:[%s9327_s1 + $0x110] sm:$0xff]   ;;  %v7148_v63 = vld [vmem:[%s9327_s1 + $0x1d8] sm:$0xff]  }
  0x10   :  { %6404 = vmatpush3.bf16.msra.mxu0 %v7116_v14  ;;  %4624 = vmatprep.mubr.bf16.mxu0 %v1101_v47  ;;  %v1111_v52 = vcombine.high %v1101_v47, %v1101_v47  ;;  %v1108_v54 = vrot.slane %v1080_v49, %v7737_v35  ;;  %v7142_v56 = vld [vmem:[%s9327_s1 + $0x188] sm:$0xff]   ;;  %v7146_v61 = vld [vmem:[%s9327_s1 + $0x190] sm:$0xff]   ;;  %v7149_v0 = vld [vmem:[%s9327_s1 + $0x118] sm:$0xff]  }
  0x11   :  { %6426 = vmatpush3.bf16.msra.mxu1 %v7117_v15  ;;  %6405 = vmatprep.subr.bf16.mxu0 %v7118_v16  ;;  %v7150_v1 = vld [vmem:[%s9327_s1 + $0x198] sm:$0xff]   ;;  %v7151_v2 = vld [vmem:[%s9327_s1 + $0x160] sm:$0xff]   ;;  %v7155_v6 = vld [vmem:[%s9327_s1 + $0x168] sm:$0xff]  }
  0x12   :  { %6427 = vmatprep.subr.bf16.mxu1 %v7119_v17  ;;  %4664 = vmatprep.mubr.bf16.mxu1 %v1111_v52  ;;  %v1112_v57 = vcombine.high %v1108_v54, %v1108_v54  ;;  %v7152_v3 = vld [vmem:[%s9327_s1 + $0x1e0] sm:$0xff]   ;;  %v7156_v7 = vld [vmem:[%s9327_s1 + $0x1e8] sm:$0xff]   ;;  %v7159_v10 = vld [vmem:[%s9327_s1 + $0x170] sm:$0xff]  }
  0x13   :  { %v7153_v4 = vld [vmem:[%s9327_s1 + $0x120] sm:$0xff]   ;;  %v7157_v8 = vld [vmem:[%s9327_s1 + $0x128] sm:$0xff]   ;;  %v7160_v11 = vld [vmem:[%s9327_s1 + $0x1f0] sm:$0xff]  }
  0x14   :  { %6406 = vmatpush3.bf16.msra.mxu0 %v7120_v18  ;;  %v7154_v5 = vld [vmem:[%s9327_s1 + $0x1a0] sm:$0xff]   ;;  %v7158_v9 = vld [vmem:[%s9327_s1 + $0x1a8] sm:$0xff]   ;;  %v7161_v12 = vld [vmem:[%s9327_s1 + $0x130] sm:$0xff]   ;;  %v1094_v18 = vrot.slane %v7757_v45, %v7737_v35 }
  0x15   :  { %6428 = vmatpush3.bf16.msra.mxu1 %v7121_v19  ;;  %6407 = vmatprep.subr.bf16.mxu0 %v7122_v20  ;;  %v7162_v13 = vld [vmem:[%s9327_s1 + $0x1b0] sm:$0xff]   ;;  %v7163_v14 = vld [vmem:[%s9327_s1 + $0x178] sm:$0xff]   ;;  %v7167_v19 = vld [vmem:[%s9327_s1 + $0x240] sm:$0xff]  }
  0x16   :  { %6429 = vmatprep.subr.bf16.mxu1 %v7123_v21  ;;  %v7164_v15 = vld [vmem:[%s9327_s1 + $0x1f8] sm:$0xff]   ;;  %v7168_v20 = vld [vmem:[%s9327_s1 + $0x2c0] sm:$0xff]   ;;  %v1110_v23 = vcombine.high %v1094_v18, %v1094_v18  ;;  %v7171_v24 = vld [vmem:[%s9327_s1 + $0x248] sm:$0xff]  }
  0x17   :  { %v7165_v16 = vld [vmem:[%s9327_s1 + $0x138] sm:$0xff]   ;;  %v7169_v21 = vld [vmem:[%s9327_s1 + $0x200] sm:$0xff]   ;;  %v7176_v29 = vld [vmem:[%s9327_s1 + $0x2d0] sm:$0xff]  }
  0x18   :  { %6408 = vmatpush3.bf16.msra.mxu0 %v7124_v25  ;;  %v7166_v17 = vld [vmem:[%s9327_s1 + $0x1b8] sm:$0xff]   ;;  %v7170_v22 = vld [vmem:[%s9327_s1 + $0x280] sm:$0xff]   ;;  %v7172_v25 = vld [vmem:[%s9327_s1 + $0x2c8] sm:$0xff]  }
  0x19   :  { %6430 = vmatpush3.bf16.msra.mxu1 %v7125_v26  ;;  %6409 = vmatprep.subr.bf16.mxu0 %v7126_v27  ;;  %v7173_v26 = vld [vmem:[%s9327_s1 + $0x208] sm:$0xff]   ;;  %v7177_v30 = vld [vmem:[%s9327_s1 + $0x210] sm:$0xff]   ;;  %v7184_v38 = vld [vmem:[%s9327_s1 + $0x2e0] sm:$0xff]  }
  0x1a   :  { %6431 = vmatprep.subr.bf16.mxu1 %v7127_v28  ;;  %v7174_v27 = vld [vmem:[%s9327_s1 + $0x288] sm:$0xff]   ;;  %v7175_v28 = vld [vmem:[%s9327_s1 + $0x250] sm:$0xff]   ;;  %v7185_v39 = vld [vmem:[%s9327_s1 + $0x220] sm:$0xff]  }
  0x1b   :  { %v7186_v40 = vld [vmem:[%s9327_s1 + $0x2a0] sm:$0xff]   ;;  %v7189_v43 = vld [vmem:[%s9327_s1 + $0x228] sm:$0xff]   ;;  %v7191_v45 = vld [vmem:[%s9327_s1 + $0x270] sm:$0xff]  }
  0x1c   :  { %6410 = vmatpush3.bf16.msra.mxu0 %v7128_v31  ;;  %v7178_v31 = vld [vmem:[%s9327_s1 + $0x290] sm:$0xff]   ;;  %v7195_v49 = vld [vmem:[%s9327_s1 + $0x278] sm:$0xff]   ;;  %v18_v52 = vld [vmem:[%s9328_s0 + $0x8] sm:$0xff] }
  0x1d   :  { %6432 = vmatpush3.bf16.msra.mxu1 %v7129_v32  ;;  %6411 = vmatprep.subr.bf16.mxu0 %v7130_v33  ;;  %v7179_v32 = vld [vmem:[%s9327_s1 + $0x258] sm:$0xff]   ;;  %v7193_v47 = vld [vmem:[%s9327_s1 + $0x230] sm:$0xff]  }
  0x1e   :  { %6433 = vmatprep.subr.bf16.mxu1 %v7131_v34  ;;  %v7180_v33 = vld [vmem:[%s9327_s1 + $0x2d8] sm:$0xff]  }
  0x1f   :  { %v7181_v34 = vld [vmem:[%s9327_s1 + $0x218] sm:$0xff]  }
  0x20   :  { %6412 = vmatpush3.bf16.msra.mxu0 %v7132_v36  ;;  %v7182_v36 = vld [vmem:[%s9327_s1 + $0x298] sm:$0xff]  }
  0x21   :  { %6434 = vmatpush3.bf16.msra.mxu1 %v7133_v37  ;;  %6441 = vmatprep.subr.bf16.mxu0 %v7135_v41  ;;  %v7183_v37 = vld [vmem:[%s9327_s1 + $0x260] sm:$0xff]   ;;  %v7187_v41 = vld [vmem:[%s9327_s1 + $0x268] sm:$0xff]  }
  0x22   :  { %6463 = vmatprep.subr.bf16.mxu1 %v7136_v42  ;;  %v7188_v42 = vld [vmem:[%s9327_s1 + $0x2e8] sm:$0xff]  }
  0x23   :  { %4625 = vmatmul.mubr.bf16.vlgmr.msra.gmra.mrb[0].mxu0 %v1087_v44  ;;  %v7190_v44 = vld [vmem:[%s9327_s1 + $0x2a8] sm:$0xff]  }
  0x24   :  { %6442 = vmatpush3.bf16.msra.mxu0 %v7137_v46  ;;  %4665 = vmatmul.mubr.bf16.vlgmr.msra.gmra.mrb[0].mxu1 %v1109_v50  ;;  %v7192_v46 = vld [vmem:[%s9327_s1 + $0x2f0] sm:$0xff]   ;;  %v7196_v50 = vld [vmem:[%s9327_s1 + $0x2f8] sm:$0xff]  }
  0x25   :  { %6443 = vmatprep.subr.bf16.mxu0 %v7139_v51  ;;  %6464 = vmatpush3.bf16.msra.mxu1 %v7138_v48  ;;  %v7194_v48 = vld [vmem:[%s9327_s1 + $0x2b0] sm:$0xff]   ;;  %v7197_v51 = vld [vmem:[%s9327_s1 + $0x238] sm:$0xff]  }
  0x26   :  { %4704 = vmatprep.mubr.bf16.mxu0 %v1108_v54  ;;  %6465 = vmatprep.subr.bf16.mxu1 %v7140_v53  ;;  %v7198_v53 = vld [vmem:[%s9327_s1 + $0x2b8] sm:$0xff]   ;;  %v1120_v54 = vrot.slane %v18_v52, %v7737_v35 }
  0x27   :  { %4744 = vmatprep.mubr.bf16.mxu1 %v1112_v57 }
  0x28   :  { %6444 = vmatpush3.bf16.msra.mxu0 %v7141_v55  ;;  %v1113_v55 = vcombine.high %v18_v52, %v18_v52  ;;  %v1128_v57 = vcombine.high %v1120_v54, %v1120_v54  ;;  %v7247_v52 = vld [vmem:[%s9327_s1 + $0x498] sm:$0xff]  }
  0x29   :  { %6445 = vmatprep.subr.bf16.mxu0 %v7143_v58  ;;  %6466 = vmatpush3.bf16.msra.mxu1 %v7142_v56  ;;  %v7199_v56 = vld [vmem:[%s9327_s1 + $0x340] sm:$0xff]   ;;  %v1136_v58 = vrot.slane %v1120_v54, %v7737_v35 }
  0x2a   :  { %6467 = vmatprep.subr.bf16.mxu1 %v7144_v59  ;;  %v7200_v59 = vld [vmem:[%s9327_s1 + $0x3c0] sm:$0xff]  }
  0x2b   :  { %v7249_v54 = vld [vmem:[%s9327_s1 + $0x4e0] sm:$0xff]  }
  0x2c   :  { %6446 = vmatpush3.bf16.msra.mxu0 %v7145_v60  ;;  %v7963_v60 = vrot.slane %v1113_v55, %v7737_v35  ;;  %v7250_v55 = vld [vmem:[%s9327_s1 + $0x420] sm:$0xff]  }
  0x2d   :  { %6447 = vmatprep.subr.bf16.mxu0 %v7147_v62  ;;  %6468 = vmatpush3.bf16.msra.mxu1 %v7146_v61  ;;  %v7201_v61 = vld [vmem:[%s9327_s1 + $0x300] sm:$0xff]   ;;  %v1150_v62 = vrot.slane %v1128_v57, %v7737_v35  ;;  %v7252_v57 = vld [vmem:[%s9327_s1 + $0x468] sm:$0xff]  }
  0x2e   :  { %6469 = vmatprep.subr.bf16.mxu1 %v7148_v63  ;;  %v7202_v63 = vld [vmem:[%s9327_s1 + $0x380] sm:$0xff]  }
  0x30   :  { %6448 = vmatpush3.bf16.msra.mxu0 %v7149_v0  ;;  %v1129_v0 = vcombine.high %v7963_v60, %v7963_v60 }
  0x31   :  { %6449 = vmatprep.subr.bf16.mxu0 %v7151_v2  ;;  %6470 = vmatpush3.bf16.msra.mxu1 %v7150_v1  ;;  %v1158_v1 = vcombine.high %v1136_v58, %v1136_v58  ;;  %v7203_v2 = vld [vmem:[%s9327_s1 + $0x348] sm:$0xff]  }
  0x32   :  { %6471 = vmatprep.subr.bf16.mxu1 %v7152_v3  ;;  %v1160_v3 = vcombine.high %v1150_v62, %v1150_v62 }
  0x34   :  { %6450 = vmatpush3.bf16.msra.mxu0 %v7153_v4  ;;  %v7204_v4 = vld [vmem:[%s9327_s1 + $0x3c8] sm:$0xff]  }
  0x35   :  { %6451 = vmatprep.subr.bf16.mxu0 %v7155_v6  ;;  %6472 = vmatpush3.bf16.msra.mxu1 %v7154_v5  ;;  %v1157_v5 = vrot.slane %v1129_v0, %v7737_v35  ;;  %v7205_v6 = vld [vmem:[%s9327_s1 + $0x308] sm:$0xff]   ;;  %v7259_v0 = vld [vmem:[%s9327_s1 + $0x4b0] sm:$0xff]  }
  0x36   :  { %6473 = vmatprep.subr.bf16.mxu1 %v7156_v7  ;;  %v7206_v7 = vld [vmem:[%s9327_s1 + $0x388] sm:$0xff]  }
  0x38   :  { %6452 = vmatpush3.bf16.msra.mxu0 %v7157_v8  ;;  %v1161_v8 = vcombine.high %v1157_v5, %v1157_v5 }
  0x39   :  { %6453 = vmatprep.subr.bf16.mxu0 %v7159_v10  ;;  %6474 = vmatpush3.bf16.msra.mxu1 %v7158_v9  ;;  %v7207_v9 = vld [vmem:[%s9327_s1 + $0x350] sm:$0xff]  }
  0x3a   :  { %6475 = vmatprep.subr.bf16.mxu1 %v7160_v11  ;;  %v7208_v10 = vld [vmem:[%s9327_s1 + $0x3d0] sm:$0xff]  }
  0x3b   :  { %v7209_v11 = vld [vmem:[%s9327_s1 + $0x310] sm:$0xff]  }
  0x3c   :  { %6454 = vmatpush3.bf16.msra.mxu0 %v7161_v12  ;;  %v7210_v12 = vld [vmem:[%s9327_s1 + $0x390] sm:$0xff]  }
  0x3d   :  { %6455 = vmatprep.subr.bf16.mxu0 %v7163_v14  ;;  %6476 = vmatpush3.bf16.msra.mxu1 %v7162_v13  ;;  %v7211_v13 = vld [vmem:[%s9327_s1 + $0x358] sm:$0xff]  }
  0x3e   :  { %6477 = vmatprep.subr.bf16.mxu1 %v7164_v15  ;;  %v7212_v14 = vld [vmem:[%s9327_s1 + $0x3d8] sm:$0xff]  }
  0x3f   :  { %v7213_v15 = vld [vmem:[%s9327_s1 + $0x318] sm:$0xff]  }
  0x40   :  { %6456 = vmatpush3.bf16.msra.mxu0 %v7165_v16  ;;  %v7214_v16 = vld [vmem:[%s9327_s1 + $0x398] sm:$0xff]  }
  0x41   :  { %6485 = vmatprep.subr.bf16.mxu0 %v7167_v19  ;;  %6478 = vmatpush3.bf16.msra.mxu1 %v7166_v17  ;;  %v7215_v17 = vld [vmem:[%s9327_s1 + $0x360] sm:$0xff]  }
  0x42   :  { %6507 = vmatprep.subr.bf16.mxu1 %v7168_v20  ;;  %v7217_v19 = vld [vmem:[%s9327_s1 + $0x320] sm:$0xff]  }
  0x43   :  { %4705 = vmatmul.mubr.bf16.vlgmr.msra.gmra.mrb[4].mxu0 %v1094_v18  ;;  %v7216_v18 = vld [vmem:[%s9327_s1 + $0x3e0] sm:$0xff]  }
  0x44   :  { %6486 = vmatpush3.bf16.msra.mxu0 %v7169_v21  ;;  %4745 = vmatmul.mubr.bf16.vlgmr.msra.gmra.mrb[4].mxu1 %v1110_v23  ;;  %v7218_v20 = vld [vmem:[%s9327_s1 + $0x3a0] sm:$0xff]   ;;  %v7219_v21 = vld [vmem:[%s9327_s1 + $0x368] sm:$0xff]  }
  0x45   :  { %6487 = vmatprep.subr.bf16.mxu0 %v7171_v24  ;;  %6508 = vmatpush3.bf16.msra.mxu1 %v7170_v22  ;;  %v7220_v22 = vld [vmem:[%s9327_s1 + $0x3e8] sm:$0xff]  }
  0x46   :  { %6509 = vmatprep.subr.bf16.mxu1 %v7172_v25  ;;  %4784 = vmatprep.mubr.bf16.mxu0 %v1150_v62  ;;  %v7221_v23 = vld [vmem:[%s9327_s1 + $0x328] sm:$0xff]   ;;  %v8_v25 = vstv %s9329_s2  ;;  %v7257_v62 = vld [vmem:[%s9327_s1 + $0x4f0] sm:$0xff]  }
  0x47   :  { %4824 = vmatprep.mubr.bf16.mxu1 %v1160_v3  ;;  %v7222_v24 = vld [vmem:[%s9327_s1 + $0x3a8] sm:$0xff]   ;;  %9 = vst [vmem:[#allocation2] sm:$0x1] %v8_v25  ;;  %v7262_v3 = vld [vmem:[%s9327_s1 + $0x438] sm:$0xff]   ;;  %v7272_v25 = vld [vmem:[%s9327_s1 + $0x550] sm:$0xff]  }
  0x48   :  { %6488 = vmatpush3.bf16.msra.mxu0 %v7173_v26  ;;  %v7223_v26 = vld [vmem:[%s9327_s1 + $0x370] sm:$0xff]  }
  0x49   :  { %6489 = vmatprep.subr.bf16.mxu0 %v7175_v28  ;;  %6510 = vmatpush3.bf16.msra.mxu1 %v7174_v27  ;;  %v7224_v27 = vld [vmem:[%s9327_s1 + $0x3f0] sm:$0xff]  }
  0x4a   :  { %6511 = vmatprep.subr.bf16.mxu1 %v7176_v29  ;;  %v7225_v28 = vld [vmem:[%s9327_s1 + $0x330] sm:$0xff]  }
  0x4b   :  { %v7226_v29 = vld [vmem:[%s9327_s1 + $0x3b0] sm:$0xff]  }
  0x4c   :  { %6490 = vmatpush3.bf16.msra.mxu0 %v7177_v30  ;;  %v7227_v30 = vld [vmem:[%s9327_s1 + $0x378] sm:$0xff]  }
  0x4d   :  { %6491 = vmatprep.subr.bf16.mxu0 %v7179_v32  ;;  %6512 = vmatpush3.bf16.msra.mxu1 %v7178_v31  ;;  %v7228_v31 = vld [vmem:[%s9327_s1 + $0x3f8] sm:$0xff]  }
  0x4e   :  { %6513 = vmatprep.subr.bf16.mxu1 %v7180_v33  ;;  %v7229_v32 = vld [vmem:[%s9327_s1 + $0x338] sm:$0xff]  }
  0x4f   :  { %v7230_v33 = vld [vmem:[%s9327_s1 + $0x3b8] sm:$0xff]  }
  0x50   :  { %6492 = vmatpush3.bf16.msra.mxu0 %v7181_v34  ;;  %v1143_v34 = vrot.slane %v7963_v60, %v7737_v35  ;;  %v7255_v60 = vld [vmem:[%s9327_s1 + $0x4a8] sm:$0xff]  }
  0x51   :  { %6493 = vmatprep.subr.bf16.mxu0 %v7183_v37  ;;  %6514 = vmatpush3.bf16.msra.mxu1 %v7182_v36  ;;  %v7232_v36 = vld [vmem:[%s9327_s1 + $0x440] sm:$0xff]  }
  0x52   :  { %6515 = vmatprep.subr.bf16.mxu1 %v7184_v38  ;;  %v7233_v37 = vld [vmem:[%s9327_s1 + $0x4c0] sm:$0xff]  }
  0x53   :  { %v7234_v38 = vld [vmem:[%s9327_s1 + $0x400] sm:$0xff]  }
  0x54   :  { %6494 = vmatpush3.bf16.msra.mxu0 %v7185_v39  ;;  %v7235_v39 = vld [vmem:[%s9327_s1 + $0x480] sm:$0xff]  }
  0x55   :  { %6495 = vmatprep.subr.bf16.mxu0 %v7187_v41  ;;  %6516 = vmatpush3.bf16.msra.mxu1 %v7186_v40  ;;  %v1159_v40 = vcombine.high %v1143_v34, %v1143_v34  ;;  %v7236_v41 = vld [vmem:[%s9327_s1 + $0x448] sm:$0xff]  }
  0x56   :  { %6517 = vmatprep.subr.bf16.mxu1 %v7188_v42  ;;  %v7237_v42 = vld [vmem:[%s9327_s1 + $0x4c8] sm:$0xff]  }
  0x58   :  { %6496 = vmatpush3.bf16.msra.mxu0 %v7189_v43  ;;  %v7238_v43 = vld [vmem:[%s9327_s1 + $0x408] sm:$0xff]  }
  0x59   :  { %6497 = vmatprep.subr.bf16.mxu0 %v7191_v45  ;;  %6518 = vmatpush3.bf16.msra.mxu1 %v7190_v44  ;;  %v7239_v44 = vld [vmem:[%s9327_s1 + $0x488] sm:$0xff]   ;;  %v7240_v45 = vld [vmem:[%s9327_s1 + $0x450] sm:$0xff]  }
  0x5a   :  { %6519 = vmatprep.subr.bf16.mxu1 %v7192_v46  ;;  %v7241_v46 = vld [vmem:[%s9327_s1 + $0x4d0] sm:$0xff]  }
  0x5c   :  { %6498 = vmatpush3.bf16.msra.mxu0 %v7193_v47  ;;  %v7242_v47 = vld [vmem:[%s9327_s1 + $0x410] sm:$0xff]  }
  0x5d   :  { %6499 = vmatprep.subr.bf16.mxu0 %v7195_v49  ;;  %6520 = vmatpush3.bf16.msra.mxu1 %v7194_v48  ;;  %v7243_v48 = vld [vmem:[%s9327_s1 + $0x490] sm:$0xff]   ;;  %v7244_v49 = vld [vmem:[%s9327_s1 + $0x458] sm:$0xff]  }
  0x5e   :  { %6521 = vmatprep.subr.bf16.mxu1 %v7196_v50  ;;  %v7245_v50 = vld [vmem:[%s9327_s1 + $0x4d8] sm:$0xff]  }
  0x60   :  { %6500 = vmatpush3.bf16.msra.mxu0 %v7197_v51  ;;  %v7246_v51 = vld [vmem:[%s9327_s1 + $0x418] sm:$0xff]  }
  0x61   :  { %6529 = vmatprep.subr.bf16.mxu0 %v7199_v56  ;;  %6522 = vmatpush3.bf16.msra.mxu1 %v7198_v53  ;;  %v7248_v53 = vld [vmem:[%s9327_s1 + $0x460] sm:$0xff]  }
  0x62   :  { %6551 = vmatprep.subr.bf16.mxu1 %v7200_v59  ;;  %v7251_v56 = vld [vmem:[%s9327_s1 + $0x4a0] sm:$0xff]   ;;  %v7254_v59 = vld [vmem:[%s9327_s1 + $0x428] sm:$0xff]  }
  0x63   :  { %4785 = vmatmul.mubr.bf16.vlgmr.msra.gmra.mrb[8].mxu0 %v1136_v58  ;;  %v7253_v58 = vld [vmem:[%s9327_s1 + $0x4e8] sm:$0xff]  }
  0x64   :  { %6530 = vmatpush3.bf16.msra.mxu0 %v7201_v61  ;;  %4825 = vmatmul.mubr.bf16.vlgmr.msra.gmra.mrb[8].mxu1 %v1158_v1  ;;  %v7256_v61 = vld [vmem:[%s9327_s1 + $0x470] sm:$0xff]   ;;  %v7260_v1 = vld [vmem:[%s9327_s1 + $0x478] sm:$0xff]  }
  0x65   :  { %6531 = vmatprep.subr.bf16.mxu0 %v7203_v2  ;;  %6552 = vmatpush3.bf16.msra.mxu1 %v7202_v63  ;;  %v7258_v63 = vld [vmem:[%s9327_s1 + $0x430] sm:$0xff]   ;;  %v7261_v2 = vld [vmem:[%s9327_s1 + $0x4f8] sm:$0xff]  }
  0x66   :  { %4864 = vmatprep.mubr.bf16.mxu0 %v1157_v5  ;;  %6553 = vmatprep.subr.bf16.mxu1 %v7204_v4  ;;  %v19_v4 = vld [vmem:[%s9328_s0 + $0x10] sm:$0xff]  ;;  %v7263_v5 = vld [vmem:[%s9327_s1 + $0x4b8] sm:$0xff]  }
  0x67   :  { %4904 = vmatprep.mubr.bf16.mxu1 %v1161_v8  ;;  %v7264_v8 = vld [vmem:[%s9327_s1 + $0x540] sm:$0xff]  }
  0x68   :  { %6532 = vmatpush3.bf16.msra.mxu0 %v7205_v6  ;;  %v1169_v6 = vrot.slane %v19_v4, %v7737_v35 }
  0x69   :  { %6533 = vmatprep.subr.bf16.mxu0 %v7207_v9  ;;  %6554 = vmatpush3.bf16.msra.mxu1 %v7206_v7  ;;  %v1162_v7 = vcombine.high %v19_v4, %v19_v4  ;;  %v7313_v4 = vld [vmem:[%s9327_s1 + $0x660] sm:$0xff]  }
  0x6a   :  { %6555 = vmatprep.subr.bf16.mxu1 %v7208_v10  ;;  %v1177_v9 = vcombine.high %v1169_v6, %v1169_v6  ;;  %v1185_v10 = vrot.slane %v1169_v6, %v7737_v35  ;;  %v7315_v6 = vld [vmem:[%s9327_s1 + $0x620] sm:$0xff]  }
  0x6c   :  { %6534 = vmatpush3.bf16.msra.mxu0 %v7209_v11  ;;  %v7265_v11 = vld [vmem:[%s9327_s1 + $0x5c0] sm:$0xff]  }
  0x6d   :  { %6535 = vmatprep.subr.bf16.mxu0 %v7211_v13  ;;  %6556 = vmatpush3.bf16.msra.mxu1 %v7210_v12  ;;  %v8172_v12 = vrot.slane %v1162_v7, %v7737_v35  ;;  %v7266_v13 = vld [vmem:[%s9327_s1 + $0x500] sm:$0xff]  }
  0x6e   :  { %6557 = vmatprep.subr.bf16.mxu1 %v7212_v14  ;;  %v1199_v14 = vrot.slane %v1177_v9, %v7737_v35  ;;  %v7316_v7 = vld [vmem:[%s9327_s1 + $0x6a0] sm:$0xff]   ;;  %v7318_v9 = vld [vmem:[%s9327_s1 + $0x6e8] sm:$0xff]  }
  0x70   :  { %6536 = vmatpush3.bf16.msra.mxu0 %v7213_v15  ;;  %v7267_v15 = vld [vmem:[%s9327_s1 + $0x580] sm:$0xff]  }
  0x71   :  { %6537 = vmatprep.subr.bf16.mxu0 %v7215_v17  ;;  %6558 = vmatpush3.bf16.msra.mxu1 %v7214_v16  ;;  %v1178_v16 = vcombine.high %v8172_v12, %v8172_v12  ;;  %v1207_v17 = vcombine.high %v1185_v10, %v1185_v10 }
  0x72   :  { %6559 = vmatprep.subr.bf16.mxu1 %v7216_v18  ;;  %v7268_v18 = vld [vmem:[%s9327_s1 + $0x548] sm:$0xff]  }
  0x74   :  { %6538 = vmatpush3.bf16.msra.mxu0 %v7217_v19  ;;  %v1209_v19 = vcombine.high %v1199_v14, %v1199_v14 }
  0x75   :  { %6539 = vmatprep.subr.bf16.mxu0 %v7219_v21  ;;  %6560 = vmatpush3.bf16.msra.mxu1 %v7218_v20  ;;  %v7269_v20 = vld [vmem:[%s9327_s1 + $0x5c8] sm:$0xff]   ;;  %v1206_v21 = vrot.slane %v1178_v16, %v7737_v35  ;;  %v7325_v16 = vld [vmem:[%s9327_s1 + $0x678] sm:$0xff]  }
  0x76   :  { %6561 = vmatprep.subr.bf16.mxu1 %v7220_v22  ;;  %v7270_v22 = vld [vmem:[%s9327_s1 + $0x508] sm:$0xff]  }
  0x78   :  { %6540 = vmatpush3.bf16.msra.mxu0 %v7221_v23  ;;  %v7271_v23 = vld [vmem:[%s9327_s1 + $0x588] sm:$0xff]  }
  0x79   :  { %6541 = vmatprep.subr.bf16.mxu0 %v7223_v26  ;;  %6562 = vmatpush3.bf16.msra.mxu1 %v7222_v24  ;;  %v1210_v24 = vcombine.high %v1206_v21, %v1206_v21  ;;  %v7273_v26 = vld [vmem:[%s9327_s1 + $0x5d0] sm:$0xff]  }
  0x7a   :  { %6563 = vmatprep.subr.bf16.mxu1 %v7224_v27  ;;  %v7274_v27 = vld [vmem:[%s9327_s1 + $0x510] sm:$0xff]  }
  0x7c   :  { %6542 = vmatpush3.bf16.msra.mxu0 %v7225_v28  ;;  %v7275_v28 = vld [vmem:[%s9327_s1 + $0x590] sm:$0xff]  }
  0x7d   :  { %6543 = vmatprep.subr.bf16.mxu0 %v7227_v30  ;;  %6564 = vmatpush3.bf16.msra.mxu1 %v7226_v29  ;;  %v7276_v29 = vld [vmem:[%s9327_s1 + $0x558] sm:$0xff]  }
  0x7e   :  { %6565 = vmatprep.subr.bf16.mxu1 %v7228_v31  ;;  %v7277_v30 = vld [vmem:[%s9327_s1 + $0x5d8] sm:$0xff]  }
  0x7f   :  { %v7278_v31 = vld [vmem:[%s9327_s1 + $0x518] sm:$0xff]  }
  0x80   :  { %6544 = vmatpush3.bf16.msra.mxu0 %v7229_v32  ;;  %v7279_v32 = vld [vmem:[%s9327_s1 + $0x598] sm:$0xff]  }
  0x81   :  { %6573 = vmatprep.subr.bf16.mxu0 %v7232_v36  ;;  %6566 = vmatpush3.bf16.msra.mxu1 %v7230_v33  ;;  %v7280_v33 = vld [vmem:[%s9327_s1 + $0x560] sm:$0xff]  }
  0x82   :  { %6595 = vmatprep.subr.bf16.mxu1 %v7233_v37  ;;  %v7282_v36 = vld [vmem:[%s9327_s1 + $0x520] sm:$0xff]  }
  0x83   :  { %4865 = vmatmul.mubr.bf16.vlgmr.msra.gmra.mrb[12].mxu0 %v1143_v34  ;;  %v7281_v34 = vld [vmem:[%s9327_s1 + $0x5e0] sm:$0xff]  }
  0x84   :  { %6574 = vmatpush3.bf16.msra.mxu0 %v7234_v38  ;;  %4905 = vmatmul.mubr.bf16.vlgmr.msra.gmra.mrb[12].mxu1 %v1159_v40  ;;  %v7283_v37 = vld [vmem:[%s9327_s1 + $0x5a0] sm:$0xff]   ;;  %v7284_v38 = vld [vmem:[%s9327_s1 + $0x568] sm:$0xff]  }
  0x85   :  { %6575 = vmatprep.subr.bf16.mxu0 %v7236_v41  ;;  %6596 = vmatpush3.bf16.msra.mxu1 %v7235_v39  ;;  %v7285_v39 = vld [vmem:[%s9327_s1 + $0x5e8] sm:$0xff]  }
  0x86   :  { %6597 = vmatprep.subr.bf16.mxu1 %v7237_v42  ;;  %4944 = vmatprep.mubr.bf16.mxu0 %v1199_v14  ;;  %v7286_v40 = vld [vmem:[%s9327_s1 + $0x528] sm:$0xff]   ;;  %v7288_v42 = vld [vmem:[%s9327_s1 + $0x570] sm:$0xff]  }
  0x87   :  { %4984 = vmatprep.mubr.bf16.mxu1 %v1209_v19  ;;  %v7287_v41 = vld [vmem:[%s9327_s1 + $0x5a8] sm:$0xff]   ;;  %v7323_v14 = vld [vmem:[%s9327_s1 + $0x630] sm:$0xff]   ;;  %v20_v19 = vld [vmem:[%s9328_s0 + $0x18] sm:$0xff] }
  0x88   :  { %6576 = vmatpush3.bf16.msra.mxu0 %v7238_v43  ;;  %v7289_v43 = vld [vmem:[%s9327_s1 + $0x5f0] sm:$0xff]  }
  0x89   :  { %6577 = vmatprep.subr.bf16.mxu0 %v7240_v45  ;;  %6598 = vmatpush3.bf16.msra.mxu1 %v7239_v44  ;;  %v7290_v44 = vld [vmem:[%s9327_s1 + $0x530] sm:$0xff]  }
  0x8a   :  { %6599 = vmatprep.subr.bf16.mxu1 %v7241_v46  ;;  %v7291_v45 = vld [vmem:[%s9327_s1 + $0x5b0] sm:$0xff]   ;;  %v7292_v46 = vld [vmem:[%s9327_s1 + $0x578] sm:$0xff]  }
  0x8c   :  { %6578 = vmatpush3.bf16.msra.mxu0 %v7242_v47  ;;  %v7293_v47 = vld [vmem:[%s9327_s1 + $0x5f8] sm:$0xff]  }
  0x8d   :  { %6579 = vmatprep.subr.bf16.mxu0 %v7244_v49  ;;  %6600 = vmatpush3.bf16.msra.mxu1 %v7243_v48  ;;  %v7294_v48 = vld [vmem:[%s9327_s1 + $0x538] sm:$0xff]  }
  0x8e   :  { %6601 = vmatprep.subr.bf16.mxu1 %v7245_v50  ;;  %v7295_v49 = vld [vmem:[%s9327_s1 + $0x5b8] sm:$0xff]   ;;  %v1192_v50 = vrot.slane %v8172_v12, %v7737_v35  ;;  %v7321_v12 = vld [vmem:[%s9327_s1 + $0x670] sm:$0xff]  }
  0x90   :  { %6580 = vmatpush3.bf16.msra.mxu0 %v7246_v51  ;;  %v7297_v51 = vld [vmem:[%s9327_s1 + $0x640] sm:$0xff]  }
  0x91   :  { %6581 = vmatprep.subr.bf16.mxu0 %v7248_v53  ;;  %6602 = vmatpush3.bf16.msra.mxu1 %v7247_v52  ;;  %v7298_v52 = vld [vmem:[%s9327_s1 + $0x6c0] sm:$0xff]  }
  0x92   :  { %6603 = vmatprep.subr.bf16.mxu1 %v7249_v54  ;;  %v7299_v53 = vld [vmem:[%s9327_s1 + $0x600] sm:$0xff]  }
  0x93   :  { %v7300_v54 = vld [vmem:[%s9327_s1 + $0x680] sm:$0xff]  }
  0x94   :  { %6582 = vmatpush3.bf16.msra.mxu0 %v7250_v55  ;;  %v1208_v55 = vcombine.high %v1192_v50, %v1192_v50 }
  0x95   :  { %6583 = vmatprep.subr.bf16.mxu0 %v7252_v57  ;;  %6604 = vmatpush3.bf16.msra.mxu1 %v7251_v56  ;;  %v7301_v56 = vld [vmem:[%s9327_s1 + $0x648] sm:$0xff]  }
  0x96   :  { %6605 = vmatprep.subr.bf16.mxu1 %v7253_v58  ;;  %v7302_v57 = vld [vmem:[%s9327_s1 + $0x6c8] sm:$0xff]  }
  0x97   :  { %v7303_v58 = vld [vmem:[%s9327_s1 + $0x608] sm:$0xff]  }
  0x98   :  { %6584 = vmatpush3.bf16.msra.mxu0 %v7254_v59  ;;  %v7304_v59 = vld [vmem:[%s9327_s1 + $0x688] sm:$0xff]  }
  0x99   :  { %6585 = vmatprep.subr.bf16.mxu0 %v7256_v61  ;;  %6606 = vmatpush3.bf16.msra.mxu1 %v7255_v60  ;;  %v7305_v60 = vld [vmem:[%s9327_s1 + $0x650] sm:$0xff]  }
  0x9a   :  { %6607 = vmatprep.subr.bf16.mxu1 %v7257_v62  ;;  %v7306_v61 = vld [vmem:[%s9327_s1 + $0x6d0] sm:$0xff]  }
  0x9b   :  { %v7307_v62 = vld [vmem:[%s9327_s1 + $0x610] sm:$0xff]  }
  0x9c   :  { %6586 = vmatpush3.bf16.msra.mxu0 %v7258_v63  ;;  %v7308_v63 = vld [vmem:[%s9327_s1 + $0x690] sm:$0xff]  }
  0x9d   :  { %6587 = vmatprep.subr.bf16.mxu0 %v7260_v1  ;;  %6608 = vmatpush3.bf16.msra.mxu1 %v7259_v0  ;;  %v7309_v0 = vld [vmem:[%s9327_s1 + $0x658] sm:$0xff]  }
  0x9e   :  { %6609 = vmatprep.subr.bf16.mxu1 %v7261_v2  ;;  %v7310_v1 = vld [vmem:[%s9327_s1 + $0x6d8] sm:$0xff]  }
  0x9f   :  { %v7311_v2 = vld [vmem:[%s9327_s1 + $0x618] sm:$0xff]  }
  0xa0   :  { %6588 = vmatpush3.bf16.msra.mxu0 %v7262_v3  ;;  %v7312_v3 = vld [vmem:[%s9327_s1 + $0x698] sm:$0xff]  }
  0xa1   :  { %6617 = vmatprep.subr.bf16.mxu0 %v7264_v8  ;;  %6610 = vmatpush3.bf16.msra.mxu1 %v7263_v5  ;;  %v7314_v5 = vld [vmem:[%s9327_s1 + $0x6e0] sm:$0xff]   ;;  %v7317_v8 = vld [vmem:[%s9327_s1 + $0x668] sm:$0xff]  }
  0xa2   :  { %6639 = vmatprep.subr.bf16.mxu1 %v7265_v11  ;;  %v7320_v11 = vld [vmem:[%s9327_s1 + $0x6a8] sm:$0xff]  }
  0xa3   :  { %4945 = vmatmul.mubr.bf16.vlgmr.msra.gmra.mrb[16].mxu0 %v1185_v10  ;;  %v7319_v10 = vld [vmem:[%s9327_s1 + $0x628] sm:$0xff]  }
  0xa4   :  { %6618 = vmatpush3.bf16.msra.mxu0 %v7266_v13  ;;  %4985 = vmatmul.mubr.bf16.vlgmr.msra.gmra.mrb[16].mxu1 %v1207_v17  ;;  %v7322_v13 = vld [vmem:[%s9327_s1 + $0x6f0] sm:$0xff]   ;;  %v7326_v17 = vld [vmem:[%s9327_s1 + $0x6f8] sm:$0xff]  }
  0xa5   :  { %6619 = vmatprep.subr.bf16.mxu0 %v7268_v18  ;;  %6640 = vmatpush3.bf16.msra.mxu1 %v7267_v15  ;;  %v7324_v15 = vld [vmem:[%s9327_s1 + $0x6b0] sm:$0xff]   ;;  %v7327_v18 = vld [vmem:[%s9327_s1 + $0x638] sm:$0xff]  }
  0xa6   :  { %5024 = vmatprep.mubr.bf16.mxu0 %v1206_v21  ;;  %6641 = vmatprep.subr.bf16.mxu1 %v7269_v20  ;;  %v1218_v20 = vrot.slane %v20_v19, %v7737_v35  ;;  %v7329_v21 = vld [vmem:[%s9327_s1 + $0x740] sm:$0xff]  }
  0xa7   :  { %5064 = vmatprep.mubr.bf16.mxu1 %v1210_v24 }
  0xa8   :  { %6620 = vmatpush3.bf16.msra.mxu0 %v7270_v22  ;;  %v1211_v22 = vcombine.high %v20_v19, %v20_v19  ;;  %v1226_v24 = vcombine.high %v1218_v20, %v1218_v20 }
  0xa9   :  { %6621 = vmatprep.subr.bf16.mxu0 %v7272_v25  ;;  %6642 = vmatpush3.bf16.msra.mxu1 %v7271_v23  ;;  %v7328_v23 = vld [vmem:[%s9327_s1 + $0x6b8] sm:$0xff]   ;;  %v1234_v25 = vrot.slane %v1218_v20, %v7737_v35  ;;  %v7366_v20 = vld [vmem:[%s9327_s1 + $0x848] sm:$0xff]  }
  0xaa   :  { %6643 = vmatprep.subr.bf16.mxu1 %v7273_v26  ;;  %v7330_v26 = vld [vmem:[%s9327_s1 + $0x7c0] sm:$0xff]  }
  0xac   :  { %6622 = vmatpush3.bf16.msra.mxu0 %v7274_v27  ;;  %v8378_v27 = vrot.slane %v1211_v22, %v7737_v35  ;;  %v7368_v22 = vld [vmem:[%s9327_s1 + $0x808] sm:$0xff]  }
  0xad   :  { %6623 = vmatprep.subr.bf16.mxu0 %v7276_v29  ;;  %6644 = vmatpush3.bf16.msra.mxu1 %v7275_v28  ;;  %v1248_v28 = vrot.slane %v1226_v24, %v7737_v35  ;;  %v7331_v29 = vld [vmem:[%s9327_s1 + $0x700] sm:$0xff]   ;;  %v7370_v24 = vld [vmem:[%s9327_s1 + $0x850] sm:$0xff]  }
  0xae   :  { %6645 = vmatprep.subr.bf16.mxu1 %v7277_v30  ;;  %v1227_v30 = vcombine.high %v8378_v27, %v8378_v27 }
  0xb0   :  { %6624 = vmatpush3.bf16.msra.mxu0 %v7278_v31  ;;  %v1256_v31 = vcombine.high %v1234_v25, %v1234_v25 }
  0xb1   :  { %6625 = vmatprep.subr.bf16.mxu0 %v7280_v33  ;;  %6646 = vmatpush3.bf16.msra.mxu1 %v7279_v32  ;;  %v7333_v32 = vld [vmem:[%s9327_s1 + $0x748] sm:$0xff]   ;;  %v1258_v33 = vcombine.high %v1248_v28, %v1248_v28 }
  0xb2   :  { %6647 = vmatprep.subr.bf16.mxu1 %v7281_v34  ;;  %v7332_v34 = vld [vmem:[%s9327_s1 + $0x780] sm:$0xff]  }
  0xb4   :  { %6626 = vmatpush3.bf16.msra.mxu0 %v7282_v36  ;;  %v1255_v36 = vrot.slane %v1227_v30, %v7737_v35  ;;  %v7376_v30 = vld [vmem:[%s9327_s1 + $0x818] sm:$0xff]  }
  0xb5   :  { %6627 = vmatprep.subr.bf16.mxu0 %v7284_v38  ;;  %6648 = vmatpush3.bf16.msra.mxu1 %v7283_v37  ;;  %v7334_v37 = vld [vmem:[%s9327_s1 + $0x7c8] sm:$0xff]  }
  0xb6   :  { %6649 = vmatprep.subr.bf16.mxu1 %v7285_v39  ;;  %v7335_v38 = vld [vmem:[%s9327_s1 + $0x708] sm:$0xff]   ;;  %v1259_v39 = vcombine.high %v1255_v36, %v1255_v36 }
  0xb8   :  { %6628 = vmatpush3.bf16.msra.mxu0 %v7286_v40  ;;  %v7337_v40 = vld [vmem:[%s9327_s1 + $0x750] sm:$0xff]  }
  0xb9   :  { %6629 = vmatprep.subr.bf16.mxu0 %v7288_v42  ;;  %6650 = vmatpush3.bf16.msra.mxu1 %v7287_v41  ;;  %v7336_v41 = vld [vmem:[%s9327_s1 + $0x788] sm:$0xff]   ;;  %v7338_v42 = vld [vmem:[%s9327_s1 + $0x7d0] sm:$0xff]  }
  0xba   :  { %6651 = vmatprep.subr.bf16.mxu1 %v7289_v43  ;;  %v7339_v43 = vld [vmem:[%s9327_s1 + $0x710] sm:$0xff]  }
  0xbc   :  { %6630 = vmatpush3.bf16.msra.mxu0 %v7290_v44  ;;  %v7341_v44 = vld [vmem:[%s9327_s1 + $0x758] sm:$0xff]  }
  0xbd   :  { %6631 = vmatprep.subr.bf16.mxu0 %v7292_v46  ;;  %6652 = vmatpush3.bf16.msra.mxu1 %v7291_v45  ;;  %v7340_v45 = vld [vmem:[%s9327_s1 + $0x790] sm:$0xff]   ;;  %v7342_v46 = vld [vmem:[%s9327_s1 + $0x7d8] sm:$0xff]  }
  0xbe   :  { %6653 = vmatprep.subr.bf16.mxu1 %v7293_v47  ;;  %v7343_v47 = vld [vmem:[%s9327_s1 + $0x718] sm:$0xff]  }
  0xc0   :  { %6632 = vmatpush3.bf16.msra.mxu0 %v7294_v48  ;;  %v7345_v48 = vld [vmem:[%s9327_s1 + $0x760] sm:$0xff]  }
  0xc1   :  { %6661 = vmatprep.subr.bf16.mxu0 %v7297_v51  ;;  %6654 = vmatpush3.bf16.msra.mxu1 %v7295_v49  ;;  %v7344_v49 = vld [vmem:[%s9327_s1 + $0x798] sm:$0xff]   ;;  %v7347_v51 = vld [vmem:[%s9327_s1 + $0x720] sm:$0xff]  }
  0xc2   :  { %6683 = vmatprep.subr.bf16.mxu1 %v7298_v52  ;;  %v7349_v52 = vld [vmem:[%s9327_s1 + $0x768] sm:$0xff]  }
  0xc3   :  { %5025 = vmatmul.mubr.bf16.vlgmr.msra.gmra.mrb[20].mxu0 %v1192_v50  ;;  %v7346_v50 = vld [vmem:[%s9327_s1 + $0x7e0] sm:$0xff]  }
  0xc4   :  { %6662 = vmatpush3.bf16.msra.mxu0 %v7299_v53  ;;  %5065 = vmatmul.mubr.bf16.vlgmr.msra.gmra.mrb[20].mxu1 %v1208_v55  ;;  %v7348_v53 = vld [vmem:[%s9327_s1 + $0x7a0] sm:$0xff]  }
  0xc5   :  { %6663 = vmatprep.subr.bf16.mxu0 %v7301_v56  ;;  %6684 = vmatpush3.bf16.msra.mxu1 %v7300_v54  ;;  %v7350_v54 = vld [vmem:[%s9327_s1 + $0x7e8] sm:$0xff]   ;;  %v5884_v55 = vld [vmem:[#allocation2] ss:$0 sm:$0xff] }
  0xc6   :  { %6685 = vmatprep.subr.bf16.mxu1 %v7302_v57  ;;  %5104 = vmatprep.mubr.bf16.mxu0 %v1248_v28  ;;  %v7351_v56 = vld [vmem:[%s9327_s1 + $0x728] sm:$0xff]   ;;  %v7374_v28 = vld [vmem:[%s9327_s1 + $0x858] sm:$0xff]  }
  0xc7   :  { %5144 = vmatprep.mubr.bf16.mxu1 %v1258_v33  ;;  %v7379_v33 = vld [vmem:[%s9327_s1 + $0x8e0] sm:$0xff]  }
  0xc8   :  { %6664 = vmatpush3.bf16.msra.mxu0 %v7303_v58  ;;  %v7353_v58 = vld [vmem:[%s9327_s1 + $0x770] sm:$0xff]  }
  0xc9   :  { %6665 = vmatprep.subr.bf16.mxu0 %v7305_v60  ;;  %6686 = vmatpush3.bf16.msra.mxu1 %v7304_v59  ;;  %v7352_v60 = vld [vmem:[%s9327_s1 + $0x7a8] sm:$0xff]  }
  0xca   :  { %6687 = vmatprep.subr.bf16.mxu1 %v7306_v61 }
  0xcc   :  { %6666 = vmatpush3.bf16.msra.mxu0 %v7307_v62 }
  0xcd   :  { %6667 = vmatprep.subr.bf16.mxu0 %v7309_v0  ;;  %6688 = vmatpush3.bf16.msra.mxu1 %v7308_v63  ;;  %v7354_v0 = vld [vmem:[%s9327_s1 + $0x7f0] sm:$0xff]  }
  0xce   :  { %6689 = vmatprep.subr.bf16.mxu1 %v7310_v1  ;;  %v7355_v1 = vld [vmem:[%s9327_s1 + $0x730] sm:$0xff]  }
  0xd0   :  { %6668 = vmatpush3.bf16.msra.mxu0 %v7311_v2 }
  0xd1   :  { %6669 = vmatprep.subr.bf16.mxu0 %v7313_v4  ;;  %6690 = vmatpush3.bf16.msra.mxu1 %v7312_v3  ;;  %v7356_v4 = vld [vmem:[%s9327_s1 + $0x7b0] sm:$0xff]  }
  0xd2   :  { %6691 = vmatprep.subr.bf16.mxu1 %v7314_v5 }
  0xd4   :  { %6670 = vmatpush3.bf16.msra.mxu0 %v7315_v6 }
  0xd5   :  { %6671 = vmatprep.subr.bf16.mxu0 %v7317_v8  ;;  %6692 = vmatpush3.bf16.msra.mxu1 %v7316_v7  ;;  %v7357_v8 = vld [vmem:[%s9327_s1 + $0x778] sm:$0xff]  }
  0xd6   :  { %6693 = vmatprep.subr.bf16.mxu1 %v7318_v9 }
  0xd8   :  { %6672 = vmatpush3.bf16.msra.mxu0 %v7319_v10  ;;  %v7358_v10 = vld [vmem:[%s9327_s1 + $0x7f8] sm:$0xff]  }
  0xd9   :  { %6673 = vmatprep.subr.bf16.mxu0 %v7321_v12  ;;  %6694 = vmatpush3.bf16.msra.mxu1 %v7320_v11  ;;  %v7359_v12 = vld [vmem:[%s9327_s1 + $0x738] sm:$0xff]  }
  0xda   :  { %6695 = vmatprep.subr.bf16.mxu1 %v7322_v13  ;;  %v7360_v13 = vld [vmem:[%s9327_s1 + $0x7b8] sm:$0xff]  }
  0xdc   :  { %6674 = vmatpush3.bf16.msra.mxu0 %v7323_v14  ;;  %v1241_v14 = vrot.slane %v8378_v27, %v7737_v35  ;;  %v7373_v27 = vld [vmem:[%s9327_s1 + $0x890] sm:$0xff]  }
  0xdd   :  { %6675 = vmatprep.subr.bf16.mxu0 %v7325_v16  ;;  %6696 = vmatpush3.bf16.msra.mxu1 %v7324_v15  ;;  %v7362_v15 = vld [vmem:[%s9327_s1 + $0x840] sm:$0xff]  }
  0xde   :  { %6697 = vmatprep.subr.bf16.mxu1 %v7326_v17  ;;  %v7363_v16 = vld [vmem:[%s9327_s1 + $0x8c0] sm:$0xff]   ;;  %v1257_v19 = vcombine.high %v1241_v14, %v1241_v14 }
  0xdf   :  { %v7364_v17 = vld [vmem:[%s9327_s1 + $0x800] sm:$0xff]  }
  0xe0   :  { %6676 = vmatpush3.bf16.msra.mxu0 %v7327_v18  ;;  %v7365_v18 = vld [vmem:[%s9327_s1 + $0x880] sm:$0xff]  }
  0xe1   :  { %6705 = vmatprep.subr.bf16.mxu0 %v7329_v21  ;;  %6698 = vmatpush3.bf16.msra.mxu1 %v7328_v23  ;;  %v7367_v21 = vld [vmem:[%s9327_s1 + $0x8c8] sm:$0xff]  }
  0xe2   :  { %6727 = vmatprep.subr.bf16.mxu1 %v7330_v26  ;;  %v7369_v23 = vld [vmem:[%s9327_s1 + $0x888] sm:$0xff]   ;;  %v7372_v26 = vld [vmem:[%s9327_s1 + $0x810] sm:$0xff]  }
  0xe3   :  { %5105 = vmatmul.mubr.bf16.vlgmr.msra.gmra.mrb[24].mxu0 %v1234_v25  ;;  %v7371_v25 = vld [vmem:[%s9327_s1 + $0x8d0] sm:$0xff]  }
  0xe4   :  { %6706 = vmatpush3.bf16.msra.mxu0 %v7331_v29  ;;  %5145 = vmatmul.mubr.bf16.vlgmr.msra.gmra.mrb[24].mxu1 %v1256_v31  ;;  %v7375_v29 = vld [vmem:[%s9327_s1 + $0x8d8] sm:$0xff]  }
  0xe5   :  { %6707 = vmatprep.subr.bf16.mxu0 %v7333_v32  ;;  %6728 = vmatpush3.bf16.msra.mxu1 %v7332_v34  ;;  %v7377_v31 = vld [vmem:[%s9327_s1 + $0x898] sm:$0xff]   ;;  %v7378_v32 = vld [vmem:[%s9327_s1 + $0x860] sm:$0xff]  }
  0xe6   :  { %5184 = vmatprep.mubr.bf16.mxu0 %v1255_v36  ;;  %6729 = vmatprep.subr.bf16.mxu1 %v7334_v37  ;;  %v7380_v34 = vld [vmem:[%s9327_s1 + $0x820] sm:$0xff]   ;;  %v7382_v37 = vld [vmem:[%s9327_s1 + $0x868] sm:$0xff]  }
  0xe7   :  { %5224 = vmatprep.mubr.bf16.mxu1 %v1259_v39  ;;  %v7381_v36 = vld [vmem:[%s9327_s1 + $0x8a0] sm:$0xff]   ;;  %v7384_v39 = vld [vmem:[%s9327_s1 + $0x828] sm:$0xff]  }
  0xe8   :  { %6708 = vmatpush3.bf16.msra.mxu0 %v7335_v38  ;;  %v7383_v38 = vld [vmem:[%s9327_s1 + $0x8e8] sm:$0xff]  }
  0xe9   :  { %6709 = vmatprep.subr.bf16.mxu0 %v7337_v40  ;;  %6730 = vmatpush3.bf16.msra.mxu1 %v7336_v41  ;;  %v7385_v40 = vld [vmem:[%s9327_s1 + $0x8a8] sm:$0xff]  }
  0xea   :  { %6731 = vmatprep.subr.bf16.mxu1 %v7338_v42  ;;  %v7386_v42 = vld [vmem:[%s9327_s1 + $0x870] sm:$0xff]  }
  0xec   :  { %6710 = vmatpush3.bf16.msra.mxu0 %v7339_v43 }
  0xed   :  { %6711 = vmatprep.subr.bf16.mxu0 %v7341_v44  ;;  %6732 = vmatpush3.bf16.msra.mxu1 %v7340_v45  ;;  %v7387_v44 = vld [vmem:[%s9327_s1 + $0x8f0] sm:$0xff]  }
  0xee   :  { %6733 = vmatprep.subr.bf16.mxu1 %v7342_v46 }
  0xf0   :  { %6712 = vmatpush3.bf16.msra.mxu0 %v7343_v47 }
  0xf1   :  { %6713 = vmatprep.subr.bf16.mxu0 %v7345_v48  ;;  %6734 = vmatpush3.bf16.msra.mxu1 %v7344_v49 }
  0xf2   :  { %6735 = vmatprep.subr.bf16.mxu1 %v7346_v50  ;;  %v7388_v50 = vld [vmem:[%s9327_s1 + $0x830] sm:$0xff]  }
  0xf4   :  { %6714 = vmatpush3.bf16.msra.mxu0 %v7347_v51  ;;  %v7389_v51 = vld [vmem:[%s9327_s1 + $0x8b0] sm:$0xff]  }
  0xf5   :  { %6715 = vmatprep.subr.bf16.mxu0 %v7349_v52  ;;  %6736 = vmatpush3.bf16.msra.mxu1 %v7348_v53 }
  0xf6   :  { %v6413_v57 = vpop.f32.mrb[0].mxu0  ;;  %6737 = vmatprep.subr.bf16.mxu1 %v7350_v54 }
  0xf7   :  { %v6414_v59 = vpop.f32.mrb[1].mxu0  ;;  %v6435_v61 = vpop.f32.mrb[0].mxu1 }
  0xf8   :  { %v6415_v62 = vadd.f32 %v6414_v59, %v6413_v57  ;;  %v6416_v63 = vpop.f32.mrb[2].mxu0  ;;  %v6436_v2 = vpop.f32.mrb[1].mxu1  ;;  %6716 = vmatpush3.bf16.msra.mxu0 %v7351_v56  ;;  %v7391_v57 = vld [vmem:[%s9327_s1 + $0x8f8] sm:$0xff]  }
  0xf9   :  { %v6417_v3 = vpop.f32.mrb[3].mxu0  ;;  %v6437_v6 = vadd.f32 %v6436_v2, %v6435_v61  ;;  %v6438_v7 = vpop.f32.mrb[2].mxu1  ;;  %6717 = vmatprep.subr.bf16.mxu0 %v7353_v58  ;;  %6738 = vmatpush3.bf16.msra.mxu1 %v7352_v60  ;;  %v7392_v59 = vld [vmem:[%s9327_s1 + $0x838] sm:$0xff]   ;;  %v21_v60 = vld [vmem:[%s9328_s0 + $0x20] sm:$0xff] }
  0xfa   :  { %v4627_v5 = vadd.f32 %v6415_v62, %v5884_v55  ;;  %v6439_v9 = vpop.f32.mrb[3].mxu1  ;;  %6739 = vmatprep.subr.bf16.mxu1 %v7354_v0  ;;  %v7390_v55 = vld [vmem:[%s9327_s1 + $0x878] sm:$0xff]   ;;  %v1267_v61 = vrot.slane %v21_v60, %v7737_v35  ;;  %v7394_v62 = vld [vmem:[%s9327_s1 + $0x940] sm:$0xff]   ;;  %v1260_v63 = vcombine.high %v21_v60, %v21_v60  ;;  %v7431_v60 = vld [vmem:[%s9327_s1 + $0xa48] sm:$0xff]  }
  0xfb   :  { %v7393_v0 = vld [vmem:[%s9327_s1 + $0x8b8] sm:$0xff]   ;;  %v7395_v3 = vld [vmem:[%s9327_s1 + $0x9c0] sm:$0xff]  }
  0xfc   :  { %v8468_v11 = vadd.f32 %v6437_v6, %v4627_v5  ;;  %6718 = vmatpush3.bf16.msra.mxu0 %v7355_v1  ;;  %v1275_v1 = vcombine.high %v1267_v61, %v1267_v61  ;;  %v1283_v2 = vrot.slane %v1267_v61, %v7737_v35  ;;  %v7396_v5 = vld [vmem:[%s9327_s1 + $0x900] sm:$0xff]   ;;  %v7432_v61 = vld [vmem:[%s9327_s1 + $0xac8] sm:$0xff]  }
  0xfd   :  { %6719 = vmatprep.subr.bf16.mxu0 %v7357_v8  ;;  %6740 = vmatpush3.bf16.msra.mxu1 %v7356_v4  ;;  %v8589_v4 = vrot.slane %v1260_v63, %v7737_v35  ;;  %v7397_v7 = vld [vmem:[%s9327_s1 + $0x980] sm:$0xff]   ;;  %v7434_v63 = vld [vmem:[%s9327_s1 + $0xa88] sm:$0xff]  }
  0xfe   :  { %6741 = vmatprep.subr.bf16.mxu1 %v7358_v10  ;;  %v1297_v6 = vrot.slane %v1275_v1, %v7737_v35  ;;  %v1305_v9 = vcombine.high %v1283_v2, %v1283_v2  ;;  %v7398_v10 = vld [vmem:[%s9327_s1 + $0x948] sm:$0xff]   ;;  %v7436_v1 = vld [vmem:[%s9327_s1 + $0xad0] sm:$0xff]  }
  0xff   :  { %v1276_v8 = vcombine.high %v8589_v4, %v8589_v4 }
 0x100   :  { %6720 = vmatpush3.bf16.msra.mxu0 %v7359_v12  ;;  %v7399_v12 = vld [vmem:[%s9327_s1 + $0x9c8] sm:$0xff]  }
 0x101   :  { %6749 = vmatprep.subr.bf16.mxu0 %v7362_v15  ;;  %6742 = vmatpush3.bf16.msra.mxu1 %v7360_v13  ;;  %v1304_v13 = vrot.slane %v1276_v8, %v7737_v35  ;;  %v7401_v15 = vld [vmem:[%s9327_s1 + $0x988] sm:$0xff]   ;;  %v7443_v8 = vld [vmem:[%s9327_s1 + $0xa60] sm:$0xff]  }
 0x102   :  { %6771 = vmatprep.subr.bf16.mxu1 %v7363_v16 }
 0x103   :  { %5185 = vmatmul.mubr.bf16.vlgmr.msra.gmra.mrb[28].mxu0 %v1241_v14  ;;  %v7400_v14 = vld [vmem:[%s9327_s1 + $0x908] sm:$0xff]   ;;  %v1308_v16 = vcombine.high %v1304_v13, %v1304_v13 }
 0x104   :  { %6750 = vmatpush3.bf16.msra.mxu0 %v7364_v17  ;;  %5225 = vmatmul.mubr.bf16.vlgmr.msra.gmra.mrb[28].mxu1 %v1257_v19  ;;  %v7402_v17 = vld [vmem:[%s9327_s1 + $0x950] sm:$0xff]  }
 0x105   :  { %6751 = vmatprep.subr.bf16.mxu0 %v7366_v20  ;;  %6772 = vmatpush3.bf16.msra.mxu1 %v7365_v18  ;;  %v7403_v18 = vld [vmem:[%s9327_s1 + $0x9d0] sm:$0xff]  }
 0x106   :  { %6773 = vmatprep.subr.bf16.mxu1 %v7367_v21  ;;  %5264 = vmatprep.mubr.bf16.mxu0 %v1297_v6  ;;  %v7404_v19 = vld [vmem:[%s9327_s1 + $0x910] sm:$0xff]   ;;  %v7406_v21 = vld [vmem:[%s9327_s1 + $0x958] sm:$0xff]  }
 0x107   :  { %v7405_v20 = vld [vmem:[%s9327_s1 + $0x990] sm:$0xff]  }
 0x108   :  { %6752 = vmatpush3.bf16.msra.mxu0 %v7368_v22  ;;  %v7407_v22 = vld [vmem:[%s9327_s1 + $0x9d8] sm:$0xff]  }
 0x109   :  { %6753 = vmatprep.subr.bf16.mxu0 %v7370_v24  ;;  %6774 = vmatpush3.bf16.msra.mxu1 %v7369_v23  ;;  %v7408_v23 = vld [vmem:[%s9327_s1 + $0x918] sm:$0xff]  }
 0x10a   :  { %6775 = vmatprep.subr.bf16.mxu1 %v7371_v25  ;;  %v7409_v24 = vld [vmem:[%s9327_s1 + $0x998] sm:$0xff]   ;;  %v7410_v25 = vld [vmem:[%s9327_s1 + $0x960] sm:$0xff]  }
 0x10c   :  { %6754 = vmatpush3.bf16.msra.mxu0 %v7372_v26  ;;  %v7411_v26 = vld [vmem:[%s9327_s1 + $0x9e0] sm:$0xff]  }
 0x10d   :  { %6755 = vmatprep.subr.bf16.mxu0 %v7374_v28  ;;  %6776 = vmatpush3.bf16.msra.mxu1 %v7373_v27  ;;  %v7412_v27 = vld [vmem:[%s9327_s1 + $0x920] sm:$0xff]  }
 0x10e   :  { %6777 = vmatprep.subr.bf16.mxu1 %v7375_v29  ;;  %v7413_v28 = vld [vmem:[%s9327_s1 + $0x9a0] sm:$0xff]   ;;  %v7414_v29 = vld [vmem:[%s9327_s1 + $0x968] sm:$0xff]  }
 0x110   :  { %6756 = vmatpush3.bf16.msra.mxu0 %v7376_v30  ;;  %v7415_v30 = vld [vmem:[%s9327_s1 + $0x9e8] sm:$0xff]  }
 0x111   :  { %6757 = vmatprep.subr.bf16.mxu0 %v7378_v32  ;;  %6778 = vmatpush3.bf16.msra.mxu1 %v7377_v31  ;;  %v7416_v31 = vld [vmem:[%s9327_s1 + $0x928] sm:$0xff]  }
 0x112   :  { %6779 = vmatprep.subr.bf16.mxu1 %v7379_v33  ;;  %v7417_v33 = vld [vmem:[%s9327_s1 + $0x9a8] sm:$0xff]  }
 0x114   :  { %6758 = vmatpush3.bf16.msra.mxu0 %v7380_v34 }
 0x115   :  { %6759 = vmatprep.subr.bf16.mxu0 %v7382_v37  ;;  %6780 = vmatpush3.bf16.msra.mxu1 %v7381_v36  ;;  %v7418_v36 = vld [vmem:[%s9327_s1 + $0x970] sm:$0xff]  }
 0x116   :  { %v6457_v41 = vpop.f32.mrb[4].mxu0  ;;  %6781 = vmatprep.subr.bf16.mxu1 %v7383_v38 }
 0x117   :  { %v6458_v43 = vpop.f32.mrb[5].mxu0  ;;  %v6479_v45 = vpop.f32.mrb[4].mxu1 }
 0x118   :  { %v6459_v46 = vadd.f32 %v6458_v43, %v6457_v41  ;;  %v6460_v47 = vpop.f32.mrb[6].mxu0  ;;  %v6480_v48 = vpop.f32.mrb[5].mxu1  ;;  %6760 = vmatpush3.bf16.msra.mxu0 %v7384_v39  ;;  %v7420_v41 = vld [vmem:[%s9327_s1 + $0x930] sm:$0xff]  }
 0x119   :  { %v6461_v49 = vpop.f32.mrb[7].mxu0  ;;  %v6481_v53 = vadd.f32 %v6480_v48, %v6479_v45  ;;  %v6482_v54 = vpop.f32.mrb[6].mxu1  ;;  %6761 = vmatprep.subr.bf16.mxu0 %v7386_v42  ;;  %6782 = vmatpush3.bf16.msra.mxu1 %v7385_v40  ;;  %v7419_v40 = vld [vmem:[%s9327_s1 + $0x9f0] sm:$0xff]  }
 0x11a   :  { %v4707_v52 = vadd.f32 %v6459_v46, %v8468_v11  ;;  %v6483_v56 = vpop.f32.mrb[7].mxu1  ;;  %6783 = vmatprep.subr.bf16.mxu1 %v7387_v44  ;;  %v1307_v11 = vcombine.high %v1297_v6, %v1297_v6  ;;  %v7421_v47 = vld [vmem:[%s9327_s1 + $0x9b0] sm:$0xff]   ;;  %v7422_v49 = vld [vmem:[%s9327_s1 + $0x978] sm:$0xff]   ;;  %v1290_v54 = vrot.slane %v8589_v4, %v7737_v35 }
 0x11b   :  { %v7428_v56 = vld [vmem:[%s9327_s1 + $0xac0] sm:$0xff]   ;;  %v7439_v4 = vld [vmem:[%s9327_s1 + $0xa58] sm:$0xff]  }
 0x11c   :  { %v8569_v58 = vadd.f32 %v6481_v53, %v4707_v52  ;;  %6762 = vmatpush3.bf16.msra.mxu0 %v7388_v50  ;;  %5304 = vmatprep.mubr.bf16.mxu1 %v1307_v11  ;;  %v7424_v52 = vld [vmem:[%s9327_s1 + $0x938] sm:$0xff]   ;;  %v7446_v11 = vld [vmem:[%s9327_s1 + $0xaa0] sm:$0xff]  }
 0x11d   :  { %6763 = vmatprep.subr.bf16.mxu0 %v7390_v55  ;;  %6784 = vmatpush3.bf16.msra.mxu1 %v7389_v51  ;;  %v7423_v51 = vld [vmem:[%s9327_s1 + $0x9f8] sm:$0xff]   ;;  %v7427_v55 = vld [vmem:[%s9327_s1 + $0xa40] sm:$0xff]  }
 0x11e   :  { %6785 = vmatprep.subr.bf16.mxu1 %v7391_v57  ;;  %v7425_v53 = vld [vmem:[%s9327_s1 + $0x9b8] sm:$0xff]   ;;  %v7429_v57 = vld [vmem:[%s9327_s1 + $0xa00] sm:$0xff]  }
 0x11f   :  { %v7441_v6 = vld [vmem:[%s9327_s1 + $0xa18] sm:$0xff]  }
 0x120   :  { %6764 = vmatpush3.bf16.msra.mxu0 %v7392_v59  ;;  %v1306_v59 = vcombine.high %v1290_v54, %v1290_v54 }
 0x121   :  { %6793 = vmatprep.subr.bf16.mxu0 %v7394_v62  ;;  %6786 = vmatpush3.bf16.msra.mxu1 %v7393_v0  ;;  %v7433_v62 = vld [vmem:[%s9327_s1 + $0xa08] sm:$0xff]   ;;  %v7435_v0 = vld [vmem:[%s9327_s1 + $0xa50] sm:$0xff]  }
 0x122   :  { %6815 = vmatprep.subr.bf16.mxu1 %v7395_v3  ;;  %v7438_v3 = vld [vmem:[%s9327_s1 + $0xa90] sm:$0xff]  }
 0x123   :  { %5265 = vmatmul.mubr.bf16.vlgmr.msra.gmra.mrb[32].mxu0 %v1283_v2  ;;  %v7437_v2 = vld [vmem:[%s9327_s1 + $0xa10] sm:$0xff]  }
 0x124   :  { %6794 = vmatpush3.bf16.msra.mxu0 %v7396_v5  ;;  %5305 = vmatmul.mubr.bf16.vlgmr.msra.gmra.mrb[32].mxu1 %v1305_v9  ;;  %v7440_v5 = vld [vmem:[%s9327_s1 + $0xad8] sm:$0xff]   ;;  %v7444_v9 = vld [vmem:[%s9327_s1 + $0xae0] sm:$0xff]  }
 0x125   :  { %6795 = vmatprep.subr.bf16.mxu0 %v7398_v10  ;;  %6816 = vmatpush3.bf16.msra.mxu1 %v7397_v7  ;;  %v7442_v7 = vld [vmem:[%s9327_s1 + $0xa98] sm:$0xff]   ;;  %v7445_v10 = vld [vmem:[%s9327_s1 + $0xa20] sm:$0xff]  }
 0x126   :  { %5344 = vmatprep.mubr.bf16.mxu0 %v1304_v13  ;;  %6817 = vmatprep.subr.bf16.mxu1 %v7399_v12  ;;  %v7447_v12 = vld [vmem:[%s9327_s1 + $0xa68] sm:$0xff]  }
 0x127   :  { %5384 = vmatprep.mubr.bf16.mxu1 %v1308_v16  ;;  %v7448_v13 = vld [vmem:[%s9327_s1 + $0xae8] sm:$0xff]  }
 0x128   :  { %6796 = vmatpush3.bf16.msra.mxu0 %v7400_v14  ;;  %v7449_v14 = vld [vmem:[%s9327_s1 + $0xa28] sm:$0xff]  }
 0x129   :  { %6797 = vmatprep.subr.bf16.mxu0 %v7402_v17  ;;  %6818 = vmatpush3.bf16.msra.mxu1 %v7401_v15  ;;  %v7450_v16 = vld [vmem:[%s9327_s1 + $0xaa8] sm:$0xff]  }
 0x12a   :  { %6819 = vmatprep.subr.bf16.mxu1 %v7403_v18  ;;  %v7451_v18 = vld [vmem:[%s9327_s1 + $0xa70] sm:$0xff]  }
 0x12c   :  { %6798 = vmatpush3.bf16.msra.mxu0 %v7404_v19 }
 0x12d   :  { %6799 = vmatprep.subr.bf16.mxu0 %v7406_v21  ;;  %6820 = vmatpush3.bf16.msra.mxu1 %v7405_v20 }
 0x12e   :  { %6821 = vmatprep.subr.bf16.mxu1 %v7407_v22 }
 0x130   :  { %6800 = vmatpush3.bf16.msra.mxu0 %v7408_v23 }
 0x131   :  { %6801 = vmatprep.subr.bf16.mxu0 %v7410_v25  ;;  %6822 = vmatpush3.bf16.msra.mxu1 %v7409_v24  ;;  %v7452_v24 = vld [vmem:[%s9327_s1 + $0xaf0] sm:$0xff]  }
 0x132   :  { %6823 = vmatprep.subr.bf16.mxu1 %v7411_v26  ;;  %v7453_v25 = vld [vmem:[%s9327_s1 + $0xa30] sm:$0xff]  }
 0x134   :  { %6802 = vmatpush3.bf16.msra.mxu0 %v7412_v27 }
 0x135   :  { %6803 = vmatprep.subr.bf16.mxu0 %v7414_v29  ;;  %6824 = vmatpush3.bf16.msra.mxu1 %v7413_v28  ;;  %v7454_v29 = vld [vmem:[%s9327_s1 + $0xab0] sm:$0xff]  }
 0x136   :  { %v6501_v32 = vpop.f32.mrb[8].mxu0  ;;  %6825 = vmatprep.subr.bf16.mxu1 %v7415_v30 }
 0x137   :  { %v6502_v34 = vpop.f32.mrb[9].mxu0  ;;  %v6523_v37 = vpop.f32.mrb[8].mxu1 }
 0x138   :  { %v6503_v38 = vadd.f32 %v6502_v34, %v6501_v32  ;;  %v6504_v39 = vpop.f32.mrb[10].mxu0  ;;  %v6524_v42 = vpop.f32.mrb[9].mxu1  ;;  %6804 = vmatpush3.bf16.msra.mxu0 %v7416_v31  ;;  %v7455_v31 = vld [vmem:[%s9327_s1 + $0xa78] sm:$0xff]  }
 0x139   :  { %v6505_v43 = vpop.f32.mrb[11].mxu0  ;;  %v6525_v45 = vadd.f32 %v6524_v42, %v6523_v37  ;;  %v6526_v46 = vpop.f32.mrb[10].mxu1  ;;  %6805 = vmatprep.subr.bf16.mxu0 %v7418_v36  ;;  %6826 = vmatpush3.bf16.msra.mxu1 %v7417_v33  ;;  %v7456_v33 = vld [vmem:[%s9327_s1 + $0xaf8] sm:$0xff]   ;;  %v22_v36 = vld [vmem:[%s9328_s0 + $0x28] sm:$0xff] }
 0x13a   :  { %v4787_v44 = vadd.f32 %v6503_v38, %v8569_v58  ;;  %v6527_v48 = vpop.f32.mrb[11].mxu1  ;;  %6827 = vmatprep.subr.bf16.mxu1 %v7419_v40  ;;  %v7430_v58 = vld [vmem:[%s9327_s1 + $0xa80] sm:$0xff]   ;;  %v7457_v34 = vld [vmem:[%s9327_s1 + $0xa38] sm:$0xff]   ;;  %v1316_v37 = vrot.slane %v22_v36, %v7737_v35  ;;  %v1309_v39 = vcombine.high %v22_v36, %v22_v36  ;;  %v7496_v36 = vld [vmem:[%s9327_s1 + $0xc48] sm:$0xff]  }
 0x13b   :  { %v7459_v38 = vld [vmem:[%s9327_s1 + $0xb40] sm:$0xff]   ;;  %v7458_v40 = vld [vmem:[%s9327_s1 + $0xab8] sm:$0xff]  }
 0x13c   :  { %v8677_v50 = vadd.f32 %v6525_v45, %v4787_v44  ;;  %6806 = vmatpush3.bf16.msra.mxu0 %v7420_v41  ;;  %v1324_v41 = vcombine.high %v1316_v37, %v1316_v37  ;;  %v1332_v42 = vrot.slane %v1316_v37, %v7737_v35  ;;  %v7460_v43 = vld [vmem:[%s9327_s1 + $0xbc0] sm:$0xff]   ;;  %v8801_v44 = vrot.slane %v1309_v39, %v7737_v35  ;;  %v7497_v37 = vld [vmem:[%s9327_s1 + $0xcc8] sm:$0xff]  }
 0x13d   :  { %6807 = vmatprep.subr.bf16.mxu0 %v7422_v49  ;;  %6828 = vmatpush3.bf16.msra.mxu1 %v7421_v47  ;;  %v7461_v45 = vld [vmem:[%s9327_s1 + $0xb00] sm:$0xff]   ;;  %v7499_v39 = vld [vmem:[%s9327_s1 + $0xc88] sm:$0xff]  }
 0x13e   :  { %6829 = vmatprep.subr.bf16.mxu1 %v7423_v51  ;;  %v1346_v46 = vrot.slane %v1324_v41, %v7737_v35  ;;  %v7462_v47 = vld [vmem:[%s9327_s1 + $0xb80] sm:$0xff]   ;;  %v1325_v48 = vcombine.high %v8801_v44, %v8801_v44  ;;  %v1354_v49 = vcombine.high %v1332_v42, %v1332_v42  ;;  %v7501_v41 = vld [vmem:[%s9327_s1 + $0xcd0] sm:$0xff]  }
 0x140   :  { %6808 = vmatpush3.bf16.msra.mxu0 %v7424_v52  ;;  %v1356_v51 = vcombine.high %v1346_v46, %v1346_v46  ;;  %v7464_v52 = vld [vmem:[%s9327_s1 + $0xbc8] sm:$0xff]  }
 0x141   :  { %6837 = vmatprep.subr.bf16.mxu0 %v7427_v55  ;;  %6830 = vmatpush3.bf16.msra.mxu1 %v7425_v53  ;;  %v1353_v53 = vrot.slane %v1325_v48, %v7737_v35  ;;  %v7466_v55 = vld [vmem:[%s9327_s1 + $0xb88] sm:$0xff]   ;;  %v7508_v48 = vld [vmem:[%s9327_s1 + $0xc60] sm:$0xff]  }
 0x142   :  { %6859 = vmatprep.subr.bf16.mxu1 %v7428_v56 }
 0x143   :  { %5345 = vmatmul.mubr.bf16.vlgmr.msra.gmra.mrb[36].mxu0 %v1290_v54  ;;  %v7465_v54 = vld [vmem:[%s9327_s1 + $0xb08] sm:$0xff]   ;;  %v1357_v56 = vcombine.high %v1353_v53, %v1353_v53 }
 0x144   :  { %6838 = vmatpush3.bf16.msra.mxu0 %v7429_v57  ;;  %5385 = vmatmul.mubr.bf16.vlgmr.msra.gmra.mrb[36].mxu1 %v1306_v59  ;;  %v7467_v57 = vld [vmem:[%s9327_s1 + $0xb50] sm:$0xff]  }
 0x145   :  { %6839 = vmatprep.subr.bf16.mxu0 %v7431_v60  ;;  %6860 = vmatpush3.bf16.msra.mxu1 %v7430_v58  ;;  %v7468_v58 = vld [vmem:[%s9327_s1 + $0xbd0] sm:$0xff]  }
 0x146   :  { %6861 = vmatprep.subr.bf16.mxu1 %v7432_v61  ;;  %5424 = vmatprep.mubr.bf16.mxu0 %v1346_v46  ;;  %v7469_v59 = vld [vmem:[%s9327_s1 + $0xb10] sm:$0xff]   ;;  %v7471_v61 = vld [vmem:[%s9327_s1 + $0xb58] sm:$0xff]  }
 0x147   :  { %5464 = vmatprep.mubr.bf16.mxu1 %v1356_v51  ;;  %v7470_v60 = vld [vmem:[%s9327_s1 + $0xb90] sm:$0xff]   ;;  %v7506_v46 = vld [vmem:[%s9327_s1 + $0xc18] sm:$0xff]   ;;  %v7511_v51 = vld [vmem:[%s9327_s1 + $0xca0] sm:$0xff]  }
 0x148   :  { %6840 = vmatpush3.bf16.msra.mxu0 %v7433_v62  ;;  %v7472_v62 = vld [vmem:[%s9327_s1 + $0xbd8] sm:$0xff]  }
 0x149   :  { %6841 = vmatprep.subr.bf16.mxu0 %v7435_v0  ;;  %6862 = vmatpush3.bf16.msra.mxu1 %v7434_v63  ;;  %v7473_v63 = vld [vmem:[%s9327_s1 + $0xb18] sm:$0xff]  }
 0x14a   :  { %6863 = vmatprep.subr.bf16.mxu1 %v7436_v1  ;;  %v7474_v0 = vld [vmem:[%s9327_s1 + $0xb98] sm:$0xff]   ;;  %v7475_v1 = vld [vmem:[%s9327_s1 + $0xb60] sm:$0xff]  }
 0x14c   :  { %6842 = vmatpush3.bf16.msra.mxu0 %v7437_v2  ;;  %v7476_v2 = vld [vmem:[%s9327_s1 + $0xbe0] sm:$0xff]  }
 0x14d   :  { %6843 = vmatprep.subr.bf16.mxu0 %v7439_v4  ;;  %6864 = vmatpush3.bf16.msra.mxu1 %v7438_v3  ;;  %v7477_v3 = vld [vmem:[%s9327_s1 + $0xb20] sm:$0xff]  }
 0x14e   :  { %6865 = vmatprep.subr.bf16.mxu1 %v7440_v5  ;;  %v7478_v4 = vld [vmem:[%s9327_s1 + $0xba0] sm:$0xff]   ;;  %v7479_v5 = vld [vmem:[%s9327_s1 + $0xb68] sm:$0xff]  }
 0x150   :  { %6844 = vmatpush3.bf16.msra.mxu0 %v7441_v6  ;;  %v7480_v6 = vld [vmem:[%s9327_s1 + $0xbe8] sm:$0xff]  }
 0x151   :  { %6845 = vmatprep.subr.bf16.mxu0 %v7443_v8  ;;  %6866 = vmatpush3.bf16.msra.mxu1 %v7442_v7  ;;  %v7481_v8 = vld [vmem:[%s9327_s1 + $0xb28] sm:$0xff]  }
 0x152   :  { %6867 = vmatprep.subr.bf16.mxu1 %v7444_v9 }
 0x154   :  { %6846 = vmatpush3.bf16.msra.mxu0 %v7445_v10  ;;  %v7482_v10 = vld [vmem:[%s9327_s1 + $0xba8] sm:$0xff]  }
 0x155   :  { %6847 = vmatprep.subr.bf16.mxu0 %v7447_v12  ;;  %6868 = vmatpush3.bf16.msra.mxu1 %v7446_v11 }
 0x156   :  { %v6545_v15 = vpop.f32.mrb[12].mxu0  ;;  %6869 = vmatprep.subr.bf16.mxu1 %v7448_v13 }
 0x157   :  { %v6546_v17 = vpop.f32.mrb[13].mxu0  ;;  %v6567_v19 = vpop.f32.mrb[12].mxu1 }
 0x158   :  { %v6547_v20 = vadd.f32 %v6546_v17, %v6545_v15  ;;  %v6548_v21 = vpop.f32.mrb[14].mxu0  ;;  %v6568_v22 = vpop.f32.mrb[13].mxu1  ;;  %6848 = vmatpush3.bf16.msra.mxu0 %v7449_v14  ;;  %v7483_v14 = vld [vmem:[%s9327_s1 + $0xb70] sm:$0xff]  }
 0x159   :  { %v6549_v23 = vpop.f32.mrb[15].mxu0  ;;  %v6569_v27 = vadd.f32 %v6568_v22, %v6567_v19  ;;  %v6570_v28 = vpop.f32.mrb[14].mxu1  ;;  %6849 = vmatprep.subr.bf16.mxu0 %v7451_v18  ;;  %6870 = vmatpush3.bf16.msra.mxu1 %v7450_v16  ;;  %v7484_v15 = vld [vmem:[%s9327_s1 + $0xbf0] sm:$0xff]  }
 0x15a   :  { %v4867_v26 = vadd.f32 %v6547_v20, %v8677_v50  ;;  %v6571_v30 = vpop.f32.mrb[15].mxu1  ;;  %6871 = vmatprep.subr.bf16.mxu1 %v7452_v24  ;;  %v7463_v50 = vld [vmem:[%s9327_s1 + $0xb48] sm:$0xff]   ;;  %v7485_v21 = vld [vmem:[%s9327_s1 + $0xb30] sm:$0xff]   ;;  %v7490_v28 = vld [vmem:[%s9327_s1 + $0xbb8] sm:$0xff]  }
 0x15b   :  { %v7486_v23 = vld [vmem:[%s9327_s1 + $0xbb0] sm:$0xff]   ;;  %v7492_v30 = vld [vmem:[%s9327_s1 + $0xc40] sm:$0xff]  }
 0x15c   :  { %v8778_v32 = vadd.f32 %v6569_v27, %v4867_v26  ;;  %6850 = vmatpush3.bf16.msra.mxu0 %v7453_v25  ;;  %v7487_v25 = vld [vmem:[%s9327_s1 + $0xb78] sm:$0xff]  }
 0x15d   :  { %6851 = vmatprep.subr.bf16.mxu0 %v7455_v31  ;;  %6872 = vmatpush3.bf16.msra.mxu1 %v7454_v29  ;;  %v7488_v26 = vld [vmem:[%s9327_s1 + $0xbf8] sm:$0xff]   ;;  %v1339_v29 = vrot.slane %v8801_v44, %v7737_v35  ;;  %v7493_v31 = vld [vmem:[%s9327_s1 + $0xcc0] sm:$0xff]  }
 0x15e   :  { %6873 = vmatprep.subr.bf16.mxu1 %v7456_v33  ;;  %v7489_v27 = vld [vmem:[%s9327_s1 + $0xb38] sm:$0xff]   ;;  %v7495_v33 = vld [vmem:[%s9327_s1 + $0xc80] sm:$0xff]  }
 0x15f   :  { %v7504_v44 = vld [vmem:[%s9327_s1 + $0xc58] sm:$0xff]  }
 0x160   :  { %6852 = vmatpush3.bf16.msra.mxu0 %v7457_v34  ;;  %v1355_v34 = vcombine.high %v1339_v29, %v1339_v29 }
 0x161   :  { %6881 = vmatprep.subr.bf16.mxu0 %v7459_v38  ;;  %6874 = vmatpush3.bf16.msra.mxu1 %v7458_v40  ;;  %v7498_v38 = vld [vmem:[%s9327_s1 + $0xc08] sm:$0xff]   ;;  %v7500_v40 = vld [vmem:[%s9327_s1 + $0xc50] sm:$0xff]  }
 0x162   :  { %6903 = vmatprep.subr.bf16.mxu1 %v7460_v43  ;;  %v7503_v43 = vld [vmem:[%s9327_s1 + $0xc90] sm:$0xff]  }
 0x163   :  { %5425 = vmatmul.mubr.bf16.vlgmr.msra.gmra.mrb[40].mxu0 %v1332_v42  ;;  %v7502_v42 = vld [vmem:[%s9327_s1 + $0xc10] sm:$0xff]  }
 0x164   :  { %6882 = vmatpush3.bf16.msra.mxu0 %v7461_v45  ;;  %5465 = vmatmul.mubr.bf16.vlgmr.msra.gmra.mrb[40].mxu1 %v1354_v49  ;;  %v7505_v45 = vld [vmem:[%s9327_s1 + $0xcd8] sm:$0xff]   ;;  %v7509_v49 = vld [vmem:[%s9327_s1 + $0xce0] sm:$0xff]  }
 0x165   :  { %6883 = vmatprep.subr.bf16.mxu0 %v7463_v50  ;;  %6904 = vmatpush3.bf16.msra.mxu1 %v7462_v47  ;;  %v7507_v47 = vld [vmem:[%s9327_s1 + $0xc98] sm:$0xff]   ;;  %v7510_v50 = vld [vmem:[%s9327_s1 + $0xc20] sm:$0xff]  }
 0x166   :  { %5504 = vmatprep.mubr.bf16.mxu0 %v1353_v53  ;;  %6905 = vmatprep.subr.bf16.mxu1 %v7464_v52  ;;  %v7512_v52 = vld [vmem:[%s9327_s1 + $0xc68] sm:$0xff]  }
 0x167   :  { %5544 = vmatprep.mubr.bf16.mxu1 %v1357_v56  ;;  %v7513_v53 = vld [vmem:[%s9327_s1 + $0xce8] sm:$0xff]  }
 0x168   :  { %6884 = vmatpush3.bf16.msra.mxu0 %v7465_v54 }
 0x169   :  { %6885 = vmatprep.subr.bf16.mxu0 %v7467_v57  ;;  %6906 = vmatpush3.bf16.msra.mxu1 %v7466_v55  ;;  %v7514_v55 = vld [vmem:[%s9327_s1 + $0xc28] sm:$0xff]   ;;  %v7516_v57 = vld [vmem:[%s9327_s1 + $0xc70] sm:$0xff]  }
 0x16a   :  { %6907 = vmatprep.subr.bf16.mxu1 %v7468_v58 }
 0x16c   :  { %6886 = vmatpush3.bf16.msra.mxu0 %v7469_v59 }
 0x16d   :  { %6887 = vmatprep.subr.bf16.mxu0 %v7471_v61  ;;  %6908 = vmatpush3.bf16.msra.mxu1 %v7470_v60 }
 0x16e   :  { %6909 = vmatprep.subr.bf16.mxu1 %v7472_v62  ;;  %v7515_v62 = vld [vmem:[%s9327_s1 + $0xca8] sm:$0xff]  }
 0x170   :  { %6888 = vmatpush3.bf16.msra.mxu0 %v7473_v63 }
 0x171   :  { %6889 = vmatprep.subr.bf16.mxu0 %v7475_v1  ;;  %6910 = vmatpush3.bf16.msra.mxu1 %v7474_v0  ;;  %v7517_v0 = vld [vmem:[%s9327_s1 + $0xcf0] sm:$0xff]  }
 0x172   :  { %6911 = vmatprep.subr.bf16.mxu1 %v7476_v2 }
 0x174   :  { %6890 = vmatpush3.bf16.msra.mxu0 %v7477_v3 }
 0x175   :  { %6891 = vmatprep.subr.bf16.mxu0 %v7479_v5  ;;  %6912 = vmatpush3.bf16.msra.mxu1 %v7478_v4  ;;  %v7518_v4 = vld [vmem:[%s9327_s1 + $0xc30] sm:$0xff]  }
 0x176   :  { %v6589_v7 = vpop.f32.mrb[16].mxu0  ;;  %6913 = vmatprep.subr.bf16.mxu1 %v7480_v6  ;;  %v7520_v6 = vld [vmem:[%s9327_s1 + $0xc78] sm:$0xff]  }
 0x177   :  { %v6590_v9 = vpop.f32.mrb[17].mxu0  ;;  %v6611_v11 = vpop.f32.mrb[16].mxu1 }
 0x178   :  { %v6591_v12 = vadd.f32 %v6590_v9, %v6589_v7  ;;  %v6592_v13 = vpop.f32.mrb[18].mxu0  ;;  %v6612_v16 = vpop.f32.mrb[17].mxu1  ;;  %6892 = vmatpush3.bf16.msra.mxu0 %v7481_v8  ;;  %v7519_v8 = vld [vmem:[%s9327_s1 + $0xcb0] sm:$0xff]   ;;  %v7521_v9 = vld [vmem:[%s9327_s1 + $0xcf8] sm:$0xff]  }
 0x179   :  { %v6593_v17 = vpop.f32.mrb[19].mxu0  ;;  %v6613_v19 = vadd.f32 %v6612_v16, %v6611_v11  ;;  %v6614_v20 = vpop.f32.mrb[18].mxu1  ;;  %6893 = vmatprep.subr.bf16.mxu0 %v7483_v14  ;;  %6914 = vmatpush3.bf16.msra.mxu1 %v7482_v10  ;;  %v7522_v10 = vld [vmem:[%s9327_s1 + $0xc38] sm:$0xff]   ;;  %v23_v11 = vld [vmem:[%s9328_s0 + $0x30] sm:$0xff]  ;;  %v7524_v13 = vld [vmem:[%s9327_s1 + $0xd40] sm:$0xff]  }
 0x17a   :  { %v4947_v18 = vadd.f32 %v6591_v12, %v8778_v32  ;;  %v6615_v22 = vpop.f32.mrb[19].mxu1  ;;  %6915 = vmatprep.subr.bf16.mxu1 %v7484_v15  ;;  %v7494_v32 = vld [vmem:[%s9327_s1 + $0xc00] sm:$0xff]   ;;  %v1365_v12 = vrot.slane %v23_v11, %v7737_v35  ;;  %v1358_v14 = vcombine.high %v23_v11, %v23_v11  ;;  %v7523_v15 = vld [vmem:[%s9327_s1 + $0xcb8] sm:$0xff]   ;;  %v7561_v11 = vld [vmem:[%s9327_s1 + $0xe48] sm:$0xff]  }
 0x17b   :  { %v7526_v20 = vld [vmem:[%s9327_s1 + $0xd00] sm:$0xff]  }
 0x17c   :  { %v8886_v24 = vadd.f32 %v6613_v19, %v4947_v18  ;;  %6894 = vmatpush3.bf16.msra.mxu0 %v7485_v21  ;;  %v1373_v16 = vcombine.high %v1365_v12, %v1365_v12  ;;  %v1381_v17 = vrot.slane %v1365_v12, %v7737_v35  ;;  %v7525_v18 = vld [vmem:[%s9327_s1 + $0xdc0] sm:$0xff]   ;;  %v9013_v19 = vrot.slane %v1358_v14, %v7737_v35  ;;  %v7562_v12 = vld [vmem:[%s9327_s1 + $0xec8] sm:$0xff]  }
 0x17d   :  { %6895 = vmatprep.subr.bf16.mxu0 %v7487_v25  ;;  %6916 = vmatpush3.bf16.msra.mxu1 %v7486_v23  ;;  %v7527_v22 = vld [vmem:[%s9327_s1 + $0xd80] sm:$0xff]   ;;  %v7528_v25 = vld [vmem:[%s9327_s1 + $0xd48] sm:$0xff]  }
 0x17e   :  { %6917 = vmatprep.subr.bf16.mxu1 %v7488_v26  ;;  %v1395_v21 = vrot.slane %v1373_v16, %v7737_v35  ;;  %v1374_v23 = vcombine.high %v9013_v19, %v9013_v19  ;;  %v7564_v14 = vld [vmem:[%s9327_s1 + $0xe88] sm:$0xff]   ;;  %v7566_v16 = vld [vmem:[%s9327_s1 + $0xed0] sm:$0xff]  }
 0x180   :  { %6896 = vmatpush3.bf16.msra.mxu0 %v7489_v27  ;;  %v1405_v26 = vcombine.high %v1395_v21, %v1395_v21  ;;  %v7529_v27 = vld [vmem:[%s9327_s1 + $0xdc8] sm:$0xff]  }
 0x181   :  { %6925 = vmatprep.subr.bf16.mxu0 %v7492_v30  ;;  %6918 = vmatpush3.bf16.msra.mxu1 %v7490_v28  ;;  %v1402_v28 = vrot.slane %v1374_v23, %v7737_v35  ;;  %v7531_v30 = vld [vmem:[%s9327_s1 + $0xd88] sm:$0xff]   ;;  %v7573_v23 = vld [vmem:[%s9327_s1 + $0xe60] sm:$0xff]  }
 0x182   :  { %6947 = vmatprep.subr.bf16.mxu1 %v7493_v31 }
 0x183   :  { %5505 = vmatmul.mubr.bf16.vlgmr.msra.gmra.mrb[44].mxu0 %v1339_v29  ;;  %v7530_v29 = vld [vmem:[%s9327_s1 + $0xd08] sm:$0xff]   ;;  %v1406_v31 = vcombine.high %v1402_v28, %v1402_v28 }
 0x184   :  { %6926 = vmatpush3.bf16.msra.mxu0 %v7494_v32  ;;  %5545 = vmatmul.mubr.bf16.vlgmr.msra.gmra.mrb[44].mxu1 %v1355_v34  ;;  %v7532_v32 = vld [vmem:[%s9327_s1 + $0xd50] sm:$0xff]  }
 0x185   :  { %6927 = vmatprep.subr.bf16.mxu0 %v7496_v36  ;;  %6948 = vmatpush3.bf16.msra.mxu1 %v7495_v33  ;;  %v7533_v33 = vld [vmem:[%s9327_s1 + $0xdd0] sm:$0xff]  }
 0x186   :  { %6949 = vmatprep.subr.bf16.mxu1 %v7497_v37  ;;  %5584 = vmatprep.mubr.bf16.mxu0 %v1395_v21  ;;  %v7534_v34 = vld [vmem:[%s9327_s1 + $0xd10] sm:$0xff]   ;;  %v7536_v37 = vld [vmem:[%s9327_s1 + $0xd58] sm:$0xff]  }
 0x187   :  { %5624 = vmatprep.mubr.bf16.mxu1 %v1405_v26  ;;  %v7535_v36 = vld [vmem:[%s9327_s1 + $0xd90] sm:$0xff]   ;;  %v7571_v21 = vld [vmem:[%s9327_s1 + $0xe18] sm:$0xff]   ;;  %v7576_v26 = vld [vmem:[%s9327_s1 + $0xea0] sm:$0xff]  }
 0x188   :  { %6928 = vmatpush3.bf16.msra.mxu0 %v7498_v38  ;;  %v7537_v38 = vld [vmem:[%s9327_s1 + $0xdd8] sm:$0xff]  }
 0x189   :  { %6929 = vmatprep.subr.bf16.mxu0 %v7500_v40  ;;  %6950 = vmatpush3.bf16.msra.mxu1 %v7499_v39  ;;  %v7538_v39 = vld [vmem:[%s9327_s1 + $0xd18] sm:$0xff]  }
 0x18a   :  { %6951 = vmatprep.subr.bf16.mxu1 %v7501_v41  ;;  %v7539_v40 = vld [vmem:[%s9327_s1 + $0xd98] sm:$0xff]   ;;  %v7540_v41 = vld [vmem:[%s9327_s1 + $0xd60] sm:$0xff]  }
 0x18c   :  { %6930 = vmatpush3.bf16.msra.mxu0 %v7502_v42  ;;  %v7541_v42 = vld [vmem:[%s9327_s1 + $0xde0] sm:$0xff]  }
 0x18d   :  { %6931 = vmatprep.subr.bf16.mxu0 %v7504_v44  ;;  %6952 = vmatpush3.bf16.msra.mxu1 %v7503_v43  ;;  %v7542_v43 = vld [vmem:[%s9327_s1 + $0xd20] sm:$0xff]  }
 0x18e   :  { %6953 = vmatprep.subr.bf16.mxu1 %v7505_v45  ;;  %v7543_v44 = vld [vmem:[%s9327_s1 + $0xda0] sm:$0xff]   ;;  %v7544_v45 = vld [vmem:[%s9327_s1 + $0xd68] sm:$0xff]  }
 0x190   :  { %6932 = vmatpush3.bf16.msra.mxu0 %v7506_v46  ;;  %v7545_v46 = vld [vmem:[%s9327_s1 + $0xde8] sm:$0xff]  }
 0x191   :  { %6933 = vmatprep.subr.bf16.mxu0 %v7508_v48  ;;  %6954 = vmatpush3.bf16.msra.mxu1 %v7507_v47  ;;  %v7546_v48 = vld [vmem:[%s9327_s1 + $0xd28] sm:$0xff]  }
 0x192   :  { %6955 = vmatprep.subr.bf16.mxu1 %v7509_v49 }
 0x194   :  { %6934 = vmatpush3.bf16.msra.mxu0 %v7510_v50  ;;  %v7547_v50 = vld [vmem:[%s9327_s1 + $0xda8] sm:$0xff]  }
 0x195   :  { %6935 = vmatprep.subr.bf16.mxu0 %v7512_v52  ;;  %6956 = vmatpush3.bf16.msra.mxu1 %v7511_v51 }
 0x196   :  { %v6633_v54 = vpop.f32.mrb[20].mxu0  ;;  %6957 = vmatprep.subr.bf16.mxu1 %v7513_v53 }
 0x197   :  { %v6634_v56 = vpop.f32.mrb[21].mxu0  ;;  %v6655_v58 = vpop.f32.mrb[20].mxu1 }
 0x198   :  { %v6635_v59 = vadd.f32 %v6634_v56, %v6633_v54  ;;  %v6636_v60 = vpop.f32.mrb[22].mxu0  ;;  %v6656_v61 = vpop.f32.mrb[21].mxu1  ;;  %6936 = vmatpush3.bf16.msra.mxu0 %v7514_v55  ;;  %v7548_v54 = vld [vmem:[%s9327_s1 + $0xd70] sm:$0xff]  }
 0x199   :  { %v6637_v63 = vpop.f32.mrb[23].mxu0  ;;  %v6657_v2 = vadd.f32 %v6656_v61, %v6655_v58  ;;  %v6658_v3 = vpop.f32.mrb[22].mxu1  ;;  %6937 = vmatprep.subr.bf16.mxu0 %v7516_v57  ;;  %6958 = vmatpush3.bf16.msra.mxu1 %v7515_v62  ;;  %v7549_v55 = vld [vmem:[%s9327_s1 + $0xdf0] sm:$0xff]  }
 0x19a   :  { %v5027_v1 = vadd.f32 %v6635_v59, %v8886_v24  ;;  %v6659_v5 = vpop.f32.mrb[23].mxu1  ;;  %6959 = vmatprep.subr.bf16.mxu1 %v7517_v0  ;;  %v1403_v24 = vcombine.high %v1381_v17, %v1381_v17  ;;  %v7550_v61 = vld [vmem:[%s9327_s1 + $0xd30] sm:$0xff]   ;;  %v7554_v3 = vld [vmem:[%s9327_s1 + $0xd38] sm:$0xff]  }
 0x19b   :  { %v7551_v63 = vld [vmem:[%s9327_s1 + $0xdb0] sm:$0xff]   ;;  %v1388_v5 = vrot.slane %v9013_v19, %v7737_v35  ;;  %v7569_v19 = vld [vmem:[%s9327_s1 + $0xe58] sm:$0xff]  }
 0x19c   :  { %v8987_v7 = vadd.f32 %v6657_v2, %v5027_v1  ;;  %6938 = vmatpush3.bf16.msra.mxu0 %v7518_v4  ;;  %v7552_v1 = vld [vmem:[%s9327_s1 + $0xd78] sm:$0xff]  }
 0x19d   :  { %6939 = vmatprep.subr.bf16.mxu0 %v7520_v6  ;;  %6960 = vmatpush3.bf16.msra.mxu1 %v7519_v8  ;;  %v7553_v2 = vld [vmem:[%s9327_s1 + $0xdf8] sm:$0xff]   ;;  %v7557_v6 = vld [vmem:[%s9327_s1 + $0xe40] sm:$0xff]  }
 0x19e   :  { %6961 = vmatprep.subr.bf16.mxu1 %v7521_v9  ;;  %v7555_v4 = vld [vmem:[%s9327_s1 + $0xdb8] sm:$0xff]   ;;  %v7559_v8 = vld [vmem:[%s9327_s1 + $0xe00] sm:$0xff]  }
 0x19f   :  { %v7560_v9 = vld [vmem:[%s9327_s1 + $0xe80] sm:$0xff]  }
 0x1a0   :  { %6940 = vmatpush3.bf16.msra.mxu0 %v7522_v10  ;;  %v1404_v10 = vcombine.high %v1388_v5, %v1388_v5 }
 0x1a1   :  { %6969 = vmatprep.subr.bf16.mxu0 %v7524_v13  ;;  %6962 = vmatpush3.bf16.msra.mxu1 %v7523_v15  ;;  %v7563_v13 = vld [vmem:[%s9327_s1 + $0xe08] sm:$0xff]   ;;  %v7565_v15 = vld [vmem:[%s9327_s1 + $0xe50] sm:$0xff]  }
 0x1a2   :  { %6991 = vmatprep.subr.bf16.mxu1 %v7525_v18  ;;  %v7568_v18 = vld [vmem:[%s9327_s1 + $0xe90] sm:$0xff]  }
 0x1a3   :  { %5585 = vmatmul.mubr.bf16.vlgmr.msra.gmra.mrb[48].mxu0 %v1381_v17  ;;  %v7567_v17 = vld [vmem:[%s9327_s1 + $0xe10] sm:$0xff]  }
 0x1a4   :  { %6970 = vmatpush3.bf16.msra.mxu0 %v7526_v20  ;;  %5625 = vmatmul.mubr.bf16.vlgmr.msra.gmra.mrb[48].mxu1 %v1403_v24  ;;  %v7570_v20 = vld [vmem:[%s9327_s1 + $0xed8] sm:$0xff]   ;;  %v7574_v24 = vld [vmem:[%s9327_s1 + $0xee0] sm:$0xff]  }
 0x1a5   :  { %6971 = vmatprep.subr.bf16.mxu0 %v7528_v25  ;;  %6992 = vmatpush3.bf16.msra.mxu1 %v7527_v22  ;;  %v7572_v22 = vld [vmem:[%s9327_s1 + $0xe98] sm:$0xff]   ;;  %v7575_v25 = vld [vmem:[%s9327_s1 + $0xe20] sm:$0xff]  }
 0x1a6   :  { %5664 = vmatprep.mubr.bf16.mxu0 %v1402_v28  ;;  %6993 = vmatprep.subr.bf16.mxu1 %v7529_v27  ;;  %v7577_v27 = vld [vmem:[%s9327_s1 + $0xe68] sm:$0xff]  }
 0x1a7   :  { %5704 = vmatprep.mubr.bf16.mxu1 %v1406_v31  ;;  %v7578_v28 = vld [vmem:[%s9327_s1 + $0xee8] sm:$0xff]  }
 0x1a8   :  { %6972 = vmatpush3.bf16.msra.mxu0 %v7530_v29 }
 0x1a9   :  { %6973 = vmatprep.subr.bf16.mxu0 %v7532_v32  ;;  %6994 = vmatpush3.bf16.msra.mxu1 %v7531_v30  ;;  %v7579_v30 = vld [vmem:[%s9327_s1 + $0xe28] sm:$0xff]   ;;  %v7581_v32 = vld [vmem:[%s9327_s1 + $0xe70] sm:$0xff]  }
 0x1aa   :  { %6995 = vmatprep.subr.bf16.mxu1 %v7533_v33 }
 0x1ac   :  { %6974 = vmatpush3.bf16.msra.mxu0 %v7534_v34 }
 0x1ad   :  { %6975 = vmatprep.subr.bf16.mxu0 %v7536_v37  ;;  %6996 = vmatpush3.bf16.msra.mxu1 %v7535_v36 }
 0x1ae   :  { %6997 = vmatprep.subr.bf16.mxu1 %v7537_v38  ;;  %v7580_v38 = vld [vmem:[%s9327_s1 + $0xea8] sm:$0xff]  }
 0x1b0   :  { %6976 = vmatpush3.bf16.msra.mxu0 %v7538_v39 }
 0x1b1   :  { %6977 = vmatprep.subr.bf16.mxu0 %v7540_v41  ;;  %6998 = vmatpush3.bf16.msra.mxu1 %v7539_v40  ;;  %v7582_v40 = vld [vmem:[%s9327_s1 + $0xef0] sm:$0xff]  }
 0x1b2   :  { %6999 = vmatprep.subr.bf16.mxu1 %v7541_v42 }
 0x1b4   :  { %6978 = vmatpush3.bf16.msra.mxu0 %v7542_v43 }
 0x1b5   :  { %6979 = vmatprep.subr.bf16.mxu0 %v7544_v45  ;;  %7000 = vmatpush3.bf16.msra.mxu1 %v7543_v44  ;;  %v7583_v44 = vld [vmem:[%s9327_s1 + $0xe30] sm:$0xff]  }
 0x1b6   :  { %v6677_v47 = vpop.f32.mrb[24].mxu0  ;;  %7001 = vmatprep.subr.bf16.mxu1 %v7545_v46  ;;  %v7585_v46 = vld [vmem:[%s9327_s1 + $0xe78] sm:$0xff]  }
 0x1b7   :  { %v6678_v49 = vpop.f32.mrb[25].mxu0  ;;  %v6699_v51 = vpop.f32.mrb[24].mxu1 }
 0x1b8   :  { %v6679_v52 = vadd.f32 %v6678_v49, %v6677_v47  ;;  %v6680_v53 = vpop.f32.mrb[26].mxu0  ;;  %v6700_v56 = vpop.f32.mrb[25].mxu1  ;;  %6980 = vmatpush3.bf16.msra.mxu0 %v7546_v48  ;;  %v7584_v48 = vld [vmem:[%s9327_s1 + $0xeb0] sm:$0xff]   ;;  %v7586_v49 = vld [vmem:[%s9327_s1 + $0xef8] sm:$0xff]  }
 0x1b9   :  { %v6681_v57 = vpop.f32.mrb[27].mxu0  ;;  %v6701_v59 = vadd.f32 %v6700_v56, %v6699_v51  ;;  %v6702_v60 = vpop.f32.mrb[26].mxu1  ;;  %6981 = vmatprep.subr.bf16.mxu0 %v7548_v54  ;;  %7002 = vmatpush3.bf16.msra.mxu1 %v7547_v50  ;;  %v7587_v50 = vld [vmem:[%s9327_s1 + $0xe38] sm:$0xff]   ;;  %v7589_v53 = vld [vmem:[%s9327_s1 + $0xf40] sm:$0xff]  }
 0x1ba   :  { %v5107_v58 = vadd.f32 %v6679_v52, %v8987_v7  ;;  %v6703_v62 = vpop.f32.mrb[27].mxu1  ;;  %7003 = vmatprep.subr.bf16.mxu1 %v7549_v55  ;;  %v7558_v7 = vld [vmem:[%s9327_s1 + $0xec0] sm:$0xff]   ;;  %v24_v51 = vld [vmem:[%s9328_s0 + $0x38] sm:$0xff] }
 0x1bb   :  { %v1414_v52 = vrot.slane %v24_v51, %v7737_v35  ;;  %v1407_v54 = vcombine.high %v24_v51, %v24_v51  ;;  %v7588_v55 = vld [vmem:[%s9327_s1 + $0xeb8] sm:$0xff]  }
 0x1bc   :  { %v9098_v0 = vadd.f32 %v6701_v59, %v5107_v58  ;;  %6982 = vmatpush3.bf16.msra.mxu0 %v7550_v61  ;;  %v7590_v58 = vld [vmem:[%s9327_s1 + $0xfc0] sm:$0xff]  }
 0x1bd   :  { %6983 = vmatprep.subr.bf16.mxu0 %v7552_v1  ;;  %7004 = vmatpush3.bf16.msra.mxu1 %v7551_v63  ;;  %v1422_v56 = vcombine.high %v1414_v52, %v1414_v52  ;;  %v1430_v57 = vrot.slane %v1414_v52, %v7737_v35  ;;  %v9225_v59 = vrot.slane %v1407_v54, %v7737_v35  ;;  %v7591_v61 = vld [vmem:[%s9327_s1 + $0xf00] sm:$0xff]  }
 0x1be   :  { %7005 = vmatprep.subr.bf16.mxu1 %v7553_v2  ;;  %v7592_v2 = vld [vmem:[%s9327_s1 + $0xf80] sm:$0xff]  }
 0x1bf   :  { %v1444_v60 = vrot.slane %v1422_v56, %v7737_v35  ;;  %v1423_v62 = vcombine.high %v9225_v59, %v9225_v59  ;;  %v1452_v63 = vcombine.high %v1430_v57, %v1430_v57 }
 0x1c0   :  { %6984 = vmatpush3.bf16.msra.mxu0 %v7554_v3 }
 0x1c1   :  { %7013 = vmatprep.subr.bf16.mxu0 %v7557_v6  ;;  %7006 = vmatpush3.bf16.msra.mxu1 %v7555_v4  ;;  %v1454_v1 = vcombine.high %v1444_v60, %v1444_v60  ;;  %v1451_v3 = vrot.slane %v1423_v62, %v7737_v35  ;;  %v7594_v4 = vld [vmem:[%s9327_s1 + $0xfc8] sm:$0xff]  }
 0x1c2   :  { %7035 = vmatprep.subr.bf16.mxu1 %v7558_v7  ;;  %v7597_v7 = vld [vmem:[%s9327_s1 + $0xf50] sm:$0xff]  }
 0x1c3   :  { %5665 = vmatmul.mubr.bf16.vlgmr.msra.gmra.mrb[52].mxu0 %v1388_v5  ;;  %v7595_v5 = vld [vmem:[%s9327_s1 + $0xf08] sm:$0xff]   ;;  %v1455_v6 = vcombine.high %v1451_v3, %v1451_v3 }
 0x1c4   :  { %7014 = vmatpush3.bf16.msra.mxu0 %v7559_v8  ;;  %5705 = vmatmul.mubr.bf16.vlgmr.msra.gmra.mrb[52].mxu1 %v1404_v10  ;;  %v7596_v8 = vld [vmem:[%s9327_s1 + $0xf88] sm:$0xff]   ;;  %v7599_v10 = vld [vmem:[%s9327_s1 + $0xf10] sm:$0xff]  }
 0x1c5   :  { %7015 = vmatprep.subr.bf16.mxu0 %v7561_v11  ;;  %7036 = vmatpush3.bf16.msra.mxu1 %v7560_v9  ;;  %v7598_v9 = vld [vmem:[%s9327_s1 + $0xfd0] sm:$0xff]   ;;  %v7601_v11 = vld [vmem:[%s9327_s1 + $0xf58] sm:$0xff]  }
 0x1c6   :  { %7037 = vmatprep.subr.bf16.mxu1 %v7562_v12  ;;  %5744 = vmatprep.mubr.bf16.mxu0 %v1444_v60  ;;  %v7600_v12 = vld [vmem:[%s9327_s1 + $0xf90] sm:$0xff]  }
 0x1c7   :  { %5784 = vmatprep.mubr.bf16.mxu1 %v1454_v1 }
 0x1c8   :  { %7016 = vmatpush3.bf16.msra.mxu0 %v7563_v13  ;;  %v7602_v13 = vld [vmem:[%s9327_s1 + $0xfd8] sm:$0xff]  }
 0x1c9   :  { %7017 = vmatprep.subr.bf16.mxu0 %v7565_v15  ;;  %7038 = vmatpush3.bf16.msra.mxu1 %v7564_v14  ;;  %v7603_v14 = vld [vmem:[%s9327_s1 + $0xf18] sm:$0xff]   ;;  %v7605_v15 = vld [vmem:[%s9327_s1 + $0xf60] sm:$0xff]  }
 0x1ca   :  { %7039 = vmatprep.subr.bf16.mxu1 %v7566_v16  ;;  %v7604_v16 = vld [vmem:[%s9327_s1 + $0xf98] sm:$0xff]  }
 0x1cc   :  { %7018 = vmatpush3.bf16.msra.mxu0 %v7567_v17  ;;  %v7606_v17 = vld [vmem:[%s9327_s1 + $0xfe0] sm:$0xff]  }
 0x1cd   :  { %7019 = vmatprep.subr.bf16.mxu0 %v7569_v19  ;;  %7040 = vmatpush3.bf16.msra.mxu1 %v7568_v18  ;;  %v7607_v18 = vld [vmem:[%s9327_s1 + $0xf20] sm:$0xff]   ;;  %v7609_v19 = vld [vmem:[%s9327_s1 + $0xf68] sm:$0xff]  }
 0x1ce   :  { %7041 = vmatprep.subr.bf16.mxu1 %v7570_v20  ;;  %v7608_v20 = vld [vmem:[%s9327_s1 + $0xfa0] sm:$0xff]  }
 0x1d0   :  { %7020 = vmatpush3.bf16.msra.mxu0 %v7571_v21 }
 0x1d1   :  { %7021 = vmatprep.subr.bf16.mxu0 %v7573_v23  ;;  %7042 = vmatpush3.bf16.msra.mxu1 %v7572_v22  ;;  %v7610_v22 = vld [vmem:[%s9327_s1 + $0xfe8] sm:$0xff]  }
 0x1d2   :  { %7043 = vmatprep.subr.bf16.mxu1 %v7574_v24  ;;  %v7611_v24 = vld [vmem:[%s9327_s1 + $0xf28] sm:$0xff]  }
 0x1d4   :  { %7022 = vmatpush3.bf16.msra.mxu0 %v7575_v25 }
 0x1d5   :  { %7023 = vmatprep.subr.bf16.mxu0 %v7577_v27  ;;  %7044 = vmatpush3.bf16.msra.mxu1 %v7576_v26 }
 0x1d6   :  { %v6721_v29 = vpop.f32.mrb[28].mxu0  ;;  %7045 = vmatprep.subr.bf16.mxu1 %v7578_v28  ;;  %v7612_v28 = vld [vmem:[%s9327_s1 + $0xfa8] sm:$0xff]  }
 0x1d7   :  { %v6722_v31 = vpop.f32.mrb[29].mxu0  ;;  %v6743_v33 = vpop.f32.mrb[28].mxu1 }
 0x1d8   :  { %v6723_v34 = vadd.f32 %v6722_v31, %v6721_v29  ;;  %v6724_v36 = vpop.f32.mrb[30].mxu0  ;;  %v6744_v37 = vpop.f32.mrb[29].mxu1  ;;  %7024 = vmatpush3.bf16.msra.mxu0 %v7579_v30  ;;  %v7613_v29 = vld [vmem:[%s9327_s1 + $0xf70] sm:$0xff]  }
 0x1d9   :  { %v6725_v39 = vpop.f32.mrb[31].mxu0  ;;  %v6745_v42 = vadd.f32 %v6744_v37, %v6743_v33  ;;  %v6746_v43 = vpop.f32.mrb[30].mxu1  ;;  %7025 = vmatprep.subr.bf16.mxu0 %v7581_v32  ;;  %7046 = vmatpush3.bf16.msra.mxu1 %v7580_v38  ;;  %v7614_v36 = vld [vmem:[%s9327_s1 + $0xff0] sm:$0xff]  }
 0x1da   :  { %v5187_v41 = vadd.f32 %v6723_v34, %v9098_v0  ;;  %v6747_v45 = vpop.f32.mrb[31].mxu1  ;;  %7047 = vmatprep.subr.bf16.mxu1 %v7582_v40  ;;  %v7593_v0 = vld [vmem:[%s9327_s1 + $0xf48] sm:$0xff]   ;;  %v7615_v38 = vld [vmem:[%s9327_s1 + $0xf30] sm:$0xff]   ;;  %v7617_v40 = vld [vmem:[%s9327_s1 + $0xf78] sm:$0xff]  }
 0x1db   :  { %v7619_v43 = vld [vmem:[%s9327_s1 + $0xf38] sm:$0xff]  }
 0x1dc   :  { %v9199_v47 = vadd.f32 %v6745_v42, %v5187_v41  ;;  %7026 = vmatpush3.bf16.msra.mxu0 %v7583_v44  ;;  %v7616_v41 = vld [vmem:[%s9327_s1 + $0xfb0] sm:$0xff]   ;;  %v7618_v42 = vld [vmem:[%s9327_s1 + $0xff8] sm:$0xff]   ;;  %v1437_v44 = vrot.slane %v9225_v59, %v7737_v35 }
 0x1dd   :  { %7027 = vmatprep.subr.bf16.mxu0 %v7585_v46  ;;  %7048 = vmatpush3.bf16.msra.mxu1 %v7584_v48  ;;  %v7620_v45 = vld [vmem:[%s9327_s1 + $0xfb8] sm:$0xff]  }
 0x1de   :  { %7049 = vmatprep.subr.bf16.mxu1 %v7586_v49  ;;  %v1453_v46 = vcombine.high %v1437_v44, %v1437_v44 }
 0x1e0   :  { %7028 = vmatpush3.bf16.msra.mxu0 %v7587_v50 }
 0x1e1   :  { %7057 = vmatprep.subr.bf16.mxu0 %v7589_v53  ;;  %7050 = vmatpush3.bf16.msra.mxu1 %v7588_v55 }
 0x1e2   :  { %7079 = vmatprep.subr.bf16.mxu1 %v7590_v58 }
 0x1e3   :  { %5745 = vmatmul.mubr.bf16.vlgmr.msra.gmra.mrb[56].mxu0 %v1430_v57 }
 0x1e4   :  { %7058 = vmatpush3.bf16.msra.mxu0 %v7591_v61  ;;  %5785 = vmatmul.mubr.bf16.vlgmr.msra.gmra.mrb[56].mxu1 %v1452_v63 }
 0x1e5   :  { %7059 = vmatprep.subr.bf16.mxu0 %v7593_v0  ;;  %7080 = vmatpush3.bf16.msra.mxu1 %v7592_v2 }
 0x1e6   :  { %5824 = vmatprep.mubr.bf16.mxu0 %v1451_v3  ;;  %7081 = vmatprep.subr.bf16.mxu1 %v7594_v4 }
 0x1e7   :  { %5864 = vmatprep.mubr.bf16.mxu1 %v1455_v6 }
 0x1e8   :  { %7060 = vmatpush3.bf16.msra.mxu0 %v7595_v5 }
 0x1e9   :  { %7061 = vmatprep.subr.bf16.mxu0 %v7597_v7  ;;  %7082 = vmatpush3.bf16.msra.mxu1 %v7596_v8 }
 0x1ea   :  { %7083 = vmatprep.subr.bf16.mxu1 %v7598_v9 }
 0x1ec   :  { %7062 = vmatpush3.bf16.msra.mxu0 %v7599_v10 }
 0x1ed   :  { %7063 = vmatprep.subr.bf16.mxu0 %v7601_v11  ;;  %7084 = vmatpush3.bf16.msra.mxu1 %v7600_v12 }
 0x1ee   :  { %7085 = vmatprep.subr.bf16.mxu1 %v7602_v13 }
 0x1f0   :  { %7064 = vmatpush3.bf16.msra.mxu0 %v7603_v14 }
 0x1f1   :  { %7065 = vmatprep.subr.bf16.mxu0 %v7605_v15  ;;  %7086 = vmatpush3.bf16.msra.mxu1 %v7604_v16 }
 0x1f2   :  { %7087 = vmatprep.subr.bf16.mxu1 %v7606_v17 }
 0x1f4   :  { %7066 = vmatpush3.bf16.msra.mxu0 %v7607_v18 }
 0x1f5   :  { %7067 = vmatprep.subr.bf16.mxu0 %v7609_v19  ;;  %7088 = vmatpush3.bf16.msra.mxu1 %v7608_v20 }
 0x1f6   :  { %v6765_v21 = vpop.f32.mrb[32].mxu0  ;;  %7089 = vmatprep.subr.bf16.mxu1 %v7610_v22 }
 0x1f7   :  { %v6766_v23 = vpop.f32.mrb[33].mxu0  ;;  %v6787_v25 = vpop.f32.mrb[32].mxu1 }
 0x1f8   :  { %v6767_v26 = vadd.f32 %v6766_v23, %v6765_v21  ;;  %v6768_v27 = vpop.f32.mrb[34].mxu0  ;;  %v6788_v30 = vpop.f32.mrb[33].mxu1  ;;  %7068 = vmatpush3.bf16.msra.mxu0 %v7611_v24 }
 0x1f9   :  { %v6769_v31 = vpop.f32.mrb[35].mxu0  ;;  %v6789_v33 = vadd.f32 %v6788_v30, %v6787_v25  ;;  %v6790_v34 = vpop.f32.mrb[34].mxu1  ;;  %7069 = vmatprep.subr.bf16.mxu0 %v7613_v29  ;;  %7090 = vmatpush3.bf16.msra.mxu1 %v7612_v28 }
 0x1fa   :  { %v5267_v32 = vadd.f32 %v6767_v26, %v9199_v47  ;;  %v6791_v37 = vpop.f32.mrb[35].mxu1  ;;  %7091 = vmatprep.subr.bf16.mxu1 %v7614_v36 }
 0x1fc   :  { %v5307_v39 = vadd.f32 %v6789_v33, %v5267_v32  ;;  %7070 = vmatpush3.bf16.msra.mxu0 %v7615_v38 }
 0x1fd   :  { %7071 = vmatprep.subr.bf16.mxu0 %v7617_v40  ;;  %7092 = vmatpush3.bf16.msra.mxu1 %v7616_v41 }
 0x1fe   :  { %7093 = vmatprep.subr.bf16.mxu1 %v7618_v42 }
 0x200   :  { %7072 = vmatpush3.bf16.msra.mxu0 %v7619_v43 }
 0x201   :  { %7094 = vmatpush3.bf16.msra.mxu1 %v7620_v45 }
 0x203   :  { %5825 = vmatmul.mubr.bf16.vlgmr.msra.gmra.mrb[60].mxu0 %v1437_v44 }
 0x204   :  { %5865 = vmatmul.mubr.bf16.vlgmr.msra.gmra.mrb[60].mxu1 %v1453_v46 }
 0x216   :  { %v6809_v47 = vpop.f32.mrb[36].mxu0 }
 0x217   :  { %v6810_v48 = vpop.f32.mrb[37].mxu0  ;;  %v6831_v49 = vpop.f32.mrb[36].mxu1 }
 0x218   :  { %v6811_v50 = vadd.f32 %v6810_v48, %v6809_v47  ;;  %v6812_v51 = vpop.f32.mrb[38].mxu0  ;;  %v6832_v52 = vpop.f32.mrb[37].mxu1 }
 0x219   :  { %v6813_v53 = vpop.f32.mrb[39].mxu0  ;;  %v6833_v35 = vadd.f32 %v6832_v52, %v6831_v49  ;;  %v6834_v55 = vpop.f32.mrb[38].mxu1 }
 0x21a   :  { %v5347_v54 = vadd.f32 %v6811_v50, %v5307_v39  ;;  %v6835_v56 = vpop.f32.mrb[39].mxu1 }
 0x21c   :  { %v5387_v57 = vadd.f32 %v6833_v35, %v5347_v54 }
 0x236   :  { %v6853_v58 = vpop.f32.mrb[40].mxu0 }
 0x237   :  { %v6854_v59 = vpop.f32.mrb[41].mxu0  ;;  %v6875_v60 = vpop.f32.mrb[40].mxu1 }
 0x238   :  { %v6855_v61 = vadd.f32 %v6854_v59, %v6853_v58  ;;  %v6856_v62 = vpop.f32.mrb[42].mxu0  ;;  %v6876_v63 = vpop.f32.mrb[41].mxu1 }
 0x239   :  { %v6857_v0 = vpop.f32.mrb[43].mxu0  ;;  %v6877_v2 = vadd.f32 %v6876_v63, %v6875_v60  ;;  %v6878_v3 = vpop.f32.mrb[42].mxu1 }
 0x23a   :  { %v5427_v1 = vadd.f32 %v6855_v61, %v5387_v57  ;;  %v6879_v4 = vpop.f32.mrb[43].mxu1 }
 0x23c   :  { %v5467_v5 = vadd.f32 %v6877_v2, %v5427_v1 }
 0x256   :  { %v6897_v6 = vpop.f32.mrb[44].mxu0 }
 0x257   :  { %v6898_v7 = vpop.f32.mrb[45].mxu0  ;;  %v6919_v8 = vpop.f32.mrb[44].mxu1 }
 0x258   :  { %v6899_v9 = vadd.f32 %v6898_v7, %v6897_v6  ;;  %v6900_v10 = vpop.f32.mrb[46].mxu0  ;;  %v6920_v11 = vpop.f32.mrb[45].mxu1 }
 0x259   :  { %v6901_v12 = vpop.f32.mrb[47].mxu0  ;;  %v6921_v14 = vadd.f32 %v6920_v11, %v6919_v8  ;;  %v6922_v15 = vpop.f32.mrb[46].mxu1 }
 0x25a   :  { %v5507_v13 = vadd.f32 %v6899_v9, %v5467_v5  ;;  %v6923_v16 = vpop.f32.mrb[47].mxu1 }
 0x25c   :  { %v5547_v17 = vadd.f32 %v6921_v14, %v5507_v13 }
 0x276   :  { %v6941_v18 = vpop.f32.mrb[48].mxu0 }
 0x277   :  { %v6942_v19 = vpop.f32.mrb[49].mxu0  ;;  %v6963_v20 = vpop.f32.mrb[48].mxu1 }
 0x278   :  { %v6943_v21 = vadd.f32 %v6942_v19, %v6941_v18  ;;  %v6944_v22 = vpop.f32.mrb[50].mxu0  ;;  %v6964_v23 = vpop.f32.mrb[49].mxu1 }
 0x279   :  { %v6945_v24 = vpop.f32.mrb[51].mxu0  ;;  %v6965_v26 = vadd.f32 %v6964_v23, %v6963_v20  ;;  %v6966_v27 = vpop.f32.mrb[50].mxu1 }
 0x27a   :  { %v5587_v25 = vadd.f32 %v6943_v21, %v5547_v17  ;;  %v6967_v28 = vpop.f32.mrb[51].mxu1 }
 0x27c   :  { %v5627_v29 = vadd.f32 %v6965_v26, %v5587_v25 }
 0x296   :  { %v6985_v30 = vpop.f32.mrb[52].mxu0 }
 0x297   :  { %v6986_v31 = vpop.f32.mrb[53].mxu0  ;;  %v7007_v32 = vpop.f32.mrb[52].mxu1 }
 0x298   :  { %v6987_v33 = vadd.f32 %v6986_v31, %v6985_v30  ;;  %v6988_v34 = vpop.f32.mrb[54].mxu0  ;;  %v7008_v36 = vpop.f32.mrb[53].mxu1 }
 0x299   :  { %v6989_v37 = vpop.f32.mrb[55].mxu0  ;;  %v7009_v39 = vadd.f32 %v7008_v36, %v7007_v32  ;;  %v7010_v40 = vpop.f32.mrb[54].mxu1 }
 0x29a   :  { %v5667_v38 = vadd.f32 %v6987_v33, %v5627_v29  ;;  %v7011_v41 = vpop.f32.mrb[55].mxu1 }
 0x29c   :  { %v5707_v42 = vadd.f32 %v7009_v39, %v5667_v38 }
 0x2b6   :  { %v7029_v43 = vpop.f32.mrb[56].mxu0 }
 0x2b7   :  { %v7030_v44 = vpop.f32.mrb[57].mxu0  ;;  %v7051_v45 = vpop.f32.mrb[56].mxu1 }
 0x2b8   :  { %v7031_v46 = vadd.f32 %v7030_v44, %v7029_v43  ;;  %v7032_v47 = vpop.f32.mrb[58].mxu0  ;;  %v7052_v48 = vpop.f32.mrb[57].mxu1 }
 0x2b9   :  { %v7033_v49 = vpop.f32.mrb[59].mxu0  ;;  %v7053_v51 = vadd.f32 %v7052_v48, %v7051_v45  ;;  %v7054_v52 = vpop.f32.mrb[58].mxu1 }
 0x2ba   :  { %v5747_v50 = vadd.f32 %v7031_v46, %v5707_v42  ;;  %v7055_v53 = vpop.f32.mrb[59].mxu1 }
 0x2bc   :  { %v5787_v54 = vadd.f32 %v7053_v51, %v5747_v50 }
 0x2d6   :  { %v7073_v35 = vpop.f32.mrb[60].mxu0 }
 0x2d7   :  { %v7074_v55 = vpop.f32.mrb[61].mxu0  ;;  %v7095_v56 = vpop.f32.mrb[60].mxu1 }
 0x2d8   :  { %v7075_v57 = vadd.f32 %v7074_v55, %v7073_v35  ;;  %v7076_v58 = vpop.f32.mrb[62].mxu0  ;;  %v7096_v59 = vpop.f32.mrb[61].mxu1 }
 0x2d9   :  { %v7077_v60 = vpop.f32.mrb[63].mxu0  ;;  %v7097_v62 = vadd.f32 %v7096_v59, %v7095_v56  ;;  %v7098_v63 = vpop.f32.mrb[62].mxu1 }
 0x2da   :  { %v5827_v61 = vadd.f32 %v7075_v57, %v5787_v54  ;;  %v7099_v0 = vpop.f32.mrb[63].mxu1 }
 0x2dc   :  { %v5867_v1 = vadd.f32 %v7097_v62, %v5827_v61 }
 0x2de   :  { %v5872_v2 = vsub.f32 0.0, %v5867_v1 }
 0x2e0   :  { %v5873_v3 = vmul.f32 1.442695, %v5872_v2 }
 0x2e2   :  { %7622 = vpow2.f32 %v5873_v3 }
 0x2ec   :  { %v7623_v4 = vpop.eup %7622 }
 0x2ed   :  { %v5875_v5 = vadd.f32 1.0, %v7623_v4 }
 0x2ef   :  { %7624 = vrcp.f32 %v5875_v5 }
 0x2f9   :  { %v7625_v6 = vpop.eup %7624 }
 0x2fa   :  { %5879 = vst.msk [vmem:[%s9330_s3] sm:$0x3] %vm5878_vm0, %v7625_v6 }

</bundles_post_ra>
